<compile_context>
chip_gen: v7x
topology: tpu7x:2x2x1
jax: 0.10.0
libtpu: 0.0.40
codegen_flags: <defaults>
</compile_context>

<pallas_src>
import functools

import jax
import jax.numpy as jnp
from jax import lax
from jax.experimental import pallas as pl
from jax.experimental.pallas import tpu as pltpu

BN_EPS = 1e-5      # nn.BatchNorm default eps
CLN_EPS = 1e-8     # look2hear / asteroid channel-wise LayerNorm eps

# Packed per-channel parameter columns, per ATTNFusionCell (12 columns):
#   [key_scale, key_shift, val_scale, val_shift,
#    att_w, att_b, att_gamma, att_beta,
#    res_w, res_b, res_gamma, res_beta]
PARAMS_PER_CELL = 12


# ----------------------------- in-kernel helpers -----------------------------

def _cln(x, gamma, beta):
    # channel-wise LayerNorm ('cLN'): stats over the channel (sublane) axis per
    # time step, per-channel affine.  x: (C, T); gamma/beta: (C, 1).
    mu = jnp.mean(x, axis=0, keepdims=True)
    var = jnp.mean((x - mu) ** 2, axis=0, keepdims=True)
    return (x - mu) * lax.rsqrt(var + CLN_EPS) * gamma + beta


def _softmax_time(x):
    # softmax over the time (lane) axis, per channel row.
    m = jnp.max(x, axis=-1, keepdims=True)
    e = jnp.exp(x - m)
    s = jnp.sum(e, axis=-1, keepdims=True)
    return e * pl.reciprocal(s, approx=True)


def _attn_fusion_cell(a, b, r_b2a, cols):
    """One ATTNFusionCell (eval mode, kernel_size=1, in_chan_a == in_chan_b).

    a: (C, Ta) tensor_a, b: (C, Tb) tensor_b,
    r_b2a: (Tb, Ta) static 0/1 nearest-interp matrix (time_b -> time_a),
    cols: twelve (C, 1) parameter columns.
    """
    (ks, ko, vs, vo, aw, ab, ag, abeta, rw, rb, rg, rbeta) = cols

    # key_embed(a): depthwise 1x1 conv (no bias) + BatchNorm(eval) + ReLU
    # (conv+BN folded on the host into scale/shift).
    k1e = jnp.maximum(a * ks + ko, 0.0)
    # value_embed(a): depthwise 1x1 conv (no bias) + BatchNorm(eval).
    v = a * vs + vo

    # resize(b): depthwise 1x1 conv (+bias) + cLN, nearest-interp to Ta.
    r = _cln(b * rw + rb, rg, rbeta)
    b_t = jnp.dot(r, r_b2a, preferred_element_type=jnp.float32)        # (C, Ta)
    k1 = k1e * b_t

    # attention_embed(b): depthwise 1x1 conv (+bias) + cLN; kernel_size=1 so the
    # reshape/mean over the kernel-tap axis is the identity; softmax over time,
    # then nearest-interp to Ta.
    att = _cln(b * aw + ab, ag, abeta)
    att = _softmax_time(att)
    att = jnp.dot(att, r_b2a, preferred_element_type=jnp.float32)      # (C, Ta)
    k2 = att * v

    return k1 + k2


def multimodal_fusion_kernel(a_ref, v_ref, p_ref, rva_ref, rav_ref, out_ref,
                             *, fusion_repeats: int):
    audio = a_ref[0]                     # (C, Ta)  channels on sublanes, time on lanes
    video = v_ref[0]                     # (C, Tv)
    params = p_ref[...]                  # (C, n_cells * PARAMS_PER_CELL)
    r_v2a = rva_ref[...]                 # (Tv, Ta)
    r_a2v = rav_ref[...]                 # (Ta, Tv)

    def cell_cols(cell_idx):
        base = cell_idx * PARAMS_PER_CELL
        return tuple(params[:, base + j:base + j + 1]
                     for j in range(PARAMS_PER_CELL))

    a_res, v_res = audio, video          # MultiModalFusion residuals (original inputs)
    a_f, v_f = audio, video
    cell_idx = 0
    for i in range(fusion_repeats):
        a_in = a_f if i == 0 else a_f + a_res
        v_in = v_f if i == 0 else v_f + v_res
        video_fusion = i != fusion_repeats - 1
        if video_fusion:
            # video_lstm(video, audio): tensor_a = video stream
            v_f = _attn_fusion_cell(v_in, a_in, r_a2v, cell_cols(cell_idx + 1))
        else:
            v_f = v_in
        # audio_lstm(audio, video): tensor_a = audio stream
        a_f = _attn_fusion_cell(a_in, v_in, r_v2a, cell_cols(cell_idx))
        cell_idx += 2 if video_fusion else 1

    out_ref[0] = a_f


# ------------------------------- host wrapper --------------------------------

def _nearest_interp_matrix(src_len, dst_len):
    # PyTorch F.interpolate(mode='nearest'): src_idx = floor(dst_idx * src/dst).
    dst = jnp.arange(dst_len)
    src = (dst * src_len) // dst_len
    return (jnp.arange(src_len)[:, None] == src[None, :]).astype(jnp.float32)


def multimodal_fusion(audio, video, packed_params, fusion_repeats=3):
    """audio: (B, C, Ta), video: (B, C, Tv) float32 (PyTorch NCT layout, kept
    end-to-end -- no transposes). Returns fused audio (B, C, Ta)."""
    B, C, Ta = audio.shape
    Bv, Cv, Tv = video.shape
    assert B == Bv and C == Cv, "grouped 1x1 convs require audio_bn_chan == video_bn_chan"
    n_cells = 2 * fusion_repeats - 1
    assert packed_params.shape == (C, n_cells * PARAMS_PER_CELL)

    r_v2a = _nearest_interp_matrix(Tv, Ta)
    r_a2v = _nearest_interp_matrix(Ta, Tv)

    return pl.pallas_call(
        functools.partial(multimodal_fusion_kernel, fusion_repeats=fusion_repeats),
        out_shape=jax.ShapeDtypeStruct((B, C, Ta), jnp.float32),
        grid_spec=pltpu.PrefetchScalarGridSpec(
            num_scalar_prefetch=0,
            grid=(B,),
            in_specs=[
                pl.BlockSpec((1, C, Ta), lambda b: (b, 0, 0)),
                pl.BlockSpec((1, C, Tv), lambda b: (b, 0, 0)),
                pl.BlockSpec(packed_params.shape, lambda b: (0, 0)),
                pl.BlockSpec((Tv, Ta), lambda b: (0, 0)),
                pl.BlockSpec((Ta, Tv), lambda b: (0, 0)),
            ],
            out_specs=pl.BlockSpec((1, C, Ta), lambda b: (b, 0, 0)),
        ),
        compiler_params=pltpu.CompilerParams(
            dimension_semantics=("parallel",),
            vmem_limit_bytes=32 * 1024 * 1024,
        ),
    )(audio.astype(jnp.float32), video.astype(jnp.float32),
      packed_params, r_v2a, r_a2v)


def init_params(key, C, fusion_repeats=3):
    """Random (deterministic) parameters, pre-folded for eval mode and packed
    as one (C, 12 * n_cells) matrix.  Cell order per repeat: [audio_cell,
    video_cell]; the last repeat has no video cell."""
    n_cells = 2 * fusion_repeats - 1
    cell_keys = jax.random.split(key, n_cells)
    cols = []

    def rn(k_, s):
        return s * jax.random.normal(k_, (C,), dtype=jnp.float32)

    for ck in cell_keys:
        ks = jax.random.split(ck, 12)

        def conv_bn_fold(kw, kg, kb, km, kv):
            # depthwise 1x1 conv (no bias) followed by BatchNorm in eval mode
            # collapses to a per-channel scale/shift.
            w = rn(kw, 0.5)
            gamma, beta = 1.0 + rn(kg, 0.1), rn(kb, 0.1)
            run_m, run_v = rn(km, 0.1), 1.0 + jnp.abs(rn(kv, 0.1))
            inv = gamma / jnp.sqrt(run_v + BN_EPS)
            return w * inv, beta - run_m * inv

        key_s, key_o = conv_bn_fold(ks[0], ks[1], ks[2], ks[3], ks[4])
        val_s, val_o = conv_bn_fold(ks[5], ks[6], ks[7], ks[8], ks[9])

        sub = jax.random.split(ks[10], 4)
        att_w, att_b = rn(sub[0], 0.5), rn(sub[1], 0.1)
        att_g, att_beta = 1.0 + rn(sub[2], 0.1), rn(sub[3], 0.1)
        sub = jax.random.split(ks[11], 4)
        res_w, res_b = rn(sub[0], 0.5), rn(sub[1], 0.1)
        res_g, res_beta = 1.0 + rn(sub[2], 0.1), rn(sub[3], 0.1)

        cols += [key_s, key_o, val_s, val_o,
                 att_w, att_b, att_g, att_beta,
                 res_w, res_b, res_g, res_beta]

    return jnp.stack(cols, axis=1)       # (C, 12 * n_cells)


if __name__ == "__main__":
    # TODO(synk): only the module-default kernel_size=1 attention_embed is
    # implemented (the reshape/mean over kernel taps is the identity for K=1).
    B = 2               # 2 batch blocks -> both v7x TensorCores get work
    C = 64              # audio_bn_chan == video_bn_chan
    Ta = 128            # audio frames (multiple of 128 -> lane-dense stores)
    Tv = 32             # video frames
    fusion_repeats = 3

    key = jax.random.PRNGKey(0)
    k_a, k_v, k_p = jax.random.split(key, 3)
    audio = jax.random.normal(k_a, (B, C, Ta), dtype=jnp.float32)
    video = jax.random.normal(k_v, (B, C, Tv), dtype=jnp.float32)
    params = init_params(k_p, C, fusion_repeats)

    out = multimodal_fusion(audio, video, params, fusion_repeats=fusion_repeats)
    jax.block_until_ready(out)
    assert out.shape == (B, C, Ta)
    assert bool(jnp.all(jnp.isfinite(out)))
    print("KERNEL_OK")
</pallas_src>

<mosaic_0001>
module attributes {stable_mosaic.version = 11 : i64} {
  func.func @multimodal_fusion_kernel(%arg0: i32, %arg1: memref<1x64x128xf32, #tpu.memory_space<vmem>>, %arg2: memref<1x64x32xf32, #tpu.memory_space<vmem>>, %arg3: memref<64x60xf32, #tpu.memory_space<vmem>>, %arg4: memref<32x128xf32, #tpu.memory_space<vmem>>, %arg5: memref<128x32xf32, #tpu.memory_space<vmem>>, %arg6: memref<1x64x128xf32, #tpu.memory_space<vmem>>) attributes {dimension_semantics = [#tpu.dimension_semantics<parallel>], iteration_bounds = array<i64: 2>, scalar_prefetch = 0 : i64, scratch_operands = 0 : i64, tpu.core_type = #tpu.core_type<tc>, window_params = [{transform_indices = @transform_0, window_bounds = array<i64: 1, 64, 128>}, {transform_indices = @transform_1, window_bounds = array<i64: 1, 64, 32>}, {pipeline_mode = #tpu.pipeline_mode<synchronous>, transform_indices = @transform_2, window_bounds = array<i64: 64, 60>}, {pipeline_mode = #tpu.pipeline_mode<synchronous>, transform_indices = @transform_3, window_bounds = array<i64: 32, 128>}, {pipeline_mode = #tpu.pipeline_mode<synchronous>, transform_indices = @transform_4, window_bounds = array<i64: 128, 32>}, {transform_indices = @transform_5, window_bounds = array<i64: 1, 64, 128>}]} {
    %c0 = arith.constant 0 : index
    %c0_0 = arith.constant 0 : index
    %c0_1 = arith.constant 0 : index
    %0 = vector.load %arg1[%c0, %c0_0, %c0_1] : memref<1x64x128xf32, #tpu.memory_space<vmem>>, vector<1x64x128xf32>
    %1 = vector.shape_cast %0 : vector<1x64x128xf32> to vector<64x128xf32>
    %c0_2 = arith.constant 0 : index
    %c0_3 = arith.constant 0 : index
    %c0_4 = arith.constant 0 : index
    %2 = vector.load %arg2[%c0_2, %c0_3, %c0_4] : memref<1x64x32xf32, #tpu.memory_space<vmem>>, vector<1x64x32xf32>
    %3 = vector.shape_cast %2 : vector<1x64x32xf32> to vector<64x32xf32>
    %c0_5 = arith.constant 0 : index
    %c0_6 = arith.constant 0 : index
    %4 = vector.load %arg3[%c0_5, %c0_6] : memref<64x60xf32, #tpu.memory_space<vmem>>, vector<64x60xf32>
    %c0_7 = arith.constant 0 : index
    %c0_8 = arith.constant 0 : index
    %5 = vector.load %arg4[%c0_7, %c0_8] : memref<32x128xf32, #tpu.memory_space<vmem>>, vector<32x128xf32>
    %c0_9 = arith.constant 0 : index
    %c0_10 = arith.constant 0 : index
    %6 = vector.load %arg5[%c0_9, %c0_10] : memref<128x32xf32, #tpu.memory_space<vmem>>, vector<128x32xf32>
    %7 = vector.extract_strided_slice %4 {offsets = [0, 12], sizes = [64, 1], strides = [1, 1]} : vector<64x60xf32> to vector<64x1xf32>
    %8 = vector.extract_strided_slice %4 {offsets = [0, 13], sizes = [64, 1], strides = [1, 1]} : vector<64x60xf32> to vector<64x1xf32>
    %9 = vector.extract_strided_slice %4 {offsets = [0, 14], sizes = [64, 1], strides = [1, 1]} : vector<64x60xf32> to vector<64x1xf32>
    %10 = vector.extract_strided_slice %4 {offsets = [0, 15], sizes = [64, 1], strides = [1, 1]} : vector<64x60xf32> to vector<64x1xf32>
    %11 = vector.extract_strided_slice %4 {offsets = [0, 16], sizes = [64, 1], strides = [1, 1]} : vector<64x60xf32> to vector<64x1xf32>
    %12 = vector.extract_strided_slice %4 {offsets = [0, 17], sizes = [64, 1], strides = [1, 1]} : vector<64x60xf32> to vector<64x1xf32>
    %13 = vector.extract_strided_slice %4 {offsets = [0, 18], sizes = [64, 1], strides = [1, 1]} : vector<64x60xf32> to vector<64x1xf32>
    %14 = vector.extract_strided_slice %4 {offsets = [0, 19], sizes = [64, 1], strides = [1, 1]} : vector<64x60xf32> to vector<64x1xf32>
    %15 = vector.extract_strided_slice %4 {offsets = [0, 20], sizes = [64, 1], strides = [1, 1]} : vector<64x60xf32> to vector<64x1xf32>
    %16 = vector.extract_strided_slice %4 {offsets = [0, 21], sizes = [64, 1], strides = [1, 1]} : vector<64x60xf32> to vector<64x1xf32>
    %17 = vector.extract_strided_slice %4 {offsets = [0, 22], sizes = [64, 1], strides = [1, 1]} : vector<64x60xf32> to vector<64x1xf32>
    %18 = vector.extract_strided_slice %4 {offsets = [0, 23], sizes = [64, 1], strides = [1, 1]} : vector<64x60xf32> to vector<64x1xf32>
    %19 = vector.broadcast %7 : vector<64x1xf32> to vector<64x32xf32>
    %20 = arith.mulf %3, %19 : vector<64x32xf32>
    %21 = vector.broadcast %8 : vector<64x1xf32> to vector<64x32xf32>
    %22 = arith.addf %20, %21 : vector<64x32xf32>
    %cst = arith.constant 0.000000e+00 : f32
    %23 = vector.broadcast %cst : f32 to vector<64x32xf32>
    %24 = arith.maximumf %22, %23 : vector<64x32xf32>
    %25 = vector.broadcast %9 : vector<64x1xf32> to vector<64x32xf32>
    %26 = arith.mulf %3, %25 : vector<64x32xf32>
    %27 = vector.broadcast %10 : vector<64x1xf32> to vector<64x32xf32>
    %28 = arith.addf %26, %27 : vector<64x32xf32>
    %29 = vector.broadcast %15 : vector<64x1xf32> to vector<64x128xf32>
    %30 = arith.mulf %1, %29 : vector<64x128xf32>
    %31 = vector.broadcast %16 : vector<64x1xf32> to vector<64x128xf32>
    %32 = arith.addf %30, %31 : vector<64x128xf32>
    %cst_11 = arith.constant dense<0.000000e+00> : vector<128xf32>
    %33 = vector.multi_reduction <add>, %32, %cst_11 [0] : vector<64x128xf32> to vector<128xf32>
    %34 = vector.shape_cast %33 : vector<128xf32> to vector<1x128xf32>
    %cst_12 = arith.constant 6.400000e+01 : f32
    %35 = vector.broadcast %cst_12 : f32 to vector<1x128xf32>
    %36 = arith.divf %34, %35 : vector<1x128xf32>
    %37 = vector.broadcast %36 : vector<1x128xf32> to vector<64x128xf32>
    %38 = arith.subf %32, %37 : vector<64x128xf32>
    %39 = arith.mulf %38, %38 : vector<64x128xf32>
    %cst_13 = arith.constant dense<0.000000e+00> : vector<128xf32>
    %40 = vector.multi_reduction <add>, %39, %cst_13 [0] : vector<64x128xf32> to vector<128xf32>
    %41 = vector.shape_cast %40 : vector<128xf32> to vector<1x128xf32>
    %cst_14 = arith.constant 6.400000e+01 : f32
    %42 = vector.broadcast %cst_14 : f32 to vector<1x128xf32>
    %43 = arith.divf %41, %42 : vector<1x128xf32>
    %44 = vector.broadcast %36 : vector<1x128xf32> to vector<64x128xf32>
    %45 = arith.subf %32, %44 : vector<64x128xf32>
    %cst_15 = arith.constant 9.99999993E-9 : f32
    %46 = vector.broadcast %cst_15 : f32 to vector<1x128xf32>
    %47 = arith.addf %43, %46 : vector<1x128xf32>
    %48 = math.rsqrt %47 : vector<1x128xf32>
    %49 = vector.broadcast %48 : vector<1x128xf32> to vector<64x128xf32>
    %50 = arith.mulf %45, %49 : vector<64x128xf32>
    %51 = vector.broadcast %17 : vector<64x1xf32> to vector<64x128xf32>
    %52 = arith.mulf %50, %51 : vector<64x128xf32>
    %53 = vector.broadcast %18 : vector<64x1xf32> to vector<64x128xf32>
    %54 = arith.addf %52, %53 : vector<64x128xf32>
    %cst_16 = arith.constant dense<0.000000e+00> : vector<64x32xf32>
    %55 = tpu.matmul %54, %6, %cst_16 {dimension_numbers = #tpu.dot_dimension_numbers<[1], [0], [0], [1], [0, 0, 1, 1], [], []>} : vector<64x128xf32>, vector<128x32xf32>, vector<64x32xf32> -> vector<64x32xf32>
    %56 = arith.mulf %24, %55 : vector<64x32xf32>
    %57 = vector.broadcast %11 : vector<64x1xf32> to vector<64x128xf32>
    %58 = arith.mulf %1, %57 : vector<64x128xf32>
    %59 = vector.broadcast %12 : vector<64x1xf32> to vector<64x128xf32>
    %60 = arith.addf %58, %59 : vector<64x128xf32>
    %cst_17 = arith.constant dense<0.000000e+00> : vector<128xf32>
    %61 = vector.multi_reduction <add>, %60, %cst_17 [0] : vector<64x128xf32> to vector<128xf32>
    %62 = vector.shape_cast %61 : vector<128xf32> to vector<1x128xf32>
    %cst_18 = arith.constant 6.400000e+01 : f32
    %63 = vector.broadcast %cst_18 : f32 to vector<1x128xf32>
    %64 = arith.divf %62, %63 : vector<1x128xf32>
    %65 = vector.broadcast %64 : vector<1x128xf32> to vector<64x128xf32>
    %66 = arith.subf %60, %65 : vector<64x128xf32>
    %67 = arith.mulf %66, %66 : vector<64x128xf32>
    %cst_19 = arith.constant dense<0.000000e+00> : vector<128xf32>
    %68 = vector.multi_reduction <add>, %67, %cst_19 [0] : vector<64x128xf32> to vector<128xf32>
    %69 = vector.shape_cast %68 : vector<128xf32> to vector<1x128xf32>
    %cst_20 = arith.constant 6.400000e+01 : f32
    %70 = vector.broadcast %cst_20 : f32 to vector<1x128xf32>
    %71 = arith.divf %69, %70 : vector<1x128xf32>
    %72 = vector.broadcast %64 : vector<1x128xf32> to vector<64x128xf32>
    %73 = arith.subf %60, %72 : vector<64x128xf32>
    %cst_21 = arith.constant 9.99999993E-9 : f32
    %74 = vector.broadcast %cst_21 : f32 to vector<1x128xf32>
    %75 = arith.addf %71, %74 : vector<1x128xf32>
    %76 = math.rsqrt %75 : vector<1x128xf32>
    %77 = vector.broadcast %76 : vector<1x128xf32> to vector<64x128xf32>
    %78 = arith.mulf %73, %77 : vector<64x128xf32>
    %79 = vector.broadcast %13 : vector<64x1xf32> to vector<64x128xf32>
    %80 = arith.mulf %78, %79 : vector<64x128xf32>
    %81 = vector.broadcast %14 : vector<64x1xf32> to vector<64x128xf32>
    %82 = arith.addf %80, %81 : vector<64x128xf32>
    %cst_22 = arith.constant dense<0xFF800000> : vector<64xf32>
    %83 = vector.multi_reduction <maximumf>, %82, %cst_22 [1] : vector<64x128xf32> to vector<64xf32>
    %84 = vector.shape_cast %83 : vector<64xf32> to vector<64x1xf32>
    %85 = vector.broadcast %84 : vector<64x1xf32> to vector<64x128xf32>
    %86 = arith.subf %82, %85 : vector<64x128xf32>
    %87 = math.exp %86 : vector<64x128xf32>
    %cst_23 = arith.constant dense<0.000000e+00> : vector<64xf32>
    %88 = vector.multi_reduction <add>, %87, %cst_23 [1] : vector<64x128xf32> to vector<64xf32>
    %89 = vector.shape_cast %88 : vector<64xf32> to vector<64x1xf32>
    %90 = tpu.reciprocal %89 {approx = true} : vector<64x1xf32> -> vector<64x1xf32>
    %91 = vector.broadcast %90 : vector<64x1xf32> to vector<64x128xf32>
    %92 = arith.mulf %87, %91 : vector<64x128xf32>
    %cst_24 = arith.constant dense<0.000000e+00> : vector<64x32xf32>
    %93 = tpu.matmul %92, %6, %cst_24 {dimension_numbers = #tpu.dot_dimension_numbers<[1], [0], [0], [1], [0, 0, 1, 1], [], []>} : vector<64x128xf32>, vector<128x32xf32>, vector<64x32xf32> -> vector<64x32xf32>
    %94 = arith.mulf %93, %28 : vector<64x32xf32>
    %95 = arith.addf %56, %94 : vector<64x32xf32>
    %96 = vector.extract_strided_slice %4 {offsets = [0, 0], sizes = [64, 1], strides = [1, 1]} : vector<64x60xf32> to vector<64x1xf32>
    %97 = vector.extract_strided_slice %4 {offsets = [0, 1], sizes = [64, 1], strides = [1, 1]} : vector<64x60xf32> to vector<64x1xf32>
    %98 = vector.extract_strided_slice %4 {offsets = [0, 2], sizes = [64, 1], strides = [1, 1]} : vector<64x60xf32> to vector<64x1xf32>
    %99 = vector.extract_strided_slice %4 {offsets = [0, 3], sizes = [64, 1], strides = [1, 1]} : vector<64x60xf32> to vector<64x1xf32>
    %100 = vector.extract_strided_slice %4 {offsets = [0, 4], sizes = [64, 1], strides = [1, 1]} : vector<64x60xf32> to vector<64x1xf32>
    %101 = vector.extract_strided_slice %4 {offsets = [0, 5], sizes = [64, 1], strides = [1, 1]} : vector<64x60xf32> to vector<64x1xf32>
    %102 = vector.extract_strided_slice %4 {offsets = [0, 6], sizes = [64, 1], strides = [1, 1]} : vector<64x60xf32> to vector<64x1xf32>
    %103 = vector.extract_strided_slice %4 {offsets = [0, 7], sizes = [64, 1], strides = [1, 1]} : vector<64x60xf32> to vector<64x1xf32>
    %104 = vector.extract_strided_slice %4 {offsets = [0, 8], sizes = [64, 1], strides = [1, 1]} : vector<64x60xf32> to vector<64x1xf32>
    %105 = vector.extract_strided_slice %4 {offsets = [0, 9], sizes = [64, 1], strides = [1, 1]} : vector<64x60xf32> to vector<64x1xf32>
    %106 = vector.extract_strided_slice %4 {offsets = [0, 10], sizes = [64, 1], strides = [1, 1]} : vector<64x60xf32> to vector<64x1xf32>
    %107 = vector.extract_strided_slice %4 {offsets = [0, 11], sizes = [64, 1], strides = [1, 1]} : vector<64x60xf32> to vector<64x1xf32>
    %108 = vector.broadcast %96 : vector<64x1xf32> to vector<64x128xf32>
    %109 = arith.mulf %1, %108 : vector<64x128xf32>
    %110 = vector.broadcast %97 : vector<64x1xf32> to vector<64x128xf32>
    %111 = arith.addf %109, %110 : vector<64x128xf32>
    %cst_25 = arith.constant 0.000000e+00 : f32
    %112 = vector.broadcast %cst_25 : f32 to vector<64x128xf32>
    %113 = arith.maximumf %111, %112 : vector<64x128xf32>
    %114 = vector.broadcast %98 : vector<64x1xf32> to vector<64x128xf32>
    %115 = arith.mulf %1, %114 : vector<64x128xf32>
    %116 = vector.broadcast %99 : vector<64x1xf32> to vector<64x128xf32>
    %117 = arith.addf %115, %116 : vector<64x128xf32>
    %118 = vector.broadcast %104 : vector<64x1xf32> to vector<64x32xf32>
    %119 = arith.mulf %3, %118 : vector<64x32xf32>
    %120 = vector.broadcast %105 : vector<64x1xf32> to vector<64x32xf32>
    %121 = arith.addf %119, %120 : vector<64x32xf32>
    %cst_26 = arith.constant dense<0.000000e+00> : vector<32xf32>
    %122 = vector.multi_reduction <add>, %121, %cst_26 [0] : vector<64x32xf32> to vector<32xf32>
    %123 = vector.shape_cast %122 : vector<32xf32> to vector<1x32xf32>
    %cst_27 = arith.constant 6.400000e+01 : f32
    %124 = vector.broadcast %cst_27 : f32 to vector<1x32xf32>
    %125 = arith.divf %123, %124 : vector<1x32xf32>
    %126 = vector.broadcast %125 : vector<1x32xf32> to vector<64x32xf32>
    %127 = arith.subf %121, %126 : vector<64x32xf32>
    %128 = arith.mulf %127, %127 : vector<64x32xf32>
    %cst_28 = arith.constant dense<0.000000e+00> : vector<32xf32>
    %129 = vector.multi_reduction <add>, %128, %cst_28 [0] : vector<64x32xf32> to vector<32xf32>
    %130 = vector.shape_cast %129 : vector<32xf32> to vector<1x32xf32>
    %cst_29 = arith.constant 6.400000e+01 : f32
    %131 = vector.broadcast %cst_29 : f32 to vector<1x32xf32>
    %132 = arith.divf %130, %131 : vector<1x32xf32>
    %133 = vector.broadcast %125 : vector<1x32xf32> to vector<64x32xf32>
    %134 = arith.subf %121, %133 : vector<64x32xf32>
    %cst_30 = arith.constant 9.99999993E-9 : f32
    %135 = vector.broadcast %cst_30 : f32 to vector<1x32xf32>
    %136 = arith.addf %132, %135 : vector<1x32xf32>
    %137 = math.rsqrt %136 : vector<1x32xf32>
    %138 = vector.broadcast %137 : vector<1x32xf32> to vector<64x32xf32>
    %139 = arith.mulf %134, %138 : vector<64x32xf32>
    %140 = vector.broadcast %106 : vector<64x1xf32> to vector<64x32xf32>
    %141 = arith.mulf %139, %140 : vector<64x32xf32>
    %142 = vector.broadcast %107 : vector<64x1xf32> to vector<64x32xf32>
    %143 = arith.addf %141, %142 : vector<64x32xf32>
    %cst_31 = arith.constant dense<0.000000e+00> : vector<64x128xf32>
    %144 = tpu.matmul %143, %5, %cst_31 {dimension_numbers = #tpu.dot_dimension_numbers<[1], [0], [0], [1], [0, 0, 1, 1], [], []>} : vector<64x32xf32>, vector<32x128xf32>, vector<64x128xf32> -> vector<64x128xf32>
    %145 = arith.mulf %113, %144 : vector<64x128xf32>
    %146 = vector.broadcast %100 : vector<64x1xf32> to vector<64x32xf32>
    %147 = arith.mulf %3, %146 : vector<64x32xf32>
    %148 = vector.broadcast %101 : vector<64x1xf32> to vector<64x32xf32>
    %149 = arith.addf %147, %148 : vector<64x32xf32>
    %cst_32 = arith.constant dense<0.000000e+00> : vector<32xf32>
    %150 = vector.multi_reduction <add>, %149, %cst_32 [0] : vector<64x32xf32> to vector<32xf32>
    %151 = vector.shape_cast %150 : vector<32xf32> to vector<1x32xf32>
    %cst_33 = arith.constant 6.400000e+01 : f32
    %152 = vector.broadcast %cst_33 : f32 to vector<1x32xf32>
    %153 = arith.divf %151, %152 : vector<1x32xf32>
    %154 = vector.broadcast %153 : vector<1x32xf32> to vector<64x32xf32>
    %155 = arith.subf %149, %154 : vector<64x32xf32>
    %156 = arith.mulf %155, %155 : vector<64x32xf32>
    %cst_34 = arith.constant dense<0.000000e+00> : vector<32xf32>
    %157 = vector.multi_reduction <add>, %156, %cst_34 [0] : vector<64x32xf32> to vector<32xf32>
    %158 = vector.shape_cast %157 : vector<32xf32> to vector<1x32xf32>
    %cst_35 = arith.constant 6.400000e+01 : f32
    %159 = vector.broadcast %cst_35 : f32 to vector<1x32xf32>
    %160 = arith.divf %158, %159 : vector<1x32xf32>
    %161 = vector.broadcast %153 : vector<1x32xf32> to vector<64x32xf32>
    %162 = arith.subf %149, %161 : vector<64x32xf32>
    %cst_36 = arith.constant 9.99999993E-9 : f32
    %163 = vector.broadcast %cst_36 : f32 to vector<1x32xf32>
    %164 = arith.addf %160, %163 : vector<1x32xf32>
    %165 = math.rsqrt %164 : vector<1x32xf32>
    %166 = vector.broadcast %165 : vector<1x32xf32> to vector<64x32xf32>
    %167 = arith.mulf %162, %166 : vector<64x32xf32>
    %168 = vector.broadcast %102 : vector<64x1xf32> to vector<64x32xf32>
    %169 = arith.mulf %167, %168 : vector<64x32xf32>
    %170 = vector.broadcast %103 : vector<64x1xf32> to vector<64x32xf32>
    %171 = arith.addf %169, %170 : vector<64x32xf32>
    %cst_37 = arith.constant dense<0xFF800000> : vector<64xf32>
    %172 = vector.multi_reduction <maximumf>, %171, %cst_37 [1] : vector<64x32xf32> to vector<64xf32>
    %173 = vector.shape_cast %172 : vector<64xf32> to vector<64x1xf32>
    %174 = vector.broadcast %173 : vector<64x1xf32> to vector<64x32xf32>
    %175 = arith.subf %171, %174 : vector<64x32xf32>
    %176 = math.exp %175 : vector<64x32xf32>
    %cst_38 = arith.constant dense<0.000000e+00> : vector<64xf32>
    %177 = vector.multi_reduction <add>, %176, %cst_38 [1] : vector<64x32xf32> to vector<64xf32>
    %178 = vector.shape_cast %177 : vector<64xf32> to vector<64x1xf32>
    %179 = tpu.reciprocal %178 {approx = true} : vector<64x1xf32> -> vector<64x1xf32>
    %180 = vector.broadcast %179 : vector<64x1xf32> to vector<64x32xf32>
    %181 = arith.mulf %176, %180 : vector<64x32xf32>
    %cst_39 = arith.constant dense<0.000000e+00> : vector<64x128xf32>
    %182 = tpu.matmul %181, %5, %cst_39 {dimension_numbers = #tpu.dot_dimension_numbers<[1], [0], [0], [1], [0, 0, 1, 1], [], []>} : vector<64x32xf32>, vector<32x128xf32>, vector<64x128xf32> -> vector<64x128xf32>
    %183 = arith.mulf %182, %117 : vector<64x128xf32>
    %184 = arith.addf %145, %183 : vector<64x128xf32>
    %185 = arith.addf %184, %1 : vector<64x128xf32>
    %186 = arith.addf %95, %3 : vector<64x32xf32>
    %187 = vector.extract_strided_slice %4 {offsets = [0, 36], sizes = [64, 1], strides = [1, 1]} : vector<64x60xf32> to vector<64x1xf32>
    %188 = vector.extract_strided_slice %4 {offsets = [0, 37], sizes = [64, 1], strides = [1, 1]} : vector<64x60xf32> to vector<64x1xf32>
    %189 = vector.extract_strided_slice %4 {offsets = [0, 38], sizes = [64, 1], strides = [1, 1]} : vector<64x60xf32> to vector<64x1xf32>
    %190 = vector.extract_strided_slice %4 {offsets = [0, 39], sizes = [64, 1], strides = [1, 1]} : vector<64x60xf32> to vector<64x1xf32>
    %191 = vector.extract_strided_slice %4 {offsets = [0, 40], sizes = [64, 1], strides = [1, 1]} : vector<64x60xf32> to vector<64x1xf32>
    %192 = vector.extract_strided_slice %4 {offsets = [0, 41], sizes = [64, 1], strides = [1, 1]} : vector<64x60xf32> to vector<64x1xf32>
    %193 = vector.extract_strided_slice %4 {offsets = [0, 42], sizes = [64, 1], strides = [1, 1]} : vector<64x60xf32> to vector<64x1xf32>
    %194 = vector.extract_strided_slice %4 {offsets = [0, 43], sizes = [64, 1], strides = [1, 1]} : vector<64x60xf32> to vector<64x1xf32>
    %195 = vector.extract_strided_slice %4 {offsets = [0, 44], sizes = [64, 1], strides = [1, 1]} : vector<64x60xf32> to vector<64x1xf32>
    %196 = vector.extract_strided_slice %4 {offsets = [0, 45], sizes = [64, 1], strides = [1, 1]} : vector<64x60xf32> to vector<64x1xf32>
    %197 = vector.extract_strided_slice %4 {offsets = [0, 46], sizes = [64, 1], strides = [1, 1]} : vector<64x60xf32> to vector<64x1xf32>
    %198 = vector.extract_strided_slice %4 {offsets = [0, 47], sizes = [64, 1], strides = [1, 1]} : vector<64x60xf32> to vector<64x1xf32>
    %199 = vector.broadcast %187 : vector<64x1xf32> to vector<64x32xf32>
    %200 = arith.mulf %186, %199 : vector<64x32xf32>
    %201 = vector.broadcast %188 : vector<64x1xf32> to vector<64x32xf32>
    %202 = arith.addf %200, %201 : vector<64x32xf32>
    %cst_40 = arith.constant 0.000000e+00 : f32
    %203 = vector.broadcast %cst_40 : f32 to vector<64x32xf32>
    %204 = arith.maximumf %202, %203 : vector<64x32xf32>
    %205 = vector.broadcast %189 : vector<64x1xf32> to vector<64x32xf32>
    %206 = arith.mulf %186, %205 : vector<64x32xf32>
    %207 = vector.broadcast %190 : vector<64x1xf32> to vector<64x32xf32>
    %208 = arith.addf %206, %207 : vector<64x32xf32>
    %209 = vector.broadcast %195 : vector<64x1xf32> to vector<64x128xf32>
    %210 = arith.mulf %185, %209 : vector<64x128xf32>
    %211 = vector.broadcast %196 : vector<64x1xf32> to vector<64x128xf32>
    %212 = arith.addf %210, %211 : vector<64x128xf32>
    %cst_41 = arith.constant dense<0.000000e+00> : vector<128xf32>
    %213 = vector.multi_reduction <add>, %212, %cst_41 [0] : vector<64x128xf32> to vector<128xf32>
    %214 = vector.shape_cast %213 : vector<128xf32> to vector<1x128xf32>
    %cst_42 = arith.constant 6.400000e+01 : f32
    %215 = vector.broadcast %cst_42 : f32 to vector<1x128xf32>
    %216 = arith.divf %214, %215 : vector<1x128xf32>
    %217 = vector.broadcast %216 : vector<1x128xf32> to vector<64x128xf32>
    %218 = arith.subf %212, %217 : vector<64x128xf32>
    %219 = arith.mulf %218, %218 : vector<64x128xf32>
    %cst_43 = arith.constant dense<0.000000e+00> : vector<128xf32>
    %220 = vector.multi_reduction <add>, %219, %cst_43 [0] : vector<64x128xf32> to vector<128xf32>
    %221 = vector.shape_cast %220 : vector<128xf32> to vector<1x128xf32>
    %cst_44 = arith.constant 6.400000e+01 : f32
    %222 = vector.broadcast %cst_44 : f32 to vector<1x128xf32>
    %223 = arith.divf %221, %222 : vector<1x128xf32>
    %224 = vector.broadcast %216 : vector<1x128xf32> to vector<64x128xf32>
    %225 = arith.subf %212, %224 : vector<64x128xf32>
    %cst_45 = arith.constant 9.99999993E-9 : f32
    %226 = vector.broadcast %cst_45 : f32 to vector<1x128xf32>
    %227 = arith.addf %223, %226 : vector<1x128xf32>
    %228 = math.rsqrt %227 : vector<1x128xf32>
    %229 = vector.broadcast %228 : vector<1x128xf32> to vector<64x128xf32>
    %230 = arith.mulf %225, %229 : vector<64x128xf32>
    %231 = vector.broadcast %197 : vector<64x1xf32> to vector<64x128xf32>
    %232 = arith.mulf %230, %231 : vector<64x128xf32>
    %233 = vector.broadcast %198 : vector<64x1xf32> to vector<64x128xf32>
    %234 = arith.addf %232, %233 : vector<64x128xf32>
    %cst_46 = arith.constant dense<0.000000e+00> : vector<64x32xf32>
    %235 = tpu.matmul %234, %6, %cst_46 {dimension_numbers = #tpu.dot_dimension_numbers<[1], [0], [0], [1], [0, 0, 1, 1], [], []>} : vector<64x128xf32>, vector<128x32xf32>, vector<64x32xf32> -> vector<64x32xf32>
    %236 = arith.mulf %204, %235 : vector<64x32xf32>
    %237 = vector.broadcast %191 : vector<64x1xf32> to vector<64x128xf32>
    %238 = arith.mulf %185, %237 : vector<64x128xf32>
    %239 = vector.broadcast %192 : vector<64x1xf32> to vector<64x128xf32>
    %240 = arith.addf %238, %239 : vector<64x128xf32>
    %cst_47 = arith.constant dense<0.000000e+00> : vector<128xf32>
    %241 = vector.multi_reduction <add>, %240, %cst_47 [0] : vector<64x128xf32> to vector<128xf32>
    %242 = vector.shape_cast %241 : vector<128xf32> to vector<1x128xf32>
    %cst_48 = arith.constant 6.400000e+01 : f32
    %243 = vector.broadcast %cst_48 : f32 to vector<1x128xf32>
    %244 = arith.divf %242, %243 : vector<1x128xf32>
    %245 = vector.broadcast %244 : vector<1x128xf32> to vector<64x128xf32>
    %246 = arith.subf %240, %245 : vector<64x128xf32>
    %247 = arith.mulf %246, %246 : vector<64x128xf32>
    %cst_49 = arith.constant dense<0.000000e+00> : vector<128xf32>
    %248 = vector.multi_reduction <add>, %247, %cst_49 [0] : vector<64x128xf32> to vector<128xf32>
    %249 = vector.shape_cast %248 : vector<128xf32> to vector<1x128xf32>
    %cst_50 = arith.constant 6.400000e+01 : f32
    %250 = vector.broadcast %cst_50 : f32 to vector<1x128xf32>
    %251 = arith.divf %249, %250 : vector<1x128xf32>
    %252 = vector.broadcast %244 : vector<1x128xf32> to vector<64x128xf32>
    %253 = arith.subf %240, %252 : vector<64x128xf32>
    %cst_51 = arith.constant 9.99999993E-9 : f32
    %254 = vector.broadcast %cst_51 : f32 to vector<1x128xf32>
    %255 = arith.addf %251, %254 : vector<1x128xf32>
    %256 = math.rsqrt %255 : vector<1x128xf32>
    %257 = vector.broadcast %256 : vector<1x128xf32> to vector<64x128xf32>
    %258 = arith.mulf %253, %257 : vector<64x128xf32>
    %259 = vector.broadcast %193 : vector<64x1xf32> to vector<64x128xf32>
    %260 = arith.mulf %258, %259 : vector<64x128xf32>
    %261 = vector.broadcast %194 : vector<64x1xf32> to vector<64x128xf32>
    %262 = arith.addf %260, %261 : vector<64x128xf32>
    %cst_52 = arith.constant dense<0xFF800000> : vector<64xf32>
    %263 = vector.multi_reduction <maximumf>, %262, %cst_52 [1] : vector<64x128xf32> to vector<64xf32>
    %264 = vector.shape_cast %263 : vector<64xf32> to vector<64x1xf32>
    %265 = vector.broadcast %264 : vector<64x1xf32> to vector<64x128xf32>
    %266 = arith.subf %262, %265 : vector<64x128xf32>
    %267 = math.exp %266 : vector<64x128xf32>
    %cst_53 = arith.constant dense<0.000000e+00> : vector<64xf32>
    %268 = vector.multi_reduction <add>, %267, %cst_53 [1] : vector<64x128xf32> to vector<64xf32>
    %269 = vector.shape_cast %268 : vector<64xf32> to vector<64x1xf32>
    %270 = tpu.reciprocal %269 {approx = true} : vector<64x1xf32> -> vector<64x1xf32>
    %271 = vector.broadcast %270 : vector<64x1xf32> to vector<64x128xf32>
    %272 = arith.mulf %267, %271 : vector<64x128xf32>
    %cst_54 = arith.constant dense<0.000000e+00> : vector<64x32xf32>
    %273 = tpu.matmul %272, %6, %cst_54 {dimension_numbers = #tpu.dot_dimension_numbers<[1], [0], [0], [1], [0, 0, 1, 1], [], []>} : vector<64x128xf32>, vector<128x32xf32>, vector<64x32xf32> -> vector<64x32xf32>
    %274 = arith.mulf %273, %208 : vector<64x32xf32>
    %275 = arith.addf %236, %274 : vector<64x32xf32>
    %276 = vector.extract_strided_slice %4 {offsets = [0, 24], sizes = [64, 1], strides = [1, 1]} : vector<64x60xf32> to vector<64x1xf32>
    %277 = vector.extract_strided_slice %4 {offsets = [0, 25], sizes = [64, 1], strides = [1, 1]} : vector<64x60xf32> to vector<64x1xf32>
    %278 = vector.extract_strided_slice %4 {offsets = [0, 26], sizes = [64, 1], strides = [1, 1]} : vector<64x60xf32> to vector<64x1xf32>
    %279 = vector.extract_strided_slice %4 {offsets = [0, 27], sizes = [64, 1], strides = [1, 1]} : vector<64x60xf32> to vector<64x1xf32>
    %280 = vector.extract_strided_slice %4 {offsets = [0, 28], sizes = [64, 1], strides = [1, 1]} : vector<64x60xf32> to vector<64x1xf32>
    %281 = vector.extract_strided_slice %4 {offsets = [0, 29], sizes = [64, 1], strides = [1, 1]} : vector<64x60xf32> to vector<64x1xf32>
    %282 = vector.extract_strided_slice %4 {offsets = [0, 30], sizes = [64, 1], strides = [1, 1]} : vector<64x60xf32> to vector<64x1xf32>
    %283 = vector.extract_strided_slice %4 {offsets = [0, 31], sizes = [64, 1], strides = [1, 1]} : vector<64x60xf32> to vector<64x1xf32>
    %284 = vector.extract_strided_slice %4 {offsets = [0, 32], sizes = [64, 1], strides = [1, 1]} : vector<64x60xf32> to vector<64x1xf32>
    %285 = vector.extract_strided_slice %4 {offsets = [0, 33], sizes = [64, 1], strides = [1, 1]} : vector<64x60xf32> to vector<64x1xf32>
    %286 = vector.extract_strided_slice %4 {offsets = [0, 34], sizes = [64, 1], strides = [1, 1]} : vector<64x60xf32> to vector<64x1xf32>
    %287 = vector.extract_strided_slice %4 {offsets = [0, 35], sizes = [64, 1], strides = [1, 1]} : vector<64x60xf32> to vector<64x1xf32>
    %288 = vector.broadcast %276 : vector<64x1xf32> to vector<64x128xf32>
    %289 = arith.mulf %185, %288 : vector<64x128xf32>
    %290 = vector.broadcast %277 : vector<64x1xf32> to vector<64x128xf32>
    %291 = arith.addf %289, %290 : vector<64x128xf32>
    %cst_55 = arith.constant 0.000000e+00 : f32
    %292 = vector.broadcast %cst_55 : f32 to vector<64x128xf32>
    %293 = arith.maximumf %291, %292 : vector<64x128xf32>
    %294 = vector.broadcast %278 : vector<64x1xf32> to vector<64x128xf32>
    %295 = arith.mulf %185, %294 : vector<64x128xf32>
    %296 = vector.broadcast %279 : vector<64x1xf32> to vector<64x128xf32>
    %297 = arith.addf %295, %296 : vector<64x128xf32>
    %298 = vector.broadcast %284 : vector<64x1xf32> to vector<64x32xf32>
    %299 = arith.mulf %186, %298 : vector<64x32xf32>
    %300 = vector.broadcast %285 : vector<64x1xf32> to vector<64x32xf32>
    %301 = arith.addf %299, %300 : vector<64x32xf32>
    %cst_56 = arith.constant dense<0.000000e+00> : vector<32xf32>
    %302 = vector.multi_reduction <add>, %301, %cst_56 [0] : vector<64x32xf32> to vector<32xf32>
    %303 = vector.shape_cast %302 : vector<32xf32> to vector<1x32xf32>
    %cst_57 = arith.constant 6.400000e+01 : f32
    %304 = vector.broadcast %cst_57 : f32 to vector<1x32xf32>
    %305 = arith.divf %303, %304 : vector<1x32xf32>
    %306 = vector.broadcast %305 : vector<1x32xf32> to vector<64x32xf32>
    %307 = arith.subf %301, %306 : vector<64x32xf32>
    %308 = arith.mulf %307, %307 : vector<64x32xf32>
    %cst_58 = arith.constant dense<0.000000e+00> : vector<32xf32>
    %309 = vector.multi_reduction <add>, %308, %cst_58 [0] : vector<64x32xf32> to vector<32xf32>
    %310 = vector.shape_cast %309 : vector<32xf32> to vector<1x32xf32>
    %cst_59 = arith.constant 6.400000e+01 : f32
    %311 = vector.broadcast %cst_59 : f32 to vector<1x32xf32>
    %312 = arith.divf %310, %311 : vector<1x32xf32>
    %313 = vector.broadcast %305 : vector<1x32xf32> to vector<64x32xf32>
    %314 = arith.subf %301, %313 : vector<64x32xf32>
    %cst_60 = arith.constant 9.99999993E-9 : f32
    %315 = vector.broadcast %cst_60 : f32 to vector<1x32xf32>
    %316 = arith.addf %312, %315 : vector<1x32xf32>
    %317 = math.rsqrt %316 : vector<1x32xf32>
    %318 = vector.broadcast %317 : vector<1x32xf32> to vector<64x32xf32>
    %319 = arith.mulf %314, %318 : vector<64x32xf32>
    %320 = vector.broadcast %286 : vector<64x1xf32> to vector<64x32xf32>
    %321 = arith.mulf %319, %320 : vector<64x32xf32>
    %322 = vector.broadcast %287 : vector<64x1xf32> to vector<64x32xf32>
    %323 = arith.addf %321, %322 : vector<64x32xf32>
    %cst_61 = arith.constant dense<0.000000e+00> : vector<64x128xf32>
    %324 = tpu.matmul %323, %5, %cst_61 {dimension_numbers = #tpu.dot_dimension_numbers<[1], [0], [0], [1], [0, 0, 1, 1], [], []>} : vector<64x32xf32>, vector<32x128xf32>, vector<64x128xf32> -> vector<64x128xf32>
    %325 = arith.mulf %293, %324 : vector<64x128xf32>
    %326 = vector.broadcast %280 : vector<64x1xf32> to vector<64x32xf32>
    %327 = arith.mulf %186, %326 : vector<64x32xf32>
    %328 = vector.broadcast %281 : vector<64x1xf32> to vector<64x32xf32>
    %329 = arith.addf %327, %328 : vector<64x32xf32>
    %cst_62 = arith.constant dense<0.000000e+00> : vector<32xf32>
    %330 = vector.multi_reduction <add>, %329, %cst_62 [0] : vector<64x32xf32> to vector<32xf32>
    %331 = vector.shape_cast %330 : vector<32xf32> to vector<1x32xf32>
    %cst_63 = arith.constant 6.400000e+01 : f32
    %332 = vector.broadcast %cst_63 : f32 to vector<1x32xf32>
    %333 = arith.divf %331, %332 : vector<1x32xf32>
    %334 = vector.broadcast %333 : vector<1x32xf32> to vector<64x32xf32>
    %335 = arith.subf %329, %334 : vector<64x32xf32>
    %336 = arith.mulf %335, %335 : vector<64x32xf32>
    %cst_64 = arith.constant dense<0.000000e+00> : vector<32xf32>
    %337 = vector.multi_reduction <add>, %336, %cst_64 [0] : vector<64x32xf32> to vector<32xf32>
    %338 = vector.shape_cast %337 : vector<32xf32> to vector<1x32xf32>
    %cst_65 = arith.constant 6.400000e+01 : f32
    %339 = vector.broadcast %cst_65 : f32 to vector<1x32xf32>
    %340 = arith.divf %338, %339 : vector<1x32xf32>
    %341 = vector.broadcast %333 : vector<1x32xf32> to vector<64x32xf32>
    %342 = arith.subf %329, %341 : vector<64x32xf32>
    %cst_66 = arith.constant 9.99999993E-9 : f32
    %343 = vector.broadcast %cst_66 : f32 to vector<1x32xf32>
    %344 = arith.addf %340, %343 : vector<1x32xf32>
    %345 = math.rsqrt %344 : vector<1x32xf32>
    %346 = vector.broadcast %345 : vector<1x32xf32> to vector<64x32xf32>
    %347 = arith.mulf %342, %346 : vector<64x32xf32>
    %348 = vector.broadcast %282 : vector<64x1xf32> to vector<64x32xf32>
    %349 = arith.mulf %347, %348 : vector<64x32xf32>
    %350 = vector.broadcast %283 : vector<64x1xf32> to vector<64x32xf32>
    %351 = arith.addf %349, %350 : vector<64x32xf32>
    %cst_67 = arith.constant dense<0xFF800000> : vector<64xf32>
    %352 = vector.multi_reduction <maximumf>, %351, %cst_67 [1] : vector<64x32xf32> to vector<64xf32>
    %353 = vector.shape_cast %352 : vector<64xf32> to vector<64x1xf32>
    %354 = vector.broadcast %353 : vector<64x1xf32> to vector<64x32xf32>
    %355 = arith.subf %351, %354 : vector<64x32xf32>
    %356 = math.exp %355 : vector<64x32xf32>
    %cst_68 = arith.constant dense<0.000000e+00> : vector<64xf32>
    %357 = vector.multi_reduction <add>, %356, %cst_68 [1] : vector<64x32xf32> to vector<64xf32>
    %358 = vector.shape_cast %357 : vector<64xf32> to vector<64x1xf32>
    %359 = tpu.reciprocal %358 {approx = true} : vector<64x1xf32> -> vector<64x1xf32>
    %360 = vector.broadcast %359 : vector<64x1xf32> to vector<64x32xf32>
    %361 = arith.mulf %356, %360 : vector<64x32xf32>
    %cst_69 = arith.constant dense<0.000000e+00> : vector<64x128xf32>
    %362 = tpu.matmul %361, %5, %cst_69 {dimension_numbers = #tpu.dot_dimension_numbers<[1], [0], [0], [1], [0, 0, 1, 1], [], []>} : vector<64x32xf32>, vector<32x128xf32>, vector<64x128xf32> -> vector<64x128xf32>
    %363 = arith.mulf %362, %297 : vector<64x128xf32>
    %364 = arith.addf %325, %363 : vector<64x128xf32>
    %365 = arith.addf %364, %1 : vector<64x128xf32>
    %366 = arith.addf %275, %3 : vector<64x32xf32>
    %367 = vector.extract_strided_slice %4 {offsets = [0, 48], sizes = [64, 1], strides = [1, 1]} : vector<64x60xf32> to vector<64x1xf32>
    %368 = vector.extract_strided_slice %4 {offsets = [0, 49], sizes = [64, 1], strides = [1, 1]} : vector<64x60xf32> to vector<64x1xf32>
    %369 = vector.extract_strided_slice %4 {offsets = [0, 50], sizes = [64, 1], strides = [1, 1]} : vector<64x60xf32> to vector<64x1xf32>
    %370 = vector.extract_strided_slice %4 {offsets = [0, 51], sizes = [64, 1], strides = [1, 1]} : vector<64x60xf32> to vector<64x1xf32>
    %371 = vector.extract_strided_slice %4 {offsets = [0, 52], sizes = [64, 1], strides = [1, 1]} : vector<64x60xf32> to vector<64x1xf32>
    %372 = vector.extract_strided_slice %4 {offsets = [0, 53], sizes = [64, 1], strides = [1, 1]} : vector<64x60xf32> to vector<64x1xf32>
    %373 = vector.extract_strided_slice %4 {offsets = [0, 54], sizes = [64, 1], strides = [1, 1]} : vector<64x60xf32> to vector<64x1xf32>
    %374 = vector.extract_strided_slice %4 {offsets = [0, 55], sizes = [64, 1], strides = [1, 1]} : vector<64x60xf32> to vector<64x1xf32>
    %375 = vector.extract_strided_slice %4 {offsets = [0, 56], sizes = [64, 1], strides = [1, 1]} : vector<64x60xf32> to vector<64x1xf32>
    %376 = vector.extract_strided_slice %4 {offsets = [0, 57], sizes = [64, 1], strides = [1, 1]} : vector<64x60xf32> to vector<64x1xf32>
    %377 = vector.extract_strided_slice %4 {offsets = [0, 58], sizes = [64, 1], strides = [1, 1]} : vector<64x60xf32> to vector<64x1xf32>
    %378 = vector.extract_strided_slice %4 {offsets = [0, 59], sizes = [64, 1], strides = [1, 1]} : vector<64x60xf32> to vector<64x1xf32>
    %379 = vector.broadcast %367 : vector<64x1xf32> to vector<64x128xf32>
    %380 = arith.mulf %365, %379 : vector<64x128xf32>
    %381 = vector.broadcast %368 : vector<64x1xf32> to vector<64x128xf32>
    %382 = arith.addf %380, %381 : vector<64x128xf32>
    %cst_70 = arith.constant 0.000000e+00 : f32
    %383 = vector.broadcast %cst_70 : f32 to vector<64x128xf32>
    %384 = arith.maximumf %382, %383 : vector<64x128xf32>
    %385 = vector.broadcast %369 : vector<64x1xf32> to vector<64x128xf32>
    %386 = arith.mulf %365, %385 : vector<64x128xf32>
    %387 = vector.broadcast %370 : vector<64x1xf32> to vector<64x128xf32>
    %388 = arith.addf %386, %387 : vector<64x128xf32>
    %389 = vector.broadcast %375 : vector<64x1xf32> to vector<64x32xf32>
    %390 = arith.mulf %366, %389 : vector<64x32xf32>
    %391 = vector.broadcast %376 : vector<64x1xf32> to vector<64x32xf32>
    %392 = arith.addf %390, %391 : vector<64x32xf32>
    %cst_71 = arith.constant dense<0.000000e+00> : vector<32xf32>
    %393 = vector.multi_reduction <add>, %392, %cst_71 [0] : vector<64x32xf32> to vector<32xf32>
    %394 = vector.shape_cast %393 : vector<32xf32> to vector<1x32xf32>
    %cst_72 = arith.constant 6.400000e+01 : f32
    %395 = vector.broadcast %cst_72 : f32 to vector<1x32xf32>
    %396 = arith.divf %394, %395 : vector<1x32xf32>
    %397 = vector.broadcast %396 : vector<1x32xf32> to vector<64x32xf32>
    %398 = arith.subf %392, %397 : vector<64x32xf32>
    %399 = arith.mulf %398, %398 : vector<64x32xf32>
    %cst_73 = arith.constant dense<0.000000e+00> : vector<32xf32>
    %400 = vector.multi_reduction <add>, %399, %cst_73 [0] : vector<64x32xf32> to vector<32xf32>
    %401 = vector.shape_cast %400 : vector<32xf32> to vector<1x32xf32>
    %cst_74 = arith.constant 6.400000e+01 : f32
    %402 = vector.broadcast %cst_74 : f32 to vector<1x32xf32>
    %403 = arith.divf %401, %402 : vector<1x32xf32>
    %404 = vector.broadcast %396 : vector<1x32xf32> to vector<64x32xf32>
    %405 = arith.subf %392, %404 : vector<64x32xf32>
    %cst_75 = arith.constant 9.99999993E-9 : f32
    %406 = vector.broadcast %cst_75 : f32 to vector<1x32xf32>
    %407 = arith.addf %403, %406 : vector<1x32xf32>
    %408 = math.rsqrt %407 : vector<1x32xf32>
    %409 = vector.broadcast %408 : vector<1x32xf32> to vector<64x32xf32>
    %410 = arith.mulf %405, %409 : vector<64x32xf32>
    %411 = vector.broadcast %377 : vector<64x1xf32> to vector<64x32xf32>
    %412 = arith.mulf %410, %411 : vector<64x32xf32>
    %413 = vector.broadcast %378 : vector<64x1xf32> to vector<64x32xf32>
    %414 = arith.addf %412, %413 : vector<64x32xf32>
    %cst_76 = arith.constant dense<0.000000e+00> : vector<64x128xf32>
    %415 = tpu.matmul %414, %5, %cst_76 {dimension_numbers = #tpu.dot_dimension_numbers<[1], [0], [0], [1], [0, 0, 1, 1], [], []>} : vector<64x32xf32>, vector<32x128xf32>, vector<64x128xf32> -> vector<64x128xf32>
    %416 = arith.mulf %384, %415 : vector<64x128xf32>
    %417 = vector.broadcast %371 : vector<64x1xf32> to vector<64x32xf32>
    %418 = arith.mulf %366, %417 : vector<64x32xf32>
    %419 = vector.broadcast %372 : vector<64x1xf32> to vector<64x32xf32>
    %420 = arith.addf %418, %419 : vector<64x32xf32>
    %cst_77 = arith.constant dense<0.000000e+00> : vector<32xf32>
    %421 = vector.multi_reduction <add>, %420, %cst_77 [0] : vector<64x32xf32> to vector<32xf32>
    %422 = vector.shape_cast %421 : vector<32xf32> to vector<1x32xf32>
    %cst_78 = arith.constant 6.400000e+01 : f32
    %423 = vector.broadcast %cst_78 : f32 to vector<1x32xf32>
    %424 = arith.divf %422, %423 : vector<1x32xf32>
    %425 = vector.broadcast %424 : vector<1x32xf32> to vector<64x32xf32>
    %426 = arith.subf %420, %425 : vector<64x32xf32>
    %427 = arith.mulf %426, %426 : vector<64x32xf32>
    %cst_79 = arith.constant dense<0.000000e+00> : vector<32xf32>
    %428 = vector.multi_reduction <add>, %427, %cst_79 [0] : vector<64x32xf32> to vector<32xf32>
    %429 = vector.shape_cast %428 : vector<32xf32> to vector<1x32xf32>
    %cst_80 = arith.constant 6.400000e+01 : f32
    %430 = vector.broadcast %cst_80 : f32 to vector<1x32xf32>
    %431 = arith.divf %429, %430 : vector<1x32xf32>
    %432 = vector.broadcast %424 : vector<1x32xf32> to vector<64x32xf32>
    %433 = arith.subf %420, %432 : vector<64x32xf32>
    %cst_81 = arith.constant 9.99999993E-9 : f32
    %434 = vector.broadcast %cst_81 : f32 to vector<1x32xf32>
    %435 = arith.addf %431, %434 : vector<1x32xf32>
    %436 = math.rsqrt %435 : vector<1x32xf32>
    %437 = vector.broadcast %436 : vector<1x32xf32> to vector<64x32xf32>
    %438 = arith.mulf %433, %437 : vector<64x32xf32>
    %439 = vector.broadcast %373 : vector<64x1xf32> to vector<64x32xf32>
    %440 = arith.mulf %438, %439 : vector<64x32xf32>
    %441 = vector.broadcast %374 : vector<64x1xf32> to vector<64x32xf32>
    %442 = arith.addf %440, %441 : vector<64x32xf32>
    %cst_82 = arith.constant dense<0xFF800000> : vector<64xf32>
    %443 = vector.multi_reduction <maximumf>, %442, %cst_82 [1] : vector<64x32xf32> to vector<64xf32>
    %444 = vector.shape_cast %443 : vector<64xf32> to vector<64x1xf32>
    %445 = vector.broadcast %444 : vector<64x1xf32> to vector<64x32xf32>
    %446 = arith.subf %442, %445 : vector<64x32xf32>
    %447 = math.exp %446 : vector<64x32xf32>
    %cst_83 = arith.constant dense<0.000000e+00> : vector<64xf32>
    %448 = vector.multi_reduction <add>, %447, %cst_83 [1] : vector<64x32xf32> to vector<64xf32>
    %449 = vector.shape_cast %448 : vector<64xf32> to vector<64x1xf32>
    %450 = tpu.reciprocal %449 {approx = true} : vector<64x1xf32> -> vector<64x1xf32>
    %451 = vector.broadcast %450 : vector<64x1xf32> to vector<64x32xf32>
    %452 = arith.mulf %447, %451 : vector<64x32xf32>
    %cst_84 = arith.constant dense<0.000000e+00> : vector<64x128xf32>
    %453 = tpu.matmul %452, %5, %cst_84 {dimension_numbers = #tpu.dot_dimension_numbers<[1], [0], [0], [1], [0, 0, 1, 1], [], []>} : vector<64x32xf32>, vector<32x128xf32>, vector<64x128xf32> -> vector<64x128xf32>
    %454 = arith.mulf %453, %388 : vector<64x128xf32>
    %455 = arith.addf %416, %454 : vector<64x128xf32>
    %c0_85 = arith.constant 0 : index
    %c0_86 = arith.constant 0 : index
    %c0_87 = arith.constant 0 : index
    %456 = vector.load %arg6[%c0_85, %c0_86, %c0_87] : memref<1x64x128xf32, #tpu.memory_space<vmem>>, vector<1x64x128xf32>
    %457 = vector.shape_cast %456 : vector<1x64x128xf32> to vector<64x128xf32>
    %458 = vector.shape_cast %455 : vector<64x128xf32> to vector<1x64x128xf32>
    tpu.vector_store %arg6[%c0_85, %c0_86, %c0_87], %458 {strides = array<i32>} : memref<1x64x128xf32, #tpu.memory_space<vmem>>, vector<1x64x128xf32>,
    return
  }
  func.func @transform_0(%arg0: i32) -> (i32, i32, i32) {
    %c0_i32 = arith.constant 0 : i32
    %c0_i32_0 = arith.constant 0 : i32
    %c0_i32_1 = arith.constant 0 : i32
    return %arg0, %c0_i32, %c0_i32_0 : i32, i32, i32
  }
  func.func @transform_1(%arg0: i32) -> (i32, i32, i32) {
    %c0_i32 = arith.constant 0 : i32
    %c0_i32_0 = arith.constant 0 : i32
    %c0_i32_1 = arith.constant 0 : i32
    return %arg0, %c0_i32, %c0_i32_0 : i32, i32, i32
  }
  func.func @transform_2(%arg0: i32) -> (i32, i32) {
    %c0_i32 = arith.constant 0 : i32
    %c0_i32_0 = arith.constant 0 : i32
    %c0_i32_1 = arith.constant 0 : i32
    return %c0_i32, %c0_i32_0 : i32, i32
  }
  func.func @transform_3(%arg0: i32) -> (i32, i32) {
    %c0_i32 = arith.constant 0 : i32
    %c0_i32_0 = arith.constant 0 : i32
    %c0_i32_1 = arith.constant 0 : i32
    return %c0_i32, %c0_i32_0 : i32, i32
  }
  func.func @transform_4(%arg0: i32) -> (i32, i32) {
    %c0_i32 = arith.constant 0 : i32
    %c0_i32_0 = arith.constant 0 : i32
    %c0_i32_1 = arith.constant 0 : i32
    return %c0_i32, %c0_i32_0 : i32, i32
  }
  func.func @transform_5(%arg0: i32) -> (i32, i32, i32) {
    %c0_i32 = arith.constant 0 : i32
    %c0_i32_0 = arith.constant 0 : i32
    %c0_i32_1 = arith.constant 0 : i32
    return %arg0, %c0_i32, %c0_i32_0 : i32, i32, i32
  }
}

</mosaic_0001>

<bundles_post_ra>
// kernel: tpu_custom_call.1
= control target key start
LH: loop header
LB: loop body
LE: loop exit
PB: predicated region body
PF: predicated region fallthrough
CT: control target
= control target key end

     0   :  { %10 = vsyncpa [#allocation3], 0  ;;  %s9805_s0 = inlined_call_operand.vmem [shape: f32[2,64,128], index: 0, kind: input, shape index: {}]   ;;  %s9806_s1 = inlined_call_operand.vmem [shape: f32[2,64,32], index: 1, kind: input, shape index: {}]   ;;  %s9807_s2 = inlined_call_operand.vmem [shape: f32[64,60], index: 2, kind: input, shape index: {}]   ;;  %s9808_s3 = inlined_call_operand.vmem [shape: f32[32,128], index: 3, kind: input, shape index: {}]   ;;  %s9809_s4 = inlined_call_operand.vmem [shape: f32[128,32], index: 4, kind: input, shape index: {}]   ;;  %s9810_s5 = inlined_call_operand.hbm [shape: f32[2,64,128], index: 5, kind: output, shape index: {}]  }
   0x1   :  { %12 = vsyncpa [#allocation3 + $0x1], 0  ;;  %s6582_s18 = smov 0   ;;  %s6584_s19 = smov 0  }
   0x2   :  { %s6586_s20 = smov 0   ;;  %s6588_s21 = smov 0  }
   0x3 LB: > { %s6603_s22 = sadd.s32 4294967295, %s6487_s21   ;;  %s5223_s23 = sadd.s32 4294967294, %s6487_s21   ;;  %s6487_s21 = sphi %s6588_s21, %s10313_s21   ;;  %s6483_s20 = sphi %s6586_s20, %s10312_s20   ;;  %s6479_s19 = sphi %s6584_s19, %s10311_s19   ;;  %s6475_s18 = sphi %s6582_s18, %s10310_s18  }
   0x4   : > { %s6607_s24 = sadd.s32 1, %s6487_s21   ;;  %s140_s25 = sadd.s32 1, %s6483_s20 }
   0x5   : > { %s137_s26 = ssub.s32 %s6487_s21, %s6607_s24  ;;  %p150_p0 = scmp.ne.s32.totalorder %s6483_s20, %s6479_s19 }
   0x6   : > { %p138_p1 = scmp.eq.s32.totalorder %s137_s26, 0  ;;  %p151_p2 = scmp.eq.s32.totalorder %s6603_s22, 1 }
   0x7   : > { %p156_p3 = scmp.ne.s32.totalorder %s6479_s19, %s6475_s18  ;;  %p157_p4 = scmp.eq.s32.totalorder %s5223_s23, 1 }
   0x8   : > { %s6618_s27 = scalar_select %p138_p1, %s6483_s20, %s140_s25  }
   0x9   : > { %p6620_p5 = por %p151_p2, %p150_p0  ;;  %p6624_p6 = por %p157_p4, %p156_p3 }
   0xa   : > { %p5226_p7 = scmp.ge.s32.totalorder %s6487_s21, 1  ;;  %p200_p8 = scmp.lt.s32.totalorder %s6487_s21, 3 }
   0xc   : > { %p201_p9 = pnand %p5226_p7, %p200_p8 }
   0xe   : > { %204 = sbr.rel (%p201_p9) target bundleno = 2821 (0xb05), region = 40 }
  0x15   : > { %v6633_v0 = vld [vmem:[%s9807_s2 + $0x10] sm:$0xff]  ;;  %v6638_v1 = vld [vmem:[%s9807_s2] sm:$0xff]  ;;  %v6489_v2 = vmov 12   ;;  %v6645_v3 = vld [vmem:[%s9807_s2 + $0x18] sm:$0xff]  ;;  %v6490_v9 = vmov 13   ;;  %v6491_v10 = vmov 14  }
  0x16   : > { %6030 = vset.pattern.permute.xlu1 %v6489_v2  ;;  %6029 = vset.pattern.permute.xlu0 %v6489_v2  ;;  %v6650_v4 = vld [vmem:[%s9807_s2 + $0x8] sm:$0xff]  ;;  %v6662_v6 = vld [vmem:[%s9807_s2 + $0x20] sm:$0xff]  ;;  %v6669_v7 = vld [vmem:[%s9807_s2 + $0x38] sm:$0xff]  ;;  %v6492_v11 = vmov 15   ;;  %v6493_v12 = vmov 20   ;;  %v6494_v13 = vmov 21  }
  0x17   : > { %299 = vperm.xlu1 %6030, %v6633_v0   ;;  %289 = vperm.xlu0 %6029, %v6638_v1   ;;  %v6657_v5 = vld [vmem:[%s9807_s2 + $0x28] sm:$0xff]  ;;  %9892 = vst [vmem:[#allocation5_spill] sm:$0xff] %v6669_v7  ;;  %v6674_v8 = vld [vmem:[%s9807_s2 + $0x30] sm:$0xff]  ;;  %v6495_v14 = vmov 22   ;;  %v6496_v15 = vmov 23   ;;  %v6497_v16 = vmov 16  }
  0x18   : > { %9893 = vst [vmem:[#allocation6_spill] sm:$0xff] %v6674_v8  ;;  %v6498_v23 = vmov 17   ;;  %v271_v28 = vld [vmem:[%s9809_s4] sm:$0xff]  ;;  %v272_v29 = vld [vmem:[%s9809_s4 + $0x8] sm:$0xff]  ;;  %v273_v33 = vld [vmem:[%s9809_s4 + $0x10] sm:$0xff]  ;;  %v6499_v40 = vmov 18  }
  0x19   : > { %v6767_v30 = vpack.c.bf16 %v272_v29, %v271_v28  ;;  %v274_v34 = vld [vmem:[%s9809_s4 + $0x18] sm:$0xff]  ;;  %v275_v38 = vld [vmem:[%s9809_s4 + $0x20] sm:$0xff]  ;;  %v276_v39 = vld [vmem:[%s9809_s4 + $0x28] sm:$0xff]  ;;  %v6500_v57 = vmov 19   ;;  %p233_p10 = scmp.lt.s32.totalorder %s6603_s22, 1  ;;  %vm1446_vm0 = vcmask 261120  }
  0x1a   : > { %v6783_v35 = vpack.c.bf16 %v274_v34, %v273_v33  ;;  %v6802_v41 = vpack.c.bf16 %v276_v39, %v275_v38  ;;  %v277_v43 = vld [vmem:[%s9809_s4 + $0x30] sm:$0xff]  ;;  %v278_v44 = vld [vmem:[%s9809_s4 + $0x38] sm:$0xff]  ;;  %v279_v47 = vld [vmem:[%s9809_s4 + $0x40] sm:$0xff]  ;;  %s5287_s16 = sshll.u32 %s6603_s22, 10  ;;  %s6549_s8 = smov [#allocation2]  }
  0x1b   : > { %304 = vperm.xlu1 %6030, %v6645_v3   ;;  %294 = vperm.xlu0 %6029, %v6650_v4   ;;  %9904 = vst [vmem:[#allocation17_spill] sm:$0xff] %v6767_v30  ;;  %v6820_v46 = vpack.c.bf16 %v278_v44, %v277_v43  ;;  %v280_v48 = vld [vmem:[%s9809_s4 + $0x48] sm:$0xff]  ;;  %v281_v52 = vld [vmem:[%s9809_s4 + $0x50] sm:$0xff]  ;;  %v282_v53 = vld [vmem:[%s9809_s4 + $0x58] sm:$0xff]  ;;  %s6929_s30 = scalar_select %p233_p10, %s6603_s22, 1 }
  0x1c   : > { %5753 = vmatprep.subr.bf16.mxu0 %v6767_v30  ;;  %9907 = vst [vmem:[#allocation20_spill] sm:$0xff] %v6783_v35  ;;  %5785 = vmatprep.subr.bf16.mxu1 %v6767_v30  ;;  %9910 = vst [vmem:[#allocation23_spill] sm:$0xff] %v6802_v41  ;;  %v6838_v51 = vpack.c.bf16 %v280_v48, %v279_v47  ;;  %v6856_v56 = vpack.c.bf16 %v282_v53, %v281_v52  ;;  %v283_v60 = vld [vmem:[%s9809_s4 + $0x60] sm:$0xff]  ;;  %v284_v61 = vld [vmem:[%s9809_s4 + $0x68] sm:$0xff]  ;;  %s9756_s26 = scalar_lea.hbm %s9810_s5, %s5287_s16 }
  0x1d   : > { %5755 = vmatpush3.bf16.msra.mxu0 %v6767_v30  ;;  %5787 = vmatpush3.bf16.msra.mxu1 %v6767_v30  ;;  %9913 = vst [vmem:[#allocation26_spill] sm:$0xff] %v6820_v46  ;;  %v6877_v62 = vpack.c.bf16 %v284_v61, %v283_v60  ;;  %s5285_s6 = sshll.u32 %s6929_s30, 6  ;;  %s6429_s30 = sshll.u32 %s6549_s8, 4  ;;  %s6430_s30 = int_to_ptr.vmem [resolvable:$false] %s6429_s30 }
  0x1e   : > { %5757 = vmatprep.subr.bf16.mxu0 %v6783_v35  ;;  %5789 = vmatprep.subr.bf16.mxu1 %v6783_v35  ;;  %9916 = vst [vmem:[#allocation29_spill] sm:$0xff] %v6838_v51  ;;  %9919 = vst [vmem:[#allocation32_spill] sm:$0xff] %v6856_v56  ;;  %s6938_s9 = scalar_lea.vmem %s9805_s0, %s5285_s6  ;;  %s7356_s10 = scalar_lea.vmem %s9806_s1, %s5285_s6 }
  0x1f   : > { %314 = vperm.xlu1 %6030, %v6657_v5   ;;  %309 = vperm.xlu0 %6029, %v6662_v6   ;;  %9922 = vst [vmem:[#allocation35_spill] sm:$0xff] %v6877_v62  ;;  %v6941_v47 = vld [vmem:[%s6938_s9 + $0x8] sm:$0xff]  ;;  %v6950_v60 = vld [vmem:[%s6938_s9 + $0x10] sm:$0xff]  ;;  %v6953_v61 = vld [vmem:[%s6938_s9 + $0x18] sm:$0xff]  ;;  %s6431_s6 = scalar_lea.vmem %s6430_s30, 2048 }
  0x21   : > { %5759 = vmatpush3.bf16.msra.mxu0 %v6783_v35  ;;  %5791 = vmatpush3.bf16.msra.mxu1 %v6783_v35 }
  0x22   : > { %5761 = vmatprep.subr.bf16.mxu0 %v6802_v41  ;;  %5793 = vmatprep.subr.bf16.mxu1 %v6802_v41 }
  0x23   : > { %324 = vperm.xlu1 %6030, %v6669_v7   ;;  %319 = vperm.xlu0 %6029, %v6674_v8  }
  0x25   : > { %5763 = vmatpush3.bf16.msra.mxu0 %v6802_v41  ;;  %5795 = vmatpush3.bf16.msra.mxu1 %v6802_v41 }
  0x26   : > { %5765 = vmatprep.subr.bf16.mxu0 %v6820_v46  ;;  %5797 = vmatprep.subr.bf16.mxu1 %v6820_v46 }
  0x27   : > { %6032 = vset.pattern.permute.xlu1 %v6490_v9  ;;  %6031 = vset.pattern.permute.xlu0 %v6490_v9  ;;  %v285_v9 = vld [vmem:[%s9809_s4 + $0x70] sm:$0xff] }
  0x28   : > { %340 = vperm.xlu1 %6032, %v6650_v4   ;;  %336 = vperm.xlu0 %6031, %v6638_v1  }
  0x29   : > { %5767 = vmatpush3.bf16.msra.mxu0 %v6820_v46  ;;  %5799 = vmatpush3.bf16.msra.mxu1 %v6820_v46 }
  0x2a   : > { %5769 = vmatprep.subr.bf16.mxu0 %v6838_v51  ;;  %5801 = vmatprep.subr.bf16.mxu1 %v6838_v51 }
  0x2c   : > { %344 = vperm.xlu1 %6032, %v6633_v0   ;;  %348 = vperm.xlu0 %6031, %v6645_v3  }
  0x2d   : > { %5771 = vmatpush3.bf16.msra.mxu0 %v6838_v51  ;;  %5803 = vmatpush3.bf16.msra.mxu1 %v6838_v51 }
  0x2e   : > { %5773 = vmatprep.subr.bf16.mxu0 %v6856_v56  ;;  %5805 = vmatprep.subr.bf16.mxu1 %v6856_v56 }
  0x30   : > { %352 = vperm.xlu1 %6032, %v6662_v6   ;;  %356 = vperm.xlu0 %6031, %v6657_v5  }
  0x31   : > { %5775 = vmatpush3.bf16.msra.mxu0 %v6856_v56  ;;  %5807 = vmatpush3.bf16.msra.mxu1 %v6856_v56 }
  0x32   : > { %5777 = vmatprep.subr.bf16.mxu0 %v6877_v62  ;;  %5809 = vmatprep.subr.bf16.mxu1 %v6877_v62 }
  0x34   : > { %360 = vperm.xlu1 %6032, %v6674_v8   ;;  %364 = vperm.xlu0 %6031, %v6669_v7  }
  0x35   : > { %5779 = vmatpush3.bf16.msra.mxu0 %v6877_v62  ;;  %5811 = vmatpush3.bf16.msra.mxu1 %v6877_v62 }
  0x38   : > { %6033 = vset.pattern.permute.xlu1 %v6491_v10  ;;  %6034 = vset.pattern.permute.xlu0 %v6491_v10  ;;  %v286_v10 = vld [vmem:[%s9809_s4 + $0x78] sm:$0xff] }
  0x39   : > { %384 = vperm.xlu1 %6033, %v6638_v1   ;;  %388 = vperm.xlu0 %6034, %v6650_v4  }
  0x3d   : > { %392 = vperm.xlu1 %6033, %v6633_v0   ;;  %400 = vperm.xlu0 %6034, %v6662_v6  }
  0x41   : > { %396 = vperm.xlu1 %6033, %v6645_v3   ;;  %408 = vperm.xlu0 %6034, %v6674_v8  }
  0x45   : > { %404 = vperm.xlu1 %6033, %v6657_v5   ;;  %6035 = vset.pattern.permute.xlu0 %v6492_v11 }
  0x46   : > { %424 = vperm.xlu0 %6035, %v6638_v1  }
  0x49   : > { %412 = vperm.xlu1 %6033, %v6669_v7  }
  0x4a   : > { %436 = vperm.xlu0 %6035, %v6645_v3  }
  0x4d   : > { %6036 = vset.pattern.permute.xlu1 %v6492_v11  ;;  %v6894_v11 = vpack.c.bf16 %v286_v10, %v285_v9 }
  0x4e   : > { %428 = vperm.xlu1 %6036, %v6650_v4   ;;  %444 = vperm.xlu0 %6035, %v6657_v5  }
  0x4f   : > { %9925 = vst [vmem:[#allocation38_spill] sm:$0xff] %v6894_v11  ;;  %5781 = vmatprep.subr.bf16.mxu0 %v6894_v11  ;;  %5813 = vmatprep.subr.bf16.mxu1 %v6894_v11 }
  0x50   : > { %5783 = vmatpush3.bf16.msra.mxu0 %v6894_v11  ;;  %5815 = vmatpush3.bf16.msra.mxu1 %v6894_v11 }
  0x52   : > { %432 = vperm.xlu1 %6036, %v6633_v0   ;;  %452 = vperm.xlu0 %6035, %v6669_v7  }
  0x56   : > { %440 = vperm.xlu1 %6036, %v6662_v6   ;;  %6038 = vset.pattern.permute.xlu0 %v6493_v12 }
  0x57   : > { %468 = vperm.xlu0 %6038, %v6650_v4  }
  0x5a   : > { %448 = vperm.xlu1 %6036, %v6674_v8  }
  0x5b   : > { %480 = vperm.xlu0 %6038, %v6662_v6  }
  0x5e   : > { %6037 = vset.pattern.permute.xlu1 %v6493_v12 }
  0x5f   : > { %464 = vperm.xlu1 %6037, %v6638_v1   ;;  %488 = vperm.xlu0 %6038, %v6674_v8  }
  0x63   : > { %472 = vperm.xlu1 %6037, %v6633_v0   ;;  %6039 = vset.pattern.permute.xlu0 %v6494_v13 }
  0x64   : > { %504 = vperm.xlu0 %6039, %v6638_v1  }
  0x67   : > { %476 = vperm.xlu1 %6037, %v6645_v3  }
  0x68   : > { %516 = vperm.xlu0 %6039, %v6645_v3  }
  0x6b   : > { %484 = vperm.xlu1 %6037, %v6657_v5  }
  0x6c   : > { %524 = vperm.xlu0 %6039, %v6657_v5  }
  0x6f   : > { %492 = vperm.xlu1 %6037, %v6669_v7  }
  0x70   : > { %532 = vperm.xlu0 %6039, %v6669_v7  }
  0x73   : > { %6040 = vset.pattern.permute.xlu1 %v6494_v13 }
  0x74   : > { %508 = vperm.xlu1 %6040, %v6650_v4   ;;  %6042 = vset.pattern.permute.xlu0 %v6495_v14 }
  0x75   : > { %603 = vperm.xlu0 %6042, %v6650_v4  }
  0x78   : > { %512 = vperm.xlu1 %6040, %v6633_v0  }
  0x79   : > { %615 = vperm.xlu0 %6042, %v6662_v6  }
  0x7c   : > { %520 = vperm.xlu1 %6040, %v6662_v6  }
  0x7d   : > { %623 = vperm.xlu0 %6042, %v6674_v8  }
  0x80   : > { %528 = vperm.xlu1 %6040, %v6674_v8  }
  0x81   : > { %6043 = vset.pattern.permute.xlu0 %v6496_v15 }
  0x82   : > { %639 = vperm.xlu0 %6043, %v6638_v1  }
  0x84   : > { %6041 = vset.pattern.permute.xlu1 %v6495_v14 }
  0x85   : > { %599 = vperm.xlu1 %6041, %v6638_v1  }
  0x86   : > { %651 = vperm.xlu0 %6043, %v6645_v3  }
  0x89   : > { %607 = vperm.xlu1 %6041, %v6633_v0  }
  0x8a   : > { %659 = vperm.xlu0 %6043, %v6657_v5  }
  0x8d   : > { %611 = vperm.xlu1 %6041, %v6645_v3  }
  0x8e   : > { %667 = vperm.xlu0 %6043, %v6669_v7  }
  0x91   : > { %619 = vperm.xlu1 %6041, %v6657_v5  }
  0x92   : > { %6046 = vset.pattern.permute.xlu0 %v6497_v16 }
  0x93   : > { %796 = vperm.xlu0 %6046, %v6650_v4  }
  0x95   : > { %627 = vperm.xlu1 %6041, %v6669_v7  }
  0x96   : > { %v6731_v17 = vpop.permute.xlu1 %299  ;;  %v6733_v18 = vpop.permute.xlu0 %289 }
  0x97   : > { %9894 = vst [vmem:[#allocation7_spill] sm:$0xff] %v6731_v17  ;;  %9895 = vst [vmem:[#allocation8_spill] sm:$0xff] %v6733_v18  ;;  %808 = vperm.xlu0 %6046, %v6662_v6  }
  0x99   : > { %6044 = vset.pattern.permute.xlu1 %v6496_v15 }
  0x9a   : > { %v6736_v19 = vpop.permute.xlu1 %304  ;;  %643 = vperm.xlu1 %6044, %v6650_v4   ;;  %v6739_v20 = vpop.permute.xlu0 %294 }
  0x9b   : > { %9896 = vst [vmem:[#allocation9_spill] sm:$0xff] %v6736_v19  ;;  %9897 = vst [vmem:[#allocation10_spill] sm:$0xff] %v6739_v20  ;;  %816 = vperm.xlu0 %6046, %v6674_v8  }
  0x9e   : > { %v6742_v21 = vpop.permute.xlu1 %314  ;;  %647 = vperm.xlu1 %6044, %v6633_v0   ;;  %v6745_v22 = vpop.permute.xlu0 %309 }
  0x9f   : > { %9898 = vst [vmem:[#allocation11_spill] sm:$0xff] %v6742_v21  ;;  %9899 = vst [vmem:[#allocation12_spill] sm:$0xff] %v6745_v22  ;;  %6047 = vset.pattern.permute.xlu0 %v6498_v23 }
  0xa0   : > { %832 = vperm.xlu0 %6047, %v6638_v1  }
  0xa2   : > { %v6749_v24 = vpop.permute.xlu1 %324  ;;  %655 = vperm.xlu1 %6044, %v6662_v6   ;;  %v6752_v25 = vpop.permute.xlu0 %319 }
  0xa3   : > { %9900 = vst [vmem:[#allocation13_spill] sm:$0xff] %v6749_v24  ;;  %9901 = vst [vmem:[#allocation14_spill] sm:$0xff] %v6752_v25 }
  0xa4   : > { %844 = vperm.xlu0 %6047, %v6645_v3  }
  0xa6   : > { %663 = vperm.xlu1 %6044, %v6674_v8  }
  0xa7   : > { %v6756_v26 = vpop.permute.xlu1 %340  ;;  %v6758_v27 = vpop.permute.xlu0 %336 }
  0xa8   : > { %9902 = vst [vmem:[#allocation15_spill] sm:$0xff] %v6756_v26  ;;  %9903 = vst [vmem:[#allocation16_spill] sm:$0xff] %v6758_v27  ;;  %852 = vperm.xlu0 %6047, %v6657_v5  }
  0xaa   : > { %6045 = vset.pattern.permute.xlu1 %v6497_v16 }
  0xab   : > { %v6770_v31 = vpop.permute.xlu1 %344  ;;  %792 = vperm.xlu1 %6045, %v6638_v1   ;;  %v6773_v32 = vpop.permute.xlu0 %348 }
  0xac   : > { %9905 = vst [vmem:[#allocation18_spill] sm:$0xff] %v6770_v31  ;;  %9906 = vst [vmem:[#allocation19_spill] sm:$0xff] %v6773_v32  ;;  %860 = vperm.xlu0 %6047, %v6669_v7  }
  0xaf   : > { %v6789_v36 = vpop.permute.xlu1 %352  ;;  %800 = vperm.xlu1 %6045, %v6633_v0   ;;  %v6792_v37 = vpop.permute.xlu0 %356 }
  0xb0   : > { %9908 = vst [vmem:[#allocation21_spill] sm:$0xff] %v6789_v36  ;;  %9909 = vst [vmem:[#allocation22_spill] sm:$0xff] %v6792_v37  ;;  %6050 = vset.pattern.permute.xlu0 %v6499_v40 }
  0xb1   : > { %930 = vperm.xlu0 %6050, %v6650_v4  }
  0xb3   : > { %v6808_v42 = vpop.permute.xlu1 %360  ;;  %804 = vperm.xlu1 %6045, %v6645_v3   ;;  %v6818_v45 = vpop.permute.xlu0 %364 }
  0xb4   : > { %9911 = vst [vmem:[#allocation24_spill] sm:$0xff] %v6808_v42  ;;  %9912 = vst [vmem:[#allocation25_spill] sm:$0xff] %v6818_v45  ;;  %v6962_v42 = vld [vmem:[%s6938_s9 + $0x28] sm:$0xff] }
  0xb5   : > { %942 = vperm.xlu0 %6050, %v6662_v6  }
  0xb7   : > { %812 = vperm.xlu1 %6045, %v6657_v5  }
  0xb8   : > { %v6834_v49 = vpop.permute.xlu1 %384  ;;  %v6836_v50 = vpop.permute.xlu0 %388 }
  0xb9   : > { %9914 = vst [vmem:[#allocation27_spill] sm:$0xff] %v6834_v49  ;;  %9915 = vst [vmem:[#allocation28_spill] sm:$0xff] %v6836_v50  ;;  %950 = vperm.xlu0 %6050, %v6674_v8  }
  0xbb   : > { %820 = vperm.xlu1 %6045, %v6669_v7  }
  0xbc   : > { %v6852_v54 = vpop.permute.xlu1 %392  ;;  %v6854_v55 = vpop.permute.xlu0 %400 }
  0xbd   : > { %9917 = vst [vmem:[#allocation30_spill] sm:$0xff] %v6852_v54  ;;  %9918 = vst [vmem:[#allocation31_spill] sm:$0xff] %v6854_v55  ;;  %6051 = vset.pattern.permute.xlu0 %v6500_v57 }
  0xbe   : > { %966 = vperm.xlu0 %6051, %v6638_v1  }
  0xbf   : > { %6048 = vset.pattern.permute.xlu1 %v6498_v23 }
  0xc0   : > { %836 = vperm.xlu1 %6048, %v6650_v4   ;;  %v6864_v58 = vpop.permute.xlu1 %396  ;;  %v6866_v59 = vpop.permute.xlu0 %408 }
  0xc1   : > { %9920 = vst [vmem:[#allocation33_spill] sm:$0xff] %v6864_v58  ;;  %9921 = vst [vmem:[#allocation34_spill] sm:$0xff] %v6866_v59 }
  0xc2   : > { %978 = vperm.xlu0 %6051, %v6645_v3  }
  0xc4   : > { %840 = vperm.xlu1 %6048, %v6633_v0   ;;  %v6880_v63 = vpop.permute.xlu1 %404 }
  0xc5   : > { %9923 = vst [vmem:[#allocation36_spill] sm:$0xff] %v6880_v63  ;;  %v6883_v2 = vpop.permute.xlu0 %424 }
  0xc6   : > { %9924 = vst [vmem:[#allocation37_spill] sm:$0xff] %v6883_v2  ;;  %986 = vperm.xlu0 %6051, %v6657_v5  }
  0xc8   : > { %848 = vperm.xlu1 %6048, %v6662_v6   ;;  %v6898_v12 = vpop.permute.xlu1 %412 }
  0xc9   : > { %9926 = vst [vmem:[#allocation39_spill] sm:$0xff] %v6898_v12  ;;  %v6905_v13 = vpop.permute.xlu0 %436  ;;  %v6957_v12 = vld [vmem:[%s6938_s9 + $0x20] sm:$0xff] }
  0xca   : > { %994 = vperm.xlu0 %6051, %v6669_v7   ;;  %9927 = vst [vmem:[#allocation40_spill] sm:$0xff] %v6905_v13 }
  0xcc   : > { %856 = vperm.xlu1 %6048, %v6674_v8  }
  0xcd   : > { %v6908_v14 = vpop.permute.xlu1 %428  ;;  %v6911_v15 = vpop.permute.xlu0 %444 }
  0xce   : > { %9928 = vst [vmem:[#allocation41_spill] sm:$0xff] %v6908_v14  ;;  %9929 = vst [vmem:[#allocation42_spill] sm:$0xff] %v6911_v15 }
  0xd0   : > { %6049 = vset.pattern.permute.xlu1 %v6499_v40 }
  0xd1   : > { %v6913_v16 = vpop.permute.xlu1 %432  ;;  %926 = vperm.xlu1 %6049, %v6638_v1   ;;  %v6919_v28 = vpop.permute.xlu0 %452 }
  0xd2   : > { %9930 = vst [vmem:[#allocation43_spill] sm:$0xff] %v6913_v16  ;;  %9932 = vst [vmem:[#allocation45_spill] sm:$0xff] %v6919_v28 }
  0xd5   : > { %v6916_v23 = vpop.permute.xlu1 %440  ;;  %934 = vperm.xlu1 %6049, %v6633_v0  }
  0xd6   : > { %9931 = vst [vmem:[#allocation44_spill] sm:$0xff] %v6916_v23  ;;  %v469_v33 = vpop.permute.xlu0 %468 }
  0xd7   : > { %v496_v53 = vmul.f32 %v469_v33, %v6941_v47 }
  0xd9   : > { %v6921_v29 = vpop.permute.xlu1 %448  ;;  %938 = vperm.xlu1 %6049, %v6645_v3  }
  0xda   : > { %9933 = vst [vmem:[#allocation46_spill] sm:$0xff] %v6921_v29  ;;  %v481_v38 = vpop.permute.xlu0 %480 }
  0xdb   : > { %v499_v45 = vmul.f32 %v481_v38, %v6957_v12 }
  0xdd   : > { %946 = vperm.xlu1 %6049, %v6657_v5  }
  0xde   : > { %v465_v34 = vpop.permute.xlu1 %464  ;;  %v489_v43 = vpop.permute.xlu0 %488 }
  0xe1   : > { %954 = vperm.xlu1 %6049, %v6669_v7  }
  0xe2   : > { %v473_v39 = vpop.permute.xlu1 %472 }
  0xe3   : > { %v505_v48 = vpop.permute.xlu0 %504  ;;  %v497_v23 = vmul.f32 %v473_v39, %v6950_v60 }
  0xe5   : > { %6052 = vset.pattern.permute.xlu1 %v6500_v57  ;;  %v6946_v57 = vld [vmem:[%s6938_s9] sm:$0xff] }
  0xe6   : > { %v477_v40 = vpop.permute.xlu1 %476  ;;  %970 = vperm.xlu1 %6052, %v6650_v4   ;;  %v495_v29 = vmul.f32 %v465_v34, %v6946_v57 }
  0xe7   : > { %v517_v9 = vpop.permute.xlu0 %516  ;;  %v498_v59 = vmul.f32 %v477_v40, %v6953_v61 }
  0xe8   : > { %v535_v33 = vadd.f32 %v505_v48, %v495_v29 }
  0xe9   : > { %v538_v55 = vadd.f32 %v517_v9, %v498_v59 }
  0xea   : > { %v485_v44 = vpop.permute.xlu1 %484  ;;  %974 = vperm.xlu1 %6052, %v6633_v0  }
  0xeb   : > { %v525_v16 = vpop.permute.xlu0 %524  ;;  %v500_v34 = vmul.f32 %v485_v44, %v6962_v42 }
  0xed   : > { %v540_v13 = vadd.f32 %v525_v16, %v500_v34 }
  0xee   : > { %v493_v52 = vpop.permute.xlu1 %492  ;;  %982 = vperm.xlu1 %6052, %v6662_v6  }
  0xef   : > { %v533_v54 = vpop.permute.xlu0 %532 }
  0xf2   : > { %990 = vperm.xlu1 %6052, %v6674_v8  }
  0xf3   : > { %v509_v10 = vpop.permute.xlu1 %508 }
  0xf4   : > { %v536_v28 = vadd.f32 %v509_v10, %v496_v53  ;;  %v6967_v53 = vld [vmem:[%s6938_s9 + $0x30] sm:$0xff]  ;;  %v6970_v10 = vld [vmem:[%s6938_s9 + $0x38] sm:$0xff] }
  0xf5   : > { %v501_v40 = vmul.f32 %v489_v43, %v6967_v53  ;;  %v502_v37 = vmul.f32 %v493_v52, %v6970_v10 }
  0xf6   : > { %v543_v63 = vadd.f32 %v536_v28, %v535_v33 }
  0xf7   : > { %v513_v15 = vpop.permute.xlu1 %512  ;;  %v542_v9 = vadd.f32 %v533_v54, %v502_v37 }
  0xf8   : > { %v537_v24 = vadd.f32 %v513_v15, %v497_v23 }
  0xfa   : > { %v544_v25 = vadd.f32 %v543_v63, %v537_v24  ;;  %v6974_v63 = vpop.permute.xlu0 %603 }
  0xfb   : > { %v521_v39 = vpop.permute.xlu1 %520 }
  0xfc   : > { %v539_v29 = vadd.f32 %v521_v39, %v499_v45  ;;  %v545_v48 = vadd.f32 %v544_v25, %v538_v55 }
  0xfe   : > { %v546_v38 = vadd.f32 %v545_v48, %v539_v29  ;;  %v6980_v43 = vpop.permute.xlu0 %615 }
  0xff   : > { %v529_v15 = vpop.permute.xlu1 %528 }
 0x100   : > { %v541_v23 = vadd.f32 %v529_v15, %v501_v40  ;;  %v547_v59 = vadd.f32 %v546_v38, %v540_v13 }
 0x102   : > { %v548_v44 = vadd.f32 %v547_v59, %v541_v23  ;;  %v6984_v48 = vpop.permute.xlu0 %623 }
 0x104   : > { %v549_v36 = vadd.f32 %v548_v44, %v542_v9  ;;  %v6976_v58 = vpop.permute.xlu1 %599 }
 0x106   : > { %v550_v21 = vrot.slane %v549_v36, 4 }
 0x108   : > { %v551_v45 = vadd.f32 %v550_v21, %v549_v36  ;;  %v6978_v25 = vpop.permute.xlu1 %607  ;;  %v6990_v36 = vpop.permute.xlu0 %639 }
 0x10a   : > { %v552_v16 = vrot.slane %v551_v45, 2 }
 0x10c   : > { %v553_v52 = vadd.f32 %v552_v16, %v551_v45  ;;  %v6982_v34 = vpop.permute.xlu1 %611  ;;  %v6994_v17 = vpop.permute.xlu0 %651 }
 0x10e   : > { %v554_v39 = vrot.slane %v553_v52, 1 }
 0x110   : > { %v555_v37 = vadd.f32 %v554_v39, %v553_v52  ;;  %v6986_v54 = vpop.permute.xlu1 %619 }
 0x112   : > { %v557_v40 = vmul.f32 0.015625, %v555_v37 }
 0x114   : > { %v559_v38 = vsub.f32 %v536_v28, %v557_v40  ;;  %v6988_v15 = vpop.permute.xlu1 %627  ;;  %v560_v59 = vsub.f32 %v537_v24, %v557_v40  ;;  %v558_v21 = vsub.f32 %v535_v33, %v557_v40  ;;  %v561_v31 = vsub.f32 %v538_v55, %v557_v40 }
 0x115   : > { %v562_v45 = vsub.f32 %v539_v29, %v557_v40  ;;  %v6992_v22 = vsub.f32 %v540_v13, %v557_v40  ;;  %v6996_v28 = vsub.f32 %v541_v23, %v557_v40  ;;  %v7000_v49 = vsub.f32 %v542_v9, %v557_v40 }
 0x116   : > { %v567_v44 = vmul.f32 %v559_v38, %v559_v38  ;;  %v566_v2 = vmul.f32 %v558_v21, %v558_v21  ;;  %v568_v16 = vmul.f32 %v560_v59, %v560_v59  ;;  %v569_v52 = vmul.f32 %v561_v31, %v561_v31 }
 0x117   : > { %v570_v37 = vmul.f32 %v562_v45, %v562_v45  ;;  %v571_v55 = vmul.f32 %v6992_v22, %v6992_v22  ;;  %v573_v23 = vmul.f32 %v7000_v49, %v7000_v49  ;;  %v6501_v9 = vmov 0  }
 0x118   : > { %v574_v32 = vadd.f32 %v567_v44, %v566_v2  ;;  %v572_v2 = vmul.f32 %v6996_v28, %v6996_v28  ;;  %v7006_v44 = vpop.permute.xlu0 %659  ;;  %6054 = vset.pattern.permute.xlu1 %v6501_v9  ;;  %6053 = vset.pattern.permute.xlu0 %v6501_v9 }
 0x119   : > { %v644_v14 = vpop.permute.xlu1 %643 }
 0x11a   : > { %v575_v39 = vadd.f32 %v574_v32, %v568_v16 }
 0x11c   : > { %v576_v24 = vadd.f32 %v575_v39, %v569_v52 }
 0x11d   : > { %v6998_v33 = vpop.permute.xlu1 %647 }
 0x11e   : > { %v577_v29 = vadd.f32 %v576_v24, %v570_v37  ;;  %v7014_v37 = vpop.permute.xlu0 %667 }
 0x120   : > { %v578_v13 = vadd.f32 %v577_v29, %v571_v55 }
 0x121   : > { %v7008_v32 = vpop.permute.xlu1 %655 }
 0x122   : > { %v579_v16 = vadd.f32 %v578_v13, %v572_v2  ;;  %v797_v27 = vpop.permute.xlu0 %796 }
 0x124   : > { %v580_v52 = vadd.f32 %v579_v16, %v573_v23 }
 0x125   : > { %v7012_v39 = vpop.permute.xlu1 %663 }
 0x126   : > { %v581_v40 = vrot.slane %v580_v52, 4  ;;  %v809_v2 = vpop.permute.xlu0 %808 }
 0x128   : > { %v582_v24 = vadd.f32 %v581_v40, %v580_v52  ;;  %v824_v52 = vmul.f32 %v797_v27, %v6941_v47 }
 0x12a   : > { %v793_v19 = vpop.permute.xlu1 %792  ;;  %v583_v55 = vrot.slane %v582_v24, 2  ;;  %v817_v16 = vpop.permute.xlu0 %816 }
 0x12c   : > { %v584_v29 = vadd.f32 %v583_v55, %v582_v24  ;;  %v823_v55 = vmul.f32 %v793_v19, %v6946_v57 }
 0x12e   : > { %v801_v50 = vpop.permute.xlu1 %800  ;;  %v585_v26 = vrot.slane %v584_v29, 1  ;;  %v833_v9 = vpop.permute.xlu0 %832 }
 0x12f   : > { %v863_v8 = vadd.f32 %v833_v9, %v823_v55  ;;  %v825_v27 = vmul.f32 %v801_v50, %v6950_v60 }
 0x130   : > { %v586_v18 = vadd.f32 %v585_v26, %v584_v29 }
 0x132   : > { %v805_v20 = vpop.permute.xlu1 %804  ;;  %v587_v11 = vmul.f32 0.015625, %v586_v18  ;;  %v845_v41 = vpop.permute.xlu0 %844 }
 0x133   : > { %v826_v35 = vmul.f32 %v805_v20, %v6953_v61 }
 0x134   : > { %v588_v13 = vadd.f32 1e-08, %v587_v11 }
 0x135   : > { %v866_v61 = vadd.f32 %v845_v41, %v826_v35 }
 0x136   : > { %v813_v23 = vpop.permute.xlu1 %812  ;;  %6181 = vrsqrt.f32 %v588_v13 }
 0x137   : > { %v828_v57 = vmul.f32 %v813_v23, %v6962_v42 }
 0x13a   : > { %v821_v62 = vpop.permute.xlu1 %820 }
 0x13f   : > { %v837_v56 = vpop.permute.xlu1 %836 }
 0x140   : > { %v6182_v51 = vpop.eup %6181  ;;  %v864_v29 = vadd.f32 %v837_v56, %v824_v52 }
 0x141   : > { %v590_v40 = vmul.f32 %v6182_v51, %v558_v21  ;;  %v591_v46 = vmul.f32 %v6182_v51, %v559_v38  ;;  %v592_v24 = vmul.f32 %v6182_v51, %v560_v59  ;;  %v593_v13 = vmul.f32 %v6182_v51, %v561_v31 }
 0x142   : > { %v594_v7 = vmul.f32 %v6182_v51, %v562_v45  ;;  %v827_v38 = vmul.f32 %v809_v2, %v6957_v12  ;;  %v871_v59 = vadd.f32 %v864_v29, %v863_v8  ;;  %v596_v20 = vmul.f32 %v6182_v51, %v6996_v28 }
 0x143   : > { %v841_v26 = vpop.permute.xlu1 %840  ;;  %v630_v18 = vmul.f32 %v6976_v58, %v590_v40  ;;  %v631_v11 = vmul.f32 %v6974_v63, %v591_v46  ;;  %v632_v30 = vmul.f32 %v6978_v25, %v592_v24  ;;  %v633_v31 = vmul.f32 %v6982_v34, %v593_v13  ;;  %v853_v63 = vpop.permute.xlu0 %852 }
 0x144   : > { %v865_v58 = vadd.f32 %v841_v26, %v825_v27  ;;  %v595_v56 = vmul.f32 %v6182_v51, %v6992_v22  ;;  %v634_v50 = vmul.f32 %v6980_v43, %v594_v7  ;;  %v829_v25 = vmul.f32 %v817_v16, %v6967_v53 }
 0x145   : > { %v671_v47 = vadd.f32 %v644_v14, %v631_v11  ;;  %v670_v46 = vadd.f32 %v6990_v36, %v630_v18  ;;  %v672_v14 = vadd.f32 %v6998_v33, %v632_v30  ;;  %v868_v21 = vadd.f32 %v853_v63, %v828_v57 }
 0x146   : > { %v872_v12 = vadd.f32 %v871_v59, %v865_v58  ;;  %v635_v34 = vmul.f32 %v6986_v54, %v595_v56  ;;  %v597_v22 = vmul.f32 %v6182_v51, %v7000_v49  ;;  %v673_v35 = vadd.f32 %v6994_v17, %v633_v31 }
 0x147   : > { %v849_v19 = vpop.permute.xlu1 %848  ;;  %5488 = vmatprep.mubr.f32.mxu0 %v670_v46  ;;  %v830_v7 = vmul.f32 %v821_v62, %v6970_v10  ;;  %v636_v30 = vmul.f32 %v6984_v48, %v596_v20  ;;  %v674_v41 = vadd.f32 %v7008_v32, %v634_v50  ;;  %v861_v28 = vpop.permute.xlu0 %860 }
 0x148   : > { %v867_v60 = vadd.f32 %v849_v19, %v827_v38  ;;  %5489 = vmatmul.mubr.f32.vlgmr.msra.gmra.mrb[0].mxu0 %v671_v47  ;;  %v873_v36 = vadd.f32 %v872_v12, %v866_v61  ;;  %v637_v33 = vmul.f32 %v6988_v15, %v597_v22  ;;  %v675_v54 = vadd.f32 %v7006_v44, %v635_v34 }
 0x149   : > { %5491 = vmatprep.mubr.f32.mxu0 %v672_v14  ;;  %v676_v49 = vadd.f32 %v7012_v39, %v636_v30  ;;  %v870_v51 = vadd.f32 %v861_v28, %v830_v7 }
 0x14a   : > { %v874_v43 = vadd.f32 %v873_v36, %v867_v60  ;;  %v677_v10 = vadd.f32 %v7014_v37, %v637_v33 }
 0x14b   : > { %v857_v42 = vpop.permute.xlu1 %856  ;;  %v931_v12 = vpop.permute.xlu0 %930 }
 0x14c   : > { %v869_v45 = vadd.f32 %v857_v42, %v829_v25  ;;  %5492 = vmatmul.mubr.f32.gmra.mrb[2].mxu0 %v673_v35  ;;  %v875_v53 = vadd.f32 %v874_v43, %v868_v21 }
 0x14d   : > { %5494 = vmatprep.mubr.f32.mxu0 %v674_v41 }
 0x14e   : > { %v876_v17 = vadd.f32 %v875_v53, %v869_v45 }
 0x14f   : > { %v943_v36 = vpop.permute.xlu0 %942 }
 0x150   : > { %5495 = vmatmul.mubr.f32.gmra.mrb[4].mxu0 %v675_v54  ;;  %v877_v62 = vadd.f32 %v876_v17, %v870_v51 }
 0x151   : > { %5497 = vmatprep.mubr.f32.mxu0 %v676_v49 }
 0x152   : > { %v878_v48 = vrot.slane %v877_v62, 4 }
 0x153   : > { %v951_v7 = vpop.permute.xlu0 %950 }
 0x154   : > { %5498 = vmatmul.mubr.f32.gmra.mrb[6].mxu0 %v677_v10  ;;  %v879_v32 = vadd.f32 %v878_v48, %v877_v62 }
 0x156   : > { %v880_v2 = vrot.slane %v879_v32, 2 }
 0x157   : > { %v967_v41 = vpop.permute.xlu0 %966 }
 0x158   : > { %v881_v23 = vadd.f32 %v880_v2, %v879_v32 }
 0x15a   : > { %v882_v16 = vrot.slane %v881_v23, 1 }
 0x15b   : > { %v979_v49 = vpop.permute.xlu0 %978 }
 0x15c   : > { %v883_v9 = vadd.f32 %v882_v16, %v881_v23 }
 0x15e   : > { %v884_v52 = vmul.f32 0.015625, %v883_v9 }
 0x15f   : > { %v987_v9 = vpop.permute.xlu0 %986 }
 0x160   : > { %v886_v15 = vsub.f32 %v864_v29, %v884_v52  ;;  %v887_v40 = vsub.f32 %v865_v58, %v884_v52  ;;  %v885_v44 = vsub.f32 %v863_v8, %v884_v52  ;;  %v888_v39 = vsub.f32 %v866_v61, %v884_v52  ;;  %v927_v29 = vpop.permute.xlu1 %926 }
 0x161   : > { %v889_v26 = vsub.f32 %v867_v60, %v884_v52  ;;  %v890_v13 = vsub.f32 %v868_v21, %v884_v52  ;;  %v891_v47 = vsub.f32 %v869_v45, %v884_v52  ;;  %v892_v57 = vsub.f32 %v870_v51, %v884_v52 }
 0x162   : > { %v894_v24 = vmul.f32 %v886_v15, %v886_v15  ;;  %v893_v55 = vmul.f32 %v885_v44, %v885_v44  ;;  %v895_v18 = vmul.f32 %v887_v40, %v887_v40  ;;  %v896_v27 = vmul.f32 %v888_v39, %v888_v39 }
 0x163   : > { %v897_v38 = vmul.f32 %v889_v26, %v889_v26  ;;  %v898_v59 = vmul.f32 %v890_v13, %v890_v13  ;;  %v899_v31 = vmul.f32 %v891_v47, %v891_v47  ;;  %v900_v58 = vmul.f32 %v892_v57, %v892_v57 }
 0x164   : > { %v901_v11 = vadd.f32 %v894_v24, %v893_v55  ;;  %v935_v63 = vpop.permute.xlu1 %934 }
 0x166   : > { %v902_v37 = vadd.f32 %v901_v11, %v895_v18 }
 0x168   : > { %v903_v19 = vadd.f32 %v902_v37, %v896_v27  ;;  %v939_v42 = vpop.permute.xlu1 %938 }
 0x16a   : > { %v904_v46 = vadd.f32 %v903_v19, %v897_v38  ;;  %v6502_v19 = vmov 1  }
 0x16c   : > { %v905_v20 = vadd.f32 %v904_v46, %v898_v59  ;;  %v947_v22 = vpop.permute.xlu1 %946  ;;  %v6503_v59 = vmov 2   ;;  %v7103_v46 = vld [vmem:[%s9807_s2 + $0x8] sm:$0xff] }
 0x16e   : > { %v906_v8 = vadd.f32 %v905_v20, %v899_v31  ;;  %v7110_v31 = vld [vmem:[%s9807_s2 + $0x20] sm:$0xff]  ;;  %v7120_v20 = vld [vmem:[%s9807_s2 + $0x30] sm:$0xff] }
 0x170   : > { %v907_v56 = vadd.f32 %v906_v8, %v900_v58  ;;  %v955_v30 = vpop.permute.xlu1 %954  ;;  %v7135_v58 = vld [vmem:[%s9807_s2 + $0x38] sm:$0xff] }
 0x172   : > { %v908_v61 = vrot.slane %v907_v56, 4 }
 0x174   : > { %v909_v50 = vadd.f32 %v908_v61, %v907_v56  ;;  %v971_v43 = vpop.permute.xlu1 %970 }
 0x176   : > { %v910_v14 = vrot.slane %v909_v50, 2 }
 0x178   : > { %v911_v60 = vadd.f32 %v910_v14, %v909_v50  ;;  %v975_v17 = vpop.permute.xlu1 %974 }
 0x17a   : > { %v912_v25 = vrot.slane %v911_v60, 1 }
 0x17c   : > { %v913_v21 = vadd.f32 %v912_v25, %v911_v60 }
 0x17e   : > { %v914_v34 = vmul.f32 0.015625, %v913_v21 }
 0x180   : > { %v915_v35 = vadd.f32 1e-08, %v914_v34 }
 0x182   : > { %6183 = vrsqrt.f32 %v915_v35 }
 0x18c   : > { %v6184_v45 = vpop.eup %6183 }
 0x18d   : > { %v917_v28 = vmul.f32 %v6184_v45, %v885_v44  ;;  %v920_v53 = vmul.f32 %v6184_v45, %v888_v39  ;;  %v919_v33 = vmul.f32 %v6184_v45, %v887_v40  ;;  %v918_v54 = vmul.f32 %v6184_v45, %v886_v15  ;;  %v983_v44 = vpop.permute.xlu1 %982 }
 0x18e   : > { %v922_v48 = vmul.f32 %v6184_v45, %v890_v13  ;;  %v921_v23 = vmul.f32 %v6184_v45, %v889_v26  ;;  %v924_v40 = vmul.f32 %v6184_v45, %v892_v57  ;;  %v923_v39 = vmul.f32 %v6184_v45, %v891_v47  ;;  %v995_v13 = vpop.permute.xlu0 %994  ;;  %v9934_v57 = vld [vmem:[#allocation6_spill] sm:$0xff] }
 0x18f   : > { %v957_v51 = vmul.f32 %v927_v29, %v917_v28  ;;  %v958_v62 = vmul.f32 %v931_v12, %v918_v54  ;;  %v960_v10 = vmul.f32 %v939_v42, %v920_v53  ;;  %v959_v2 = vmul.f32 %v935_v63, %v919_v33  ;;  %v7129_v29 = vld [vmem:[%s9807_s2 + $0x28] sm:$0xff] }
 0x190   : > { %v962_v52 = vmul.f32 %v947_v22, %v922_v48  ;;  %v961_v24 = vmul.f32 %v943_v36, %v921_v23  ;;  %v964_v26 = vmul.f32 %v955_v30, %v924_v40  ;;  %v963_v11 = vmul.f32 %v951_v7, %v923_v39 }
 0x191   : > { %v7042_v32 = vadd.f32 %v967_v41, %v957_v51  ;;  %v7044_v16 = vadd.f32 %v971_v43, %v958_v62  ;;  %v7048_v15 = vadd.f32 %v979_v49, %v960_v10  ;;  %v7050_v55 = vadd.f32 %v975_v17, %v959_v2  ;;  %v991_v37 = vpop.permute.xlu1 %990 }
 0x192   : > { %v7054_v18 = vadd.f32 %v987_v9, %v962_v52  ;;  %v7056_v27 = vadd.f32 %v983_v44, %v961_v24  ;;  %v7060_v38 = vadd.f32 %v995_v13, %v964_v26  ;;  %v7062_v47 = vadd.f32 %v991_v37, %v963_v11 }
 0x193   : > { %1005 = vmax.xlane.f32.xlu1 %v7042_v32  ;;  %1007 = vmax.xlane.f32.xlu0 %v7044_v16  ;;  %v6506_v13 = vmov 9  }
 0x197   : > { %1011 = vmax.xlane.f32.xlu1 %v7048_v15  ;;  %1009 = vmax.xlane.f32.xlu0 %v7050_v55 }
 0x19b   : > { %1015 = vmax.xlane.f32.xlu1 %v7054_v18  ;;  %1013 = vmax.xlane.f32.xlu0 %v7056_v27 }
 0x19f   : > { %1019 = vmax.xlane.f32.xlu1 %v7060_v38  ;;  %1017 = vmax.xlane.f32.xlu0 %v7062_v47 }
 0x1b0   : > { %1203 = vperm.xlu1 %6054, %v6650_v4  }
 0x1b4   : > { %1207 = vperm.xlu1 %6054, %v6633_v0   ;;  %v9935_v0 = vld [vmem:[#allocation5_spill] sm:$0xff] }
 0x1b5   : > { %1199 = vperm.xlu0 %6053, %v6638_v1  }
 0x1b8   : > { %1211 = vperm.xlu1 %6054, %v6645_v3  }
 0x1b9   : > { %6056 = vset.pattern.permute.xlu0 %v6502_v19 }
 0x1ba   : > { %1243 = vperm.xlu0 %6056, %v6650_v4   ;;  %v7082_v4 = vld [vmem:[%s9807_s2] sm:$0xff] }
 0x1bc   : > { %1215 = vperm.xlu1 %6054, %v6662_v6  }
 0x1be   : > { %1255 = vperm.xlu0 %6056, %v6662_v6   ;;  %v7089_v6 = vld [vmem:[%s9807_s2 + $0x10] sm:$0xff] }
 0x1c0   : > { %1219 = vperm.xlu1 %6054, %v6657_v5  }
 0x1c2   : > { %1263 = vperm.xlu0 %6056, %v9934_v57  }
 0x1c4   : > { %1223 = vperm.xlu1 %6054, %v9934_v57  }
 0x1c6   : > { %6057 = vset.pattern.permute.xlu0 %v6503_v59 }
 0x1c7   : > { %1287 = vperm.xlu0 %6057, %v6638_v1   ;;  %v7096_v1 = vld [vmem:[%s9807_s2 + $0x18] sm:$0xff] }
 0x1c8   : > { %1227 = vperm.xlu1 %6054, %v9935_v0  }
 0x1cb   : > { %1299 = vperm.xlu0 %6057, %v6645_v3   ;;  %v6504_v3 = vmov 3  }
 0x1cc   : > { %6055 = vset.pattern.permute.xlu1 %v6502_v19 }
 0x1cd   : > { %1239 = vperm.xlu1 %6055, %v7082_v4  }
 0x1cf   : > { %1307 = vperm.xlu0 %6057, %v6657_v5  }
 0x1d1   : > { %1247 = vperm.xlu1 %6055, %v7089_v6  }
 0x1d3   : > { %1315 = vperm.xlu0 %6057, %v9935_v0  }
 0x1d5   : > { %1251 = vperm.xlu1 %6055, %v7096_v1  }
 0x1d7   : > { %6060 = vset.pattern.permute.xlu0 %v6504_v3 }
 0x1d8   : > { %1331 = vperm.xlu0 %6060, %v7103_v46  }
 0x1d9   : > { %1259 = vperm.xlu1 %6055, %v6657_v5   ;;  %v6505_v5 = vmov 8  }
 0x1dc   : > { %1343 = vperm.xlu0 %6060, %v7110_v31  }
 0x1dd   : > { %1267 = vperm.xlu1 %6055, %v9935_v0  }
 0x1e0   : > { %1351 = vperm.xlu0 %6060, %v9934_v57  }
 0x1e1   : > { %6058 = vset.pattern.permute.xlu1 %v6503_v59 }
 0x1e2   : > { %1291 = vperm.xlu1 %6058, %v7103_v46  }
 0x1e4   : > { %6061 = vset.pattern.permute.xlu0 %v6505_v5 }
 0x1e6   : > { %1295 = vperm.xlu1 %6058, %v7089_v6  }
 0x1ea   : > { %1303 = vperm.xlu1 %6058, %v7110_v31  }
 0x1ee   : > { %1311 = vperm.xlu1 %6058, %v7120_v20  }
 0x1f2   : > { %6059 = vset.pattern.permute.xlu1 %v6504_v3  ;;  %v6508_v3 = vmov 11  }
 0x1f3   : > { %1327 = vperm.xlu1 %6059, %v7082_v4  }
 0x1f7   : > { %1335 = vperm.xlu1 %6059, %v7089_v6  }
 0x1fb   : > { %1339 = vperm.xlu1 %6059, %v7096_v1  }
 0x1ff   : > { %1347 = vperm.xlu1 %6059, %v7129_v29  }
 0x203   : > { %1355 = vperm.xlu1 %6059, %v7135_v58  }
 0x207   : > { %6062 = vset.pattern.permute.xlu1 %v6505_v5 }
 0x21b   : > { %v7138_v8 = vpop.f32.mrb[0].mxu0 }
 0x21c   : > { %v7140_v56 = vpop.f32.mrb[1].mxu0 }
 0x21f   : > { %v7142_v61 = vpop.f32.mrb[2].mxu0 }
 0x220   : > { %v7144_v63 = vpop.f32.mrb[3].mxu0  ;;  %v1006_v50 = vpop.xlane.xlu1 %1005 }
 0x221   : > { %v1008_v14 = vpop.xlane.xlu0 %1007  ;;  %v1021_v12 = vsub.f32 %v7042_v32, %v1006_v50 }
 0x222   : > { %v1022_v42 = vsub.f32 %v7044_v16, %v1008_v14 }
 0x223   : > { %v7147_v60 = vpop.f32.mrb[4].mxu0  ;;  %v1029_v21 = vmul.f32 1.442695, %v1021_v12 }
 0x224   : > { %v7150_v25 = vpop.f32.mrb[5].mxu0  ;;  %v1031_v36 = vmul.f32 1.442695, %v1022_v42  ;;  %v1012_v34 = vpop.xlane.xlu1 %1011  ;;  %v6509_v42 = vmov 4  }
 0x225   : > { %6185 = vpow2.f32 %v1029_v21  ;;  %v1010_v22 = vpop.xlane.xlu0 %1009  ;;  %v1024_v35 = vsub.f32 %v7048_v15, %v1012_v34  ;;  %v6510_v34 = vmov 5  }
 0x226   : > { %6187 = vpow2.f32 %v1031_v36  ;;  %v1023_v30 = vsub.f32 %v7050_v55, %v1010_v22 }
 0x227   : > { %v7153_v7 = vpop.f32.mrb[6].mxu0  ;;  %v1035_v43 = vmul.f32 1.442695, %v1024_v35 }
 0x228   : > { %v7156_v41 = vpop.f32.mrb[7].mxu0  ;;  %v1033_v45 = vmul.f32 1.442695, %v1023_v30  ;;  %v1016_v28 = vpop.xlane.xlu1 %1015 }
 0x229   : > { %6189 = vpow2.f32 %v1035_v43  ;;  %v1014_v53 = vpop.xlane.xlu0 %1013  ;;  %v1026_v33 = vsub.f32 %v7054_v18, %v1016_v28 }
 0x22a   : > { %6191 = vpow2.f32 %v1033_v45  ;;  %v1025_v54 = vsub.f32 %v7056_v27, %v1014_v53 }
 0x22b   : > { %v1039_v49 = vmul.f32 1.442695, %v1026_v33 }
 0x22c   : > { %v1037_v51 = vmul.f32 1.442695, %v1025_v54  ;;  %v1020_v17 = vpop.xlane.xlu1 %1019  ;;  %v9831_v54 = vmov 7  }
 0x22d   : > { %6193 = vpow2.f32 %v1039_v49  ;;  %v1018_v62 = vpop.xlane.xlu0 %1017  ;;  %v1028_v10 = vsub.f32 %v7060_v38, %v1020_v17 }
 0x22e   : > { %6195 = vpow2.f32 %v1037_v51  ;;  %v1027_v48 = vsub.f32 %v7062_v47, %v1018_v62  ;;  %v6507_v47 = vmov 10   ;;  %v267_v62 = vld [vmem:[%s9808_s3] sm:$0xff] }
 0x22f   : > { %v7162_v32 = vpop.eup %6185  ;;  %v1043_v2 = vmul.f32 1.442695, %v1028_v10  ;;  %v268_v10 = vld [vmem:[%s9808_s3 + $0x8] sm:$0xff] }
 0x230   : > { %v7164_v23 = vpop.eup %6187  ;;  %v1041_v16 = vmul.f32 1.442695, %v1027_v48  ;;  %1045 = vadd.xlane.f32.xlu0 %v7162_v32  ;;  %v7186_v39 = vpop.permute.xlu1 %1203 }
 0x231   : > { %6197 = vpow2.f32 %v1043_v2  ;;  %1047 = vadd.xlane.f32.xlu1 %v7164_v23  ;;  %9936 = vst [vmem:[#allocation6_spill] sm:$0xff] %v7186_v39  ;;  %v7301_v2 = vpack.c.bf16 %v268_v10, %v267_v62  ;;  %v9970_v10 = vld [vmem:[#allocation17_spill] sm:$0xff] }
 0x232   : > { %6199 = vpow2.f32 %v1041_v16  ;;  %v9833_v16 = vmov 6  }
 0x233   : > { %v7168_v9 = vpop.eup %6189  ;;  %9966 = vst [vmem:[#allocation75_spill] sm:$0xff] %v7301_v2  ;;  %5817 = vmatprep.subr.bf16.mxu0 %v7301_v2  ;;  %5825 = vmatprep.subr.bf16.mxu1 %v7301_v2 }
 0x234   : > { %v7170_v52 = vpop.eup %6191  ;;  %v7188_v55 = vpop.permute.xlu1 %1207  ;;  %5819 = vmatpush3.bf16.msra.mxu0 %v7301_v2 }
 0x235   : > { %1049 = vadd.xlane.f32.xlu0 %v7170_v52  ;;  %1051 = vadd.xlane.f32.xlu1 %v7168_v9  ;;  %9937 = vst [vmem:[#allocation5_spill] sm:$0xff] %v7188_v55  ;;  %v7232_v0 = vpop.permute.xlu0 %1199 }
 0x236   : > { %9947 = vst [vmem:[#allocation56_spill] sm:$0xff] %v7232_v0 }
 0x237   : > { %v7174_v40 = vpop.eup %6193 }
 0x238   : > { %v7176_v15 = vpop.eup %6195  ;;  %v7190_v26 = vpop.permute.xlu1 %1211 }
 0x239   : > { %1053 = vadd.xlane.f32.xlu0 %v7176_v15  ;;  %1055 = vadd.xlane.f32.xlu1 %v7174_v40  ;;  %9938 = vst [vmem:[#allocation47_spill] sm:$0xff] %v7190_v26  ;;  %v7239_v50 = vpop.permute.xlu0 %1243 }
 0x23a   : > { %9949 = vst [vmem:[#allocation58_spill] sm:$0xff] %v7239_v50 }
 0x23b   : > { %v7180_v44 = vpop.eup %6197 }
 0x23c   : > { %v7182_v24 = vpop.eup %6199  ;;  %v7195_v18 = vpop.permute.xlu1 %1215 }
 0x23d   : > { %1057 = vadd.xlane.f32.xlu0 %v7182_v24  ;;  %1059 = vadd.xlane.f32.xlu1 %v7180_v44  ;;  %9939 = vst [vmem:[#allocation48_spill] sm:$0xff] %v7195_v18  ;;  %v7245_v12 = vpop.permute.xlu0 %1255 }
 0x23e   : > { %9951 = vst [vmem:[#allocation60_spill] sm:$0xff] %v7245_v12 }
 0x240   : > { %v7199_v11 = vpop.permute.xlu1 %1219 }
 0x241   : > { %9940 = vst [vmem:[#allocation49_spill] sm:$0xff] %v7199_v11  ;;  %v7251_v36 = vpop.permute.xlu0 %1263 }
 0x242   : > { %9953 = vst [vmem:[#allocation62_spill] sm:$0xff] %v7251_v36 }
 0x244   : > { %v7205_v27 = vpop.permute.xlu1 %1223 }
 0x245   : > { %9941 = vst [vmem:[#allocation50_spill] sm:$0xff] %v7205_v27 }
 0x246   : > { %v7255_v22 = vpop.permute.xlu0 %1287 }
 0x247   : > { %9954 = vst [vmem:[#allocation63_spill] sm:$0xff] %v7255_v22 }
 0x248   : > { %v7209_v37 = vpop.permute.xlu1 %1227 }
 0x249   : > { %9942 = vst [vmem:[#allocation51_spill] sm:$0xff] %v7209_v37 }
 0x24a   : > { %v7262_v30 = vpop.permute.xlu0 %1299 }
 0x24b   : > { %9956 = vst [vmem:[#allocation65_spill] sm:$0xff] %v7262_v30 }
 0x24c   : > { %v7214_v38 = vpop.permute.xlu1 %1239 }
 0x24d   : > { %9943 = vst [vmem:[#allocation52_spill] sm:$0xff] %v7214_v38 }
 0x24e   : > { %1371 = vperm.xlu1 %6062, %v7103_v46   ;;  %v7269_v45 = vpop.permute.xlu0 %1307 }
 0x24f   : > { %9958 = vst [vmem:[#allocation67_spill] sm:$0xff] %v7269_v45 }
 0x250   : > { %v7219_v19 = vpop.permute.xlu1 %1247 }
 0x251   : > { %9944 = vst [vmem:[#allocation53_spill] sm:$0xff] %v7219_v19 }
 0x252   : > { %1375 = vperm.xlu1 %6062, %v7089_v6   ;;  %v7275_v53 = vpop.permute.xlu0 %1315 }
 0x253   : > { %1367 = vperm.xlu0 %6061, %v7082_v4   ;;  %9960 = vst [vmem:[#allocation69_spill] sm:$0xff] %v7275_v53 }
 0x254   : > { %v7223_v57 = vpop.permute.xlu1 %1251 }
 0x255   : > { %9945 = vst [vmem:[#allocation54_spill] sm:$0xff] %v7223_v57 }
 0x256   : > { %1383 = vperm.xlu1 %6062, %v7110_v31  }
 0x257   : > { %1379 = vperm.xlu0 %6061, %v7096_v1   ;;  %v7283_v49 = vpop.permute.xlu0 %1331 }
 0x258   : > { %v7229_v59 = vpop.permute.xlu1 %1259  ;;  %9962 = vst [vmem:[#allocation71_spill] sm:$0xff] %v7283_v49 }
 0x259   : > { %9946 = vst [vmem:[#allocation55_spill] sm:$0xff] %v7229_v59 }
 0x25a   : > { %1391 = vperm.xlu1 %6062, %v7120_v20  }
 0x25b   : > { %1387 = vperm.xlu0 %6061, %v7129_v29   ;;  %v7290_v17 = vpop.permute.xlu0 %1343 }
 0x25c   : > { %v7235_v5 = vpop.permute.xlu1 %1267  ;;  %9964 = vst [vmem:[#allocation73_spill] sm:$0xff] %v7290_v17 }
 0x25d   : > { %9948 = vst [vmem:[#allocation57_spill] sm:$0xff] %v7235_v5 }
 0x25e   : > { %6063 = vset.pattern.permute.xlu1 %v6506_v13 }
 0x25f   : > { %1395 = vperm.xlu0 %6061, %v7135_v58   ;;  %1407 = vperm.xlu1 %6063, %v7082_v4  }
 0x261   : > { %v7242_v14 = vpop.permute.xlu1 %1291 }
 0x262   : > { %9950 = vst [vmem:[#allocation59_spill] sm:$0xff] %v7242_v14 }
 0x263   : > { %6064 = vset.pattern.permute.xlu0 %v6506_v13  ;;  %1415 = vperm.xlu1 %6063, %v7089_v6   ;;  %v269_v13 = vld [vmem:[%s9808_s3 + $0x10] sm:$0xff] }
 0x264   : > { %1411 = vperm.xlu0 %6064, %v7103_v46  }
 0x265   : > { %v7249_v21 = vpop.permute.xlu1 %1295 }
 0x266   : > { %9952 = vst [vmem:[#allocation61_spill] sm:$0xff] %v7249_v21 }
 0x267   : > { %1419 = vperm.xlu1 %6063, %v7096_v1  }
 0x268   : > { %1423 = vperm.xlu0 %6064, %v7110_v31  }
 0x269   : > { %v7258_v35 = vpop.permute.xlu1 %1303 }
 0x26a   : > { %9955 = vst [vmem:[#allocation64_spill] sm:$0xff] %v7258_v35 }
 0x26b   : > { %1427 = vperm.xlu1 %6063, %v7129_v29  }
 0x26c   : > { %1431 = vperm.xlu0 %6064, %v7120_v20  }
 0x26d   : > { %v7264_v43 = vpop.permute.xlu1 %1311 }
 0x26e   : > { %9957 = vst [vmem:[#allocation66_spill] sm:$0xff] %v7264_v43 }
 0x26f   : > { %1435 = vperm.xlu1 %6063, %v7135_v58  }
 0x270   : > { %6065 = vset.pattern.permute.xlu0 %v6507_v47 }
 0x271   : > { %1518 = vperm.xlu0 %6065, %v7082_v4  }
 0x272   : > { %v7271_v28 = vpop.permute.xlu1 %1327 }
 0x273   : > { %6066 = vset.pattern.permute.xlu1 %v6507_v47  ;;  %9959 = vst [vmem:[#allocation68_spill] sm:$0xff] %v7271_v28  ;;  %v270_v47 = vld [vmem:[%s9808_s3 + $0x18] sm:$0xff] }
 0x274   : > { %1522 = vperm.xlu1 %6066, %v7103_v46  }
 0x275   : > { %1530 = vperm.xlu0 %6065, %v7096_v1  }
 0x276   : > { %v7277_v33 = vpop.permute.xlu1 %1335 }
 0x277   : > { %9961 = vst [vmem:[#allocation70_spill] sm:$0xff] %v7277_v33 }
 0x278   : > { %1526 = vperm.xlu1 %6066, %v7089_v6  }
 0x279   : > { %1538 = vperm.xlu0 %6065, %v7129_v29  }
 0x27a   : > { %v7286_v51 = vpop.permute.xlu1 %1339 }
 0x27b   : > { %9963 = vst [vmem:[#allocation72_spill] sm:$0xff] %v7286_v51 }
 0x27c   : > { %1534 = vperm.xlu1 %6066, %v7110_v31  }
 0x27d   : > { %1546 = vperm.xlu0 %6065, %v7135_v58  }
 0x27e   : > { %v7298_v48 = vpop.permute.xlu1 %1347 }
 0x27f   : > { %9965 = vst [vmem:[#allocation74_spill] sm:$0xff] %v7298_v48 }
 0x280   : > { %1542 = vperm.xlu1 %6066, %v7120_v20  }
 0x281   : > { %6068 = vset.pattern.permute.xlu0 %v6508_v3 }
 0x282   : > { %1562 = vperm.xlu0 %6068, %v7103_v46   ;;  %v7319_v62 = vpop.permute.xlu1 %1355 }
 0x283   : > { %9969 = vst [vmem:[#allocation78_spill] sm:$0xff] %v7319_v62 }
 0x284   : > { %6067 = vset.pattern.permute.xlu1 %v6508_v3  ;;  %v7315_v3 = vpack.c.bf16 %v270_v47, %v269_v13  ;;  %v9971_v13 = vmov 6  }
 0x285   : > { %1558 = vperm.xlu1 %6067, %v7082_v4  }
 0x286   : > { %1574 = vperm.xlu0 %6068, %v7110_v31   ;;  %9967 = vst [vmem:[#allocation76_spill] sm:$0xff] %v7315_v3  ;;  %5821 = vmatprep.subr.bf16.mxu0 %v7315_v3 }
 0x287   : > { %5823 = vmatpush3.bf16.msra.mxu0 %v7315_v3 }
 0x288   : > { %5833 = vmatprep.subr.bf16.mxu0 %v9970_v10 }
 0x289   : > { %1566 = vperm.xlu1 %6067, %v7089_v6  }
 0x28a   : > { %1582 = vperm.xlu0 %6068, %v7120_v20  }
 0x28d   : > { %1570 = vperm.xlu1 %6067, %v7096_v1  }
 0x28e   : > { %6069 = vset.pattern.permute.xlu0 %v6509_v42 }
 0x28f   : > { %1735 = vperm.xlu0 %6069, %v7082_v4  }
 0x291   : > { %1578 = vperm.xlu1 %6067, %v7129_v29  }
 0x293   : > { %6071 = vset.pattern.permute.xlu0 %v6510_v34 }
 0x294   : > { %1775 = vperm.xlu0 %6071, %v7082_v4  }
 0x295   : > { %1586 = vperm.xlu1 %6067, %v7135_v58  }
 0x298   : > { %1783 = vperm.xlu0 %6071, %v7089_v6  }
 0x299   : > { %6070 = vset.pattern.permute.xlu1 %v6509_v42 }
 0x29a   : > { %1739 = vperm.xlu1 %6070, %v7103_v46  }
 0x29c   : > { %1787 = vperm.xlu0 %6071, %v7096_v1  }
 0x29e   : > { %1743 = vperm.xlu1 %6070, %v7089_v6  }
 0x2a0   : > { %1791 = vperm.xlu0 %6071, %v7110_v31  }
 0x2a2   : > { %6072 = vset.pattern.permute.xlu1 %v6510_v34 }
 0x2a3   : > { %1779 = vperm.xlu1 %6072, %v7103_v46  }
 0x2a4   : > { %1795 = vperm.xlu0 %6071, %v7129_v29  }
 0x2a7   : > { %6073 = vset.pattern.permute.xlu1 %v6509_v42  ;;  %v7317_v42 = vpop.permute.xlu0 %1351 }
 0x2a8   : > { %1799 = vperm.xlu0 %6071, %v7120_v20   ;;  %1747 = vperm.xlu1 %6073, %v7096_v1   ;;  %9968 = vst [vmem:[#allocation77_spill] sm:$0xff] %v7317_v42  ;;  %v9972_v42 = vmov 7  }
 0x2ac   : > { %1751 = vperm.xlu1 %6073, %v7110_v31   ;;  %6077 = vset.pattern.permute.xlu0 %v9831_v54 }
 0x2ad   : > { %1929 = vperm.xlu0 %6077, %v7103_v46  }
 0x2b0   : > { %1755 = vperm.xlu1 %6073, %v7129_v29  }
 0x2b1   : > { %1941 = vperm.xlu0 %6077, %v7110_v31  }
 0x2b4   : > { %1759 = vperm.xlu1 %6073, %v7120_v20  }
 0x2b5   : > { %6078 = vset.pattern.permute.xlu0 %v9833_v16 }
 0x2b6   : > { %1885 = vperm.xlu0 %6078, %v7082_v4  }
 0x2b8   : > { %1763 = vperm.xlu1 %6073, %v7135_v58  }
 0x2ba   : > { %1897 = vperm.xlu0 %6078, %v7096_v1  }
 0x2bc   : > { %6074 = vset.pattern.permute.xlu1 %v6510_v34 }
 0x2bd   : > { %1803 = vperm.xlu1 %6074, %v7135_v58   ;;  %v1046_v54 = vpop.xlane.xlu0 %1045 }
 0x2be   : > { %6201 = vrcp.f32 %v1046_v54  ;;  %v1048_v16 = vpop.xlane.xlu1 %1047  ;;  %1905 = vperm.xlu0 %6078, %v7129_v29  }
 0x2bf   : > { %6203 = vrcp.f32 %v1048_v16 }
 0x2c1   : > { %6075 = vset.pattern.permute.xlu1 %v9971_v13 }
 0x2c2   : > { %v1050_v47 = vpop.xlane.xlu0 %1049  ;;  %v1052_v62 = vpop.xlane.xlu1 %1051  ;;  %1889 = vperm.xlu1 %6075, %v7103_v46   ;;  %1909 = vperm.xlu0 %6078, %v7120_v20  }
 0x2c3   : > { %6205 = vrcp.f32 %v1050_v47 }
 0x2c4   : > { %6207 = vrcp.f32 %v1052_v62 }
 0x2c6   : > { %v1054_v34 = vpop.xlane.xlu0 %1053  ;;  %v1056_v48 = vpop.xlane.xlu1 %1055  ;;  %1893 = vperm.xlu1 %6075, %v7089_v6   ;;  %6081 = vset.pattern.permute.xlu0 %v9972_v42 }
 0x2c7   : > { %6209 = vrcp.f32 %v1054_v34  ;;  %1953 = vperm.xlu0 %6081, %v7135_v58  }
 0x2c8   : > { %v6202_v54 = vpop.eup %6201  ;;  %6211 = vrcp.f32 %v1056_v48 }
 0x2c9   : > { %v6204_v16 = vpop.eup %6203  ;;  %v1069_v33 = vmul.f32 %v6202_v54, %v7162_v32 }
 0x2ca   : > { %v1058_v17 = vpop.xlane.xlu0 %1057  ;;  %v1060_v46 = vpop.xlane.xlu1 %1059  ;;  %v1070_v51 = vmul.f32 %v6204_v16, %v7164_v23  ;;  %1901 = vperm.xlu1 %6075, %v7110_v31  }
 0x2cb   : > { %6213 = vrcp.f32 %v1058_v17  ;;  %5532 = vmatprep.mubr.f32.mxu1 %v1069_v33 }
 0x2cc   : > { %6215 = vrcp.f32 %v1060_v46  ;;  %5533 = vmatmul.mubr.f32.vlgmr.msra.gmra.mrb[0].mxu1 %v1070_v51 }
 0x2cd   : > { %v6206_v62 = vpop.eup %6205  ;;  %5827 = vmatpush3.bf16.msra.mxu1 %v7301_v2 }
 0x2ce   : > { %v6208_v47 = vpop.eup %6207  ;;  %v1372_v34 = vpop.permute.xlu1 %1371  ;;  %v1071_v48 = vmul.f32 %v6206_v62, %v7170_v52  ;;  %6076 = vset.pattern.permute.xlu1 %v9972_v42  ;;  %5829 = vmatprep.subr.bf16.mxu1 %v7315_v3 }
 0x2cf   : > { %v1072_v32 = vmul.f32 %v6208_v47, %v7168_v9  ;;  %1925 = vperm.xlu1 %6076, %v7082_v4   ;;  %v7368_v47 = vld [vmem:[%s7356_s10 + $0x8] sm:$0xff] }
 0x2d0   : > { %5535 = vmatprep.mubr.f32.mxu1 %v1071_v48  ;;  %v7371_v48 = vld [vmem:[%s7356_s10 + $0x18] sm:$0xff] }
 0x2d1   : > { %v6210_v31 = vpop.eup %6209  ;;  %5536 = vmatmul.mubr.f32.gmra.mrb[2].mxu1 %v1072_v32  ;;  %v1399_v32 = vmul.f32 %v1372_v34, %v7368_v47 }
 0x2d2   : > { %v6212_v23 = vpop.eup %6211  ;;  %v1376_v33 = vpop.permute.xlu1 %1375  ;;  %v1073_v17 = vmul.f32 %v6210_v31, %v7176_v15  ;;  %5831 = vmatpush3.bf16.msra.mxu1 %v7315_v3 }
 0x2d3   : > { %v1368_v51 = vpop.permute.xlu0 %1367  ;;  %v1074_v52 = vmul.f32 %v6212_v23, %v7174_v40  ;;  %1933 = vperm.xlu1 %6076, %v7089_v6   ;;  %5865 = vmatprep.subr.bf16.mxu1 %v9970_v10  ;;  %v7359_v6 = vld [vmem:[%s7356_s10] sm:$0xff] }
 0x2d4   : > { %5538 = vmatprep.mubr.f32.mxu1 %v1073_v17 }
 0x2d5   : > { %v6214_v9 = vpop.eup %6213  ;;  %5539 = vmatmul.mubr.f32.gmra.mrb[4].mxu1 %v1074_v52 }
 0x2d6   : > { %v6216_v4 = vpop.eup %6215  ;;  %v1384_v54 = vpop.permute.xlu1 %1383  ;;  %v1075_v46 = vmul.f32 %v6214_v9, %v7182_v24  ;;  %v7378_v9 = vld [vmem:[%s7356_s10 + $0x20] sm:$0xff] }
 0x2d7   : > { %v1380_v16 = vpop.permute.xlu0 %1379  ;;  %v1076_v62 = vmul.f32 %v6216_v4, %v7180_v44  ;;  %1937 = vperm.xlu1 %6076, %v7096_v1   ;;  %v1398_v1 = vmul.f32 %v1368_v51, %v7359_v6  ;;  %v1402_v34 = vmul.f32 %v1384_v54, %v7378_v9 }
 0x2d8   : > { %5541 = vmatprep.mubr.f32.mxu1 %v1075_v46  ;;  %v1401_v51 = vmul.f32 %v1380_v16, %v7371_v48 }
 0x2d9   : > { %5542 = vmatmul.mubr.f32.gmra.mrb[6].mxu1 %v1076_v62 }
 0x2da   : > { %v1392_v40 = vpop.permute.xlu1 %1391 }
 0x2db   : > { %v1388_v15 = vpop.permute.xlu0 %1387  ;;  %1945 = vperm.xlu1 %6076, %v7129_v29   ;;  %v7365_v29 = vld [vmem:[%s7356_s10 + $0x10] sm:$0xff] }
 0x2dc   : > { %v1400_v31 = vmul.f32 %v1376_v33, %v7365_v29 }
 0x2de   : > { %v1408_v44 = vpop.permute.xlu1 %1407 }
 0x2df   : > { %v1396_v24 = vpop.permute.xlu0 %1395  ;;  %6079 = vset.pattern.permute.xlu1 %v9971_v13  ;;  %v1438_v23 = vadd.f32 %v1408_v44, %v1398_v1  ;;  %v7385_v44 = vld [vmem:[%s7356_s10 + $0x28] sm:$0xff] }
 0x2e0   : > { %1913 = vperm.xlu1 %6079, %v7135_v58  }
 0x2e1   : > { %v1447_v33 = vsel %vm1446_vm0, %v1438_v23, 0.0 }
 0x2e2   : > { %v1416_v17 = vpop.permute.xlu1 %1415 }
 0x2e3   : > { %v1412_v52 = vpop.permute.xlu0 %1411  ;;  %v1440_v13 = vadd.f32 %v1416_v17, %v1400_v31  ;;  %v7389_v31 = vld [vmem:[%s7356_s10 + $0x30] sm:$0xff] }
 0x2e4   : > { %v1439_v58 = vadd.f32 %v1412_v52, %v1399_v32  ;;  %6080 = vset.pattern.permute.xlu1 %v9972_v42  ;;  %v1404_v52 = vmul.f32 %v1392_v40, %v7389_v31 }
 0x2e5   : > { %1949 = vperm.xlu1 %6080, %v7120_v20   ;;  %v1450_v32 = vsel %vm1446_vm0, %v1440_v13, 0.0  ;;  %v1403_v20 = vmul.f32 %v1388_v15, %v7385_v44 }
 0x2e6   : > { %v1448_v4 = vsel %vm1446_vm0, %v1439_v58, 0.0  ;;  %v1420_v46 = vpop.permute.xlu1 %1419 }
 0x2e7   : > { %v1449_v16 = vadd.f32 %v1448_v4, %v1447_v33  ;;  %v1441_v62 = vadd.f32 %v1420_v46, %v1401_v51  ;;  %v1424_v1 = vpop.permute.xlu0 %1423  ;;  %v7395_v51 = vld [vmem:[%s7356_s10 + $0x38] sm:$0xff] }
 0x2e8   : > { %v1442_v42 = vadd.f32 %v1424_v1, %v1402_v34  ;;  %v1405_v34 = vmul.f32 %v1396_v24, %v7395_v51 }
 0x2e9   : > { %v1451_v17 = vadd.f32 %v1450_v32, %v1449_v16  ;;  %v1452_v54 = vsel %vm1446_vm0, %v1441_v62, 0.0 }
 0x2ea   : > { %v1428_v3 = vpop.permute.xlu1 %1427  ;;  %v1454_v4 = vsel %vm1446_vm0, %v1442_v42, 0.0 }
 0x2eb   : > { %v1453_v21 = vadd.f32 %v1452_v54, %v1451_v17  ;;  %v1443_v53 = vadd.f32 %v1428_v3, %v1403_v20  ;;  %v1432_v33 = vpop.permute.xlu0 %1431 }
 0x2ec   : > { %v1444_v46 = vadd.f32 %v1432_v33, %v1404_v52 }
 0x2ed   : > { %v1455_v1 = vadd.f32 %v1454_v4, %v1453_v21  ;;  %v1456_v43 = vsel %vm1446_vm0, %v1443_v53, 0.0 }
 0x2ee   : > { %v1436_v15 = vpop.permute.xlu1 %1435  ;;  %v1458_v28 = vsel %vm1446_vm0, %v1444_v46, 0.0 }
 0x2ef   : > { %v1457_v16 = vadd.f32 %v1456_v43, %v1455_v1  ;;  %v1445_v32 = vadd.f32 %v1436_v15, %v1405_v34 }
 0x2f0   : > { %v7401_v40 = vpop.permute.xlu0 %1518 }
 0x2f1   : > { %v1459_v17 = vadd.f32 %v1458_v28, %v1457_v16  ;;  %v1460_v3 = vsel %vm1446_vm0, %v1445_v32, 0.0 }
 0x2f3   : > { %v1461_v20 = vadd.f32 %v1460_v3, %v1459_v17  ;;  %v7404_v54 = vpop.permute.xlu1 %1522 }
 0x2f4   : > { %v7406_v35 = vpop.permute.xlu0 %1530 }
 0x2f5   : > { %v1462_v52 = vrot.slane %v1461_v20, 4 }
 0x2f7   : > { %v1463_v24 = vadd.f32 %v1462_v52, %v1461_v20  ;;  %v7408_v21 = vpop.permute.xlu1 %1526 }
 0x2f8   : > { %v7410_v33 = vpop.permute.xlu0 %1538 }
 0x2f9   : > { %v1464_v43 = vrot.slane %v1463_v24, 2 }
 0x2fb   : > { %v1465_v4 = vadd.f32 %v1464_v43, %v1463_v24  ;;  %v7412_v34 = vpop.permute.xlu1 %1534 }
 0x2fc   : > { %v7414_v15 = vpop.permute.xlu0 %1546 }
 0x2fd   : > { %v1466_v1 = vrot.slane %v1465_v4, 1 }
 0x2ff   : > { %v1467_v28 = vadd.f32 %v1466_v1, %v1465_v4  ;;  %v7416_v16 = vpop.permute.xlu1 %1542 }
 0x301   : > { %v1468_v17 = vmul.f32 0.015625, %v1467_v28  ;;  %v7420_v45 = vpop.permute.xlu0 %1562 }
 0x303   : > { %v7418_v3 = vsub.f32 %v1439_v58, %v1468_v17  ;;  %v7422_v20 = vsub.f32 %v1441_v62, %v1468_v17  ;;  %v7424_v52 = vsub.f32 %v1438_v23, %v1468_v17  ;;  %v7426_v5 = vsub.f32 %v1440_v13, %v1468_v17 }
 0x304   : > { %v7428_v24 = vpop.permute.xlu1 %1558  ;;  %v7432_v49 = vsub.f32 %v1442_v42, %v1468_v17  ;;  %v7439_v1 = vsub.f32 %v1443_v53, %v1468_v17  ;;  %v7448_v57 = vsub.f32 %v1444_v46, %v1468_v17  ;;  %v7453_v53 = vsub.f32 %v1445_v32, %v1468_v17 }
 0x305   : > { %v1478_v43 = vmul.f32 %v7418_v3, %v7418_v3  ;;  %v1477_v4 = vmul.f32 %v7424_v52, %v7424_v52  ;;  %v1479_v58 = vmul.f32 %v7426_v5, %v7426_v5  ;;  %v1480_v23 = vmul.f32 %v7422_v20, %v7422_v20  ;;  %v7446_v42 = vpop.permute.xlu0 %1574 }
 0x306   : > { %v1481_v30 = vmul.f32 %v7432_v49, %v7432_v49  ;;  %v1482_v19 = vmul.f32 %v7439_v1, %v7439_v1  ;;  %v1483_v46 = vmul.f32 %v7448_v57, %v7448_v57 }
 0x307   : > { %v1486_v62 = vsel %vm1446_vm0, %v1478_v43, 0.0  ;;  %v1485_v13 = vsel %vm1446_vm0, %v1477_v4, 0.0  ;;  %v1488_v37 = vsel %vm1446_vm0, %v1479_v58, 0.0  ;;  %v1490_v4 = vsel %vm1446_vm0, %v1480_v23, 0.0 }
 0x308   : > { %v7444_v28 = vpop.permute.xlu1 %1566  ;;  %v1487_v59 = vadd.f32 %v1486_v62, %v1485_v13  ;;  %v1492_v13 = vsel %vm1446_vm0, %v1481_v30, 0.0  ;;  %v1496_v58 = vsel %vm1446_vm0, %v1483_v46, 0.0 }
 0x309   : > { %v7463_v22 = vpop.permute.xlu0 %1582 }
 0x30a   : > { %v1489_v43 = vadd.f32 %v1488_v37, %v1487_v59  ;;  %v1484_v37 = vmul.f32 %v7453_v53, %v7453_v53  ;;  %v1494_v59 = vsel %vm1446_vm0, %v1482_v19, 0.0 }
 0x30c   : > { %v7458_v11 = vpop.permute.xlu1 %1570  ;;  %v1491_v62 = vadd.f32 %v1490_v4, %v1489_v43  ;;  %v1498_v43 = vsel %vm1446_vm0, %v1484_v37, 0.0 }
 0x30e   : > { %v1493_v26 = vadd.f32 %v1492_v13, %v1491_v62  ;;  %v1736_v30 = vpop.permute.xlu0 %1735 }
 0x30f   : > { %v1766_v46 = vmul.f32 %v1736_v30, %v7359_v6 }
 0x310   : > { %v7468_v32 = vpop.permute.xlu1 %1578  ;;  %v1495_v17 = vadd.f32 %v1494_v59, %v1493_v26 }
 0x312   : > { %v1497_v23 = vadd.f32 %v1496_v58, %v1495_v17 }
 0x313   : > { %v1776_v36 = vpop.permute.xlu0 %1775 }
 0x314   : > { %v7472_v4 = vpop.permute.xlu1 %1586  ;;  %v1499_v14 = vadd.f32 %v1498_v43, %v1497_v23  ;;  %v7476_v58 = vadd.f32 %v1776_v36, %v1766_v46 }
 0x316   : > { %v1500_v62 = vrot.slane %v1499_v14, 4 }
 0x317   : > { %v1784_v27 = vpop.permute.xlu0 %1783 }
 0x318   : > { %v1501_v13 = vadd.f32 %v1500_v62, %v1499_v14 }
 0x319   : > { %v1740_v38 = vpop.permute.xlu1 %1739 }
 0x31a   : > { %v1502_v55 = vrot.slane %v1501_v13, 2  ;;  %v1767_v37 = vmul.f32 %v1740_v38, %v7368_v47 }
 0x31b   : > { %v1788_v23 = vpop.permute.xlu0 %1787 }
 0x31c   : > { %v1503_v12 = vadd.f32 %v1502_v55, %v1501_v13 }
 0x31d   : > { %v1744_v50 = vpop.permute.xlu1 %1743 }
 0x31e   : > { %v1504_v19 = vrot.slane %v1503_v12, 1  ;;  %v1768_v55 = vmul.f32 %v1744_v50, %v7365_v29 }
 0x31f   : > { %v1792_v38 = vpop.permute.xlu0 %1791 }
 0x320   : > { %v1505_v0 = vadd.f32 %v1504_v19, %v1503_v12  ;;  %v1814_v12 = vsel %vm1446_vm0, %v7476_v58, 0.0  ;;  %v7486_v13 = vadd.f32 %v1784_v27, %v1768_v55 }
 0x322   : > { %v1780_v26 = vpop.permute.xlu1 %1779  ;;  %v1506_v59 = vmul.f32 0.015625, %v1505_v0  ;;  %v1817_v50 = vsel %vm1446_vm0, %v7486_v13, 0.0 }
 0x323   : > { %v7478_v14 = vadd.f32 %v1780_v26, %v1767_v37  ;;  %v1796_v55 = vpop.permute.xlu0 %1795 }
 0x324   : > { %v1507_v17 = vadd.f32 1e-08, %v1506_v59 }
 0x325   : > { %v1815_v0 = vsel %vm1446_vm0, %v7478_v14, 0.0 }
 0x326   : > { %6217 = vrsqrt.f32 %v1507_v17  ;;  %v1816_v36 = vadd.f32 %v1815_v0, %v1814_v12 }
 0x327   : > { %v1748_v43 = vpop.permute.xlu1 %1747 }
 0x328   : > { %v1769_v30 = vmul.f32 %v1748_v43, %v7371_v48  ;;  %v1818_v18 = vadd.f32 %v1817_v50, %v1816_v36 }
 0x32a   : > { %v7488_v19 = vadd.f32 %v1788_v23, %v1769_v30 }
 0x32b   : > { %v1752_v62 = vpop.permute.xlu1 %1751 }
 0x32c   : > { %v1770_v26 = vmul.f32 %v1752_v62, %v7378_v9  ;;  %v1819_v23 = vsel %vm1446_vm0, %v7488_v19, 0.0 }
 0x32d   : > { %v1820_v50 = vadd.f32 %v1819_v23, %v1818_v18  ;;  %v1800_v18 = vpop.permute.xlu0 %1799 }
 0x32e   : > { %v7499_v12 = vadd.f32 %v1792_v38, %v1770_v26 }
 0x32f   : > { %v1756_v59 = vpop.permute.xlu1 %1755 }
 0x330   : > { %v6218_v46 = vpop.eup %6217  ;;  %v1771_v0 = vmul.f32 %v1756_v59, %v7385_v44 }
 0x331   : > { %v1509_v17 = vmul.f32 %v6218_v46, %v7424_v52  ;;  %v1510_v37 = vmul.f32 %v6218_v46, %v7418_v3  ;;  %v1511_v43 = vmul.f32 %v6218_v46, %v7426_v5  ;;  %v1512_v27 = vmul.f32 %v6218_v46, %v7422_v20 }
 0x332   : > { %v1513_v5 = vmul.f32 %v6218_v46, %v7432_v49  ;;  %v1514_v38 = vmul.f32 %v6218_v46, %v7439_v1  ;;  %v1515_v26 = vmul.f32 %v6218_v46, %v7448_v57  ;;  %v1811_v49 = vadd.f32 %v1796_v55, %v1771_v0 }
 0x333   : > { %v1760_v30 = vpop.permute.xlu1 %1759  ;;  %v1549_v62 = vmul.f32 %v7401_v40, %v1509_v17  ;;  %v1550_v52 = vmul.f32 %v7404_v54, %v1510_v37  ;;  %v1551_v3 = vmul.f32 %v7408_v21, %v1511_v43  ;;  %v1552_v39 = vmul.f32 %v7406_v35, %v1512_v27  ;;  %v9973_v37 = vld [vmem:[#allocation20_spill] sm:$0xff] }
 0x334   : > { %v1821_v40 = vsel %vm1446_vm0, %v7499_v12, 0.0  ;;  %v1553_v54 = vmul.f32 %v7412_v34, %v1513_v5  ;;  %v1554_v34 = vmul.f32 %v7410_v33, %v1514_v38  ;;  %v1516_v1 = vmul.f32 %v6218_v46, %v7453_v53  ;;  %v9974_v53 = vld [vmem:[#allocation23_spill] sm:$0xff]  ;;  %v9976_v5 = vld [vmem:[#allocation29_spill] sm:$0xff] }
 0x335   : > { %v1590_v36 = vadd.f32 %v7420_v45, %v1550_v52  ;;  %v1589_v20 = vadd.f32 %v7428_v24, %v1549_v62  ;;  %v1591_v21 = vadd.f32 %v7444_v28, %v1551_v3  ;;  %v1772_v45 = vmul.f32 %v1760_v30, %v7389_v31  ;;  %v9975_v3 = vld [vmem:[#allocation26_spill] sm:$0xff] }
 0x336   : > { %v1822_v35 = vadd.f32 %v1821_v40, %v1820_v50  ;;  %v1823_v24 = vsel %vm1446_vm0, %v1811_v49, 0.0  ;;  %v1592_v28 = vadd.f32 %v7458_v11, %v1552_v39  ;;  %v1555_v43 = vmul.f32 %v7416_v16, %v1515_v26 }
 0x337   : > { %v1764_v59 = vpop.permute.xlu1 %1763  ;;  %5552 = vmatprep.mubr.msk.f32.mxu0 %vm1446_vm0, %v1589_v20  ;;  %v1812_v57 = vadd.f32 %v1800_v18, %v1772_v45  ;;  %v1593_v27 = vadd.f32 %v7446_v42, %v1553_v54  ;;  %v1556_v39 = vmul.f32 %v7414_v15, %v1516_v1  ;;  %v1594_v11 = vadd.f32 %v7468_v32, %v1554_v34  ;;  %v9977_v20 = vld [vmem:[#allocation32_spill] sm:$0xff] }
 0x338   : > { %5553 = vmatmul.mubr.msk.f32.vlgmr.msra.gmra.mrb[8].mxu0 %vm1446_vm0, %v1590_v36  ;;  %v1773_v17 = vmul.f32 %v1764_v59, %v7395_v51  ;;  %v1824_v55 = vadd.f32 %v1823_v24, %v1822_v35  ;;  %v1595_v42 = vadd.f32 %v7463_v22, %v1555_v43  ;;  %v9979_v24 = vld [vmem:[#allocation38_spill] sm:$0xff] }
 0x339   : > { %5555 = vmatprep.mubr.msk.f32.mxu0 %vm1446_vm0, %v1591_v21  ;;  %5835 = vmatpush3.bf16.msra.mxu0 %v9970_v10  ;;  %v1825_v23 = vsel %vm1446_vm0, %v1812_v57, 0.0  ;;  %v1596_v52 = vadd.f32 %v7472_v4, %v1556_v39  ;;  %v9978_v4 = vld [vmem:[#allocation35_spill] sm:$0xff] }
 0x33a   : > { %5837 = vmatprep.subr.bf16.mxu0 %v9973_v37  ;;  %v1826_v33 = vadd.f32 %v1825_v23, %v1824_v55 }
 0x33c   : > { %v1804_v0 = vpop.permute.xlu1 %1803  ;;  %5556 = vmatmul.mubr.msk.f32.gmra.mrb[10].mxu0 %vm1446_vm0, %v1592_v28 }
 0x33d   : > { %v1813_v30 = vadd.f32 %v1804_v0, %v1773_v17  ;;  %5558 = vmatprep.mubr.msk.f32.mxu0 %vm1446_vm0, %v1593_v27  ;;  %5839 = vmatpush3.bf16.msra.mxu0 %v9973_v37 }
 0x33e   : > { %5841 = vmatprep.subr.bf16.mxu0 %v9974_v53 }
 0x33f   : > { %v1827_v16 = vsel %vm1446_vm0, %v1813_v30, 0.0 }
 0x340   : > { %v1828_v46 = vadd.f32 %v1827_v16, %v1826_v33  ;;  %5559 = vmatmul.mubr.msk.f32.gmra.mrb[12].mxu0 %vm1446_vm0, %v1594_v11 }
 0x341   : > { %5561 = vmatprep.mubr.msk.f32.mxu0 %vm1446_vm0, %v1595_v42  ;;  %5843 = vmatpush3.bf16.msra.mxu0 %v9974_v53  ;;  %v1890_v39 = vpop.permute.xlu1 %1889 }
 0x342   : > { %v1829_v62 = vrot.slane %v1828_v46, 4  ;;  %5845 = vmatprep.subr.bf16.mxu0 %v9975_v3 }
 0x344   : > { %v1830_v15 = vadd.f32 %v1829_v62, %v1828_v46  ;;  %5562 = vmatmul.mubr.msk.f32.gmra.mrb[14].mxu0 %vm1446_vm0, %v1596_v52 }
 0x345   : > { %5847 = vmatpush3.bf16.msra.mxu0 %v9975_v3 }
 0x346   : > { %v1831_v32 = vrot.slane %v1830_v15, 2  ;;  %5849 = vmatprep.subr.bf16.mxu0 %v9976_v5 }
 0x348   : > { %v1832_v22 = vadd.f32 %v1831_v32, %v1830_v15 }
 0x349   : > { %5851 = vmatpush3.bf16.msra.mxu0 %v9976_v5 }
 0x34a   : > { %v1833_v36 = vrot.slane %v1832_v22, 1  ;;  %5853 = vmatprep.subr.bf16.mxu0 %v9977_v20 }
 0x34c   : > { %v1834_v50 = vadd.f32 %v1833_v36, %v1832_v22  ;;  %v1930_v22 = vpop.permute.xlu0 %1929 }
 0x34d   : > { %5855 = vmatpush3.bf16.msra.mxu0 %v9977_v20 }
 0x34e   : > { %v1835_v38 = vmul.f32 0.015625, %v1834_v50  ;;  %5857 = vmatprep.subr.bf16.mxu0 %v9978_v4 }
 0x350   : > { %v1838_v26 = vsub.f32 %v7486_v13, %v1835_v38  ;;  %v1836_v40 = vsub.f32 %v7476_v58, %v1835_v38  ;;  %v1837_v59 = vsub.f32 %v7478_v14, %v1835_v38  ;;  %v1839_v54 = vsub.f32 %v7488_v19, %v1835_v38 }
 0x351   : > { %5859 = vmatpush3.bf16.msra.mxu0 %v9978_v4  ;;  %v1840_v45 = vsub.f32 %v7499_v12, %v1835_v38  ;;  %v1841_v1 = vsub.f32 %v1811_v49, %v1835_v38  ;;  %v1842_v14 = vsub.f32 %v1812_v57, %v1835_v38  ;;  %v1843_v43 = vsub.f32 %v1813_v30, %v1835_v38  ;;  %v1894_v30 = vpop.permute.xlu1 %1893 }
 0x352   : > { %v1844_v21 = vmul.f32 %v1836_v40, %v1836_v40  ;;  %v1845_v18 = vmul.f32 %v1837_v59, %v1837_v59  ;;  %v1846_v35 = vmul.f32 %v1838_v26, %v1838_v26  ;;  %5861 = vmatprep.subr.bf16.mxu0 %v9979_v24  ;;  %v1847_v28 = vmul.f32 %v1839_v54, %v1839_v54 }
 0x353   : > { %v1848_v19 = vmul.f32 %v1840_v45, %v1840_v45  ;;  %v1849_v27 = vmul.f32 %v1841_v1, %v1841_v1  ;;  %v1850_v0 = vmul.f32 %v1842_v14, %v1842_v14  ;;  %v1851_v11 = vmul.f32 %v1843_v43, %v1843_v43 }
 0x354   : > { %v1852_v34 = vsel %vm1446_vm0, %v1844_v21, 0.0  ;;  %v1853_v13 = vsel %vm1446_vm0, %v1845_v18, 0.0  ;;  %v1855_v17 = vsel %vm1446_vm0, %v1846_v35, 0.0  ;;  %v1857_v55 = vsel %vm1446_vm0, %v1847_v28, 0.0  ;;  %v1942_v18 = vpop.permute.xlu0 %1941 }
 0x355   : > { %v1854_v58 = vadd.f32 %v1853_v13, %v1852_v34  ;;  %5863 = vmatpush3.bf16.msra.mxu0 %v9979_v24  ;;  %v1859_v49 = vsel %vm1446_vm0, %v1848_v19, 0.0  ;;  %v1861_v16 = vsel %vm1446_vm0, %v1849_v27, 0.0  ;;  %v1863_v42 = vsel %vm1446_vm0, %v1850_v0, 0.0  ;;  %v1902_v50 = vpop.permute.xlu1 %1901 }
 0x356   : > { %5897 = vmatprep.subr.bf16.mxu0 %v7301_v2  ;;  %v1865_v62 = vsel %vm1446_vm0, %v1851_v11, 0.0 }
 0x357   : > { %v1856_v12 = vadd.f32 %v1855_v17, %v1854_v58 }
 0x358   : > { %v1886_v58 = vpop.permute.xlu0 %1885 }
 0x359   : > { %v1858_v23 = vadd.f32 %v1857_v55, %v1856_v12  ;;  %v1926_v34 = vpop.permute.xlu1 %1925 }
 0x35b   : > { %v1860_v33 = vadd.f32 %v1859_v49, %v1858_v23 }
 0x35c   : > { %v1898_v17 = vpop.permute.xlu0 %1897 }
 0x35d   : > { %v1862_v57 = vadd.f32 %v1861_v16, %v1860_v33  ;;  %v1934_v19 = vpop.permute.xlu1 %1933 }
 0x35f   : > { %v1864_v46 = vadd.f32 %v1863_v42, %v1862_v57 }
 0x360   : > { %v1906_v55 = vpop.permute.xlu0 %1905 }
 0x361   : > { %v1866_v52 = vadd.f32 %v1865_v62, %v1864_v46  ;;  %v1938_v12 = vpop.permute.xlu1 %1937 }
 0x363   : > { %v1867_v15 = vrot.slane %v1866_v52, 4 }
 0x365   : > { %v1868_v32 = vadd.f32 %v1867_v15, %v1866_v52  ;;  %v1946_v16 = vpop.permute.xlu1 %1945 }
 0x367   : > { %v1869_v36 = vrot.slane %v1868_v32, 2 }
 0x369   : > { %v1870_v38 = vadd.f32 %v1869_v36, %v1868_v32 }
 0x36b   : > { %v1871_v21 = vrot.slane %v1870_v38, 1 }
 0x36d   : > { %v1872_v35 = vadd.f32 %v1871_v21, %v1870_v38  ;;  %v1910_v21 = vpop.permute.xlu0 %1909 }
 0x36f   : > { %v1873_v28 = vmul.f32 0.015625, %v1872_v35 }
 0x371   : > { %v1874_v13 = vadd.f32 1e-08, %v1873_v28 }
 0x373   : > { %6219 = vrsqrt.f32 %v1874_v13 }
 0x37d   : > { %v6220_v27 = vpop.eup %6219 }
 0x37e   : > { %v1877_v23 = vmul.f32 %v6220_v27, %v1837_v59  ;;  %v1878_v0 = vmul.f32 %v6220_v27, %v1838_v26  ;;  %v1876_v49 = vmul.f32 %v6220_v27, %v1836_v40  ;;  %v1880_v33 = vmul.f32 %v6220_v27, %v1840_v45  ;;  %v1914_v59 = vpop.permute.xlu1 %1913 }
 0x37f   : > { %v1879_v11 = vmul.f32 %v6220_v27, %v1839_v54  ;;  %v1881_v57 = vmul.f32 %v6220_v27, %v1841_v1  ;;  %v1882_v35 = vmul.f32 %v6220_v27, %v1842_v14  ;;  %v1883_v28 = vmul.f32 %v6220_v27, %v1843_v43  ;;  %v9980_v27 = vld [vmem:[#allocation10_spill] sm:$0xff] }
 0x380   : > { %v1917_v42 = vmul.f32 %v1890_v39, %v1877_v23  ;;  %v1918_v46 = vmul.f32 %v1894_v30, %v1878_v0  ;;  %v1916_v62 = vmul.f32 %v1886_v58, %v1876_v49  ;;  %v1920_v36 = vmul.f32 %v1902_v50, %v1880_v33  ;;  %v1954_v50 = vpop.permute.xlu0 %1953  ;;  %v9981_v23 = vld [vmem:[#allocation8_spill] sm:$0xff]  ;;  %v9982_v49 = vld [vmem:[#allocation15_spill] sm:$0xff] }
 0x381   : > { %v1919_v52 = vmul.f32 %v1898_v17, %v1879_v11  ;;  %v1921_v38 = vmul.f32 %v1906_v55, %v1881_v57  ;;  %v1922_v1 = vmul.f32 %v1910_v21, %v1882_v35  ;;  %v1923_v39 = vmul.f32 %v1914_v59, %v1883_v28  ;;  %v9983_v11 = vld [vmem:[#allocation28_spill] sm:$0xff] }
 0x382   : > { %v7566_v15 = vadd.f32 %v1930_v22, %v1917_v42  ;;  %v7568_v32 = vadd.f32 %v1926_v34, %v1916_v62  ;;  %v7570_v26 = vadd.f32 %v1934_v19, %v1918_v46  ;;  %v7578_v30 = vadd.f32 %v1942_v18, %v1920_v36  ;;  %v1950_v34 = vpop.permute.xlu1 %1949  ;;  %v9984_v57 = vld [vmem:[#allocation16_spill] sm:$0xff]  ;;  %v9985_v46 = vld [vmem:[#allocation9_spill] sm:$0xff] }
 0x383   : > { %v7576_v45 = vadd.f32 %v1938_v12, %v1919_v52  ;;  %v7584_v22 = vadd.f32 %v1946_v16, %v1921_v38  ;;  %v7586_v13 = vadd.f32 %v1954_v50, %v1923_v39  ;;  %v7588_v58 = vadd.f32 %v1950_v34, %v1922_v1  ;;  %v9986_v52 = vld [vmem:[#allocation27_spill] sm:$0xff]  ;;  %v9988_v35 = vld [vmem:[#allocation12_spill] sm:$0xff]  ;;  %v9992_v34 = vld [vmem:[#allocation18_spill] sm:$0xff] }
 0x384   : > { %v1967_v40 = vsel %vm1446_vm0, %v7566_v15, -inf  ;;  %v1964_v54 = vsel %vm1446_vm0, %v7568_v32, -inf  ;;  %v1970_v14 = vsel %vm1446_vm0, %v7570_v26, -inf  ;;  %v1976_v18 = vsel %vm1446_vm0, %v7578_v30, -inf  ;;  %v9987_v38 = vld [vmem:[#allocation7_spill] sm:$0xff] }
 0x385   : > { %1968 = vmax.xlane.f32.xlu0 %v1967_v40  ;;  %1965 = vmax.xlane.f32.xlu1 %v1964_v54  ;;  %v1973_v43 = vsel %vm1446_vm0, %v7576_v45, -inf  ;;  %v1979_v19 = vsel %vm1446_vm0, %v7584_v22, -inf  ;;  %v1985_v17 = vsel %vm1446_vm0, %v7586_v13, -inf  ;;  %v1982_v12 = vsel %vm1446_vm0, %v7588_v58, -inf  ;;  %v9989_v40 = vld [vmem:[#allocation41_spill] sm:$0xff]  ;;  %v9990_v39 = vld [vmem:[#allocation19_spill] sm:$0xff] }
 0x386   : > { %v328_v55 = vmul.f32 %v9980_v27, %v7368_v47  ;;  %v327_v0 = vmul.f32 %v9981_v23, %v7359_v6  ;;  %v416_v16 = vmul.f32 %v9983_v11, %v7368_v47  ;;  %v330_v62 = vmul.f32 %v9985_v46, %v7371_v48 }
 0x387   : > { %v415_v36 = vmul.f32 %v9986_v52, %v7359_v6  ;;  %v329_v21 = vmul.f32 %v9987_v38, %v7365_v29  ;;  %v331_v28 = vmul.f32 %v9988_v35, %v7378_v9  ;;  %v9999_v52 = vld [vmem:[#allocation40_spill] sm:$0xff] }
 0x388   : > { %v368_v33 = vadd.f32 %v9982_v49, %v328_v55  ;;  %v367_v42 = vadd.f32 %v9984_v57, %v327_v0  ;;  %v456_v54 = vadd.f32 %v9989_v40, %v416_v16  ;;  %v370_v47 = vadd.f32 %v9990_v39, %v330_v62  ;;  %v9994_v55 = vld [vmem:[#allocation33_spill] sm:$0xff]  ;;  %v9996_v16 = vld [vmem:[#allocation30_spill] sm:$0xff]  ;;  %v10005_v39 = vld [vmem:[#allocation36_spill] sm:$0xff] }
 0x389   : > { %1971 = vmax.xlane.f32.xlu1 %v1970_v14  ;;  %1974 = vmax.xlane.f32.xlu0 %v1973_v43  ;;  %v9991_v14 = vld [vmem:[#allocation37_spill] sm:$0xff]  ;;  %v418_v23 = vmul.f32 %v9994_v55, %v7371_v48  ;;  %v417_v57 = vmul.f32 %v9996_v16, %v7365_v29 }
 0x38a   : > { %v376_v59 = vmax.f32 %v368_v33, 0.0  ;;  %v375_v1 = vmax.f32 %v367_v42, 0.0  ;;  %v455_v43 = vadd.f32 %v9991_v14, %v415_v36  ;;  %v9995_v33 = vld [vmem:[#allocation21_spill] sm:$0xff]  ;;  %v378_v46 = vmax.f32 %v370_v47, 0.0 }
 0x38b   : > { %v371_v11 = vadd.f32 %v9995_v33, %v331_v28  ;;  %v458_v36 = vadd.f32 %v9999_v52, %v418_v23  ;;  %v10003_v28 = vld [vmem:[#allocation43_spill] sm:$0xff]  ;;  %v10004_v29 = vld [vmem:[#allocation13_spill] sm:$0xff]  ;;  %v420_v47 = vmul.f32 %v10005_v39, %v7385_v44  ;;  %v10009_v23 = vld [vmem:[#allocation24_spill] sm:$0xff] }
 0x38c   : > { %v783_v0 = vmul.f32 %v7140_v56, %v375_v1  ;;  %v10002_v56 = vld [vmem:[#allocation31_spill] sm:$0xff]  ;;  %v457_v40 = vadd.f32 %v10003_v28, %v417_v57  ;;  %v334_v1 = vmul.f32 %v10004_v29, %v7395_v51  ;;  %v786_v14 = vmul.f32 %v7142_v61, %v378_v46  ;;  %v10011_v33 = vld [vmem:[#allocation44_spill] sm:$0xff] }
 0x38d   : > { %1977 = vmax.xlane.f32.xlu1 %v1976_v18  ;;  %1980 = vmax.xlane.f32.xlu0 %v1979_v19  ;;  %v369_v18 = vadd.f32 %v9992_v34, %v329_v21  ;;  %v784_v19 = vmul.f32 %v7138_v8, %v376_v59  ;;  %v9998_v8 = vld [vmem:[#allocation22_spill] sm:$0xff]  ;;  %v419_v59 = vmul.f32 %v10002_v56, %v7378_v9  ;;  %v379_v34 = vmax.f32 %v371_v11, 0.0 }
 0x38e   : > { %v10001_v21 = vld [vmem:[#allocation14_spill] sm:$0xff] }
 0x38f   : > { %v333_v48 = vmul.f32 %v10001_v21, %v7389_v31  ;;  %v377_v35 = vmax.f32 %v369_v18, 0.0  ;;  %v459_v61 = vadd.f32 %v10011_v33, %v419_v59  ;;  %v787_v52 = vmul.f32 %v7150_v25, %v379_v34  ;;  %v10016_v59 = vld [vmem:[#allocation46_spill] sm:$0xff] }
 0x391   : > { %1986 = vmax.xlane.f32.xlu0 %v1985_v17  ;;  %1983 = vmax.xlane.f32.xlu1 %v1982_v12  ;;  %v9993_v12 = vld [vmem:[#allocation11_spill] sm:$0xff] }
 0x392   : > { %v332_v27 = vmul.f32 %v9993_v12, %v7385_v44  ;;  %v10007_v12 = vld [vmem:[#allocation42_spill] sm:$0xff] }
 0x394   : > { %v372_v62 = vadd.f32 %v9998_v8, %v332_v27  ;;  %v460_v27 = vadd.f32 %v10007_v12, %v420_v47 }
 0x39f   : > { %v5534_v50 = vpop.f32.mrb[0].mxu1 }
 0x3a0   : > { %v1183_v6 = vmul.f32 %v5534_v50, %v456_v54  ;;  %v1143_v17 = vpop.f32.mrb[1].mxu1 }
 0x3a1   : > { %v1182_v49 = vmul.f32 %v1143_v17, %v455_v43  ;;  %v10006_v17 = vld [vmem:[#allocation25_spill] sm:$0xff] }
 0x3a2   : > { %v7627_v42 = vadd.f32 %v1183_v6, %v784_v19  ;;  %v785_v19 = vmul.f32 %v7144_v63, %v377_v35  ;;  %v380_v6 = vmax.f32 %v372_v62, 0.0  ;;  %v374_v9 = vadd.f32 %v10006_v17, %v334_v1  ;;  %v10013_v63 = vld [vmem:[#allocation39_spill] sm:$0xff] }
 0x3a3   : > { %v7631_v38 = vadd.f32 %v1182_v49, %v783_v0  ;;  %v373_v0 = vadd.f32 %v10009_v23, %v333_v48  ;;  %v10010_v49 = vld [vmem:[#allocation34_spill] sm:$0xff]  ;;  %v422_v57 = vmul.f32 %v10013_v63, %v7395_v51  ;;  %v10014_v48 = vld [vmem:[#allocation45_spill] sm:$0xff] }
 0x3a4   : > { %9997 = vst [vmem:[#allocation17_spill] sm:$0xff] %v7627_v42  ;;  %v5537_v54 = vpop.f32.mrb[2].mxu1  ;;  %v421_v44 = vmul.f32 %v10010_v49, %v7389_v31  ;;  %v788_v46 = vmul.f32 %v7147_v60, %v380_v6  ;;  %v382_v21 = vmax.f32 %v374_v9, 0.0  ;;  %v8062_v42 = vld [vmem:[%s6938_s9 + $0x10] sm:$0xff] }
 0x3a5   : > { %10000 = vst [vmem:[#allocation20_spill] sm:$0xff] %v7631_v38  ;;  %v1185_v43 = vmul.f32 %v5537_v54, %v458_v36  ;;  %v1153_v50 = vpop.f32.mrb[3].mxu1  ;;  %v462_v35 = vadd.f32 %v10014_v48, %v422_v57  ;;  %v381_v31 = vmax.f32 %v373_v0, 0.0 }
 0x3a6   : > { %v1184_v18 = vmul.f32 %v1153_v50, %v457_v40  ;;  %v461_v28 = vadd.f32 %v10016_v59, %v421_v44  ;;  %v790_v51 = vmul.f32 %v7153_v7, %v382_v21 }
 0x3a7   : > { %v7646_v55 = vadd.f32 %v1185_v43, %v786_v14  ;;  %v789_v1 = vmul.f32 %v7156_v41, %v381_v31  ;;  %v6513_v14 = vmov 36  }
 0x3a8   : > { %v7652_v16 = vadd.f32 %v1184_v18, %v785_v19  ;;  %v5540_v11 = vpop.f32.mrb[4].mxu1  ;;  %6082 = vset.pattern.permute.xlu1 %v6513_v14  ;;  %6083 = vset.pattern.permute.xlu0 %v6513_v14 }
 0x3a9   : > { %10008 = vst [vmem:[#allocation23_spill] sm:$0xff] %v7646_v55  ;;  %v1187_v8 = vmul.f32 %v5540_v11, %v460_v27  ;;  %v1163_v62 = vpop.f32.mrb[5].mxu1  ;;  %v10082_v55 = vld [vmem:[#allocation60_spill] sm:$0xff] }
 0x3aa   : > { %10012 = vst [vmem:[#allocation26_spill] sm:$0xff] %v7652_v16  ;;  %v1186_v36 = vmul.f32 %v1163_v62, %v459_v61 }
 0x3ab   : > { %v7659_v56 = vadd.f32 %v1187_v8, %v788_v46 }
 0x3ac   : > { %v7662_v40 = vadd.f32 %v1186_v36, %v787_v52  ;;  %v5543_v54 = vpop.f32.mrb[6].mxu1 }
 0x3ad   : > { %10015 = vst [vmem:[#allocation29_spill] sm:$0xff] %v7659_v56  ;;  %v1189_v29 = vmul.f32 %v5543_v54, %v462_v35  ;;  %v1173_v60 = vpop.f32.mrb[7].mxu1  ;;  %v10080_v56 = vld [vmem:[#allocation58_spill] sm:$0xff] }
 0x3ae   : > { %10017 = vst [vmem:[#allocation32_spill] sm:$0xff] %v7662_v40  ;;  %v1188_v39 = vmul.f32 %v1173_v60, %v461_v28 }
 0x3af   : > { %v7666_v25 = vadd.f32 %v1189_v29, %v790_v51 }
 0x3b0   : > { %v7668_v47 = vadd.f32 %v1188_v39, %v789_v1 }
 0x3b1   : > { %10018 = vst [vmem:[#allocation35_spill] sm:$0xff] %v7666_v25 }
 0x3b2   : > { %10019 = vst [vmem:[#allocation38_spill] sm:$0xff] %v7668_v47 }
 0x40b   : > { %v7670_v43 = vpop.f32.mrb[8].mxu0 }
 0x40c   : > { %v7672_v50 = vpop.f32.mrb[9].mxu0 }
 0x40f   : > { %v7674_v34 = vpop.f32.mrb[10].mxu0 }
 0x410   : > { %v7676_v19 = vpop.f32.mrb[11].mxu0 }
 0x412   : > { %v1969_v7 = vpop.xlane.xlu0 %1968  ;;  %v1966_v18 = vpop.xlane.xlu1 %1965 }
 0x413   : > { %v1989_v41 = vsub.f32 %v7566_v15, %v1969_v7  ;;  %v1988_v6 = vsub.f32 %v7568_v32, %v1966_v18  ;;  %v7680_v17 = vpop.f32.mrb[12].mxu0  ;;  %v7729_v18 = vld [vmem:[%s9807_s2] sm:$0xff] }
 0x414   : > { %v7682_v9 = vpop.f32.mrb[13].mxu0 }
 0x415   : > { %v1998_v12 = vmul.f32 1.442695, %v1989_v41  ;;  %v1996_v27 = vmul.f32 1.442695, %v1988_v6  ;;  %v7735_v41 = vld [vmem:[%s9807_s2 + $0x10] sm:$0xff]  ;;  %v7741_v6 = vld [vmem:[%s9807_s2 + $0x8] sm:$0xff] }
 0x416   : > { %v1975_v23 = vpop.xlane.xlu0 %1974  ;;  %v1972_v0 = vpop.xlane.xlu1 %1971 }
 0x417   : > { %6221 = vpow2.f32 %v1998_v12  ;;  %v1991_v49 = vsub.f32 %v7576_v45, %v1975_v23  ;;  %v1990_v44 = vsub.f32 %v7570_v26, %v1972_v0  ;;  %v7686_v33 = vpop.f32.mrb[14].mxu0  ;;  %v7747_v12 = vld [vmem:[%s9807_s2 + $0x18] sm:$0xff]  ;;  %v7754_v23 = vld [vmem:[%s9807_s2 + $0x20] sm:$0xff]  ;;  %v7761_v0 = vld [vmem:[%s9807_s2 + $0x28] sm:$0xff] }
 0x418   : > { %6223 = vpow2.f32 %v1996_v27  ;;  %v7688_v61 = vpop.f32.mrb[15].mxu0  ;;  %v6514_v27 = vmov 37  }
 0x419   : > { %v2002_v15 = vmul.f32 1.442695, %v1991_v49  ;;  %v2000_v32 = vmul.f32 1.442695, %v1990_v44  ;;  %v7767_v49 = vld [vmem:[%s9807_s2 + $0x30] sm:$0xff]  ;;  %v6515_v44 = vmov 38  }
 0x41a   : > { %v1981_v11 = vpop.xlane.xlu0 %1980  ;;  %v1978_v63 = vpop.xlane.xlu1 %1977 }
 0x41b   : > { %6225 = vpow2.f32 %v2002_v15  ;;  %v1993_v57 = vsub.f32 %v7584_v22, %v1981_v11  ;;  %v1992_v46 = vsub.f32 %v7578_v30, %v1978_v63  ;;  %v7775_v15 = vld [vmem:[%s9807_s2 + $0x38] sm:$0xff]  ;;  %v6517_v11 = vmov 44  }
 0x41c   : > { %6227 = vpow2.f32 %v2000_v32  ;;  %v6516_v32 = vmov 39   ;;  %v6518_v63 = vmov 45  }
 0x41d   : > { %v2006_v8 = vmul.f32 1.442695, %v1993_v57  ;;  %v2004_v62 = vmul.f32 1.442695, %v1992_v46  ;;  %v6519_v57 = vmov 46   ;;  %v6520_v46 = vmov 47  }
 0x41e   : > { %v1987_v45 = vpop.xlane.xlu0 %1986  ;;  %v1984_v52 = vpop.xlane.xlu1 %1983 }
 0x41f   : > { %6229 = vpow2.f32 %v2006_v8  ;;  %v1995_v26 = vsub.f32 %v7586_v13, %v1987_v45  ;;  %v1994_v36 = vsub.f32 %v7588_v58, %v1984_v52 }
 0x420   : > { %6231 = vpow2.f32 %v2004_v62  ;;  %v6521_v62 = vmov 40  }
 0x421   : > { %v7694_v21 = vpop.eup %6221  ;;  %v2010_v48 = vmul.f32 1.442695, %v1995_v26  ;;  %v2008_v35 = vmul.f32 1.442695, %v1994_v36 }
 0x422   : > { %v7696_v31 = vpop.eup %6223  ;;  %v2015_v30 = vsel %vm1446_vm0, %v7694_v21, 0.0 }
 0x423   : > { %6233 = vpow2.f32 %v2010_v48  ;;  %2016 = vadd.xlane.f32.xlu0 %v2015_v30  ;;  %v2012_v22 = vsel %vm1446_vm0, %v7696_v31, 0.0 }
 0x424   : > { %6235 = vpow2.f32 %v2008_v35  ;;  %2013 = vadd.xlane.f32.xlu1 %v2012_v22 }
 0x425   : > { %v7702_v13 = vpop.eup %6225 }
 0x426   : > { %v7704_v58 = vpop.eup %6227  ;;  %v2021_v59 = vsel %vm1446_vm0, %v7702_v13, 0.0 }
 0x427   : > { %2022 = vadd.xlane.f32.xlu0 %v2021_v59  ;;  %v2018_v28 = vsel %vm1446_vm0, %v7704_v58, 0.0 }
 0x428   : > { %2019 = vadd.xlane.f32.xlu1 %v2018_v28 }
 0x429   : > { %v7710_v54 = vpop.eup %6229 }
 0x42a   : > { %v7712_v51 = vpop.eup %6231  ;;  %v2027_v29 = vsel %vm1446_vm0, %v7710_v54, 0.0 }
 0x42b   : > { %2028 = vadd.xlane.f32.xlu0 %v2027_v29  ;;  %v2024_v60 = vsel %vm1446_vm0, %v7712_v51, 0.0 }
 0x42c   : > { %2025 = vadd.xlane.f32.xlu1 %v2024_v60 }
 0x42d   : > { %v7718_v1 = vpop.eup %6233 }
 0x42e   : > { %v7720_v39 = vpop.eup %6235  ;;  %v2033_v14 = vsel %vm1446_vm0, %v7718_v1, 0.0 }
 0x42f   : > { %2034 = vadd.xlane.f32.xlu0 %v2033_v14  ;;  %v2030_v7 = vsel %vm1446_vm0, %v7720_v39, 0.0 }
 0x430   : > { %2031 = vadd.xlane.f32.xlu1 %v2030_v7 }
 0x441   : > { %2214 = vperm.xlu1 %6082, %v7729_v18  }
 0x445   : > { %2222 = vperm.xlu1 %6082, %v7735_v41   ;;  %2218 = vperm.xlu0 %6083, %v7741_v6  }
 0x449   : > { %2226 = vperm.xlu1 %6082, %v7747_v12   ;;  %6085 = vset.pattern.permute.xlu0 %v6514_v27 }
 0x44a   : > { %2258 = vperm.xlu0 %6085, %v7741_v6  }
 0x44d   : > { %2230 = vperm.xlu1 %6082, %v7754_v23  }
 0x44e   : > { %2270 = vperm.xlu0 %6085, %v7754_v23  }
 0x451   : > { %2234 = vperm.xlu1 %6082, %v7761_v0  }
 0x452   : > { %2278 = vperm.xlu0 %6085, %v7767_v49  }
 0x455   : > { %2238 = vperm.xlu1 %6082, %v7767_v49  }
 0x456   : > { %6086 = vset.pattern.permute.xlu0 %v6515_v44 }
 0x457   : > { %2302 = vperm.xlu0 %6086, %v7729_v18  }
 0x459   : > { %2242 = vperm.xlu1 %6082, %v7775_v15  }
 0x45b   : > { %2314 = vperm.xlu0 %6086, %v7747_v12  }
 0x45d   : > { %6084 = vset.pattern.permute.xlu1 %v6514_v27 }
 0x45e   : > { %2254 = vperm.xlu1 %6084, %v7729_v18  }
 0x45f   : > { %2322 = vperm.xlu0 %6086, %v7761_v0  }
 0x462   : > { %2262 = vperm.xlu1 %6084, %v7735_v41  }
 0x463   : > { %2330 = vperm.xlu0 %6086, %v7775_v15  }
 0x466   : > { %2266 = vperm.xlu1 %6084, %v7747_v12  }
 0x467   : > { %6089 = vset.pattern.permute.xlu0 %v6516_v32 }
 0x468   : > { %2346 = vperm.xlu0 %6089, %v7741_v6  }
 0x46a   : > { %2274 = vperm.xlu1 %6084, %v7761_v0  }
 0x46c   : > { %2358 = vperm.xlu0 %6089, %v7754_v23  }
 0x46e   : > { %2282 = vperm.xlu1 %6084, %v7775_v15  }
 0x470   : > { %2366 = vperm.xlu0 %6089, %v7767_v49  }
 0x472   : > { %6087 = vset.pattern.permute.xlu1 %v6515_v44  ;;  %v6522_v44 = vmov 41  }
 0x473   : > { %2306 = vperm.xlu1 %6087, %v7741_v6  }
 0x474   : > { %6090 = vset.pattern.permute.xlu0 %v6517_v11 }
 0x475   : > { %2382 = vperm.xlu0 %6090, %v7729_v18  }
 0x477   : > { %2310 = vperm.xlu1 %6087, %v7735_v41  }
 0x479   : > { %2394 = vperm.xlu0 %6090, %v7747_v12  }
 0x47b   : > { %2318 = vperm.xlu1 %6087, %v7754_v23  }
 0x47d   : > { %2402 = vperm.xlu0 %6090, %v7761_v0  }
 0x47f   : > { %2326 = vperm.xlu1 %6087, %v7767_v49  }
 0x481   : > { %2410 = vperm.xlu0 %6090, %v7775_v15  }
 0x483   : > { %6088 = vset.pattern.permute.xlu1 %v6516_v32 }
 0x484   : > { %2342 = vperm.xlu1 %6088, %v7729_v18  }
 0x485   : > { %6093 = vset.pattern.permute.xlu0 %v6518_v63 }
 0x486   : > { %2426 = vperm.xlu0 %6093, %v7741_v6  }
 0x488   : > { %2350 = vperm.xlu1 %6088, %v7735_v41  }
 0x48a   : > { %2438 = vperm.xlu0 %6093, %v7754_v23  }
 0x48c   : > { %2354 = vperm.xlu1 %6088, %v7747_v12  }
 0x48e   : > { %2446 = vperm.xlu0 %6093, %v7767_v49  }
 0x490   : > { %2362 = vperm.xlu1 %6088, %v7761_v0  }
 0x492   : > { %6094 = vset.pattern.permute.xlu0 %v6519_v57 }
 0x493   : > { %2516 = vperm.xlu0 %6094, %v7729_v18  }
 0x494   : > { %2370 = vperm.xlu1 %6088, %v7775_v15  }
 0x497   : > { %2528 = vperm.xlu0 %6094, %v7747_v12  }
 0x498   : > { %6091 = vset.pattern.permute.xlu1 %v6517_v11 }
 0x499   : > { %2386 = vperm.xlu1 %6091, %v7741_v6  }
 0x49b   : > { %2536 = vperm.xlu0 %6094, %v7761_v0  }
 0x49d   : > { %2390 = vperm.xlu1 %6091, %v7735_v41  }
 0x49f   : > { %2544 = vperm.xlu0 %6094, %v7775_v15  }
 0x4a1   : > { %2398 = vperm.xlu1 %6091, %v7754_v23  }
 0x4a3   : > { %6097 = vset.pattern.permute.xlu0 %v6520_v46 }
 0x4a4   : > { %2560 = vperm.xlu0 %6097, %v7741_v6  }
 0x4a5   : > { %2406 = vperm.xlu1 %6091, %v7767_v49  }
 0x4a8   : > { %2572 = vperm.xlu0 %6097, %v7754_v23  }
 0x4a9   : > { %6092 = vset.pattern.permute.xlu1 %v6518_v63 }
 0x4aa   : > { %2422 = vperm.xlu1 %6092, %v7729_v18  }
 0x4ac   : > { %2580 = vperm.xlu0 %6097, %v7767_v49  }
 0x4ae   : > { %2430 = vperm.xlu1 %6092, %v7735_v41  }
 0x4b0   : > { %v2017_v8 = vpop.xlane.xlu0 %2016  ;;  %6098 = vset.pattern.permute.xlu0 %v6521_v62 }
 0x4b1   : > { %6237 = vrcp.f32 %v2017_v8  ;;  %v2014_v45 = vpop.xlane.xlu1 %2013  ;;  %2709 = vperm.xlu0 %6098, %v7729_v18  }
 0x4b2   : > { %6239 = vrcp.f32 %v2014_v45  ;;  %2434 = vperm.xlu1 %6092, %v7747_v12  }
 0x4b4   : > { %v2023_v52 = vpop.xlane.xlu0 %2022 }
 0x4b5   : > { %6241 = vrcp.f32 %v2023_v52  ;;  %v2020_v26 = vpop.xlane.xlu1 %2019  ;;  %2721 = vperm.xlu0 %6098, %v7747_v12  }
 0x4b6   : > { %6243 = vrcp.f32 %v2020_v26  ;;  %2442 = vperm.xlu1 %6092, %v7761_v0  }
 0x4b8   : > { %v2029_v36 = vpop.xlane.xlu0 %2028 }
 0x4b9   : > { %6245 = vrcp.f32 %v2029_v36  ;;  %v2026_v48 = vpop.xlane.xlu1 %2025  ;;  %2729 = vperm.xlu0 %6098, %v7761_v0  }
 0x4ba   : > { %6247 = vrcp.f32 %v2026_v48  ;;  %2450 = vperm.xlu1 %6092, %v7775_v15  }
 0x4bb   : > { %v6238_v35 = vpop.eup %6237 }
 0x4bc   : > { %v6240_v30 = vpop.eup %6239  ;;  %v2045_v22 = vmul.f32 %v6238_v35, %v7694_v21  ;;  %v2035_v59 = vpop.xlane.xlu0 %2034 }
 0x4bd   : > { %6249 = vrcp.f32 %v2035_v59  ;;  %v2032_v28 = vpop.xlane.xlu1 %2031  ;;  %v2044_v29 = vmul.f32 %v6240_v30, %v7696_v31  ;;  %2737 = vperm.xlu0 %6098, %v7775_v15  }
 0x4be   : > { %6251 = vrcp.f32 %v2032_v28  ;;  %6095 = vset.pattern.permute.xlu1 %v6519_v57 }
 0x4bf   : > { %v6242_v60 = vpop.eup %6241  ;;  %5572 = vmatprep.mubr.msk.f32.mxu1 %vm1446_vm0, %v2044_v29  ;;  %2520 = vperm.xlu1 %6095, %v7741_v6  }
 0x4c0   : > { %v6244_v14 = vpop.eup %6243  ;;  %5573 = vmatmul.mubr.msk.f32.vlgmr.msra.gmra.mrb[8].mxu1 %vm1446_vm0, %v2045_v22  ;;  %v2047_v7 = vmul.f32 %v6242_v60, %v7702_v13 }
 0x4c1   : > { %v7833_v21 = vpop.permute.xlu1 %2214  ;;  %v2046_v27 = vmul.f32 %v6244_v14, %v7704_v58  ;;  %6101 = vset.pattern.permute.xlu0 %v6522_v44  ;;  %5867 = vmatpush3.bf16.msra.mxu1 %v9970_v10 }
 0x4c2   : > { %10020 = vst [vmem:[#allocation10_spill] sm:$0xff] %v7833_v21  ;;  %2753 = vperm.xlu0 %6101, %v7741_v6   ;;  %5869 = vmatprep.subr.bf16.mxu1 %v9973_v37  ;;  %v10078_v21 = vld [vmem:[#allocation50_spill] sm:$0xff] }
 0x4c3   : > { %v6246_v31 = vpop.eup %6245  ;;  %5575 = vmatprep.mubr.msk.f32.mxu1 %vm1446_vm0, %v2046_v27  ;;  %2524 = vperm.xlu1 %6095, %v7735_v41  }
 0x4c4   : > { %v6248_v32 = vpop.eup %6247  ;;  %5576 = vmatmul.mubr.msk.f32.gmra.mrb[10].mxu1 %vm1446_vm0, %v2047_v7  ;;  %v2049_v13 = vmul.f32 %v6246_v31, %v7710_v54  ;;  %v7915_v52 = vpop.permute.xlu0 %2218 }
 0x4c5   : > { %v7844_v58 = vpop.permute.xlu1 %2222  ;;  %v2048_v11 = vmul.f32 %v6248_v32, %v7712_v51  ;;  %5871 = vmatpush3.bf16.msra.mxu1 %v9973_v37  ;;  %10034 = vst [vmem:[#allocation33_spill] sm:$0xff] %v7915_v52 }
 0x4c6   : > { %10021 = vst [vmem:[#allocation8_spill] sm:$0xff] %v7844_v58  ;;  %2765 = vperm.xlu0 %6101, %v7754_v23   ;;  %5873 = vmatprep.subr.bf16.mxu1 %v9974_v53  ;;  %v10075_v58 = vld [vmem:[#allocation6_spill] sm:$0xff] }
 0x4c7   : > { %v6250_v10 = vpop.eup %6249  ;;  %5578 = vmatprep.mubr.msk.f32.mxu1 %vm1446_vm0, %v2048_v11  ;;  %2532 = vperm.xlu1 %6095, %v7754_v23  }
 0x4c8   : > { %v6252_v63 = vpop.eup %6251  ;;  %5579 = vmatmul.mubr.msk.f32.gmra.mrb[12].mxu1 %vm1446_vm0, %v2049_v13  ;;  %v2051_v54 = vmul.f32 %v6250_v10, %v7718_v1  ;;  %v6523_v1 = vmov 42  }
 0x4c9   : > { %v7854_v57 = vpop.permute.xlu1 %2226  ;;  %v2050_v51 = vmul.f32 %v6252_v63, %v7720_v39  ;;  %5875 = vmatpush3.bf16.msra.mxu1 %v9974_v53  ;;  %v7923_v48 = vpop.permute.xlu0 %2258 }
 0x4ca   : > { %10022 = vst [vmem:[#allocation15_spill] sm:$0xff] %v7854_v57  ;;  %2773 = vperm.xlu0 %6101, %v7767_v49   ;;  %5877 = vmatprep.subr.bf16.mxu1 %v9975_v3  ;;  %10037 = vst [vmem:[#allocation22_spill] sm:$0xff] %v7923_v48  ;;  %v6377_v57 = vld [vmem:[%s6938_s9 + $0x8] sm:$0xff]  ;;  %v8044_v48 = vld [vmem:[%s6938_s9 + $0x30] sm:$0xff] }
 0x4cb   : > { %5581 = vmatprep.mubr.msk.f32.mxu1 %vm1446_vm0, %v2050_v51  ;;  %2540 = vperm.xlu1 %6095, %v7767_v49   ;;  %10077 = vst [vmem:[#allocation6_spill] sm:$0xff] %v8044_v48  ;;  %v1236_v52 = vmul.f32 %v8044_v48, %v10078_v21  ;;  %v10084_v21 = vld [vmem:[#allocation5_spill] sm:$0xff] }
 0x4cc   : > { %5582 = vmatmul.mubr.msk.f32.gmra.mrb[14].mxu1 %vm1446_vm0, %v2051_v54 }
 0x4cd   : > { %v7863_v37 = vpop.permute.xlu1 %2230  ;;  %5879 = vmatpush3.bf16.msra.mxu1 %v9975_v3  ;;  %v7928_v30 = vpop.permute.xlu0 %2270 }
 0x4ce   : > { %10023 = vst [vmem:[#allocation28_spill] sm:$0xff] %v7863_v37  ;;  %6102 = vset.pattern.permute.xlu0 %v6523_v1  ;;  %5881 = vmatprep.subr.bf16.mxu1 %v9976_v5  ;;  %10039 = vst [vmem:[#allocation14_spill] sm:$0xff] %v7928_v30  ;;  %v10079_v37 = vld [vmem:[#allocation56_spill] sm:$0xff] }
 0x4cf   : > { %6096 = vset.pattern.permute.xlu1 %v6520_v46  ;;  %2843 = vperm.xlu0 %6102, %v7729_v18  }
 0x4d0   : > { %2556 = vperm.xlu1 %6096, %v7729_v18  }
 0x4d1   : > { %v7870_v53 = vpop.permute.xlu1 %2234  ;;  %5883 = vmatpush3.bf16.msra.mxu1 %v9976_v5  ;;  %v7933_v59 = vpop.permute.xlu0 %2278 }
 0x4d2   : > { %10024 = vst [vmem:[#allocation16_spill] sm:$0xff] %v7870_v53  ;;  %5885 = vmatprep.subr.bf16.mxu1 %v9977_v20  ;;  %10041 = vst [vmem:[#allocation43_spill] sm:$0xff] %v7933_v59 }
 0x4d3   : > { %2855 = vperm.xlu0 %6102, %v7747_v12  }
 0x4d4   : > { %2564 = vperm.xlu1 %6096, %v7735_v41  }
 0x4d5   : > { %v7876_v3 = vpop.permute.xlu1 %2238  ;;  %5887 = vmatpush3.bf16.msra.mxu1 %v9977_v20  ;;  %v6524_v20 = vmov 43  }
 0x4d6   : > { %10025 = vst [vmem:[#allocation9_spill] sm:$0xff] %v7876_v3  ;;  %5889 = vmatprep.subr.bf16.mxu1 %v9978_v4  ;;  %v7941_v60 = vpop.permute.xlu0 %2302  ;;  %v10076_v3 = vld [vmem:[#allocation48_spill] sm:$0xff] }
 0x4d7   : > { %2863 = vperm.xlu0 %6102, %v7761_v0   ;;  %10044 = vst [vmem:[#allocation25_spill] sm:$0xff] %v7941_v60 }
 0x4d8   : > { %2568 = vperm.xlu1 %6096, %v7747_v12  }
 0x4d9   : > { %v7882_v39 = vpop.permute.xlu1 %2242  ;;  %5891 = vmatpush3.bf16.msra.mxu1 %v9978_v4 }
 0x4da   : > { %10026 = vst [vmem:[#allocation27_spill] sm:$0xff] %v7882_v39  ;;  %5893 = vmatprep.subr.bf16.mxu1 %v9979_v24  ;;  %v7946_v7 = vpop.permute.xlu0 %2314 }
 0x4db   : > { %2871 = vperm.xlu0 %6102, %v7775_v15   ;;  %10046 = vst [vmem:[#allocation24_spill] sm:$0xff] %v7946_v7 }
 0x4dc   : > { %2576 = vperm.xlu1 %6096, %v7761_v0  }
 0x4dd   : > { %v7888_v5 = vpop.permute.xlu1 %2254  ;;  %5895 = vmatpush3.bf16.msra.mxu1 %v9979_v24 }
 0x4de   : > { %10027 = vst [vmem:[#allocation7_spill] sm:$0xff] %v7888_v5  ;;  %5905 = vmatprep.subr.bf16.mxu1 %v7301_v2  ;;  %v1231_v5 = vmul.f32 %v6377_v57, %v10075_v58  ;;  %v8075_v2 = vld [vmem:[%s6938_s9 + $0x28] sm:$0xff] }
 0x4df   : > { %6105 = vset.pattern.permute.xlu0 %v6524_v20 }
 0x4e0   : > { %2584 = vperm.xlu1 %6096, %v7775_v15   ;;  %2887 = vperm.xlu0 %6105, %v7741_v6   ;;  %v1271_v40 = vadd.f32 %v10080_v56, %v1231_v5  ;;  %v8070_v5 = vld [vmem:[%s6938_s9 + $0x18] sm:$0xff] }
 0x4e1   : > { %v7894_v46 = vpop.permute.xlu1 %2262 }
 0x4e2   : > { %10028 = vst [vmem:[#allocation12_spill] sm:$0xff] %v7894_v46  ;;  %v6525_v46 = vmov 24  }
 0x4e4   : > { %6099 = vset.pattern.permute.xlu1 %v6521_v62  ;;  %2899 = vperm.xlu0 %6105, %v7754_v23  }
 0x4e5   : > { %v7898_v4 = vpop.permute.xlu1 %2266  ;;  %2713 = vperm.xlu1 %6099, %v7741_v6  }
 0x4e6   : > { %10029 = vst [vmem:[#allocation41_spill] sm:$0xff] %v7898_v4 }
 0x4e8   : > { %2907 = vperm.xlu0 %6105, %v7767_v49  }
 0x4e9   : > { %v7902_v24 = vpop.permute.xlu1 %2274  ;;  %2717 = vperm.xlu1 %6099, %v7735_v41  }
 0x4ea   : > { %10030 = vst [vmem:[#allocation19_spill] sm:$0xff] %v7902_v24 }
 0x4ec   : > { %6107 = vset.pattern.permute.xlu0 %v6525_v46 }
 0x4ed   : > { %v7905_v8 = vpop.permute.xlu1 %2282  ;;  %2725 = vperm.xlu1 %6099, %v7754_v23  }
 0x4ee   : > { %10031 = vst [vmem:[#allocation37_spill] sm:$0xff] %v7905_v8 }
 0x4f1   : > { %2733 = vperm.xlu1 %6099, %v7767_v49  }
 0x4f2   : > { %v7909_v45 = vpop.permute.xlu1 %2306 }
 0x4f3   : > { %10032 = vst [vmem:[#allocation18_spill] sm:$0xff] %v7909_v45  ;;  %v8039_v45 = vld [vmem:[%s6938_s9 + $0x20] sm:$0xff] }
 0x4f4   : > { %v1234_v30 = vmul.f32 %v8039_v45, %v10076_v3  ;;  %v10083_v3 = vld [vmem:[#allocation62_spill] sm:$0xff] }
 0x4f5   : > { %6100 = vset.pattern.permute.xlu1 %v6522_v44  ;;  %v8059_v38 = vadd.f32 %v10083_v3, %v1236_v52  ;;  %v10089_v52 = vld [vmem:[#allocation49_spill] sm:$0xff] }
 0x4f6   : > { %v7912_v62 = vpop.permute.xlu1 %2310  ;;  %2749 = vperm.xlu1 %6100, %v7729_v18   ;;  %v8056_v16 = vadd.f32 %v10082_v55, %v1234_v30  ;;  %v1279_v30 = vmax.f32 %v1271_v40, 0.0  ;;  %v1235_v3 = vmul.f32 %v8075_v2, %v10089_v52  ;;  %v10095_v52 = vld [vmem:[#allocation55_spill] sm:$0xff] }
 0x4f7   : > { %10033 = vst [vmem:[#allocation11_spill] sm:$0xff] %v7912_v62 }
 0x4fa   : > { %v7917_v26 = vpop.permute.xlu1 %2318  ;;  %2757 = vperm.xlu1 %6100, %v7735_v41  }
 0x4fb   : > { %10035 = vst [vmem:[#allocation21_spill] sm:$0xff] %v7917_v26 }
 0x4fe   : > { %v7920_v36 = vpop.permute.xlu1 %2326  ;;  %2761 = vperm.xlu1 %6100, %v7747_v12  }
 0x4ff   : > { %10036 = vst [vmem:[#allocation30_spill] sm:$0xff] %v7920_v36 }
 0x502   : > { %2769 = vperm.xlu1 %6100, %v7761_v0  }
 0x503   : > { %v7926_v35 = vpop.permute.xlu1 %2342 }
 0x504   : > { %10038 = vst [vmem:[#allocation40_spill] sm:$0xff] %v7926_v35 }
 0x506   : > { %2777 = vperm.xlu1 %6100, %v7775_v15  }
 0x507   : > { %v7931_v22 = vpop.permute.xlu1 %2350 }
 0x508   : > { %10040 = vst [vmem:[#allocation31_spill] sm:$0xff] %v7931_v22 }
 0x50a   : > { %6103 = vset.pattern.permute.xlu1 %v6523_v1 }
 0x50b   : > { %v7935_v28 = vpop.permute.xlu1 %2354  ;;  %2847 = vperm.xlu1 %6103, %v7741_v6   ;;  %v7954_v6 = vpop.permute.xlu0 %2322 }
 0x50c   : > { %10042 = vst [vmem:[#allocation13_spill] sm:$0xff] %v7935_v28  ;;  %10047 = vst [vmem:[#allocation34_spill] sm:$0xff] %v7954_v6 }
 0x50f   : > { %v7938_v29 = vpop.permute.xlu1 %2362  ;;  %2851 = vperm.xlu1 %6103, %v7735_v41  }
 0x510   : > { %10043 = vst [vmem:[#allocation36_spill] sm:$0xff] %v7938_v29 }
 0x513   : > { %2859 = vperm.xlu1 %6103, %v7754_v23   ;;  %v7944_v14 = vpop.permute.xlu1 %2370  ;;  %v7959_v23 = vpop.permute.xlu0 %2330 }
 0x514   : > { %10045 = vst [vmem:[#allocation42_spill] sm:$0xff] %v7944_v14  ;;  %10048 = vst [vmem:[#allocation44_spill] sm:$0xff] %v7959_v23 }
 0x517   : > { %2867 = vperm.xlu1 %6103, %v7767_v49   ;;  %v7964_v49 = vpop.permute.xlu0 %2346 }
 0x518   : > { %v7949_v27 = vpop.permute.xlu1 %2386  ;;  %10050 = vst [vmem:[#allocation45_spill] sm:$0xff] %v7964_v49 }
 0x51b   : > { %6104 = vset.pattern.permute.xlu1 %v6524_v20  ;;  %v7969_v11 = vpop.permute.xlu0 %2358 }
 0x51c   : > { %v7951_v44 = vpop.permute.xlu1 %2390  ;;  %2883 = vperm.xlu1 %6104, %v7729_v18   ;;  %10051 = vst [vmem:[#allocation46_spill] sm:$0xff] %v7969_v11 }
 0x51f   : > { %v7974_v10 = vpop.permute.xlu0 %2366 }
 0x520   : > { %v7956_v31 = vpop.permute.xlu1 %2398  ;;  %2891 = vperm.xlu1 %6104, %v7735_v41   ;;  %10052 = vst [vmem:[#allocation79_spill] sm:$0xff] %v7974_v10 }
 0x523   : > { %v7976_v41 = vpop.permute.xlu0 %2382 }
 0x524   : > { %v7961_v32 = vpop.permute.xlu1 %2406  ;;  %2895 = vperm.xlu1 %6104, %v7747_v12  }
 0x525   : > { %10049 = vst [vmem:[#allocation39_spill] sm:$0xff] %v7961_v32 }
 0x527   : > { %v7980_v54 = vpop.permute.xlu0 %2394 }
 0x528   : > { %2903 = vperm.xlu1 %6104, %v7761_v0  }
 0x529   : > { %v7967_v13 = vpop.permute.xlu1 %2422 }
 0x52b   : > { %v7984_v51 = vpop.permute.xlu0 %2402 }
 0x52c   : > { %2911 = vperm.xlu1 %6104, %v7775_v15   ;;  %10054 = vst [vmem:[#allocation81_spill] sm:$0xff] %v7984_v51 }
 0x52d   : > { %v7972_v18 = vpop.permute.xlu1 %2430 }
 0x52f   : > { %v7990_v20 = vpop.permute.xlu0 %2410 }
 0x530   : > { %10057 = vst [vmem:[#allocation84_spill] sm:$0xff] %v7990_v20  ;;  %6106 = vset.pattern.permute.xlu1 %v6525_v46  ;;  %v6380_v46 = vld [vmem:[%s6938_s9] sm:$0xff] }
 0x531   : > { %v7978_v63 = vpop.permute.xlu1 %2434  ;;  %v1230_v25 = vmul.f32 %v6380_v46, %v10079_v37 }
 0x533   : > { %v7992_v15 = vpop.permute.xlu0 %2426 }
 0x535   : > { %v7982_v12 = vpop.permute.xlu1 %2442 }
 0x536   : > { %10053 = vst [vmem:[#allocation80_spill] sm:$0xff] %v7982_v12 }
 0x537   : > { %v7996_v10 = vpop.permute.xlu0 %2438 }
 0x538   : > { %10059 = vst [vmem:[#allocation86_spill] sm:$0xff] %v7996_v10 }
 0x539   : > { %v7986_v0 = vpop.permute.xlu1 %2450 }
 0x53a   : > { %10055 = vst [vmem:[#allocation82_spill] sm:$0xff] %v7986_v0  ;;  %v10099_v0 = vld [vmem:[#allocation64_spill] sm:$0xff] }
 0x53b   : > { %v8000_v29 = vpop.permute.xlu0 %2446 }
 0x53c   : > { %10061 = vst [vmem:[#allocation88_spill] sm:$0xff] %v8000_v29  ;;  %v10100_v29 = vld [vmem:[#allocation68_spill] sm:$0xff] }
 0x53e   : > { %v7988_v1 = vpop.permute.xlu1 %2520 }
 0x53f   : > { %10056 = vst [vmem:[#allocation83_spill] sm:$0xff] %v7988_v1  ;;  %v8004_v22 = vpop.permute.xlu0 %2516  ;;  %v10098_v1 = vld [vmem:[#allocation67_spill] sm:$0xff] }
 0x540   : > { %10063 = vst [vmem:[#allocation90_spill] sm:$0xff] %v8004_v22  ;;  %v1323_v22 = vmul.f32 %v8075_v2, %v10098_v1 }
 0x542   : > { %v7994_v14 = vpop.permute.xlu1 %2524 }
 0x543   : > { %10058 = vst [vmem:[#allocation85_spill] sm:$0xff] %v7994_v14  ;;  %v8008_v8 = vpop.permute.xlu0 %2528  ;;  %v10097_v14 = vld [vmem:[#allocation57_spill] sm:$0xff] }
 0x544   : > { %10065 = vst [vmem:[#allocation92_spill] sm:$0xff] %v8008_v8  ;;  %v10094_v8 = vld [vmem:[#allocation54_spill] sm:$0xff] }
 0x546   : > { %v7998_v11 = vpop.permute.xlu1 %2532 }
 0x547   : > { %10060 = vst [vmem:[#allocation87_spill] sm:$0xff] %v7998_v11  ;;  %v8012_v62 = vpop.permute.xlu0 %2536  ;;  %v10093_v11 = vld [vmem:[#allocation65_spill] sm:$0xff] }
 0x548   : > { %10067 = vst [vmem:[#allocation94_spill] sm:$0xff] %v8012_v62  ;;  %v10090_v62 = vld [vmem:[#allocation53_spill] sm:$0xff] }
 0x54a   : > { %v8002_v36 = vpop.permute.xlu1 %2540 }
 0x54b   : > { %10062 = vst [vmem:[#allocation89_spill] sm:$0xff] %v8002_v36  ;;  %v8016_v23 = vpop.permute.xlu0 %2544  ;;  %v10087_v36 = vld [vmem:[#allocation63_spill] sm:$0xff] }
 0x54c   : > { %10069 = vst [vmem:[#allocation96_spill] sm:$0xff] %v8016_v23  ;;  %v10086_v23 = vld [vmem:[#allocation59_spill] sm:$0xff]  ;;  %v1318_v56 = vmul.f32 %v6380_v46, %v10087_v36 }
 0x54d   : > { %v10092_v36 = vld [vmem:[#allocation51_spill] sm:$0xff] }
 0x54f   : > { %v8006_v26 = vpop.permute.xlu1 %2556  ;;  %v8020_v35 = vpop.permute.xlu0 %2560 }
 0x550   : > { %10064 = vst [vmem:[#allocation91_spill] sm:$0xff] %v8006_v26  ;;  %10071 = vst [vmem:[#allocation98_spill] sm:$0xff] %v8020_v35  ;;  %v1275_v26 = vadd.f32 %v10095_v52, %v1235_v3  ;;  %v10102_v52 = vld [vmem:[#allocation69_spill] sm:$0xff] }
 0x553   : > { %v8010_v28 = vpop.permute.xlu1 %2564  ;;  %v8024_v39 = vpop.permute.xlu0 %2572 }
 0x554   : > { %10066 = vst [vmem:[#allocation93_spill] sm:$0xff] %v8010_v28  ;;  %10073 = vst [vmem:[#allocation100_spill] sm:$0xff] %v8024_v39  ;;  %v10088_v39 = vld [vmem:[#allocation47_spill] sm:$0xff] }
 0x555   : > { %v1233_v55 = vmul.f32 %v8070_v5, %v10088_v39  ;;  %v1321_v39 = vmul.f32 %v8070_v5, %v10093_v11  ;;  %v1358_v11 = vadd.f32 %v10100_v29, %v1318_v56  ;;  %v1283_v29 = vmax.f32 %v1275_v26, 0.0  ;;  %v10104_v56 = vld [vmem:[#allocation72_spill] sm:$0xff] }
 0x557   : > { %v8014_v24 = vpop.permute.xlu1 %2568  ;;  %v8028_v49 = vpop.permute.xlu0 %2580  ;;  %v1273_v35 = vadd.f32 %v10094_v8, %v1233_v55  ;;  %v1727_v55 = vmul.f32 %v7670_v43, %v1279_v30  ;;  %v10106_v43 = vld [vmem:[#allocation70_spill] sm:$0xff] }
 0x558   : > { %10068 = vst [vmem:[#allocation95_spill] sm:$0xff] %v8014_v24  ;;  %10074 = vst [vmem:[#allocation101_spill] sm:$0xff] %v8028_v49  ;;  %v10085_v49 = vld [vmem:[#allocation52_spill] sm:$0xff] }
 0x559   : > { %v1270_v37 = vadd.f32 %v10085_v49, %v1230_v25 }
 0x55b   : > { %v8018_v6 = vpop.permute.xlu1 %2576  ;;  %v8032_v60 = vpop.permute.xlu0 %2709  ;;  %v1278_v28 = vmax.f32 %v1270_v37, 0.0  ;;  %v10101_v37 = vld [vmem:[#allocation66_spill] sm:$0xff] }
 0x55c   : > { %10070 = vst [vmem:[#allocation97_spill] sm:$0xff] %v8018_v6  ;;  %v1319_v6 = vmul.f32 %v6377_v57, %v10086_v23  ;;  %v8083_v23 = vld [vmem:[%s6938_s9 + $0x38] sm:$0xff]  ;;  %v1324_v8 = vmul.f32 %v8044_v48, %v10101_v37  ;;  %v10105_v37 = vld [vmem:[#allocation73_spill] sm:$0xff] }
 0x55d   : > { %10091 = vst [vmem:[#allocation50_spill] sm:$0xff] %v8083_v23  ;;  %v1237_v49 = vmul.f32 %v8083_v23, %v10092_v36  ;;  %v1322_v36 = vmul.f32 %v8039_v45, %v10099_v0 }
 0x55f   : > { %v8022_v7 = vpop.permute.xlu1 %2584  ;;  %v8050_v47 = vpop.permute.xlu0 %2721  ;;  %v1277_v25 = vadd.f32 %v10097_v14, %v1237_v49  ;;  %v1325_v14 = vmul.f32 %v8083_v23, %v10102_v52  ;;  %v10103_v49 = vld [vmem:[#allocation61_spill] sm:$0xff]  ;;  %v1362_v48 = vadd.f32 %v10105_v37, %v1322_v36 }
 0x560   : > { %10072 = vst [vmem:[#allocation99_spill] sm:$0xff] %v8022_v7  ;;  %v1232_v7 = vmul.f32 %v8062_v42, %v10084_v21  ;;  %v1282_v21 = vmax.f32 %v8056_v16, 0.0  ;;  %v1320_v1 = vmul.f32 %v8062_v42, %v10103_v49  ;;  %v10107_v23 = vld [vmem:[#allocation77_spill] sm:$0xff] }
 0x561   : > { %v1285_v10 = vmax.f32 %v1277_v25, 0.0  ;;  %v1364_v51 = vadd.f32 %v10107_v23, %v1324_v8 }
 0x562   : > { %v1272_v24 = vadd.f32 %v10090_v62, %v1232_v7  ;;  %v10096_v62 = vld [vmem:[#allocation71_spill] sm:$0xff]  ;;  %v1730_v23 = vmul.f32 %v7682_v9, %v1282_v21 }
 0x563   : > { %v8089_v40 = vpop.permute.xlu0 %2729  ;;  %v1359_v7 = vadd.f32 %v10096_v62, %v1319_v6  ;;  %v1726_v62 = vmul.f32 %v7672_v50, %v1278_v28 }
 0x564   : > { %v8026_v59 = vpop.permute.xlu1 %2713  ;;  %v1280_v12 = vmax.f32 %v1272_v24, 0.0  ;;  %v1361_v24 = vadd.f32 %v10104_v56, %v1321_v39  ;;  %v10109_v39 = vld [vmem:[#allocation74_spill] sm:$0xff]  ;;  %v10114_v56 = vmax.f32 %v8059_v38, 0.0 }
 0x566   : > { %v1728_v25 = vmul.f32 %v7676_v19, %v1280_v12 }
 0x567   : > { %v8111_v30 = vpop.permute.xlu0 %2737 }
 0x568   : > { %v8030_v4 = vpop.permute.xlu1 %2717 }
 0x56c   : > { %v8034_v53 = vpop.permute.xlu1 %2725 }
 0x570   : > { %v8053_v58 = vpop.permute.xlu1 %2733 }
 0x571   : > { %10081 = vst [vmem:[#allocation48_spill] sm:$0xff] %v8053_v58  ;;  %v1281_v58 = vmax.f32 %v1273_v35, 0.0 }
 0x573   : > { %v1729_v49 = vmul.f32 %v7674_v34, %v1281_v58 }
 0x575   : > { %v2750_v16 = vpop.permute.xlu1 %2749 }
 0x579   : > { %v2758_v50 = vpop.permute.xlu1 %2757 }
 0x593   : > { %v5574_v20 = vpop.f32.mrb[8].mxu1 }
 0x594   : > { %v2182_v3 = vmul.f32 %v5574_v20, %v1359_v7  ;;  %v2142_v6 = vpop.f32.mrb[9].mxu1  ;;  %v1360_v20 = vadd.f32 %v10106_v43, %v1320_v1 }
 0x595   : > { %v2181_v0 = vmul.f32 %v2142_v6, %v1358_v11  ;;  %v1363_v11 = vadd.f32 %v10109_v39, %v1323_v22  ;;  %v2754_v22 = vpop.permute.xlu0 %2753  ;;  %v10118_v39 = vld [vmem:[#allocation50_spill] sm:$0xff] }
 0x596   : > { %v2190_v32 = vadd.f32 %v2182_v3, %v1727_v55  ;;  %v10111_v3 = vld [vmem:[#allocation78_spill] sm:$0xff] }
 0x597   : > { %v2189_v7 = vadd.f32 %v2181_v0, %v1726_v62  ;;  %v5577_v52 = vpop.f32.mrb[10].mxu1  ;;  %v1365_v6 = vadd.f32 %v10111_v3, %v1325_v14 }
 0x598   : > { %v8115_v28 = vadd.f32 %v6377_v57, %v2190_v32  ;;  %v2184_v26 = vmul.f32 %v5577_v52, %v1361_v24  ;;  %v2152_v35 = vpop.f32.mrb[11].mxu1  ;;  %v1731_v57 = vmul.f32 %v7680_v17, %v1283_v29  ;;  %v1733_v17 = vmul.f32 %v7686_v33, %v1285_v10 }
 0x599   : > { %v8119_v36 = vadd.f32 %v6380_v46, %v2189_v7  ;;  %v2183_v55 = vmul.f32 %v2152_v35, %v1360_v20  ;;  %v1732_v33 = vmul.f32 %v7688_v61, %v10114_v56  ;;  %v2766_v20 = vpop.permute.xlu0 %2765 }
 0x59a   : > { %10108 = vst [vmem:[#allocation56_spill] sm:$0xff] %v8115_v28  ;;  %v2414_v1 = vmul.f32 %v7949_v27, %v8115_v28  ;;  %v2741_v34 = vmul.f32 %v8026_v59, %v8115_v28  ;;  %v2192_v58 = vadd.f32 %v2184_v26, %v1729_v49  ;;  %v10117_v26 = vld [vmem:[#allocation81_spill] sm:$0xff] }
 0x59b   : > { %10110 = vst [vmem:[#allocation58_spill] sm:$0xff] %v8119_v36  ;;  %v2413_v32 = vmul.f32 %v7976_v41, %v8119_v36  ;;  %v2740_v19 = vmul.f32 %v8032_v60, %v8119_v36  ;;  %v2191_v12 = vadd.f32 %v2183_v55, %v1728_v25  ;;  %v5580_v46 = vpop.f32.mrb[12].mxu1  ;;  %v2762_v60 = vpop.permute.xlu1 %2761  ;;  %v10120_v25 = vld [vmem:[#allocation86_spill] sm:$0xff] }
 0x59c   : > { %v8132_v8 = vadd.f32 %v2754_v22, %v2741_v34  ;;  %v8135_v27 = vadd.f32 %v8070_v5, %v2192_v58  ;;  %v2186_v59 = vmul.f32 %v5580_v46, %v1363_v11  ;;  %v2162_v14 = vpop.f32.mrb[13].mxu1  ;;  %v8144_v29 = vadd.f32 %v7992_v15, %v2414_v1  ;;  %v10124_v22 = vld [vmem:[#allocation48_spill] sm:$0xff] }
 0x59d   : > { %v8138_v62 = vadd.f32 %v2750_v16, %v2740_v19  ;;  %v8141_v41 = vadd.f32 %v8062_v42, %v2191_v12  ;;  %v2185_v0 = vmul.f32 %v2162_v14, %v1362_v48  ;;  %v8149_v5 = vadd.f32 %v7967_v13, %v2413_v32  ;;  %v10125_v12 = vld [vmem:[#allocation80_spill] sm:$0xff] }
 0x59e   : > { %10112 = vst [vmem:[#allocation60_spill] sm:$0xff] %v8135_v27  ;;  %v2743_v9 = vmul.f32 %v8050_v47, %v8135_v27  ;;  %v2194_v21 = vadd.f32 %v2186_v59, %v1731_v57  ;;  %v2416_v47 = vmul.f32 %v7980_v54, %v8135_v27  ;;  %v10123_v57 = vld [vmem:[#allocation39_spill] sm:$0xff]  ;;  %v10126_v59 = vld [vmem:[#allocation84_spill] sm:$0xff] }
 0x59f   : > { %10113 = vst [vmem:[#allocation62_spill] sm:$0xff] %v8141_v41  ;;  %v2415_v42 = vmul.f32 %v7951_v44, %v8141_v41  ;;  %v2742_v48 = vmul.f32 %v8030_v4, %v8141_v41  ;;  %v2193_v10 = vadd.f32 %v2185_v0, %v1730_v23  ;;  %v5583_v15 = vpop.f32.mrb[14].mxu1  ;;  %v2788_v16 = vadd.f32 %v8132_v8, %v8138_v62  ;;  %v2774_v23 = vpop.permute.xlu0 %2773  ;;  %v10127_v0 = vld [vmem:[#allocation88_spill] sm:$0xff] }
 0x5a0   : > { %v8163_v13 = vadd.f32 %v8075_v2, %v2194_v21  ;;  %v2188_v38 = vmul.f32 %v5583_v15, %v1365_v6  ;;  %v2172_v24 = vpop.f32.mrb[15].mxu1  ;;  %v2783_v43 = vadd.f32 %v2762_v60, %v2743_v9  ;;  %v2461_v2 = vadd.f32 %v8144_v29, %v8149_v5 }
 0x5a1   : > { %v8166_v61 = vadd.f32 %v7972_v18, %v2415_v42  ;;  %v2782_v44 = vadd.f32 %v2758_v50, %v2742_v48  ;;  %v8169_v37 = vadd.f32 %v8039_v45, %v2193_v10  ;;  %v2187_v4 = vmul.f32 %v2172_v24, %v1364_v51  ;;  %v2770_v45 = vpop.permute.xlu1 %2769  ;;  %v10128_v48 = vld [vmem:[#allocation82_spill] sm:$0xff] }
 0x5a2   : > { %10115 = vst [vmem:[#allocation5_spill] sm:$0xff] %v8163_v13  ;;  %v2745_v7 = vmul.f32 %v8089_v40, %v8163_v13  ;;  %v2196_v52 = vadd.f32 %v2188_v38, %v1733_v17  ;;  %v2456_v51 = vadd.f32 %v7978_v63, %v2416_v47  ;;  %v2418_v35 = vmul.f32 %v10117_v26, %v8163_v13 }
 0x5a3   : > { %10116 = vst [vmem:[#allocation52_spill] sm:$0xff] %v8169_v37  ;;  %v2789_v54 = vadd.f32 %v2788_v16, %v2782_v44  ;;  %v2417_v49 = vmul.f32 %v7956_v31, %v8169_v37  ;;  %v2744_v18 = vmul.f32 %v8034_v53, %v8169_v37  ;;  %v2195_v50 = vadd.f32 %v2187_v4, %v1732_v33  ;;  %v10121_v31 = vld [vmem:[#allocation6_spill] sm:$0xff]  ;;  %v10187_v37 = vld [vmem:[#allocation17_spill] sm:$0xff] }
 0x5a4   : > { %v8183_v40 = vadd.f32 %v10118_v39, %v2196_v52  ;;  %v2462_v11 = vadd.f32 %v2461_v2, %v8166_v61  ;;  %v2785_v53 = vadd.f32 %v2770_v45, %v2745_v7  ;;  %v2458_v46 = vadd.f32 %v10125_v12, %v2418_v35 }
 0x5a5   : > { %v2457_v55 = vadd.f32 %v10120_v25, %v2417_v49  ;;  %v2784_v3 = vadd.f32 %v2766_v20, %v2744_v18  ;;  %v2790_v6 = vadd.f32 %v2789_v54, %v2783_v43  ;;  %v8188_v1 = vadd.f32 %v10121_v31, %v2195_v50  ;;  %v2778_v56 = vpop.permute.xlu1 %2777 }
 0x5a6   : > { %10119 = vst [vmem:[#allocation59_spill] sm:$0xff] %v8183_v40  ;;  %v2463_v34 = vadd.f32 %v2462_v11, %v2456_v51  ;;  %v2747_v63 = vmul.f32 %v8111_v30, %v8183_v40  ;;  %v2420_v14 = vmul.f32 %v10126_v59, %v8183_v40 }
 0x5a7   : > { %10122 = vst [vmem:[#allocation63_spill] sm:$0xff] %v8188_v1  ;;  %v2791_v58 = vadd.f32 %v2790_v6, %v2784_v3  ;;  %v2419_v32 = vmul.f32 %v10123_v57, %v8188_v1  ;;  %v2746_v19 = vmul.f32 %v10124_v22, %v8188_v1  ;;  %v10184_v1 = vmov 53  }
 0x5a8   : > { %v2464_v17 = vadd.f32 %v2463_v34, %v2457_v55  ;;  %v2787_v30 = vadd.f32 %v2778_v56, %v2747_v63  ;;  %v2460_v10 = vadd.f32 %v10128_v48, %v2420_v14 }
 0x5a9   : > { %v2459_v60 = vadd.f32 %v10127_v0, %v2419_v32  ;;  %v2786_v9 = vadd.f32 %v2774_v23, %v2746_v19  ;;  %v2792_v21 = vadd.f32 %v2791_v58, %v2785_v53 }
 0x5aa   : > { %v2465_v33 = vadd.f32 %v2464_v17, %v2458_v46 }
 0x5ab   : > { %v2793_v42 = vadd.f32 %v2792_v21, %v2786_v9 }
 0x5ac   : > { %v2466_v15 = vadd.f32 %v2465_v33, %v2459_v60 }
 0x5ad   : > { %v2794_v16 = vadd.f32 %v2793_v42, %v2787_v30 }
 0x5ae   : > { %v2467_v47 = vadd.f32 %v2466_v15, %v2460_v10 }
 0x5af   : > { %v2795_v38 = vrot.slane %v2794_v16, 4 }
 0x5b0   : > { %v2468_v24 = vrot.slane %v2467_v47, 4 }
 0x5b1   : > { %v2796_v4 = vadd.f32 %v2795_v38, %v2794_v16  ;;  %v2848_v38 = vpop.permute.xlu1 %2847 }
 0x5b2   : > { %v2469_v20 = vadd.f32 %v2468_v24, %v2467_v47 }
 0x5b3   : > { %v2797_v7 = vrot.slane %v2796_v4, 2 }
 0x5b4   : > { %v2470_v52 = vrot.slane %v2469_v20, 2 }
 0x5b5   : > { %v2798_v2 = vadd.f32 %v2797_v7, %v2796_v4 }
 0x5b6   : > { %v2471_v54 = vadd.f32 %v2470_v52, %v2469_v20 }
 0x5b7   : > { %v2799_v49 = vrot.slane %v2798_v2, 1 }
 0x5b8   : > { %v2472_v18 = vrot.slane %v2471_v54, 1 }
 0x5b9   : > { %v2800_v50 = vadd.f32 %v2799_v49, %v2798_v2 }
 0x5ba   : > { %v2473_v45 = vadd.f32 %v2472_v18, %v2471_v54  ;;  %v2844_v54 = vpop.permute.xlu0 %2843 }
 0x5bb   : > { %v2801_v26 = vmul.f32 0.015625, %v2800_v50 }
 0x5bc   : > { %v2474_v25 = vmul.f32 0.015625, %v2473_v45 }
 0x5bd   : > { %v8202_v35 = vsub.f32 %v8138_v62, %v2801_v26  ;;  %v8205_v39 = vsub.f32 %v8132_v8, %v2801_v26  ;;  %v8207_v11 = vsub.f32 %v2782_v44, %v2801_v26  ;;  %v8209_v6 = vsub.f32 %v2783_v43, %v2801_v26 }
 0x5be   : > { %v8215_v58 = vsub.f32 %v2784_v3, %v2801_v26  ;;  %v8220_v8 = vsub.f32 %v8149_v5, %v2474_v25  ;;  %v8223_v44 = vsub.f32 %v8144_v29, %v2474_v25  ;;  %v8226_v43 = vsub.f32 %v8166_v61, %v2474_v25 }
 0x5bf   : > { %v2810_v31 = vmul.f32 %v8202_v35, %v8202_v35  ;;  %v2811_v34 = vmul.f32 %v8205_v39, %v8205_v39  ;;  %v2812_v62 = vmul.f32 %v8207_v11, %v8207_v11  ;;  %v8228_v57 = vsub.f32 %v2785_v53, %v2801_v26 }
 0x5c0   : > { %v2813_v32 = vmul.f32 %v8209_v6, %v8209_v6  ;;  %v8232_v22 = vsub.f32 %v2456_v51, %v2474_v25  ;;  %v2483_v19 = vmul.f32 %v8220_v8, %v8220_v8  ;;  %v2484_v5 = vmul.f32 %v8223_v44, %v8223_v44 }
 0x5c1   : > { %v2818_v63 = vadd.f32 %v2811_v34, %v2810_v31  ;;  %v8238_v12 = vsub.f32 %v2786_v9, %v2801_v26  ;;  %v2814_v29 = vmul.f32 %v8215_v58, %v8215_v58  ;;  %v8242_v53 = vsub.f32 %v2457_v55, %v2474_v25  ;;  %v2856_v31 = vpop.permute.xlu0 %2855 }
 0x5c2   : > { %v2485_v23 = vmul.f32 %v8226_v43, %v8226_v43  ;;  %v2491_v59 = vadd.f32 %v2484_v5, %v2483_v19  ;;  %v8246_v51 = vsub.f32 %v2787_v30, %v2801_v26  ;;  %v2815_v14 = vmul.f32 %v8228_v57, %v8228_v57 }
 0x5c3   : > { %v2819_v3 = vadd.f32 %v2818_v63, %v2812_v62  ;;  %v8250_v0 = vsub.f32 %v2458_v46, %v2474_v25  ;;  %v2486_v9 = vmul.f32 %v8232_v22, %v8232_v22  ;;  %v2816_v55 = vmul.f32 %v8238_v12, %v8238_v12 }
 0x5c4   : > { %v2492_v21 = vadd.f32 %v2491_v59, %v2485_v23  ;;  %v8256_v33 = vsub.f32 %v2459_v60, %v2474_v25  ;;  %v2487_v30 = vmul.f32 %v8242_v53, %v8242_v53  ;;  %v2817_v48 = vmul.f32 %v8246_v51, %v8246_v51 }
 0x5c5   : > { %v2820_v61 = vadd.f32 %v2819_v3, %v2813_v32  ;;  %v8262_v46 = vsub.f32 %v2460_v10, %v2474_v25  ;;  %v2488_v16 = vmul.f32 %v8250_v0, %v8250_v0  ;;  %v2852_v10 = vpop.permute.xlu1 %2851 }
 0x5c6   : > { %v2493_v42 = vadd.f32 %v2492_v21, %v2486_v9  ;;  %v2489_v60 = vmul.f32 %v8256_v33, %v8256_v33 }
 0x5c7   : > { %v2821_v17 = vadd.f32 %v2820_v61, %v2814_v29  ;;  %v2490_v7 = vmul.f32 %v8262_v46, %v8262_v46  ;;  %v2864_v29 = vpop.permute.xlu0 %2863 }
 0x5c8   : > { %v2494_v47 = vadd.f32 %v2493_v42, %v2487_v30 }
 0x5c9   : > { %v2822_v56 = vadd.f32 %v2821_v17, %v2815_v14  ;;  %v2860_v62 = vpop.permute.xlu1 %2859 }
 0x5ca   : > { %v2495_v4 = vadd.f32 %v2494_v47, %v2488_v16 }
 0x5cb   : > { %v2823_v15 = vadd.f32 %v2822_v56, %v2816_v55  ;;  %v8270_v17 = vpop.permute.xlu0 %2871 }
 0x5cc   : > { %v2496_v52 = vadd.f32 %v2495_v4, %v2489_v60 }
 0x5cd   : > { %v2824_v24 = vadd.f32 %v2823_v15, %v2817_v48  ;;  %v2868_v23 = vpop.permute.xlu1 %2867 }
 0x5ce   : > { %v2497_v49 = vadd.f32 %v2496_v52, %v2490_v7 }
 0x5cf   : > { %v2825_v20 = vrot.slane %v2824_v24, 4  ;;  %v2888_v21 = vpop.permute.xlu0 %2887 }
 0x5d0   : > { %v2498_v50 = vrot.slane %v2497_v49, 4 }
 0x5d1   : > { %v2826_v2 = vadd.f32 %v2825_v20, %v2824_v24  ;;  %v2884_v9 = vpop.permute.xlu1 %2883 }
 0x5d2   : > { %v2499_v26 = vadd.f32 %v2498_v50, %v2497_v49  ;;  %v10130_v50 = vld [vmem:[#allocation83_spill] sm:$0xff] }
 0x5d3   : > { %v2827_v18 = vrot.slane %v2826_v2, 2  ;;  %v2900_v7 = vpop.permute.xlu0 %2899 }
 0x5d4   : > { %v2500_v34 = vrot.slane %v2499_v26, 2 }
 0x5d5   : > { %v2828_v45 = vadd.f32 %v2827_v18, %v2826_v2  ;;  %v2892_v48 = vpop.permute.xlu1 %2891  ;;  %v10129_v18 = vld [vmem:[#allocation90_spill] sm:$0xff] }
 0x5d6   : > { %v2501_v32 = vadd.f32 %v2500_v34, %v2499_v26  ;;  %v10131_v26 = vld [vmem:[#allocation85_spill] sm:$0xff] }
 0x5d7   : > { %v2829_v25 = vrot.slane %v2828_v45, 1 }
 0x5d8   : > { %v2502_v19 = vrot.slane %v2501_v32, 1 }
 0x5d9   : > { %v2830_v63 = vadd.f32 %v2829_v25, %v2828_v45 }
 0x5da   : > { %v2503_v61 = vadd.f32 %v2502_v19, %v2501_v32  ;;  %v10133_v32 = vld [vmem:[#allocation98_spill] sm:$0xff] }
 0x5db   : > { %v2831_v3 = vmul.f32 0.015625, %v2830_v63 }
 0x5dc   : > { %v2504_v59 = vmul.f32 0.015625, %v2503_v61 }
 0x5dd   : > { %v2832_v5 = vadd.f32 1e-08, %v2831_v3 }
 0x5de   : > { %v2505_v14 = vadd.f32 1e-08, %v2504_v59 }
 0x5df   : > { %6253 = vrsqrt.f32 %v2832_v5 }
 0x5e0   : > { %6255 = vrsqrt.f32 %v2505_v14 }
 0x5e9   : > { %v6254_v55 = vpop.eup %6253 }
 0x5ea   : > { %v2835_v56 = vmul.f32 %v6254_v55, %v8205_v39  ;;  %v2834_v30 = vmul.f32 %v6254_v55, %v8202_v35  ;;  %v2836_v42 = vmul.f32 %v6254_v55, %v8207_v11  ;;  %v2838_v15 = vmul.f32 %v6254_v55, %v8215_v58  ;;  %v6256_v24 = vpop.eup %6255  ;;  %v2896_v35 = vpop.permute.xlu1 %2895 }
 0x5eb   : > { %v2840_v20 = vmul.f32 %v6254_v55, %v8238_v12  ;;  %v2837_v39 = vmul.f32 %v6254_v55, %v8209_v6  ;;  %v2507_v11 = vmul.f32 %v6256_v24, %v8220_v8  ;;  %v2508_v58 = vmul.f32 %v6256_v24, %v8223_v44 }
 0x5ec   : > { %v2875_v16 = vmul.f32 %v2848_v38, %v2835_v56  ;;  %v2874_v47 = vmul.f32 %v2844_v54, %v2834_v30  ;;  %v2876_v60 = vmul.f32 %v2852_v10, %v2836_v42  ;;  %v2878_v4 = vmul.f32 %v2860_v62, %v2838_v15  ;;  %v2908_v62 = vpop.permute.xlu0 %2907  ;;  %v10138_v42 = vld [vmem:[#allocation94_spill] sm:$0xff] }
 0x5ed   : > { %v2509_v38 = vmul.f32 %v6256_v24, %v8226_v43  ;;  %v2880_v54 = vmul.f32 %v2868_v23, %v2840_v20  ;;  %v2510_v10 = vmul.f32 %v6256_v24, %v8232_v22  ;;  %v2547_v6 = vmul.f32 %v10129_v18, %v2507_v11  ;;  %v10132_v43 = vld [vmem:[#allocation91_spill] sm:$0xff]  ;;  %v10134_v22 = vld [vmem:[#allocation92_spill] sm:$0xff] }
 0x5ee   : > { %v8277_v52 = vadd.f32 %v2884_v9, %v2874_v47  ;;  %v8279_v2 = vadd.f32 %v2888_v21, %v2875_v16  ;;  %v8287_v12 = vadd.f32 %v2892_v48, %v2876_v60  ;;  %v8289_v49 = vadd.f32 %v2900_v7, %v2878_v4  ;;  %v2904_v61 = vpop.permute.xlu1 %2903  ;;  %v10139_v16 = vld [vmem:[#allocation75_spill] sm:$0xff]  ;;  %v10141_v47 = vld [vmem:[#allocation89_spill] sm:$0xff]  ;;  %v8348_v18 = vld [vmem:[%s9807_s2 + $0x18] sm:$0xff] }
 0x5ef   : > { %v2548_v45 = vmul.f32 %v10130_v50, %v2508_v58  ;;  %v2549_v25 = vmul.f32 %v10131_v26, %v2509_v38  ;;  %v2511_v34 = vmul.f32 %v6256_v24, %v8242_v53  ;;  %v2877_v8 = vmul.f32 %v2856_v31, %v2837_v39  ;;  %v10135_v53 = vld [vmem:[#allocation93_spill] sm:$0xff]  ;;  %v8360_v50 = vld [vmem:[%s9807_s2 + $0x8] sm:$0xff] }
 0x5f0   : > { %2924 = vmax.xlane.f32.xlu1 %v8279_v2  ;;  %2922 = vmax.xlane.f32.xlu0 %v8277_v52  ;;  %v2839_v44 = vmul.f32 %v6254_v55, %v8228_v57  ;;  %v2587_v63 = vadd.f32 %v10132_v43, %v2547_v6  ;;  %v2550_v19 = vmul.f32 %v10134_v22, %v2510_v10  ;;  %v10136_v57 = vld [vmem:[#allocation87_spill] sm:$0xff]  ;;  %v10143_v7 = vld [vmem:[#allocation97_spill] sm:$0xff]  ;;  %v6526_v26 = vmov 25  }
 0x5f1   : > { %v2588_v3 = vadd.f32 %v10133_v32, %v2548_v45  ;;  %v2512_v5 = vmul.f32 %v6256_v24, %v8250_v0  ;;  %v8303_v23 = vadd.f32 %v2908_v62, %v2880_v54  ;;  %v2589_v31 = vadd.f32 %v10135_v53, %v2549_v25  ;;  %v10137_v0 = vld [vmem:[#allocation95_spill] sm:$0xff]  ;;  %v8336_v54 = vld [vmem:[%s9807_s2] sm:$0xff]  ;;  %v8366_v45 = vld [vmem:[%s9807_s2 + $0x28] sm:$0xff] }
 0x5f2   : > { %5616 = vmatprep.mubr.f32.mxu0 %v2587_v63  ;;  %v2551_v59 = vmul.f32 %v10136_v57, %v2511_v34  ;;  %v2513_v14 = vmul.f32 %v6256_v24, %v8256_v33  ;;  %v2879_v9 = vmul.f32 %v2864_v29, %v2839_v44  ;;  %v2841_v21 = vmul.f32 %v6254_v55, %v8246_v51  ;;  %v10140_v33 = vld [vmem:[#allocation100_spill] sm:$0xff]  ;;  %v2912_v20 = vpop.permute.xlu1 %2911  ;;  %v8342_v10 = vld [vmem:[%s9807_s2 + $0x10] sm:$0xff]  ;;  %v8354_v6 = vld [vmem:[%s9807_s2 + $0x20] sm:$0xff] }
 0x5f3   : > { %v8309_v56 = vadd.f32 %v2896_v35, %v2877_v8  ;;  %5617 = vmatmul.mubr.f32.vlgmr.msra.gmra.mrb[16].mxu0 %v2588_v3  ;;  %v2590_v30 = vadd.f32 %v10137_v0, %v2550_v19  ;;  %v2552_v48 = vmul.f32 %v10138_v42, %v2512_v5  ;;  %v2514_v15 = vmul.f32 %v6256_v24, %v8262_v46  ;;  %v10142_v55 = vld [vmem:[#allocation76_spill] sm:$0xff]  ;;  %v10145_v35 = vld [vmem:[#allocation101_spill] sm:$0xff]  ;;  %v8373_v25 = vld [vmem:[%s9807_s2 + $0x30] sm:$0xff] }
 0x5f4   : > { %2930 = vmax.xlane.f32.xlu1 %v8289_v49  ;;  %2926 = vmax.xlane.f32.xlu0 %v8287_v12  ;;  %v2591_v29 = vadd.f32 %v10140_v33, %v2551_v59  ;;  %v2553_v51 = vmul.f32 %v10141_v47, %v2513_v14  ;;  %v2881_v60 = vmul.f32 %v8270_v17, %v2841_v21  ;;  %v10144_v46 = vld [vmem:[#allocation96_spill] sm:$0xff]  ;;  %v10146_v17 = vld [vmem:[#allocation99_spill] sm:$0xff]  ;;  %v6527_v8 = vmov 26  }
 0x5f5   : > { %5619 = vmatprep.mubr.f32.mxu0 %v2589_v31  ;;  %5899 = vmatpush3.bf16.msra.mxu0 %v10139_v16  ;;  %v8321_v4 = vadd.f32 %v2904_v61, %v2879_v9  ;;  %v2592_v39 = vadd.f32 %v10143_v7, %v2552_v48  ;;  %v2554_v24 = vmul.f32 %v10144_v46, %v2514_v15  ;;  %v8380_v34 = vld [vmem:[%s9807_s2 + $0x38] sm:$0xff]  ;;  %v6528_v44 = vmov 27  }
 0x5f6   : > { %5901 = vmatprep.subr.bf16.mxu0 %v10142_v55  ;;  %v2593_v11 = vadd.f32 %v10145_v35, %v2553_v51  ;;  %v8329_v58 = vadd.f32 %v2912_v20, %v2881_v60  ;;  %v6529_v62 = vmov 32   ;;  %v6530_v43 = vmov 33  }
 0x5f7   : > { %5620 = vmatmul.mubr.f32.gmra.mrb[18].mxu0 %v2590_v30  ;;  %v2594_v38 = vadd.f32 %v10146_v17, %v2554_v24 }
 0x5f8   : > { %2934 = vmax.xlane.f32.xlu1 %v8303_v23  ;;  %2928 = vmax.xlane.f32.xlu0 %v8309_v56 }
 0x5f9   : > { %5622 = vmatprep.mubr.f32.mxu0 %v2591_v29  ;;  %5903 = vmatpush3.bf16.msra.mxu0 %v10142_v55 }
 0x5fa   : > { %5913 = vmatprep.subr.bf16.mxu0 %v10139_v16 }
 0x5fb   : > { %5623 = vmatmul.mubr.f32.gmra.mrb[20].mxu0 %v2592_v39 }
 0x5fc   : > { %2932 = vmax.xlane.f32.xlu0 %v8321_v4  ;;  %5625 = vmatprep.mubr.f32.mxu0 %v2593_v11 }
 0x5ff   : > { %5626 = vmatmul.mubr.f32.gmra.mrb[22].mxu0 %v2594_v38 }
 0x600   : > { %2936 = vmax.xlane.f32.xlu0 %v8329_v58 }
 0x609   : > { %3116 = vperm.xlu1 %6106, %v8336_v54  }
 0x60d   : > { %3124 = vperm.xlu1 %6106, %v8342_v10  }
 0x611   : > { %3128 = vperm.xlu1 %6106, %v8348_v18  }
 0x615   : > { %3132 = vperm.xlu1 %6106, %v8354_v6  }
 0x616   : > { %3120 = vperm.xlu0 %6107, %v8360_v50  }
 0x619   : > { %3136 = vperm.xlu1 %6106, %v8366_v45  }
 0x61a   : > { %6109 = vset.pattern.permute.xlu0 %v6526_v26 }
 0x61b   : > { %3164 = vperm.xlu0 %6109, %v8342_v10  }
 0x61d   : > { %3140 = vperm.xlu1 %6106, %v8373_v25  }
 0x61f   : > { %3176 = vperm.xlu0 %6109, %v8366_v45  }
 0x621   : > { %3144 = vperm.xlu1 %6106, %v8380_v34  }
 0x623   : > { %3184 = vperm.xlu0 %6109, %v8380_v34  }
 0x625   : > { %6108 = vset.pattern.permute.xlu1 %v6526_v26 }
 0x626   : > { %3156 = vperm.xlu1 %6108, %v8336_v54  }
 0x627   : > { %6111 = vset.pattern.permute.xlu0 %v6527_v8 }
 0x628   : > { %3208 = vperm.xlu0 %6111, %v8360_v50  }
 0x62a   : > { %3160 = vperm.xlu1 %6108, %v8360_v50  }
 0x62c   : > { %3220 = vperm.xlu0 %6111, %v8354_v6  }
 0x62e   : > { %3168 = vperm.xlu1 %6108, %v8348_v18  }
 0x630   : > { %3228 = vperm.xlu0 %6111, %v8373_v25  }
 0x632   : > { %3172 = vperm.xlu1 %6108, %v8354_v6  }
 0x634   : > { %6112 = vset.pattern.permute.xlu0 %v6528_v44 }
 0x635   : > { %3244 = vperm.xlu0 %6112, %v8336_v54  }
 0x636   : > { %3180 = vperm.xlu1 %6108, %v8373_v25  }
 0x639   : > { %3256 = vperm.xlu0 %6112, %v8348_v18  }
 0x63a   : > { %6110 = vset.pattern.permute.xlu1 %v6527_v8  ;;  %v6531_v8 = vmov 34  }
 0x63b   : > { %3204 = vperm.xlu1 %6110, %v8336_v54  }
 0x63d   : > { %3264 = vperm.xlu0 %6112, %v8366_v45  }
 0x63f   : > { %3212 = vperm.xlu1 %6110, %v8342_v10  }
 0x641   : > { %3272 = vperm.xlu0 %6112, %v8380_v34  }
 0x643   : > { %3216 = vperm.xlu1 %6110, %v8348_v18  }
 0x645   : > { %6115 = vset.pattern.permute.xlu0 %v6529_v62 }
 0x646   : > { %3288 = vperm.xlu0 %6115, %v8360_v50  }
 0x647   : > { %3224 = vperm.xlu1 %6110, %v8366_v45  }
 0x64a   : > { %3300 = vperm.xlu0 %6115, %v8354_v6  }
 0x64b   : > { %3232 = vperm.xlu1 %6110, %v8380_v34  }
 0x64e   : > { %3308 = vperm.xlu0 %6115, %v8373_v25  }
 0x64f   : > { %6113 = vset.pattern.permute.xlu1 %v6528_v44 }
 0x650   : > { %3248 = vperm.xlu1 %6113, %v8360_v50  }
 0x652   : > { %6116 = vset.pattern.permute.xlu0 %v6530_v43 }
 0x654   : > { %3252 = vperm.xlu1 %6113, %v8342_v10  }
 0x658   : > { %3260 = vperm.xlu1 %6113, %v8354_v6  }
 0x65c   : > { %3268 = vperm.xlu1 %6113, %v8373_v25  }
 0x660   : > { %6114 = vset.pattern.permute.xlu1 %v6529_v62 }
 0x661   : > { %3284 = vperm.xlu1 %6114, %v8336_v54  }
 0x665   : > { %3292 = vperm.xlu1 %6114, %v8342_v10  }
 0x669   : > { %3296 = vperm.xlu1 %6114, %v8348_v18  }
 0x66d   : > { %3304 = vperm.xlu1 %6114, %v8366_v45  }
 0x671   : > { %3312 = vperm.xlu1 %6114, %v8380_v34  }
 0x675   : > { %6117 = vset.pattern.permute.xlu1 %v6530_v43 }
 0x67d   : > { %v2925_v63 = vpop.xlane.xlu1 %2924  ;;  %v2923_v32 = vpop.xlane.xlu0 %2922 }
 0x67e   : > { %v2939_v3 = vsub.f32 %v8279_v2, %v2925_v63  ;;  %v2938_v61 = vsub.f32 %v8277_v52, %v2923_v32 }
 0x680   : > { %v2948_v22 = vmul.f32 1.442695, %v2939_v3  ;;  %v2946_v31 = vmul.f32 1.442695, %v2938_v61 }
 0x681   : > { %v2931_v19 = vpop.xlane.xlu1 %2930  ;;  %v2927_v5 = vpop.xlane.xlu0 %2926 }
 0x682   : > { %6257 = vpow2.f32 %v2948_v22  ;;  %v2940_v57 = vsub.f32 %v8287_v12, %v2927_v5  ;;  %v2942_v0 = vsub.f32 %v8289_v49, %v2931_v19  ;;  %v6532_v5 = vmov 35  }
 0x683   : > { %6259 = vpow2.f32 %v2946_v31 }
 0x684   : > { %v2950_v2 = vmul.f32 1.442695, %v2940_v57  ;;  %v2954_v12 = vmul.f32 1.442695, %v2942_v0 }
 0x685   : > { %v2935_v53 = vpop.xlane.xlu1 %2934  ;;  %v2929_v59 = vpop.xlane.xlu0 %2928 }
 0x686   : > { %v2941_v14 = vsub.f32 %v8309_v56, %v2929_v59  ;;  %v2944_v56 = vsub.f32 %v8303_v23, %v2935_v53 }
 0x688   : > { %v2952_v9 = vmul.f32 1.442695, %v2941_v14  ;;  %v2958_v47 = vmul.f32 1.442695, %v2944_v56 }
 0x689   : > { %v8417_v21 = vpop.permute.xlu1 %3116  ;;  %v2933_v30 = vpop.xlane.xlu0 %2932 }
 0x68a   : > { %10147 = vst [vmem:[#allocation47_spill] sm:$0xff] %v8417_v21  ;;  %6261 = vpow2.f32 %v2952_v9  ;;  %v2943_v42 = vsub.f32 %v8321_v4, %v2933_v30 }
 0x68b   : > { %6263 = vpow2.f32 %v2950_v2 }
 0x68c   : > { %v8421_v48 = vpop.eup %6257  ;;  %v2956_v52 = vmul.f32 1.442695, %v2943_v42  ;;  %v6533_v42 = vmov 28  }
 0x68d   : > { %2964 = vadd.xlane.f32.xlu0 %v8421_v48  ;;  %v8425_v15 = vpop.permute.xlu1 %3124  ;;  %v2937_v33 = vpop.xlane.xlu0 %2936 }
 0x68e   : > { %10148 = vst [vmem:[#allocation49_spill] sm:$0xff] %v8425_v15  ;;  %6265 = vpow2.f32 %v2956_v52  ;;  %v2945_v49 = vsub.f32 %v8329_v58, %v2937_v33  ;;  %v8428_v51 = vpop.eup %6259  ;;  %v8671_v15 = vld [vmem:[%s7356_s10 + $0x28] sm:$0xff] }
 0x68f   : > { %6267 = vpow2.f32 %v2954_v12  ;;  %10196 = vst [vmem:[#allocation89_spill] sm:$0xff] %v8671_v15 }
 0x690   : > { %v2960_v29 = vmul.f32 1.442695, %v2945_v49  ;;  %v6534_v49 = vmov 29  }
 0x691   : > { %v8430_v60 = vpop.permute.xlu1 %3128 }
 0x692   : > { %6269 = vpow2.f32 %v2960_v29  ;;  %10149 = vst [vmem:[#allocation53_spill] sm:$0xff] %v8430_v60  ;;  %v10200_v60 = vmov 31  }
 0x693   : > { %6271 = vpow2.f32 %v2958_v47 }
 0x694   : > { %v8432_v4 = vpop.eup %6261 }
 0x695   : > { %2962 = vadd.xlane.f32.xlu1 %v8428_v51  ;;  %2968 = vadd.xlane.f32.xlu0 %v8432_v4  ;;  %v8436_v23 = vpop.eup %6263  ;;  %v8441_v7 = vpop.permute.xlu1 %3132 }
 0x696   : > { %10150 = vst [vmem:[#allocation51_spill] sm:$0xff] %v8441_v7  ;;  %v8489_v3 = vpop.permute.xlu0 %3120  ;;  %v8604_v7 = vld [vmem:[%s7356_s10 + $0x8] sm:$0xff] }
 0x697   : > { %10159 = vst [vmem:[#allocation66_spill] sm:$0xff] %v8489_v3  ;;  %10186 = vst [vmem:[#allocation93_spill] sm:$0xff] %v8604_v7 }
 0x698   : > { %v8438_v20 = vpop.eup %6265 }
 0x699   : > { %2966 = vadd.xlane.f32.xlu1 %v8436_v23  ;;  %2972 = vadd.xlane.f32.xlu0 %v8438_v20  ;;  %v8444_v39 = vpop.eup %6267  ;;  %v8452_v35 = vpop.permute.xlu1 %3136 }
 0x69a   : > { %10151 = vst [vmem:[#allocation65_spill] sm:$0xff] %v8452_v35  ;;  %v8502_v31 = vpop.permute.xlu0 %3164 }
 0x69b   : > { %10164 = vst [vmem:[#allocation70_spill] sm:$0xff] %v8502_v31 }
 0x69c   : > { %v8446_v46 = vpop.eup %6269 }
 0x69d   : > { %2970 = vadd.xlane.f32.xlu1 %v8444_v39  ;;  %2976 = vadd.xlane.f32.xlu0 %v8446_v46  ;;  %v8450_v24 = vpop.eup %6271  ;;  %v8455_v11 = vpop.permute.xlu1 %3140 }
 0x69e   : > { %10152 = vst [vmem:[#allocation54_spill] sm:$0xff] %v8455_v11  ;;  %v8513_v9 = vpop.permute.xlu0 %3176 }
 0x69f   : > { %10168 = vst [vmem:[#allocation81_spill] sm:$0xff] %v8513_v9 }
 0x6a1   : > { %2974 = vadd.xlane.f32.xlu1 %v8450_v24  ;;  %v8457_v58 = vpop.permute.xlu1 %3144 }
 0x6a2   : > { %10153 = vst [vmem:[#allocation55_spill] sm:$0xff] %v8457_v58  ;;  %v8520_v2 = vpop.permute.xlu0 %3184 }
 0x6a3   : > { %10170 = vst [vmem:[#allocation86_spill] sm:$0xff] %v8520_v2  ;;  %v9841_v2 = vmov 53  }
 0x6a5   : > { %v8459_v17 = vpop.permute.xlu1 %3156 }
 0x6a6   : > { %10154 = vst [vmem:[#allocation71_spill] sm:$0xff] %v8459_v17 }
 0x6a7   : > { %v8526_v52 = vpop.permute.xlu0 %3208 }
 0x6a8   : > { %10172 = vst [vmem:[#allocation39_spill] sm:$0xff] %v8526_v52 }
 0x6a9   : > { %v8464_v38 = vpop.permute.xlu1 %3160 }
 0x6aa   : > { %10155 = vst [vmem:[#allocation57_spill] sm:$0xff] %v8464_v38 }
 0x6ab   : > { %v8533_v56 = vpop.permute.xlu0 %3220 }
 0x6ac   : > { %10174 = vst [vmem:[#allocation80_spill] sm:$0xff] %v8533_v56  ;;  %v9843_v56 = vmov 30  }
 0x6ad   : > { %v8469_v26 = vpop.permute.xlu1 %3168 }
 0x6ae   : > { %10156 = vst [vmem:[#allocation67_spill] sm:$0xff] %v8469_v26  ;;  %v8638_v26 = vld [vmem:[%s7356_s10 + $0x18] sm:$0xff] }
 0x6af   : > { %v8540_v29 = vpop.permute.xlu0 %3228  ;;  %10192 = vst [vmem:[#allocation94_spill] sm:$0xff] %v8638_v26 }
 0x6b0   : > { %10176 = vst [vmem:[#allocation88_spill] sm:$0xff] %v8540_v29 }
 0x6b1   : > { %v8474_v44 = vpop.permute.xlu1 %3172 }
 0x6b2   : > { %3328 = vperm.xlu1 %6117, %v8360_v50   ;;  %10157 = vst [vmem:[#allocation64_spill] sm:$0xff] %v8474_v44  ;;  %v10185_v44 = vmov 30  }
 0x6b3   : > { %3324 = vperm.xlu0 %6116, %v8336_v54  }
 0x6b5   : > { %v8479_v62 = vpop.permute.xlu1 %3180 }
 0x6b6   : > { %3332 = vperm.xlu1 %6117, %v8342_v10   ;;  %10158 = vst [vmem:[#allocation68_spill] sm:$0xff] %v8479_v62  ;;  %v6535_v62 = vmov 52  }
 0x6b7   : > { %3336 = vperm.xlu0 %6116, %v8348_v18  }
 0x6ba   : > { %3340 = vperm.xlu1 %6117, %v8354_v6   ;;  %v8494_v19 = vpop.permute.xlu1 %3204 }
 0x6bb   : > { %3344 = vperm.xlu0 %6116, %v8366_v45   ;;  %10161 = vst [vmem:[#allocation61_spill] sm:$0xff] %v8494_v19 }
 0x6be   : > { %3348 = vperm.xlu1 %6117, %v8373_v25   ;;  %v8504_v57 = vpop.permute.xlu1 %3212 }
 0x6bf   : > { %3352 = vperm.xlu0 %6116, %v8380_v34   ;;  %10165 = vst [vmem:[#allocation77_spill] sm:$0xff] %v8504_v57 }
 0x6c2   : > { %6118 = vset.pattern.permute.xlu1 %v6531_v8  ;;  %v8515_v0 = vpop.permute.xlu1 %3216 }
 0x6c3   : > { %3434 = vperm.xlu1 %6118, %v8336_v54   ;;  %6119 = vset.pattern.permute.xlu0 %v6531_v8  ;;  %10169 = vst [vmem:[#allocation50_spill] sm:$0xff] %v8515_v0  ;;  %v8546_v8 = vpop.permute.xlu0 %3244 }
 0x6c4   : > { %3438 = vperm.xlu0 %6119, %v8360_v50   ;;  %10178 = vst [vmem:[#allocation90_spill] sm:$0xff] %v8546_v8  ;;  %v9851_v8 = vmov 31  }
 0x6c6   : > { %v8481_v43 = vpop.f32.mrb[16].mxu0  ;;  %v8522_v30 = vpop.permute.xlu1 %3224 }
 0x6c7   : > { %3442 = vperm.xlu1 %6118, %v8342_v10   ;;  %v8483_v63 = vpop.f32.mrb[17].mxu0  ;;  %10171 = vst [vmem:[#allocation6_spill] sm:$0xff] %v8522_v30 }
 0x6c8   : > { %3450 = vperm.xlu0 %6119, %v8354_v6  }
 0x6ca   : > { %v8487_v32 = vpop.f32.mrb[18].mxu0  ;;  %v8529_v12 = vpop.permute.xlu1 %3232 }
 0x6cb   : > { %3446 = vperm.xlu1 %6118, %v8348_v18   ;;  %v8491_v22 = vpop.f32.mrb[19].mxu0  ;;  %10173 = vst [vmem:[#allocation48_spill] sm:$0xff] %v8529_v12 }
 0x6cc   : > { %3458 = vperm.xlu0 %6119, %v8373_v25   ;;  %10160 = vst [vmem:[#allocation69_spill] sm:$0xff] %v8491_v22 }
 0x6ce   : > { %v8496_v61 = vpop.f32.mrb[20].mxu0 }
 0x6cf   : > { %3454 = vperm.xlu1 %6118, %v8366_v45   ;;  %10162 = vst [vmem:[#allocation72_spill] sm:$0xff] %v8496_v61  ;;  %v8499_v53 = vpop.f32.mrb[21].mxu0  ;;  %v8536_v33 = vpop.permute.xlu1 %3248 }
 0x6d0   : > { %6120 = vset.pattern.permute.xlu0 %v6532_v5  ;;  %10163 = vst [vmem:[#allocation73_spill] sm:$0xff] %v8499_v53  ;;  %10175 = vst [vmem:[#allocation84_spill] sm:$0xff] %v8536_v33  ;;  %v10189_v33 = vld [vmem:[#allocation20_spill] sm:$0xff] }
 0x6d1   : > { %3474 = vperm.xlu0 %6120, %v8336_v54  }
 0x6d2   : > { %v8506_v59 = vpop.f32.mrb[22].mxu0 }
 0x6d3   : > { %3462 = vperm.xlu1 %6118, %v8380_v34   ;;  %10166 = vst [vmem:[#allocation74_spill] sm:$0xff] %v8506_v59  ;;  %v8509_v14 = vpop.f32.mrb[23].mxu0  ;;  %v8542_v47 = vpop.permute.xlu1 %3252  ;;  %v10204_v59 = vmov 55  }
 0x6d4   : > { %10167 = vst [vmem:[#allocation78_spill] sm:$0xff] %v8509_v14  ;;  %10177 = vst [vmem:[#allocation82_spill] sm:$0xff] %v8542_v47 }
 0x6d5   : > { %3486 = vperm.xlu0 %6120, %v8348_v18  }
 0x6d7   : > { %6121 = vset.pattern.permute.xlu1 %v6532_v5  ;;  %v8550_v5 = vpop.permute.xlu1 %3260 }
 0x6d8   : > { %3478 = vperm.xlu1 %6121, %v8360_v50   ;;  %10179 = vst [vmem:[#allocation83_spill] sm:$0xff] %v8550_v5 }
 0x6d9   : > { %3494 = vperm.xlu0 %6120, %v8366_v45  }
 0x6db   : > { %v8556_v29 = vpop.permute.xlu1 %3268 }
 0x6dc   : > { %3482 = vperm.xlu1 %6121, %v8342_v10   ;;  %10181 = vst [vmem:[#allocation91_spill] sm:$0xff] %v8556_v29 }
 0x6dd   : > { %3502 = vperm.xlu0 %6120, %v8380_v34  }
 0x6e0   : > { %3490 = vperm.xlu1 %6121, %v8354_v6   ;;  %v8563_v5 = vpop.permute.xlu1 %3284 }
 0x6e1   : > { %6123 = vset.pattern.permute.xlu0 %v6533_v42 }
 0x6e2   : > { %3655 = vperm.xlu0 %6123, %v8360_v50  }
 0x6e4   : > { %3498 = vperm.xlu1 %6121, %v8373_v25   ;;  %v8571_v29 = vpop.permute.xlu1 %3292 }
 0x6e6   : > { %3667 = vperm.xlu0 %6123, %v8354_v6  }
 0x6e8   : > { %6122 = vset.pattern.permute.xlu1 %v6533_v42  ;;  %v8553_v42 = vpop.permute.xlu0 %3256 }
 0x6e9   : > { %3651 = vperm.xlu1 %6122, %v8336_v54   ;;  %10180 = vst [vmem:[#allocation85_spill] sm:$0xff] %v8553_v42 }
 0x6ea   : > { %3675 = vperm.xlu0 %6123, %v8373_v25  }
 0x6ec   : > { %v8560_v12 = vpop.permute.xlu0 %3264 }
 0x6ed   : > { %3659 = vperm.xlu1 %6122, %v8342_v10   ;;  %10182 = vst [vmem:[#allocation98_spill] sm:$0xff] %v8560_v12  ;;  %v8576_v12 = vpop.permute.xlu1 %3296 }
 0x6ee   : > { %6124 = vset.pattern.permute.xlu0 %v6534_v49 }
 0x6ef   : > { %3691 = vperm.xlu0 %6124, %v8336_v54  }
 0x6f1   : > { %3663 = vperm.xlu1 %6122, %v8348_v18   ;;  %v8583_v11 = vpop.permute.xlu1 %3304 }
 0x6f3   : > { %3703 = vperm.xlu0 %6124, %v8348_v18  }
 0x6f5   : > { %3671 = vperm.xlu1 %6122, %v8366_v45   ;;  %v8591_v47 = vpop.permute.xlu1 %3312 }
 0x6f7   : > { %3711 = vperm.xlu0 %6124, %v8366_v45  }
 0x6f9   : > { %3679 = vperm.xlu1 %6122, %v8380_v34  }
 0x6fb   : > { %3719 = vperm.xlu0 %6124, %v8380_v34  }
 0x6fd   : > { %6125 = vset.pattern.permute.xlu1 %v6534_v49  ;;  %v8567_v49 = vpop.permute.xlu0 %3272 }
 0x6fe   : > { %3695 = vperm.xlu1 %6125, %v8360_v50   ;;  %10183 = vst [vmem:[#allocation92_spill] sm:$0xff] %v8567_v49 }
 0x6ff   : > { %6127 = vset.pattern.permute.xlu0 %v6535_v62 }
 0x700   : > { %4665 = vperm.xlu0 %6127, %v8336_v54  }
 0x702   : > { %3699 = vperm.xlu1 %6125, %v8342_v10  }
 0x704   : > { %6129 = vset.pattern.permute.xlu0 %v9841_v2  ;;  %v3289_v2 = vpop.permute.xlu0 %3288 }
 0x705   : > { %4705 = vperm.xlu0 %6129, %v8336_v54  }
 0x706   : > { %3707 = vperm.xlu1 %6125, %v8354_v6  }
 0x708   : > { %v8580_v49 = vpop.permute.xlu0 %3300 }
 0x709   : > { %4713 = vperm.xlu0 %6129, %v8342_v10  }
 0x70a   : > { %3715 = vperm.xlu1 %6125, %v8373_v25  }
 0x70d   : > { %4717 = vperm.xlu0 %6129, %v8348_v18  }
 0x70e   : > { %6126 = vset.pattern.permute.xlu1 %v9843_v56  ;;  %v8587_v56 = vpop.permute.xlu0 %3308 }
 0x70f   : > { %3801 = vperm.xlu1 %6126, %v8336_v54  }
 0x711   : > { %4721 = vperm.xlu0 %6129, %v8354_v6  }
 0x713   : > { %6128 = vset.pattern.permute.xlu1 %v6535_v62 }
 0x714   : > { %4669 = vperm.xlu1 %6128, %v8360_v50  }
 0x715   : > { %4725 = vperm.xlu0 %6129, %v8366_v45  }
 0x718   : > { %4673 = vperm.xlu1 %6128, %v8342_v10  }
 0x719   : > { %4729 = vperm.xlu0 %6129, %v8373_v25  }
 0x71a   : > { %v2965_v42 = vpop.xlane.xlu0 %2964 }
 0x71b   : > { %6273 = vrcp.f32 %v2965_v42 }
 0x71c   : > { %6130 = vset.pattern.permute.xlu1 %v10184_v1 }
 0x71d   : > { %4709 = vperm.xlu1 %6130, %v8360_v50   ;;  %6133 = vset.pattern.permute.xlu0 %v10185_v44 }
 0x71e   : > { %3805 = vperm.xlu0 %6133, %v8360_v50  }
 0x721   : > { %6131 = vset.pattern.permute.xlu1 %v6535_v62 }
 0x722   : > { %v2963_v30 = vpop.xlane.xlu1 %2962  ;;  %4677 = vperm.xlu1 %6131, %v8348_v18   ;;  %v2969_v57 = vpop.xlane.xlu0 %2968  ;;  %3809 = vperm.xlu0 %6133, %v8342_v10  }
 0x723   : > { %6275 = vrcp.f32 %v2963_v30 }
 0x724   : > { %6277 = vrcp.f32 %v2969_v57 }
 0x725   : > { %v6274_v30 = vpop.eup %6273 }
 0x726   : > { %4681 = vperm.xlu1 %6131, %v8354_v6   ;;  %v2967_v58 = vpop.xlane.xlu1 %2966  ;;  %v2973_v40 = vpop.xlane.xlu0 %2972  ;;  %3821 = vperm.xlu0 %6133, %v8366_v45  }
 0x727   : > { %6279 = vrcp.f32 %v2967_v58 }
 0x728   : > { %6281 = vrcp.f32 %v2973_v40  ;;  %v8608_v40 = vadd.f32 %v8604_v7, %v10187_v37 }
 0x72a   : > { %4685 = vperm.xlu1 %6131, %v8366_v45   ;;  %v2971_v62 = vpop.xlane.xlu1 %2970  ;;  %v2977_v42 = vpop.xlane.xlu0 %2976  ;;  %3825 = vperm.xlu0 %6133, %v8373_v25  }
 0x72b   : > { %6283 = vrcp.f32 %v2971_v62  ;;  %v2987_v62 = vmul.f32 %v6274_v30, %v8421_v48 }
 0x72c   : > { %6285 = vrcp.f32 %v2977_v42  ;;  %v8613_v42 = vld [vmem:[%s7356_s10] sm:$0xff] }
 0x72d   : > { %v6276_v9 = vpop.eup %6275  ;;  %10188 = vst [vmem:[#allocation87_spill] sm:$0xff] %v8613_v42  ;;  %v8617_v0 = vadd.f32 %v8613_v42, %v10189_v33  ;;  %v8627_v33 = vld [vmem:[%s7356_s10 + $0x10] sm:$0xff] }
 0x72e   : > { %4689 = vperm.xlu1 %6131, %v8373_v25   ;;  %v2975_v57 = vpop.xlane.xlu1 %2974  ;;  %v2986_v58 = vmul.f32 %v6276_v9, %v8428_v51  ;;  %6139 = vset.pattern.permute.xlu0 %v9851_v8  ;;  %v6278_v31 = vpop.eup %6277  ;;  %v3316_v51 = vmul.f32 %v3289_v2, %v8608_v40  ;;  %10190 = vst [vmem:[#allocation95_spill] sm:$0xff] %v8627_v33 }
 0x72f   : > { %6287 = vrcp.f32 %v2975_v57  ;;  %3849 = vperm.xlu0 %6139, %v8342_v10   ;;  %v3315_v48 = vmul.f32 %v8563_v5, %v8617_v0  ;;  %v10191_v57 = vld [vmem:[#allocation26_spill] sm:$0xff] }
 0x730   : > { %5660 = vmatprep.mubr.f32.mxu1 %v2986_v58  ;;  %v8631_v58 = vadd.f32 %v8627_v33, %v10191_v57 }
 0x731   : > { %v6280_v37 = vpop.eup %6279  ;;  %5661 = vmatmul.mubr.f32.vlgmr.msra.gmra.mrb[16].mxu1 %v2987_v62  ;;  %v2989_v62 = vmul.f32 %v6278_v31, %v8432_v4 }
 0x732   : > { %4693 = vperm.xlu1 %6131, %v8380_v34   ;;  %v3329_v9 = vpop.permute.xlu1 %3328  ;;  %v2988_v30 = vmul.f32 %v6280_v37, %v8436_v23  ;;  %5907 = vmatpush3.bf16.msra.mxu1 %v10139_v16  ;;  %v3325_v2 = vpop.permute.xlu0 %3324  ;;  %v10193_v23 = vld [vmem:[#allocation23_spill] sm:$0xff] }
 0x733   : > { %v8633_v8 = vadd.f32 %v3329_v9, %v3316_v51  ;;  %5909 = vmatprep.subr.bf16.mxu1 %v10142_v55  ;;  %v6282_v5 = vpop.eup %6281  ;;  %v8642_v37 = vadd.f32 %v8638_v26, %v10193_v23  ;;  %v8644_v35 = vadd.f32 %v3325_v2, %v3315_v48  ;;  %3865 = vperm.xlu0 %6139, %v8373_v25   ;;  %v8659_v2 = vld [vmem:[%s7356_s10 + $0x20] sm:$0xff] }
 0x734   : > { %5663 = vmatprep.mubr.f32.mxu1 %v2988_v30  ;;  %v3317_v9 = vmul.f32 %v8571_v29, %v8631_v58  ;;  %10194 = vst [vmem:[#allocation100_spill] sm:$0xff] %v8659_v2  ;;  %v10195_v29 = vld [vmem:[#allocation32_spill] sm:$0xff] }
 0x735   : > { %v6284_v51 = vpop.eup %6283  ;;  %v3364_v4 = vsel %vm1446_vm0, %v8633_v8, 0.0  ;;  %5664 = vmatmul.mubr.f32.gmra.mrb[18].mxu1 %v2989_v62  ;;  %v3318_v31 = vmul.f32 %v8576_v12, %v8642_v37  ;;  %v3363_v57 = vsel %vm1446_vm0, %v8644_v35, 0.0  ;;  %v8663_v23 = vadd.f32 %v8659_v2, %v10195_v29 }
 0x736   : > { %6132 = vset.pattern.permute.xlu1 %v10184_v1  ;;  %v3333_v48 = vpop.permute.xlu1 %3332  ;;  %v2990_v30 = vmul.f32 %v6284_v51, %v8444_v39  ;;  %5911 = vmatpush3.bf16.msra.mxu1 %v10142_v55  ;;  %v3337_v13 = vpop.permute.xlu0 %3336  ;;  %v2991_v12 = vmul.f32 %v6282_v5, %v8438_v20  ;;  %v10197_v39 = vld [vmem:[#allocation29_spill] sm:$0xff]  ;;  %v3365_v41 = vadd.f32 %v3364_v4, %v3363_v57 }
 0x737   : > { %v8665_v62 = vadd.f32 %v3333_v48, %v3317_v9  ;;  %4733 = vperm.xlu1 %6132, %v8380_v34   ;;  %5921 = vmatprep.subr.bf16.mxu1 %v10139_v16  ;;  %v6286_v1 = vpop.eup %6285  ;;  %v8675_v51 = vadd.f32 %v8671_v15, %v10197_v39  ;;  %v8677_v29 = vadd.f32 %v3337_v13, %v3318_v31  ;;  %v9857_v9 = vmov 54   ;;  %v10199_v39 = vld [vmem:[#allocation38_spill] sm:$0xff] }
 0x738   : > { %5666 = vmatprep.mubr.f32.mxu1 %v2990_v30  ;;  %6143 = vset.pattern.permute.xlu0 %v9857_v9  ;;  %v3319_v20 = vmul.f32 %v8580_v49, %v8663_v23  ;;  %v8689_v30 = vld [vmem:[%s7356_s10 + $0x30] sm:$0xff] }
 0x739   : > { %v6288_v48 = vpop.eup %6287  ;;  %v3366_v5 = vsel %vm1446_vm0, %v8665_v62, 0.0  ;;  %5667 = vmatmul.mubr.f32.gmra.mrb[20].mxu1 %v2991_v12  ;;  %4819 = vperm.xlu0 %6143, %v8360_v50   ;;  %v3320_v4 = vmul.f32 %v8583_v11, %v8675_v51  ;;  %10198 = vst [vmem:[#allocation97_spill] sm:$0xff] %v8689_v30  ;;  %v8693_v9 = vadd.f32 %v8689_v30, %v10199_v39  ;;  %v3368_v49 = vsel %vm1446_vm0, %v8677_v29, 0.0 }
 0x73a   : > { %v3367_v13 = vadd.f32 %v3366_v5, %v3365_v41  ;;  %v3341_v31 = vpop.permute.xlu1 %3340  ;;  %v2992_v57 = vmul.f32 %v6288_v48, %v8450_v24  ;;  %v3345_v12 = vpop.permute.xlu0 %3344  ;;  %v2993_v11 = vmul.f32 %v6286_v1, %v8446_v46  ;;  %v8702_v41 = vld [vmem:[%s7356_s10 + $0x38] sm:$0xff]  ;;  %v10202_v5 = vld [vmem:[#allocation35_spill] sm:$0xff] }
 0x73b   : > { %v8697_v52 = vadd.f32 %v3341_v31, %v3319_v20  ;;  %6134 = vset.pattern.permute.xlu1 %v10200_v60  ;;  %10201 = vst [vmem:[#allocation96_spill] sm:$0xff] %v8702_v41  ;;  %v8706_v24 = vadd.f32 %v8702_v41, %v10202_v5  ;;  %v3360_v27 = vadd.f32 %v3345_v12, %v3320_v4 }
 0x73c   : > { %v3369_v48 = vadd.f32 %v3368_v49, %v3367_v13  ;;  %3841 = vperm.xlu1 %6134, %v8336_v54   ;;  %5669 = vmatprep.mubr.f32.mxu1 %v2992_v57  ;;  %v3321_v20 = vmul.f32 %v8587_v56, %v8693_v9 }
 0x73d   : > { %v3370_v31 = vsel %vm1446_vm0, %v8697_v52, 0.0  ;;  %5670 = vmatmul.mubr.f32.gmra.mrb[22].mxu1 %v2993_v11  ;;  %4823 = vperm.xlu0 %6143, %v8342_v10   ;;  %v3322_v46 = vmul.f32 %v8591_v47, %v8706_v24  ;;  %v3372_v13 = vsel %vm1446_vm0, %v3360_v27, 0.0 }
 0x73e   : > { %v3371_v1 = vadd.f32 %v3370_v31, %v3369_v48  ;;  %v3349_v39 = vpop.permute.xlu1 %3348  ;;  %v3353_v49 = vpop.permute.xlu0 %3352 }
 0x73f   : > { %v3361_v4 = vadd.f32 %v3349_v39, %v3321_v20  ;;  %v3362_v57 = vadd.f32 %v3353_v49, %v3322_v46  ;;  %v9861_v39 = vmov 55  }
 0x740   : > { %v3373_v12 = vadd.f32 %v3372_v13, %v3371_v1  ;;  %3845 = vperm.xlu1 %6134, %v8360_v50  }
 0x741   : > { %v3374_v56 = vsel %vm1446_vm0, %v3361_v4, 0.0  ;;  %4835 = vperm.xlu0 %6143, %v8366_v45   ;;  %v3376_v19 = vsel %vm1446_vm0, %v3362_v57, 0.0 }
 0x742   : > { %v3375_v11 = vadd.f32 %v3374_v56, %v3373_v12  ;;  %v8720_v5 = vpop.permute.xlu1 %3434 }
 0x743   : > { %v8724_v48 = vpop.permute.xlu0 %3438 }
 0x744   : > { %v3377_v47 = vadd.f32 %v3376_v19, %v3375_v11  ;;  %6135 = vset.pattern.permute.xlu1 %v10185_v44 }
 0x745   : > { %3813 = vperm.xlu1 %6135, %v8348_v18   ;;  %4839 = vperm.xlu0 %6143, %v8373_v25  }
 0x746   : > { %v3378_v20 = vrot.slane %v3377_v47, 4  ;;  %v8728_v31 = vpop.permute.xlu1 %3442 }
 0x747   : > { %v8730_v1 = vpop.permute.xlu0 %3450 }
 0x748   : > { %v3379_v46 = vadd.f32 %v3378_v20, %v3377_v47 }
 0x749   : > { %6136 = vset.pattern.permute.xlu1 %v10200_v60  ;;  %6149 = vset.pattern.permute.xlu0 %v9861_v39 }
 0x74a   : > { %v3380_v19 = vrot.slane %v3379_v46, 2  ;;  %3853 = vperm.xlu1 %6136, %v8348_v18   ;;  %v8735_v13 = vpop.permute.xlu1 %3446  ;;  %4863 = vperm.xlu0 %6149, %v8342_v10  }
 0x74b   : > { %v8738_v12 = vpop.permute.xlu0 %3458 }
 0x74c   : > { %v3381_v49 = vadd.f32 %v3380_v19, %v3379_v46 }
 0x74e   : > { %v3382_v56 = vrot.slane %v3381_v49, 1  ;;  %6137 = vset.pattern.permute.xlu1 %v10185_v44  ;;  %v8741_v11 = vpop.permute.xlu1 %3454  ;;  %4879 = vperm.xlu0 %6149, %v8373_v25  }
 0x74f   : > { %3817 = vperm.xlu1 %6137, %v8354_v6  }
 0x750   : > { %v3383_v47 = vadd.f32 %v3382_v56, %v3381_v49  ;;  %v8745_v20 = vpop.permute.xlu0 %3474 }
 0x752   : > { %v3384_v39 = vmul.f32 0.015625, %v3383_v47  ;;  %v8747_v17 = vpop.permute.xlu1 %3462 }
 0x753   : > { %6138 = vset.pattern.permute.xlu1 %v10200_v60 }
 0x754   : > { %v8751_v10 = vsub.f32 %v8633_v8, %v3384_v39  ;;  %v8754_v46 = vsub.f32 %v8665_v62, %v3384_v39  ;;  %3857 = vperm.xlu1 %6138, %v8354_v6   ;;  %v8758_v25 = vsub.f32 %v8677_v29, %v3384_v39  ;;  %v8761_v19 = vsub.f32 %v8644_v35, %v3384_v39  ;;  %v8765_v56 = vpop.permute.xlu0 %3486 }
 0x755   : > { %v8768_v47 = vsub.f32 %v8697_v52, %v3384_v39  ;;  %v8778_v35 = vsub.f32 %v3360_v27, %v3384_v39  ;;  %v8783_v3 = vsub.f32 %v3361_v4, %v3384_v39  ;;  %v8793_v27 = vsub.f32 %v3362_v57, %v3384_v39 }
 0x756   : > { %v3394_v49 = vmul.f32 %v8751_v10, %v8751_v10  ;;  %v3393_v8 = vmul.f32 %v8761_v19, %v8761_v19  ;;  %v3395_v62 = vmul.f32 %v8754_v46, %v8754_v46  ;;  %v3396_v21 = vmul.f32 %v8758_v25, %v8758_v25 }
 0x757   : > { %v8774_v38 = vpop.permute.xlu1 %3478  ;;  %v3397_v28 = vmul.f32 %v8768_v47, %v8768_v47 }
 0x758   : > { %v3402_v29 = vsel %vm1446_vm0, %v3394_v49, 0.0  ;;  %3861 = vperm.xlu1 %6138, %v8366_v45   ;;  %v3401_v52 = vsel %vm1446_vm0, %v3393_v8, 0.0  ;;  %v3404_v30 = vsel %vm1446_vm0, %v3395_v62, 0.0  ;;  %v8790_v2 = vpop.permute.xlu0 %3494  ;;  %v3398_v8 = vmul.f32 %v8778_v35, %v8778_v35 }
 0x759   : > { %v3403_v36 = vadd.f32 %v3402_v29, %v3401_v52  ;;  %v3406_v4 = vsel %vm1446_vm0, %v3396_v21, 0.0  ;;  %v3399_v62 = vmul.f32 %v8783_v3, %v8783_v3  ;;  %v3408_v52 = vsel %vm1446_vm0, %v3397_v28, 0.0 }
 0x75a   : > { %v3410_v57 = vsel %vm1446_vm0, %v3398_v8, 0.0  ;;  %v9873_v8 = vmov 56  }
 0x75b   : > { %v8788_v41 = vpop.permute.xlu1 %3482  ;;  %v3405_v49 = vadd.f32 %v3404_v30, %v3403_v36  ;;  %6152 = vset.pattern.permute.xlu0 %v9873_v8 }
 0x75c   : > { %6140 = vset.pattern.permute.xlu1 %v10185_v44  ;;  %v3400_v44 = vmul.f32 %v8793_v27, %v8793_v27  ;;  %v8808_v21 = vpop.permute.xlu0 %3502 }
 0x75d   : > { %3829 = vperm.xlu1 %6140, %v8380_v34   ;;  %v3407_v29 = vadd.f32 %v3406_v4, %v3405_v49  ;;  %v3412_v49 = vsel %vm1446_vm0, %v3399_v62, 0.0 }
 0x75e   : > { %v3414_v15 = vsel %vm1446_vm0, %v3400_v44, 0.0 }
 0x75f   : > { %v8802_v36 = vpop.permute.xlu1 %3490  ;;  %v3409_v30 = vadd.f32 %v3408_v52, %v3407_v29  ;;  %v10203_v52 = vmov 54  }
 0x761   : > { %6141 = vset.pattern.permute.xlu1 %v10200_v60  ;;  %v3411_v39 = vadd.f32 %v3410_v57, %v3409_v30  ;;  %v3656_v30 = vpop.permute.xlu0 %3655 }
 0x762   : > { %3869 = vperm.xlu1 %6141, %v8380_v34  }
 0x763   : > { %v8812_v4 = vpop.permute.xlu1 %3498  ;;  %v3413_v28 = vadd.f32 %v3412_v49, %v3411_v39 }
 0x765   : > { %v3415_v29 = vadd.f32 %v3414_v15, %v3413_v28  ;;  %v3668_v44 = vpop.permute.xlu0 %3667 }
 0x766   : > { %6142 = vset.pattern.permute.xlu1 %v10203_v52 }
 0x767   : > { %4815 = vperm.xlu1 %6142, %v8336_v54   ;;  %v3416_v60 = vrot.slane %v3415_v29, 4 }
 0x768   : > { %v3652_v57 = vpop.permute.xlu1 %3651 }
 0x769   : > { %v3417_v14 = vadd.f32 %v3416_v60, %v3415_v29  ;;  %v3676_v26 = vpop.permute.xlu0 %3675 }
 0x76b   : > { %6144 = vset.pattern.permute.xlu1 %v10204_v59  ;;  %v3418_v62 = vrot.slane %v3417_v14, 2 }
 0x76c   : > { %v3660_v33 = vpop.permute.xlu1 %3659  ;;  %4855 = vperm.xlu1 %6144, %v8336_v54  }
 0x76d   : > { %v3419_v39 = vadd.f32 %v3418_v62, %v3417_v14  ;;  %v3683_v62 = vmul.f32 %v3656_v30, %v8608_v40 }
 0x76e   : > { %v3692_v54 = vpop.permute.xlu0 %3691 }
 0x76f   : > { %v3420_v15 = vrot.slane %v3419_v39, 1 }
 0x770   : > { %v3664_v49 = vpop.permute.xlu1 %3663  ;;  %4859 = vperm.xlu1 %6144, %v8360_v50  }
 0x771   : > { %v3421_v28 = vadd.f32 %v3420_v15, %v3419_v39  ;;  %v3682_v15 = vmul.f32 %v3652_v57, %v8617_v0  ;;  %v3685_v61 = vmul.f32 %v3664_v49, %v8642_v37 }
 0x772   : > { %v3704_v50 = vpop.permute.xlu0 %3703 }
 0x773   : > { %v3422_v53 = vmul.f32 0.015625, %v3421_v28  ;;  %v8836_v22 = vadd.f32 %v3692_v54, %v3682_v15  ;;  %v3686_v54 = vmul.f32 %v3668_v44, %v8663_v23  ;;  %v8850_v15 = vadd.f32 %v3704_v50, %v3685_v61 }
 0x774   : > { %v3672_v8 = vpop.permute.xlu1 %3671  ;;  %6145 = vset.pattern.permute.xlu1 %v10203_v52 }
 0x775   : > { %4827 = vperm.xlu1 %6145, %v8348_v18   ;;  %v3423_v29 = vadd.f32 1e-08, %v3422_v53 }
 0x776   : > { %v3712_v7 = vpop.permute.xlu0 %3711 }
 0x777   : > { %6289 = vrsqrt.f32 %v3423_v29  ;;  %v3684_v29 = vmul.f32 %v3660_v33, %v8631_v58 }
 0x778   : > { %v3680_v60 = vpop.permute.xlu1 %3679 }
 0x779   : > { %6146 = vset.pattern.permute.xlu1 %v10204_v59 }
 0x77a   : > { %4867 = vperm.xlu1 %6146, %v8348_v18  }
 0x77d   : > { %v3696_v14 = vpop.permute.xlu1 %3695 }
 0x77e   : > { %6147 = vset.pattern.permute.xlu1 %v10203_v52  ;;  %v8828_v39 = vadd.f32 %v3696_v14, %v3683_v62 }
 0x77f   : > { %4831 = vperm.xlu1 %6147, %v8354_v6  }
 0x780   : > { %v3731_v57 = vsel %vm1446_vm0, %v8828_v39, 0.0 }
 0x781   : > { %v3700_v53 = vpop.permute.xlu1 %3699  ;;  %v6290_v28 = vpop.eup %6289 }
 0x782   : > { %v3425_v18 = vmul.f32 %v6290_v28, %v8761_v19  ;;  %v3426_v42 = vmul.f32 %v6290_v28, %v8751_v10  ;;  %v3427_v30 = vmul.f32 %v6290_v28, %v8754_v46  ;;  %v3428_v14 = vmul.f32 %v6290_v28, %v8758_v25 }
 0x783   : > { %6148 = vset.pattern.permute.xlu1 %v10204_v59  ;;  %v8842_v62 = vadd.f32 %v3700_v53, %v3684_v29  ;;  %v3429_v46 = vmul.f32 %v6290_v28, %v8768_v47  ;;  %v3687_v25 = vmul.f32 %v3672_v8, %v8675_v51  ;;  %v3430_v47 = vmul.f32 %v6290_v28, %v8778_v35 }
 0x784   : > { %4871 = vperm.xlu1 %6148, %v8354_v6   ;;  %v3465_v33 = vmul.f32 %v8720_v5, %v3425_v18  ;;  %v3466_v19 = vmul.f32 %v8724_v48, %v3426_v42  ;;  %v3467_v10 = vmul.f32 %v8728_v31, %v3427_v30  ;;  %v3688_v5 = vmul.f32 %v3676_v26, %v8693_v9  ;;  %v3720_v18 = vpop.permute.xlu0 %3719 }
 0x785   : > { %v3708_v49 = vpop.permute.xlu1 %3707  ;;  %v3730_v42 = vsel %vm1446_vm0, %v8836_v22, 0.0  ;;  %v3468_v48 = vmul.f32 %v8735_v13, %v3428_v14  ;;  %v3431_v31 = vmul.f32 %v6290_v28, %v8783_v3  ;;  %v3469_v8 = vmul.f32 %v8730_v1, %v3429_v46 }
 0x786   : > { %v3505_v53 = vadd.f32 %v8745_v20, %v3465_v33  ;;  %v3506_v6 = vadd.f32 %v8774_v38, %v3466_v19  ;;  %v3732_v61 = vadd.f32 %v3731_v57, %v3730_v42  ;;  %v3507_v20 = vadd.f32 %v8788_v41, %v3467_v10 }
 0x787   : > { %v3733_v38 = vsel %vm1446_vm0, %v8842_v62, 0.0  ;;  %v8866_v26 = vadd.f32 %v3708_v49, %v3686_v54  ;;  %v3735_v3 = vsel %vm1446_vm0, %v8850_v15, 0.0  ;;  %v8871_v13 = vadd.f32 %v3712_v7, %v3687_v25 }
 0x788   : > { %4875 = vperm.xlu1 %6148, %v8366_v45   ;;  %5680 = vmatprep.mubr.msk.f32.mxu0 %vm1446_vm0, %v3505_v53  ;;  %v3734_v35 = vadd.f32 %v3733_v38, %v3732_v61  ;;  %v3432_v45 = vmul.f32 %v6290_v28, %v8793_v27  ;;  %v3689_v41 = vmul.f32 %v3680_v60, %v8706_v24  ;;  %v10205_v54 = vmov 56  }
 0x789   : > { %v3716_v44 = vpop.permute.xlu1 %3715  ;;  %5681 = vmatmul.mubr.msk.f32.vlgmr.msra.gmra.mrb[24].mxu0 %vm1446_vm0, %v3506_v6  ;;  %v3737_v1 = vsel %vm1446_vm0, %v8866_v26, 0.0  ;;  %v3470_v29 = vmul.f32 %v8741_v11, %v3430_v47  ;;  %v3508_v7 = vadd.f32 %v8765_v56, %v3468_v48  ;;  %v3471_v27 = vmul.f32 %v8738_v12, %v3431_v31 }
 0x78a   : > { %v8878_v50 = vadd.f32 %v3716_v44, %v3688_v5  ;;  %5683 = vmatprep.mubr.msk.f32.mxu0 %vm1446_vm0, %v3507_v20  ;;  %5915 = vmatpush3.bf16.msra.mxu0 %v10139_v16  ;;  %v3736_v30 = vadd.f32 %v3735_v3, %v3734_v35  ;;  %v3509_v60 = vadd.f32 %v8802_v36, %v3469_v8  ;;  %v3739_v11 = vsel %vm1446_vm0, %v8871_v13, 0.0 }
 0x78b   : > { %5917 = vmatprep.subr.bf16.mxu0 %v10142_v55  ;;  %v3729_v56 = vadd.f32 %v3720_v18, %v3689_v41  ;;  %v3472_v12 = vmul.f32 %v8747_v17, %v3432_v45  ;;  %v3510_v36 = vadd.f32 %v8790_v2, %v3470_v29  ;;  %v3511_v33 = vadd.f32 %v8812_v4, %v3471_v27  ;;  %v8910_v4 = vpop.permute.xlu0 %4665 }
 0x78c   : > { %6150 = vset.pattern.permute.xlu1 %v10203_v52  ;;  %v3738_v28 = vadd.f32 %v3737_v1, %v3736_v30  ;;  %v3741_v52 = vsel %vm1446_vm0, %v8878_v50, 0.0 }
 0x78d   : > { %4843 = vperm.xlu1 %6150, %v8380_v34   ;;  %5684 = vmatmul.mubr.msk.f32.gmra.mrb[26].mxu0 %vm1446_vm0, %v3508_v7  ;;  %v3743_v10 = vsel %vm1446_vm0, %v3729_v56, 0.0  ;;  %v3512_v17 = vadd.f32 %v8808_v21, %v3472_v12 }
 0x78e   : > { %v8890_v14 = vpop.permute.xlu1 %3801  ;;  %5686 = vmatprep.mubr.msk.f32.mxu0 %vm1446_vm0, %v3509_v60  ;;  %5919 = vmatpush3.bf16.msra.mxu0 %v10142_v55  ;;  %v3740_v57 = vadd.f32 %v3739_v11, %v3738_v28 }
 0x78f   : > { %v8917_v42 = vpop.permute.xlu0 %4705 }
 0x790   : > { %v3742_v19 = vadd.f32 %v3741_v52, %v3740_v57 }
 0x791   : > { %6151 = vset.pattern.permute.xlu1 %v10204_v59  ;;  %5687 = vmatmul.mubr.msk.f32.gmra.mrb[28].mxu0 %vm1446_vm0, %v3510_v36 }
 0x792   : > { %4883 = vperm.xlu1 %6151, %v8380_v34   ;;  %5689 = vmatprep.mubr.msk.f32.mxu0 %vm1446_vm0, %v3511_v33  ;;  %v3744_v49 = vadd.f32 %v3743_v10, %v3742_v19 }
 0x793   : > { %v8906_v46 = vpop.permute.xlu1 %4669  ;;  %v8921_v61 = vpop.permute.xlu0 %4713 }
 0x794   : > { %v3745_v2 = vrot.slane %v3744_v49, 4 }
 0x795   : > { %5690 = vmatmul.mubr.msk.f32.gmra.mrb[30].mxu0 %vm1446_vm0, %v3512_v17 }
 0x796   : > { %6153 = vset.pattern.permute.xlu1 %v10205_v54  ;;  %v3746_v53 = vadd.f32 %v3745_v2, %v3744_v49 }
 0x797   : > { %v8913_v25 = vpop.permute.xlu1 %4673  ;;  %v8933_v7 = vpop.permute.xlu0 %4717 }
 0x798   : > { %v3747_v34 = vrot.slane %v3746_v53, 2 }
 0x79a   : > { %v3748_v6 = vadd.f32 %v3747_v34, %v3746_v53 }
 0x79b   : > { %v8948_v36 = vpop.permute.xlu0 %4721 }
 0x79c   : > { %v8915_v5 = vpop.permute.xlu1 %4709  ;;  %v3749_v48 = vrot.slane %v3748_v6, 1 }
 0x79e   : > { %v3750_v31 = vadd.f32 %v3749_v48, %v3748_v6 }
 0x79f   : > { %v8957_v53 = vpop.permute.xlu0 %4725 }
 0x7a0   : > { %v3751_v47 = vmul.f32 0.015625, %v3750_v31 }
 0x7a1   : > { %v8919_v21 = vpop.permute.xlu1 %4677 }
 0x7a2   : > { %v3753_v8 = vsub.f32 %v8828_v39, %v3751_v47  ;;  %v3754_v20 = vsub.f32 %v8842_v62, %v3751_v47  ;;  %v3752_v38 = vsub.f32 %v8836_v22, %v3751_v47  ;;  %v3755_v44 = vsub.f32 %v8850_v15, %v3751_v47 }
 0x7a3   : > { %v8930_v45 = vsub.f32 %v8866_v26, %v3751_v47  ;;  %v3757_v39 = vsub.f32 %v8871_v13, %v3751_v47  ;;  %v3758_v30 = vsub.f32 %v8878_v50, %v3751_v47  ;;  %v8943_v28 = vsub.f32 %v3729_v56, %v3751_v47 }
 0x7a4   : > { %v3761_v35 = vmul.f32 %v3753_v8, %v3753_v8  ;;  %v3760_v41 = vmul.f32 %v3752_v38, %v3752_v38  ;;  %v3762_v1 = vmul.f32 %v3754_v20, %v3754_v20  ;;  %v3763_v18 = vmul.f32 %v3755_v44, %v3755_v44 }
 0x7a5   : > { %v8927_v3 = vpop.permute.xlu1 %4681  ;;  %v3764_v26 = vmul.f32 %v8930_v45, %v8930_v45  ;;  %v3765_v11 = vmul.f32 %v3757_v39, %v3757_v39  ;;  %v3766_v57 = vmul.f32 %v3758_v30, %v3758_v30  ;;  %v3767_v19 = vmul.f32 %v8943_v28, %v8943_v28 }
 0x7a6   : > { %v3769_v29 = vsel %vm1446_vm0, %v3761_v35, 0.0  ;;  %v3768_v62 = vsel %vm1446_vm0, %v3760_v41, 0.0  ;;  %v3771_v27 = vsel %vm1446_vm0, %v3762_v1, 0.0  ;;  %v3773_v52 = vsel %vm1446_vm0, %v3763_v18, 0.0  ;;  %v8962_v35 = vpop.permute.xlu0 %4729 }
 0x7a7   : > { %v3770_v15 = vadd.f32 %v3769_v29, %v3768_v62  ;;  %v3775_v33 = vsel %vm1446_vm0, %v3764_v26, 0.0  ;;  %v3777_v10 = vsel %vm1446_vm0, %v3765_v11, 0.0  ;;  %v3779_v49 = vsel %vm1446_vm0, %v3766_v57, 0.0 }
 0x7a8   : > { %v3781_v34 = vsel %vm1446_vm0, %v3767_v19, 0.0 }
 0x7a9   : > { %v8937_v22 = vpop.permute.xlu1 %4685  ;;  %v3772_v60 = vadd.f32 %v3771_v27, %v3770_v15 }
 0x7aa   : > { %v3806_v15 = vpop.permute.xlu0 %3805 }
 0x7ab   : > { %v3774_v12 = vadd.f32 %v3773_v52, %v3772_v60 }
 0x7ad   : > { %v8946_v13 = vpop.permute.xlu1 %4689  ;;  %v3776_v50 = vadd.f32 %v3775_v33, %v3774_v12 }
 0x7ae   : > { %v3810_v52 = vpop.permute.xlu0 %3809 }
 0x7af   : > { %v3778_v56 = vadd.f32 %v3777_v10, %v3776_v50 }
 0x7b1   : > { %v8954_v17 = vpop.permute.xlu1 %4693  ;;  %v3780_v2 = vadd.f32 %v3779_v49, %v3778_v56 }
 0x7b2   : > { %v3822_v57 = vpop.permute.xlu0 %3821 }
 0x7b3   : > { %v3782_v6 = vadd.f32 %v3781_v34, %v3780_v2 }
 0x7b5   : > { %v3783_v31 = vrot.slane %v3782_v6, 4 }
 0x7b6   : > { %v8960_v48 = vpop.permute.xlu1 %4733  ;;  %v3826_v19 = vpop.permute.xlu0 %3825 }
 0x7b7   : > { %v3784_v47 = vadd.f32 %v3783_v31, %v3782_v6 }
 0x7b9   : > { %v3785_v1 = vrot.slane %v3784_v47, 2 }
 0x7bb   : > { %v3842_v41 = vpop.permute.xlu1 %3841  ;;  %v3786_v29 = vadd.f32 %v3785_v1, %v3784_v47 }
 0x7bd   : > { %v3787_v62 = vrot.slane %v3786_v29, 1 }
 0x7bf   : > { %v3846_v18 = vpop.permute.xlu1 %3845  ;;  %v3788_v26 = vadd.f32 %v3787_v62, %v3786_v29 }
 0x7c1   : > { %v3789_v27 = vmul.f32 0.015625, %v3788_v26 }
 0x7c3   : > { %v3790_v11 = vadd.f32 1e-08, %v3789_v27 }
 0x7c4   : > { %v3814_v60 = vpop.permute.xlu1 %3813 }
 0x7c5   : > { %6291 = vrsqrt.f32 %v3790_v11 }
 0x7c9   : > { %v3854_v12 = vpop.permute.xlu1 %3853 }
 0x7ce   : > { %v3818_v33 = vpop.permute.xlu1 %3817 }
 0x7cf   : > { %v6292_v50 = vpop.eup %6291 }
 0x7d0   : > { %v3792_v10 = vmul.f32 %v6292_v50, %v3752_v38  ;;  %v3793_v56 = vmul.f32 %v6292_v50, %v3753_v8  ;;  %v3794_v49 = vmul.f32 %v6292_v50, %v3754_v20  ;;  %v3795_v2 = vmul.f32 %v6292_v50, %v3755_v44  ;;  %v3850_v38 = vpop.permute.xlu0 %3849 }
 0x7d1   : > { %v3797_v6 = vmul.f32 %v6292_v50, %v3757_v39  ;;  %v3796_v27 = vmul.f32 %v6292_v50, %v8930_v45  ;;  %v3798_v55 = vmul.f32 %v6292_v50, %v3758_v30 }
 0x7d2   : > { %v3832_v31 = vmul.f32 %v8890_v14, %v3792_v10  ;;  %v3833_v47 = vmul.f32 %v3806_v15, %v3793_v56  ;;  %v3834_v1 = vmul.f32 %v3810_v52, %v3794_v49  ;;  %v3835_v29 = vmul.f32 %v3814_v60, %v3795_v2  ;;  %v10209_v49 = vld [vmem:[#allocation28_spill] sm:$0xff] }
 0x7d3   : > { %v3858_v34 = vpop.permute.xlu1 %3857  ;;  %v3837_v59 = vmul.f32 %v3822_v57, %v3797_v6  ;;  %v3836_v39 = vmul.f32 %v3818_v33, %v3796_v27  ;;  %v2249_v2 = vmul.f32 %v10209_v49, %v8663_v23  ;;  %v10210_v6 = vld [vmem:[#allocation33_spill] sm:$0xff]  ;;  %v10213_v27 = vld [vmem:[#allocation22_spill] sm:$0xff] }
 0x7d4   : > { %v8965_v62 = vadd.f32 %v3842_v41, %v3832_v31  ;;  %v8967_v26 = vadd.f32 %v3846_v18, %v3833_v47  ;;  %v8970_v8 = vadd.f32 %v3854_v12, %v3835_v29  ;;  %v8972_v20 = vadd.f32 %v3850_v38, %v3834_v1  ;;  %v3866_v52 = vpop.permute.xlu0 %3865  ;;  %v9018_v47 = vld [vmem:[%s9807_s2] sm:$0xff]  ;;  %v10212_v1 = vld [vmem:[#allocation10_spill] sm:$0xff] }
 0x7d5   : > { %v3838_v18 = vmul.f32 %v3826_v19, %v3798_v55  ;;  %v8980_v15 = vadd.f32 %v3858_v34, %v3836_v39  ;;  %v3799_v12 = vmul.f32 %v6292_v50, %v8943_v28  ;;  %v9002_v50 = vld [vmem:[%s9807_s2 + $0x8] sm:$0xff]  ;;  %v9010_v34 = vld [vmem:[%s9807_s2 + $0x10] sm:$0xff]  ;;  %v2246_v31 = vmul.f32 %v10210_v6, %v8608_v40  ;;  %10211 = vst [vmem:[#allocation20_spill] sm:$0xff] %v9018_v47 }
 0x7d6   : > { %v3883_v14 = vsel %vm1446_vm0, %v8967_v26, -inf  ;;  %v3880_v44 = vsel %vm1446_vm0, %v8965_v62, -inf  ;;  %v3886_v30 = vsel %vm1446_vm0, %v8972_v20, -inf  ;;  %v3889_v60 = vsel %vm1446_vm0, %v8970_v8, -inf  ;;  %10208 = vst [vmem:[#allocation17_spill] sm:$0xff] %v9002_v50  ;;  %v10214_v38 = vld [vmem:[#allocation14_spill] sm:$0xff] }
 0x7d7   : > { %v3862_v11 = vpop.permute.xlu1 %3861  ;;  %3884 = vmax.xlane.f32.xlu0 %v3883_v14  ;;  %3881 = vmax.xlane.f32.xlu1 %v3880_v44  ;;  %v8989_v33 = vadd.f32 %v3866_v52, %v3838_v18  ;;  %v3892_v55 = vsel %vm1446_vm0, %v8980_v15, -inf  ;;  %v2245_v29 = vmul.f32 %v10212_v1, %v8617_v0  ;;  %v9025_v14 = vadd.f32 %v10214_v38, %v2249_v2  ;;  %v10215_v44 = vld [vmem:[#allocation9_spill] sm:$0xff] }
 0x7d8   : > { %v8978_v41 = vadd.f32 %v3862_v11, %v3837_v59  ;;  %v2286_v11 = vadd.f32 %v10213_v27, %v2246_v31  ;;  %v2251_v39 = vmul.f32 %v10215_v44, %v8693_v9  ;;  %v10221_v2 = vld [vmem:[#allocation25_spill] sm:$0xff]  ;;  %v10222_v31 = vld [vmem:[#allocation12_spill] sm:$0xff] }
 0x7d9   : > { %10206 = vst [vmem:[#allocation101_spill] sm:$0xff] %v8989_v33  ;;  %v3898_v28 = vsel %vm1446_vm0, %v8989_v33, -inf  ;;  %v2333_v6 = vmul.f32 %v10221_v2, %v8617_v0  ;;  %v10224_v38 = vld [vmem:[#allocation45_spill] sm:$0xff] }
 0x7da   : > { %v3895_v57 = vsel %vm1446_vm0, %v8978_v41, -inf }
 0x7db   : > { %3887 = vmax.xlane.f32.xlu0 %v3886_v30  ;;  %3890 = vmax.xlane.f32.xlu1 %v3889_v60  ;;  %v9879_v30 = vmov 57   ;;  %v10217_v60 = vld [vmem:[#allocation7_spill] sm:$0xff] }
 0x7dc   : > { %v3830_v45 = vpop.permute.xlu1 %3829  ;;  %v2285_v52 = vadd.f32 %v10217_v60, %v2245_v29  ;;  %v10223_v29 = vld [vmem:[#allocation41_spill] sm:$0xff] }
 0x7dd   : > { %v3839_v59 = vmul.f32 %v3830_v45, %v3799_v12  ;;  %v10216_v45 = vld [vmem:[#allocation18_spill] sm:$0xff]  ;;  %v9036_v12 = vld [vmem:[%s9807_s2 + $0x30] sm:$0xff] }
 0x7de   : > { %v2334_v18 = vmul.f32 %v10216_v45, %v8608_v40  ;;  %v10225_v45 = vld [vmem:[#allocation43_spill] sm:$0xff] }
 0x7df   : > { %3893 = vmax.xlane.f32.xlu0 %v3892_v55  ;;  %3896 = vmax.xlane.f32.xlu1 %v3895_v57  ;;  %v10218_v57 = vld [vmem:[#allocation8_spill] sm:$0xff]  ;;  %v10219_v55 = vld [vmem:[#allocation15_spill] sm:$0xff]  ;;  %v9053_v60 = vadd.f32 %v10225_v45, %v2251_v39 }
 0x7e0   : > { %v2248_v40 = vmul.f32 %v10219_v55, %v8642_v37  ;;  %v2374_v44 = vadd.f32 %v10224_v38, %v2334_v18  ;;  %v10231_v39 = vld [vmem:[#allocation44_spill] sm:$0xff]  ;;  %v10233_v38 = vld [vmem:[#allocation11_spill] sm:$0xff] }
 0x7e1   : > { %v3870_v19 = vpop.permute.xlu1 %3869  ;;  %v2335_v45 = vmul.f32 %v10233_v38, %v8631_v58 }
 0x7e2   : > { %v8993_v10 = vadd.f32 %v3870_v19, %v3839_v59  ;;  %v2247_v59 = vmul.f32 %v10218_v57, %v8631_v58  ;;  %v2294_v19 = vmax.f32 %v2286_v11, 0.0  ;;  %v2288_v27 = vadd.f32 %v10223_v29, %v2248_v40  ;;  %v10226_v57 = vld [vmem:[#allocation27_spill] sm:$0xff] }
 0x7e3   : > { %3899 = vmax.xlane.f32.xlu0 %v3898_v28  ;;  %v10220_v28 = vld [vmem:[#allocation16_spill] sm:$0xff]  ;;  %v2252_v11 = vmul.f32 %v10226_v57, %v8706_v24  ;;  %v2340_v40 = vmul.f32 %v10231_v39, %v8706_v24 }
 0x7e4   : > { %10207 = vst [vmem:[#allocation99_spill] sm:$0xff] %v8993_v10  ;;  %v3901_v56 = vsel %vm1446_vm0, %v8993_v10, -inf  ;;  %v2250_v49 = vmul.f32 %v10220_v28, %v8675_v51  ;;  %v2287_v1 = vadd.f32 %v10222_v31, %v2247_v59  ;;  %v10228_v28 = vld [vmem:[#allocation40_spill] sm:$0xff]  ;;  %v10230_v59 = vld [vmem:[#allocation34_spill] sm:$0xff]  ;;  %v2701_v2 = vmul.f32 %v8481_v43, %v2294_v19  ;;  %v10232_v31 = vld [vmem:[#allocation19_spill] sm:$0xff] }
 0x7e5   : > { %3902 = vmax.xlane.f32.xlu1 %v3901_v56  ;;  %v2297_v56 = vmax.f32 %v9025_v14, 0.0  ;;  %v10227_v14 = vld [vmem:[#allocation24_spill] sm:$0xff]  ;;  %v2373_v16 = vadd.f32 %v10228_v28, %v2333_v6  ;;  %v2338_v18 = vmul.f32 %v10230_v59, %v8675_v51  ;;  %v10234_v43 = vld [vmem:[#allocation13_spill] sm:$0xff] }
 0x7e6   : > { %v2336_v55 = vmul.f32 %v10227_v14, %v8642_v37  ;;  %v9070_v37 = vld [vmem:[%s9807_s2 + $0x18] sm:$0xff]  ;;  %v2290_v29 = vadd.f32 %v10232_v31, %v2250_v49  ;;  %v2295_v24 = vmax.f32 %v2287_v1, 0.0  ;;  %v2296_v14 = vmax.f32 %v2288_v27, 0.0  ;;  %v10235_v59 = vld [vmem:[#allocation37_spill] sm:$0xff] }
 0x7e7   : > { %v2292_v39 = vadd.f32 %v10235_v59, %v2252_v11 }
 0x7e8   : > { %v2376_v19 = vadd.f32 %v10234_v43, %v2336_v55  ;;  %v2703_v58 = vmul.f32 %v8487_v32, %v2296_v14  ;;  %v10240_v55 = vld [vmem:[#allocation87_spill] sm:$0xff]  ;;  %v10241_v32 = vld [vmem:[#allocation30_spill] sm:$0xff] }
 0x7f6   : > { %4302 = vperm.xlu1 %6153, %v9002_v50  }
 0x7f9   : > { %4298 = vperm.xlu0 %6152, %v9018_v47  }
 0x7fa   : > { %4306 = vperm.xlu1 %6153, %v9010_v34  }
 0x7fd   : > { %4322 = vperm.xlu0 %6152, %v9036_v12  }
 0x7fe   : > { %6154 = vset.pattern.permute.xlu1 %v9879_v30  ;;  %v2293_v30 = vmax.f32 %v2285_v52, 0.0 }
 0x7ff   : > { %4338 = vperm.xlu1 %6154, %v9018_v47   ;;  %v10229_v47 = vmov 57  }
 0x800   : > { %v2700_v51 = vmul.f32 %v8483_v63, %v2293_v30  ;;  %v10238_v63 = vld [vmem:[#allocation93_spill] sm:$0xff] }
 0x801   : > { %6159 = vset.pattern.permute.xlu0 %v10229_v47 }
 0x802   : > { %4350 = vperm.xlu0 %6159, %v9070_v37  }
 0x803   : > { %4342 = vperm.xlu1 %6154, %v9002_v50   ;;  %v10236_v50 = vld [vmem:[#allocation21_spill] sm:$0xff] }
 0x804   : > { %v5662_v0 = vpop.f32.mrb[16].mxu1  ;;  %v2337_v10 = vmul.f32 %v10236_v50, %v8663_v23  ;;  %v2298_v23 = vmax.f32 %v2290_v29, 0.0  ;;  %v10239_v50 = vld [vmem:[#allocation69_spill] sm:$0xff] }
 0x805   : > { %v3100_v52 = vmul.f32 %v5662_v0, %v2374_v44  ;;  %v3060_v6 = vpop.f32.mrb[17].mxu1  ;;  %v10237_v44 = vld [vmem:[#allocation31_spill] sm:$0xff]  ;;  %v2702_v11 = vmul.f32 %v10239_v50, %v2295_v24 }
 0x806   : > { %v3099_v57 = vmul.f32 %v3060_v6, %v2373_v16  ;;  %v2375_v0 = vadd.f32 %v10237_v44, %v2335_v45  ;;  %v2299_v16 = vmax.f32 %v9053_v60, 0.0  ;;  %4362 = vperm.xlu0 %6159, %v9036_v12   ;;  %v2339_v6 = vmul.f32 %v10241_v32, %v8693_v9  ;;  %v10242_v60 = vld [vmem:[#allocation36_spill] sm:$0xff]  ;;  %v10245_v9 = vld [vmem:[#allocation94_spill] sm:$0xff] }
 0x807   : > { %v3108_v28 = vadd.f32 %v3100_v52, %v2701_v2  ;;  %6155 = vset.pattern.permute.xlu1 %v10205_v54  ;;  %v2378_v31 = vadd.f32 %v10242_v60, %v2338_v18 }
 0x808   : > { %v3107_v33 = vadd.f32 %v3099_v57, %v2700_v51  ;;  %v5665_v49 = vpop.f32.mrb[18].mxu1  ;;  %4310 = vperm.xlu1 %6155, %v9070_v37   ;;  %v2300_v51 = vmax.f32 %v2292_v39, 0.0  ;;  %v10243_v57 = vld [vmem:[#allocation46_spill] sm:$0xff]  ;;  %v10246_v39 = vld [vmem:[#allocation73_spill] sm:$0xff] }
 0x809   : > { %v9087_v30 = vadd.f32 %v10238_v63, %v3108_v28  ;;  %v3102_v1 = vmul.f32 %v5665_v49, %v2376_v19  ;;  %v3070_v27 = vpop.f32.mrb[19].mxu1  ;;  %v2377_v14 = vadd.f32 %v10243_v57, %v2337_v10  ;;  %v2704_v44 = vmul.f32 %v10246_v39, %v2297_v56  ;;  %v10249_v63 = vld [vmem:[#allocation42_spill] sm:$0xff]  ;;  %v10253_v57 = vld [vmem:[#allocation100_spill] sm:$0xff]  ;;  %v10255_v39 = vld [vmem:[#allocation97_spill] sm:$0xff] }
 0x80a   : > { %v9092_v2 = vadd.f32 %v10240_v55, %v3107_v33  ;;  %v3101_v52 = vmul.f32 %v3070_v27, %v2375_v0  ;;  %v10244_v33 = vld [vmem:[#allocation72_spill] sm:$0xff] }
 0x80b   : > { %v4697_v38 = vmul.f32 %v8906_v46, %v9087_v30  ;;  %v3110_v45 = vadd.f32 %v3102_v1, %v2703_v58  ;;  %v2705_v19 = vmul.f32 %v10244_v33, %v2298_v23  ;;  %v2380_v1 = vadd.f32 %v10249_v63, %v2340_v40  ;;  %v10252_v40 = vld [vmem:[#allocation89_spill] sm:$0xff] }
 0x80c   : > { %v4696_v29 = vmul.f32 %v8910_v4, %v9092_v2  ;;  %v3109_v24 = vadd.f32 %v3101_v52, %v2702_v11  ;;  %v5668_v43 = vpop.f32.mrb[20].mxu1  ;;  %6156 = vset.pattern.permute.xlu1 %v10229_v47  ;;  %v10247_v4 = vld [vmem:[#allocation95_spill] sm:$0xff]  ;;  %v10250_v52 = vld [vmem:[#allocation74_spill] sm:$0xff] }
 0x80d   : > { %v9104_v28 = vadd.f32 %v8915_v5, %v4697_v38  ;;  %v9107_v59 = vadd.f32 %v10245_v9, %v3110_v45  ;;  %v3104_v18 = vmul.f32 %v5668_v43, %v2378_v31  ;;  %v3080_v46 = vpop.f32.mrb[21].mxu1  ;;  %4346 = vperm.xlu1 %6156, %v9010_v34   ;;  %v10248_v5 = vld [vmem:[#allocation79_spill] sm:$0xff]  ;;  %v2707_v32 = vmul.f32 %v10250_v52, %v2300_v51  ;;  %v9144_v43 = vld [vmem:[%s9807_s2 + $0x20] sm:$0xff]  ;;  %v10254_v9 = vld [vmem:[#allocation96_spill] sm:$0xff] }
 0x80e   : > { %v9112_v10 = vadd.f32 %v8917_v42, %v4696_v29  ;;  %v9115_v0 = vadd.f32 %v10247_v4, %v3109_v24  ;;  %v3103_v49 = vmul.f32 %v3080_v46, %v2377_v14  ;;  %v2379_v58 = vadd.f32 %v10248_v5, %v2339_v6  ;;  %v10251_v6 = vld [vmem:[#allocation78_spill] sm:$0xff] }
 0x80f   : > { %v4699_v27 = vmul.f32 %v8919_v21, %v9107_v59  ;;  %v3112_v23 = vadd.f32 %v3104_v18, %v2705_v19  ;;  %v4745_v56 = vsel %vm1446_vm0, %v9104_v28, 0.0  ;;  %v2706_v60 = vmul.f32 %v10251_v6, %v2299_v16 }
 0x810   : > { %v4744_v42 = vsel %vm1446_vm0, %v9112_v10, 0.0  ;;  %v4698_v50 = vmul.f32 %v8913_v25, %v9115_v0  ;;  %v3111_v11 = vadd.f32 %v3103_v49, %v2704_v44  ;;  %v5671_v55 = vpop.f32.mrb[22].mxu1 }
 0x811   : > { %v9131_v31 = vadd.f32 %v10252_v40, %v3112_v23  ;;  %v3106_v21 = vmul.f32 %v5671_v55, %v2380_v1  ;;  %v3090_v38 = vpop.f32.mrb[23].mxu1  ;;  %v4739_v24 = vadd.f32 %v8933_v7, %v4699_v27  ;;  %6157 = vset.pattern.permute.xlu1 %v10205_v54  ;;  %v4746_v25 = vadd.f32 %v4745_v56, %v4744_v42  ;;  %v9183_v55 = vld [vmem:[%s9807_s2 + $0x38] sm:$0xff] }
 0x812   : > { %v4738_v45 = vadd.f32 %v8921_v61, %v4698_v50  ;;  %v9135_v14 = vadd.f32 %v10253_v57, %v3111_v11  ;;  %v3105_v29 = vmul.f32 %v3090_v38, %v2379_v58  ;;  %4314 = vperm.xlu1 %6157, %v9144_v43   ;;  %v9199_v57 = vpop.permute.xlu1 %4815 }
 0x813   : > { %v4701_v51 = vmul.f32 %v8937_v22, %v9131_v31  ;;  %v3114_v16 = vadd.f32 %v3106_v21, %v2707_v32  ;;  %v4749_v4 = vsel %vm1446_vm0, %v4739_v24, 0.0 }
 0x814   : > { %v4747_v61 = vsel %vm1446_vm0, %v4738_v45, 0.0  ;;  %v4700_v33 = vmul.f32 %v8927_v3, %v9135_v14  ;;  %v3113_v7 = vadd.f32 %v3105_v29, %v2706_v60  ;;  %v9164_v3 = vld [vmem:[%s9807_s2 + $0x28] sm:$0xff] }
 0x815   : > { %v4748_v19 = vadd.f32 %v4747_v61, %v4746_v25  ;;  %v9151_v18 = vadd.f32 %v10254_v9, %v3114_v16  ;;  %v4741_v22 = vadd.f32 %v8957_v53, %v4701_v51 }
 0x816   : > { %v4740_v46 = vadd.f32 %v8948_v36, %v4700_v33  ;;  %v9156_v44 = vadd.f32 %v10255_v39, %v3113_v7  ;;  %4318 = vperm.xlu1 %6157, %v9164_v3   ;;  %v9220_v9 = vpop.permute.xlu1 %4855 }
 0x817   : > { %v4703_v49 = vmul.f32 %v8954_v17, %v9151_v18  ;;  %v4750_v5 = vadd.f32 %v4749_v4, %v4748_v19  ;;  %v4753_v63 = vsel %vm1446_vm0, %v4741_v22, 0.0 }
 0x818   : > { %v4751_v53 = vsel %vm1446_vm0, %v4740_v46, 0.0  ;;  %v4702_v36 = vmul.f32 %v8946_v13, %v9156_v44 }
 0x819   : > { %v4752_v58 = vadd.f32 %v4751_v53, %v4750_v5  ;;  %v4743_v1 = vadd.f32 %v8960_v48, %v4703_v49  ;;  %v9888_v48 = vmov 58  }
 0x81a   : > { %v4742_v17 = vadd.f32 %v8962_v35, %v4702_v36  ;;  %6158 = vset.pattern.permute.xlu1 %v10229_v47  ;;  %6162 = vset.pattern.permute.xlu0 %v9888_v48 }
 0x81b   : > { %v4754_v27 = vadd.f32 %v4753_v63, %v4752_v58  ;;  %4354 = vperm.xlu1 %6158, %v9144_v43   ;;  %v4757_v42 = vsel %vm1446_vm0, %v4743_v1, 0.0 }
 0x81c   : > { %v4755_v23 = vsel %vm1446_vm0, %v4742_v17, 0.0 }
 0x81d   : > { %v4756_v56 = vadd.f32 %v4755_v23, %v4754_v27 }
 0x81f   : > { %v4758_v50 = vadd.f32 %v4757_v42, %v4756_v56  ;;  %4358 = vperm.xlu1 %6158, %v9164_v3  }
 0x821   : > { %v4759_v13 = vrot.slane %v4758_v50, 4 }
 0x823   : > { %v4760_v11 = vadd.f32 %v4759_v13, %v4758_v50  ;;  %6160 = vset.pattern.permute.xlu1 %v10205_v54  ;;  %v9235_v13 = vpop.permute.xlu0 %4819 }
 0x824   : > { %4326 = vperm.xlu1 %6160, %v9183_v55  }
 0x825   : > { %v4761_v35 = vrot.slane %v4760_v11, 2 }
 0x827   : > { %v4762_v52 = vadd.f32 %v4761_v35, %v4760_v11 }
 0x828   : > { %6161 = vset.pattern.permute.xlu1 %v10229_v47 }
 0x829   : > { %v4763_v32 = vrot.slane %v4762_v52, 1  ;;  %4366 = vperm.xlu1 %6161, %v9183_v55  }
 0x82b   : > { %v4764_v6 = vadd.f32 %v4763_v32, %v4762_v52 }
 0x82d   : > { %v4765_v60 = vmul.f32 0.015625, %v4764_v6  ;;  %6163 = vset.pattern.permute.xlu1 %v9888_v48  ;;  %v9239_v6 = vpop.permute.xlu0 %4823 }
 0x82f   : > { %v9190_v54 = vsub.f32 %v9112_v10, %v4765_v60  ;;  %v9193_v40 = vsub.f32 %v9104_v28, %v4765_v60  ;;  %v9195_v21 = vsub.f32 %v4738_v45, %v4765_v60  ;;  %v9197_v38 = vsub.f32 %v4739_v24, %v4765_v60 }
 0x830   : > { %v9201_v29 = vsub.f32 %v4740_v46, %v4765_v60  ;;  %v9209_v51 = vsub.f32 %v4741_v22, %v4765_v60  ;;  %v9215_v61 = vsub.f32 %v4742_v17, %v4765_v60  ;;  %v4773_v22 = vsub.f32 %v4743_v1, %v4765_v60  ;;  %v9229_v17 = vpop.permute.xlu1 %4859 }
 0x831   : > { %v4774_v47 = vmul.f32 %v9190_v54, %v9190_v54  ;;  %v4775_v25 = vmul.f32 %v9193_v40, %v9193_v40  ;;  %v4776_v10 = vmul.f32 %v9195_v21, %v9195_v21  ;;  %v4777_v28 = vmul.f32 %v9197_v38, %v9197_v38 }
 0x832   : > { %v4778_v33 = vmul.f32 %v9201_v29, %v9201_v29  ;;  %v4779_v46 = vmul.f32 %v9209_v51, %v9209_v51  ;;  %v4780_v49 = vmul.f32 %v9215_v61, %v9215_v61  ;;  %v4781_v36 = vmul.f32 %v4773_v22, %v4773_v22 }
 0x833   : > { %v4782_v45 = vsel %vm1446_vm0, %v4774_v47, 0.0  ;;  %v4783_v24 = vsel %vm1446_vm0, %v4775_v25, 0.0  ;;  %v4785_v7 = vsel %vm1446_vm0, %v4776_v10, 0.0  ;;  %v4787_v39 = vsel %vm1446_vm0, %v4777_v28, 0.0  ;;  %v9243_v28 = vpop.permute.xlu0 %4835 }
 0x834   : > { %v4784_v16 = vadd.f32 %v4783_v24, %v4782_v45  ;;  %v4789_v5 = vsel %vm1446_vm0, %v4778_v33, 0.0  ;;  %v4791_v58 = vsel %vm1446_vm0, %v4779_v46, 0.0  ;;  %v4793_v1 = vsel %vm1446_vm0, %v4780_v49, 0.0  ;;  %v9233_v42 = vpop.permute.xlu1 %4827 }
 0x835   : > { %v4795_v23 = vsel %vm1446_vm0, %v4781_v36, 0.0 }
 0x836   : > { %v4786_v19 = vadd.f32 %v4785_v7, %v4784_v16 }
 0x837   : > { %v9247_v16 = vpop.permute.xlu0 %4839 }
 0x838   : > { %v4788_v4 = vadd.f32 %v4787_v39, %v4786_v19  ;;  %v9237_v52 = vpop.permute.xlu1 %4867 }
 0x83a   : > { %v4790_v53 = vadd.f32 %v4789_v5, %v4788_v4 }
 0x83b   : > { %v9251_v7 = vpop.permute.xlu0 %4863 }
 0x83c   : > { %v4792_v63 = vadd.f32 %v4791_v58, %v4790_v53  ;;  %v9241_v25 = vpop.permute.xlu1 %4831 }
 0x83e   : > { %v4794_v27 = vadd.f32 %v4793_v1, %v4792_v63 }
 0x83f   : > { %v9264_v5 = vpop.permute.xlu0 %4879 }
 0x840   : > { %v4796_v56 = vadd.f32 %v4795_v23, %v4794_v27  ;;  %v9245_v24 = vpop.permute.xlu1 %4871 }
 0x842   : > { %v4797_v50 = vrot.slane %v4796_v56, 4 }
 0x844   : > { %v4798_v11 = vadd.f32 %v4797_v50, %v4796_v56  ;;  %v9249_v33 = vpop.permute.xlu1 %4875 }
 0x846   : > { %v4799_v35 = vrot.slane %v4798_v11, 2 }
 0x848   : > { %v4800_v32 = vadd.f32 %v4799_v35, %v4798_v11  ;;  %v9255_v46 = vpop.permute.xlu1 %4843 }
 0x84a   : > { %v4801_v60 = vrot.slane %v4800_v32, 1 }
 0x84c   : > { %v4802_v47 = vadd.f32 %v4801_v60, %v4800_v32  ;;  %v9270_v58 = vpop.permute.xlu1 %4883 }
 0x84e   : > { %v4803_v10 = vmul.f32 0.015625, %v4802_v47 }
 0x850   : > { %v4804_v45 = vadd.f32 1e-08, %v4803_v10 }
 0x852   : > { %6293 = vrsqrt.f32 %v4804_v45 }
 0x85c   : > { %v9253_v19 = vpop.eup %6293  ;;  %v9260_v4 = vpop.f32.mrb[24].mxu0 }
 0x85d   : > { %v9258_v39 = vmul.f32 %v9253_v19, %v4773_v22  ;;  %v9262_v49 = vpop.f32.mrb[25].mxu0 }
 0x860   : > { %v9266_v53 = vpop.f32.mrb[26].mxu0 }
 0x861   : > { %v9268_v36 = vpop.f32.mrb[27].mxu0 }
 0x864   : > { %v9272_v63 = vpop.f32.mrb[28].mxu0  ;;  %v3885_v27 = vpop.xlane.xlu0 %3884 }
 0x865   : > { %10256 = vst [vmem:[#allocation26_spill] sm:$0xff] %v9272_v63  ;;  %v9274_v1 = vpop.f32.mrb[29].mxu0  ;;  %v3882_v23 = vpop.xlane.xlu1 %3881  ;;  %v3905_v22 = vsub.f32 %v8967_v26, %v3885_v27 }
 0x866   : > { %10257 = vst [vmem:[#allocation23_spill] sm:$0xff] %v9274_v1  ;;  %v3904_v56 = vsub.f32 %v8965_v62, %v3882_v23 }
 0x867   : > { %v3914_v11 = vmul.f32 1.442695, %v3905_v22 }
 0x868   : > { %v9278_v50 = vpop.f32.mrb[30].mxu0  ;;  %v3912_v35 = vmul.f32 1.442695, %v3904_v56  ;;  %v3888_v60 = vpop.xlane.xlu0 %3887 }
 0x869   : > { %v9280_v32 = vpop.f32.mrb[31].mxu0  ;;  %v3891_v47 = vpop.xlane.xlu1 %3890  ;;  %6295 = vpow2.f32 %v3914_v11  ;;  %v3906_v10 = vsub.f32 %v8972_v20, %v3888_v60  ;;  %v10259_v11 = vld [vmem:[#allocation101_spill] sm:$0xff]  ;;  %v10260_v60 = vld [vmem:[#allocation99_spill] sm:$0xff] }
 0x86a   : > { %10258 = vst [vmem:[#allocation32_spill] sm:$0xff] %v9280_v32  ;;  %v3907_v45 = vsub.f32 %v8970_v8, %v3891_v47  ;;  %6297 = vpow2.f32 %v3912_v35 }
 0x86b   : > { %v3916_v48 = vmul.f32 1.442695, %v3906_v10 }
 0x86c   : > { %v3918_v1 = vmul.f32 1.442695, %v3907_v45  ;;  %v3894_v63 = vpop.xlane.xlu0 %3893 }
 0x86d   : > { %v3897_v26 = vpop.xlane.xlu1 %3896  ;;  %6299 = vpow2.f32 %v3916_v48  ;;  %v3908_v62 = vsub.f32 %v8980_v15, %v3894_v63 }
 0x86e   : > { %v3909_v27 = vsub.f32 %v8978_v41, %v3897_v26  ;;  %6301 = vpow2.f32 %v3918_v1 }
 0x86f   : > { %v3920_v23 = vmul.f32 1.442695, %v3908_v62  ;;  %v4806_v62 = vmul.f32 %v9253_v19, %v9190_v54 }
 0x870   : > { %v3922_v22 = vmul.f32 1.442695, %v3909_v27  ;;  %v3900_v56 = vpop.xlane.xlu0 %3899  ;;  %v4807_v27 = vmul.f32 %v9253_v19, %v9193_v40  ;;  %v4809_v40 = vmul.f32 %v9253_v19, %v9197_v38 }
 0x871   : > { %6303 = vpow2.f32 %v3920_v23  ;;  %v3910_v20 = vsub.f32 %v10259_v11, %v3900_v56  ;;  %v4808_v11 = vmul.f32 %v9253_v19, %v9195_v21  ;;  %v4846_v54 = vmul.f32 %v9199_v57, %v4806_v62 }
 0x872   : > { %v3903_v32 = vpop.xlane.xlu1 %3902  ;;  %6305 = vpow2.f32 %v3922_v22  ;;  %v4810_v21 = vmul.f32 %v9253_v19, %v9201_v29 }
 0x873   : > { %v3911_v8 = vsub.f32 %v10260_v60, %v3903_v32  ;;  %v9288_v35 = vpop.eup %6295  ;;  %v3924_v47 = vmul.f32 1.442695, %v3910_v20 }
 0x874   : > { %v9290_v48 = vpop.eup %6297  ;;  %v3931_v41 = vsel %vm1446_vm0, %v9288_v35, 0.0 }
 0x875   : > { %v3926_v10 = vmul.f32 1.442695, %v3911_v8  ;;  %6307 = vpow2.f32 %v3924_v47  ;;  %3932 = vadd.xlane.f32.xlu0 %v3931_v41  ;;  %v3928_v63 = vsel %vm1446_vm0, %v9290_v48, 0.0  ;;  %v4847_v8 = vmul.f32 %v9235_v13, %v4807_v27 }
 0x876   : > { %v9294_v15 = vpop.permute.xlu1 %4302  ;;  %3929 = vadd.xlane.f32.xlu1 %v3928_v63  ;;  %v4848_v63 = vmul.f32 %v9239_v6, %v4808_v11  ;;  %v9334_v13 = vadd.f32 %v9220_v9, %v4846_v54  ;;  %v4811_v27 = vmul.f32 %v9253_v19, %v9209_v51  ;;  %v4850_v6 = vmul.f32 %v9241_v25, %v4810_v21 }
 0x877   : > { %6309 = vpow2.f32 %v3926_v10  ;;  %v9298_v1 = vpop.eup %6299  ;;  %v9338_v62 = vadd.f32 %v9229_v17, %v4847_v8 }
 0x878   : > { %v9300_v32 = vpop.eup %6301  ;;  %v3934_v45 = vsel %vm1446_vm0, %v9298_v1, 0.0  ;;  %v9348_v9 = vadd.f32 %v9251_v7, %v4848_v63  ;;  %v4894_v17 = vsel %vm1446_vm0, %v9334_v13, -inf  ;;  %v4851_v51 = vmul.f32 %v9243_v28, %v4811_v27 }
 0x879   : > { %3935 = vadd.xlane.f32.xlu0 %v3934_v45  ;;  %v3937_v23 = vsel %vm1446_vm0, %v9300_v32, 0.0  ;;  %v4849_v45 = vmul.f32 %v9233_v42, %v4809_v40  ;;  %v9359_v25 = vadd.f32 %v9245_v24, %v4850_v6  ;;  %v4299_v40 = vpop.permute.xlu0 %4298 }
 0x87a   : > { %v4307_v26 = vpop.permute.xlu1 %4306  ;;  %3938 = vadd.xlane.f32.xlu1 %v3937_v23  ;;  %v4812_v23 = vmul.f32 %v9253_v19, %v9215_v61  ;;  %v4900_v7 = vsel %vm1446_vm0, %v9348_v9, -inf  ;;  %v9365_v19 = vadd.f32 %v9249_v33, %v4851_v51 }
 0x87b   : > { %v9310_v22 = vpop.eup %6303  ;;  %v9353_v42 = vadd.f32 %v9237_v52, %v4849_v45  ;;  %v4906_v24 = vsel %vm1446_vm0, %v9359_v25, -inf  ;;  %v4331_v21 = vmul.f32 %v4307_v26, %v9115_v0 }
 0x87c   : > { %v9312_v56 = vpop.eup %6305  ;;  %v3940_v20 = vsel %vm1446_vm0, %v9310_v22, 0.0  ;;  %v4852_v61 = vmul.f32 %v9247_v16, %v4812_v23  ;;  %v4909_v16 = vsel %vm1446_vm0, %v9365_v19, -inf }
 0x87d   : > { %3941 = vadd.xlane.f32.xlu0 %v3940_v20  ;;  %v3943_v47 = vsel %vm1446_vm0, %v9312_v56, 0.0  ;;  %v4897_v20 = vsel %vm1446_vm0, %v9338_v62, -inf  ;;  %v4903_v52 = vsel %vm1446_vm0, %v9353_v42, -inf  ;;  %v4323_v45 = vpop.permute.xlu0 %4322 }
 0x87e   : > { %v4339_v60 = vpop.permute.xlu1 %4338  ;;  %3944 = vadd.xlane.f32.xlu1 %v3943_v47  ;;  %v9370_v54 = vadd.f32 %v9264_v5, %v4852_v61  ;;  %v4330_v47 = vmul.f32 %v9294_v15, %v9087_v30  ;;  %v4329_v5 = vmul.f32 %v4299_v40, %v9092_v2 }
 0x87f   : > { %v9324_v10 = vpop.eup %6307 }
 0x880   : > { %v3946_v57 = vsel %vm1446_vm0, %v9324_v10, 0.0  ;;  %v4912_v8 = vsel %vm1446_vm0, %v9370_v54, -inf  ;;  %v4369_v27 = vadd.f32 %v4339_v60, %v4329_v5  ;;  %v10262_v5 = vld [vmem:[#allocation20_spill] sm:$0xff] }
 0x881   : > { %v9326_v41 = vpop.eup %6309  ;;  %3947 = vadd.xlane.f32.xlu0 %v3946_v57  ;;  %v4351_v15 = vpop.permute.xlu0 %4350 }
 0x882   : > { %v4343_v38 = vpop.permute.xlu1 %4342  ;;  %v3949_v29 = vsel %vm1446_vm0, %v9326_v41, 0.0  ;;  %v4377_v51 = vsel %vm1446_vm0, %v4369_v27, 0.0 }
 0x883   : > { %3950 = vadd.xlane.f32.xlu1 %v3949_v29  ;;  %v4370_v63 = vadd.f32 %v4343_v38, %v4330_v47 }
 0x885   : > { %4895 = vmax.xlane.f32.xlu0 %v4894_v17  ;;  %v4378_v6 = vsel %vm1446_vm0, %v4370_v63, 0.0 }
 0x886   : > { %v4379_v2 = vadd.f32 %v4378_v6, %v4377_v51 }
 0x887   : > { %v4311_v11 = vpop.permute.xlu1 %4310  ;;  %4898 = vmax.xlane.f32.xlu1 %v4897_v20 }
 0x888   : > { %v4332_v23 = vmul.f32 %v4311_v11, %v9107_v59  ;;  %v10261_v11 = vld [vmem:[#allocation17_spill] sm:$0xff] }
 0x889   : > { %4901 = vmax.xlane.f32.xlu0 %v4900_v7 }
 0x88a   : > { %v4372_v61 = vadd.f32 %v4351_v15, %v4332_v23 }
 0x88b   : > { %4904 = vmax.xlane.f32.xlu1 %v4903_v52 }
 0x88c   : > { %v4347_v28 = vpop.permute.xlu1 %4346  ;;  %v4382_v52 = vsel %vm1446_vm0, %v4372_v61, 0.0 }
 0x88d   : > { %4907 = vmax.xlane.f32.xlu0 %v4906_v24  ;;  %v4371_v29 = vadd.f32 %v4347_v28, %v4331_v21  ;;  %v4363_v28 = vpop.permute.xlu0 %4362 }
 0x88f   : > { %4910 = vmax.xlane.f32.xlu1 %v4909_v16  ;;  %v4380_v20 = vsel %vm1446_vm0, %v4371_v29, 0.0  ;;  %v4335_v16 = vmul.f32 %v4323_v45, %v9156_v44 }
 0x890   : > { %v4381_v38 = vadd.f32 %v4380_v20, %v4379_v2  ;;  %v10263_v20 = vmov 58  }
 0x891   : > { %v4315_v33 = vpop.permute.xlu1 %4314  ;;  %4913 = vmax.xlane.f32.xlu0 %v4912_v8  ;;  %v4375_v8 = vadd.f32 %v4363_v28, %v4335_v16 }
 0x892   : > { %v4333_v30 = vmul.f32 %v4315_v33, %v9135_v14  ;;  %v4383_v24 = vadd.f32 %v4382_v52, %v4381_v38 }
 0x893   : > { %v4388_v6 = vsel %vm1446_vm0, %v4375_v8, 0.0 }
 0x895   : > { %v4319_v57 = vpop.permute.xlu1 %4318 }
 0x896   : > { %v4334_v0 = vmul.f32 %v4319_v57, %v9131_v31  ;;  %v6544_v31 = vmov 59  }
 0x89a   : > { %v4355_v17 = vpop.permute.xlu1 %4354 }
 0x89b   : > { %v4373_v26 = vadd.f32 %v4355_v17, %v4333_v30 }
 0x89d   : > { %v4384_v59 = vsel %vm1446_vm0, %v4373_v26, 0.0 }
 0x89e   : > { %v4359_v60 = vpop.permute.xlu1 %4358  ;;  %v4385_v33 = vadd.f32 %v4384_v59, %v4383_v24 }
 0x89f   : > { %v4374_v7 = vadd.f32 %v4359_v60, %v4334_v0 }
 0x8a0   : > { %4452 = vperm.xlu1 %6163, %v10261_v11  }
 0x8a1   : > { %v4386_v14 = vsel %vm1446_vm0, %v4374_v7, 0.0 }
 0x8a2   : > { %v4387_v47 = vadd.f32 %v4386_v14, %v4385_v33 }
 0x8a3   : > { %v4327_v40 = vpop.permute.xlu1 %4326 }
 0x8a4   : > { %6164 = vset.pattern.permute.xlu1 %v6544_v31  ;;  %v4336_v21 = vmul.f32 %v4327_v40, %v9151_v18  ;;  %v4389_v44 = vadd.f32 %v4388_v6, %v4387_v47 }
 0x8a5   : > { %4488 = vperm.xlu1 %6164, %v10262_v5  }
 0x8a7   : > { %4448 = vperm.xlu0 %6162, %v10262_v5  }
 0x8a8   : > { %v4367_v57 = vpop.permute.xlu1 %4366 }
 0x8a9   : > { %v4376_v23 = vadd.f32 %v4367_v57, %v4336_v21  ;;  %4492 = vperm.xlu1 %6164, %v10261_v11  }
 0x8ab   : > { %v4390_v45 = vsel %vm1446_vm0, %v4376_v23, 0.0  ;;  %4468 = vperm.xlu0 %6162, %v9164_v3  }
 0x8ac   : > { %v4391_v17 = vadd.f32 %v4390_v45, %v4389_v44 }
 0x8ad   : > { %6165 = vset.pattern.permute.xlu1 %v10263_v20 }
 0x8ae   : > { %v4392_v51 = vrot.slane %v4391_v17, 4  ;;  %4456 = vperm.xlu1 %6165, %v9010_v34  }
 0x8af   : > { %6169 = vset.pattern.permute.xlu0 %v6544_v31 }
 0x8b0   : > { %v4393_v18 = vadd.f32 %v4392_v51, %v4391_v17  ;;  %4508 = vperm.xlu0 %6169, %v9164_v3  }
 0x8b2   : > { %v4394_v30 = vrot.slane %v4393_v18, 2  ;;  %4460 = vperm.xlu1 %6165, %v9070_v37  }
 0x8b4   : > { %v4395_v15 = vadd.f32 %v4394_v30, %v4393_v18 }
 0x8b6   : > { %v4396_v2 = vrot.slane %v4395_v15, 1  ;;  %6166 = vset.pattern.permute.xlu1 %v6544_v31 }
 0x8b7   : > { %4496 = vperm.xlu1 %6166, %v9010_v34  }
 0x8b8   : > { %v4397_v0 = vadd.f32 %v4396_v2, %v4395_v15 }
 0x8ba   : > { %v4398_v38 = vmul.f32 0.015625, %v4397_v0 }
 0x8bb   : > { %4500 = vperm.xlu1 %6166, %v9070_v37  }
 0x8bc   : > { %v9408_v60 = vsub.f32 %v4369_v27, %v4398_v38  ;;  %v9411_v52 = vsub.f32 %v4370_v63, %v4398_v38  ;;  %v9413_v59 = vsub.f32 %v4371_v29, %v4398_v38  ;;  %v9415_v11 = vsub.f32 %v4372_v61, %v4398_v38 }
 0x8bd   : > { %v4403_v28 = vsub.f32 %v4373_v26, %v4398_v38  ;;  %v4404_v27 = vsub.f32 %v4374_v7, %v4398_v38  ;;  %v4405_v26 = vsub.f32 %v4375_v8, %v4398_v38  ;;  %v4406_v47 = vsub.f32 %v4376_v23, %v4398_v38 }
 0x8be   : > { %v4407_v24 = vmul.f32 %v9408_v60, %v9408_v60  ;;  %v4408_v16 = vmul.f32 %v9411_v52, %v9411_v52  ;;  %v4409_v34 = vmul.f32 %v9413_v59, %v9413_v59  ;;  %v4410_v37 = vmul.f32 %v9415_v11, %v9415_v11 }
 0x8bf   : > { %6167 = vset.pattern.permute.xlu1 %v10263_v20  ;;  %v4411_v14 = vmul.f32 %v4403_v28, %v4403_v28  ;;  %v4412_v5 = vmul.f32 %v4404_v27, %v4404_v27  ;;  %v4413_v57 = vmul.f32 %v4405_v26, %v4405_v26  ;;  %v4414_v45 = vmul.f32 %v4406_v47, %v4406_v47 }
 0x8c0   : > { %v4415_v63 = vsel %vm1446_vm0, %v4407_v24, 0.0  ;;  %v4416_v29 = vsel %vm1446_vm0, %v4408_v16, 0.0  ;;  %4464 = vperm.xlu1 %6167, %v9144_v43   ;;  %v4418_v40 = vsel %vm1446_vm0, %v4409_v34, 0.0  ;;  %v4420_v21 = vsel %vm1446_vm0, %v4410_v37, 0.0 }
 0x8c1   : > { %v4417_v61 = vadd.f32 %v4416_v29, %v4415_v63  ;;  %v4422_v6 = vsel %vm1446_vm0, %v4411_v14, 0.0  ;;  %v4424_v17 = vsel %vm1446_vm0, %v4412_v5, 0.0  ;;  %v4426_v8 = vsel %vm1446_vm0, %v4413_v57, 0.0 }
 0x8c2   : > { %v4428_v30 = vsel %vm1446_vm0, %v4414_v45, 0.0  ;;  %v4853_v37 = vmul.f32 %v9255_v46, %v9258_v39 }
 0x8c3   : > { %v4419_v33 = vadd.f32 %v4418_v40, %v4417_v61 }
 0x8c4   : > { %6168 = vset.pattern.permute.xlu1 %v6544_v31  ;;  %v9439_v29 = vadd.f32 %v9270_v58, %v4853_v37 }
 0x8c5   : > { %v4421_v7 = vadd.f32 %v4420_v21, %v4419_v33 }
 0x8c6   : > { %v4915_v61 = vsel %vm1446_vm0, %v9439_v29, -inf }
 0x8c7   : > { %v4423_v44 = vadd.f32 %v4422_v6, %v4421_v7 }
 0x8c9   : > { %v4425_v51 = vadd.f32 %v4424_v17, %v4423_v44 }
 0x8cb   : > { %v4427_v18 = vadd.f32 %v4426_v8, %v4425_v51 }
 0x8cd   : > { %v4429_v23 = vadd.f32 %v4428_v30, %v4427_v18  ;;  %v10264_v18 = vld [vmem:[#allocation75_spill] sm:$0xff]  ;;  %v10265_v30 = vld [vmem:[#allocation76_spill] sm:$0xff] }
 0x8cf   : > { %v4430_v15 = vrot.slane %v4429_v23, 4 }
 0x8d1   : > { %v4431_v2 = vadd.f32 %v4430_v15, %v4429_v23 }
 0x8d3   : > { %v4432_v0 = vrot.slane %v4431_v2, 2 }
 0x8d5   : > { %v4433_v38 = vadd.f32 %v4432_v0, %v4431_v2 }
 0x8d7   : > { %v4434_v24 = vrot.slane %v4433_v38, 1 }
 0x8d9   : > { %v4435_v16 = vadd.f32 %v4434_v24, %v4433_v38 }
 0x8db   : > { %v4436_v34 = vmul.f32 0.015625, %v4435_v16 }
 0x8dd   : > { %v4437_v63 = vadd.f32 1e-08, %v4436_v34 }
 0x8df   : > { %6311 = vrsqrt.f32 %v4437_v63 }
 0x8e4   : > { %4916 = vmax.xlane.f32.xlu1 %v4915_v61 }
 0x8e9   : > { %v9443_v14 = vpop.eup %6311 }
 0x8ea   : > { %v9446_v40 = vmul.f32 %v9443_v14, %v4404_v27  ;;  %v9449_v33 = vmul.f32 %v9443_v14, %v4403_v28  ;;  %v9452_v5 = vmul.f32 %v9443_v14, %v4405_v26  ;;  %v9455_v46 = vmul.f32 %v9443_v14, %v4406_v47 }
 0x8f5   : > { %4504 = vperm.xlu1 %6168, %v9144_v43  }
 0x8f9   : > { %6170 = vset.pattern.permute.xlu1 %v10263_v20 }
 0x8fa   : > { %4472 = vperm.xlu1 %6170, %v9036_v12  }
 0x8fe   : > { %4476 = vperm.xlu1 %6170, %v9183_v55  }
 0x902   : > { %6171 = vset.pattern.permute.xlu1 %v6544_v31  ;;  %v3933_v39 = vpop.xlane.xlu0 %3932 }
 0x903   : > { %6313 = vrcp.f32 %v3933_v39  ;;  %v3930_v58 = vpop.xlane.xlu1 %3929 }
 0x904   : > { %6315 = vrcp.f32 %v3930_v58 }
 0x906   : > { %v3936_v28 = vpop.xlane.xlu0 %3935 }
 0x907   : > { %6317 = vrcp.f32 %v3936_v28  ;;  %v3939_v27 = vpop.xlane.xlu1 %3938 }
 0x908   : > { %6319 = vrcp.f32 %v3939_v27 }
 0x90a   : > { %v3942_v26 = vpop.xlane.xlu0 %3941 }
 0x90b   : > { %6321 = vrcp.f32 %v3942_v26  ;;  %v3945_v47 = vpop.xlane.xlu1 %3944 }
 0x90c   : > { %6323 = vrcp.f32 %v3945_v47 }
 0x90d   : > { %v6314_v21 = vpop.eup %6313 }
 0x90e   : > { %v6316_v20 = vpop.eup %6315  ;;  %v3961_v12 = vmul.f32 %v6314_v21, %v9288_v35  ;;  %v3948_v7 = vpop.xlane.xlu0 %3947 }
 0x90f   : > { %6325 = vrcp.f32 %v3948_v7  ;;  %v3960_v31 = vmul.f32 %v6316_v20, %v9290_v48  ;;  %v4439_v7 = vmul.f32 %v9443_v14, %v9408_v60 }
 0x910   : > { %v3951_v57 = vpop.xlane.xlu1 %3950 }
 0x911   : > { %6327 = vrcp.f32 %v3951_v57  ;;  %v6318_v6 = vpop.eup %6317  ;;  %5700 = vmatprep.mubr.msk.f32.mxu1 %vm1446_vm0, %v3960_v31 }
 0x912   : > { %v6320_v44 = vpop.eup %6319  ;;  %5701 = vmatmul.mubr.msk.f32.vlgmr.msra.gmra.mrb[24].mxu1 %vm1446_vm0, %v3961_v12  ;;  %v4896_v45 = vpop.xlane.xlu0 %4895  ;;  %v3962_v17 = vmul.f32 %v6318_v6, %v9298_v1  ;;  %v4440_v12 = vmul.f32 %v9443_v14, %v9411_v52 }
 0x913   : > { %v4918_v51 = vsub.f32 %v9334_v13, %v4896_v45  ;;  %v3963_v8 = vmul.f32 %v6320_v44, %v9300_v32  ;;  %5923 = vmatpush3.bf16.msra.mxu1 %v10264_v18 }
 0x914   : > { %v4899_v35 = vpop.xlane.xlu1 %4898  ;;  %5703 = vmatprep.mubr.msk.f32.mxu1 %vm1446_vm0, %v3962_v17  ;;  %5925 = vmatprep.subr.bf16.mxu1 %v10265_v30 }
 0x915   : > { %v4919_v48 = vsub.f32 %v9338_v62, %v4899_v35  ;;  %v6322_v23 = vpop.eup %6321  ;;  %v4926_v15 = vmul.f32 1.442695, %v4918_v51 }
 0x916   : > { %v6324_v2 = vpop.eup %6323  ;;  %5704 = vmatmul.mubr.msk.f32.gmra.mrb[26].mxu1 %vm1446_vm0, %v3963_v8  ;;  %v4902_v0 = vpop.xlane.xlu0 %4901  ;;  %v3964_v13 = vmul.f32 %v6322_v23, %v9310_v22 }
 0x917   : > { %v4928_v1 = vmul.f32 1.442695, %v4919_v48  ;;  %6329 = vpow2.f32 %v4926_v15  ;;  %v4920_v32 = vsub.f32 %v9348_v9, %v4902_v0  ;;  %v3965_v38 = vmul.f32 %v6324_v2, %v9312_v56  ;;  %5927 = vmatpush3.bf16.msra.mxu1 %v10265_v30 }
 0x918   : > { %v4905_v24 = vpop.xlane.xlu1 %4904  ;;  %5706 = vmatprep.mubr.msk.f32.mxu1 %vm1446_vm0, %v3964_v13  ;;  %v4441_v0 = vmul.f32 %v9443_v14, %v9413_v59  ;;  %v6545_v59 = vmov 48  }
 0x919   : > { %6331 = vpow2.f32 %v4928_v1  ;;  %v4921_v62 = vsub.f32 %v9353_v42, %v4905_v24  ;;  %v6326_v16 = vpop.eup %6325  ;;  %v4930_v34 = vmul.f32 1.442695, %v4920_v32  ;;  %v4442_v32 = vmul.f32 %v9443_v14, %v9415_v11  ;;  %v9537_v11 = vld [vmem:[%s9807_s2] sm:$0xff]  ;;  %v9543_v14 = vld [vmem:[%s9807_s2 + $0x18] sm:$0xff] }
 0x91a   : > { %5707 = vmatmul.mubr.msk.f32.gmra.mrb[28].mxu1 %vm1446_vm0, %v3965_v38  ;;  %v4908_v63 = vpop.xlane.xlu0 %4907  ;;  %v3966_v61 = vmul.f32 %v6326_v16, %v9324_v10 }
 0x91b   : > { %v6328_v37 = vpop.eup %6327  ;;  %v4932_v22 = vmul.f32 1.442695, %v4921_v62  ;;  %6333 = vpow2.f32 %v4930_v34  ;;  %v4922_v56 = vsub.f32 %v9359_v25, %v4908_v63  ;;  %v9531_v34 = vld [vmem:[%s9807_s2 + $0x30] sm:$0xff]  ;;  %v9551_v63 = vld [vmem:[%s9807_s2 + $0x8] sm:$0xff] }
 0x91c   : > { %v4911_v9 = vpop.xlane.xlu1 %4910  ;;  %v3967_v39 = vmul.f32 %v6328_v37, %v9326_v41  ;;  %5709 = vmatprep.mubr.msk.f32.mxu1 %vm1446_vm0, %v3966_v61  ;;  %v6546_v37 = vmov 49  }
 0x91d   : > { %6335 = vpow2.f32 %v4932_v22  ;;  %v4923_v42 = vsub.f32 %v9365_v19, %v4911_v9  ;;  %v4934_v58 = vmul.f32 1.442695, %v4922_v56  ;;  %v6547_v22 = vmov 50  }
 0x91e   : > { %v4914_v28 = vpop.xlane.xlu0 %4913  ;;  %5710 = vmatmul.mubr.msk.f32.gmra.mrb[30].mxu1 %vm1446_vm0, %v3967_v39 }
 0x91f   : > { %v4936_v27 = vmul.f32 1.442695, %v4923_v42  ;;  %6337 = vpow2.f32 %v4934_v58  ;;  %v4924_v26 = vsub.f32 %v9370_v54, %v4914_v28 }
 0x920   : > { %v4453_v10 = vpop.permute.xlu1 %4452 }
 0x921   : > { %6339 = vpow2.f32 %v4936_v27  ;;  %v9488_v47 = vpop.eup %6329  ;;  %v4938_v25 = vmul.f32 1.442695, %v4924_v26  ;;  %v4480_v57 = vmul.f32 %v4453_v10, %v4440_v12  ;;  %v10266_v12 = vmov 55  }
 0x922   : > { %v4942_v41 = vsel %vm1446_vm0, %v9488_v47, 0.0 }
 0x923   : > { %v9490_v21 = vpop.eup %6331  ;;  %6341 = vpow2.f32 %v4938_v25  ;;  %4943 = vadd.xlane.f32.xlu0 %v4942_v41 }
 0x924   : > { %v4489_v19 = vpop.permute.xlu1 %4488  ;;  %v4945_v20 = vsel %vm1446_vm0, %v9490_v21, 0.0 }
 0x925   : > { %4946 = vadd.xlane.f32.xlu1 %v4945_v20  ;;  %v9498_v54 = vpop.eup %6333 }
 0x926   : > { %v4449_v6 = vpop.permute.xlu0 %4448  ;;  %v4948_v44 = vsel %vm1446_vm0, %v9498_v54, 0.0 }
 0x927   : > { %v9502_v31 = vpop.eup %6335  ;;  %v4479_v45 = vmul.f32 %v4449_v6, %v4439_v7  ;;  %4949 = vadd.xlane.f32.xlu0 %v4948_v44 }
 0x928   : > { %v4493_v17 = vpop.permute.xlu1 %4492  ;;  %v4951_v51 = vsel %vm1446_vm0, %v9502_v31, 0.0 }
 0x929   : > { %v4520_v52 = vadd.f32 %v4493_v17, %v4480_v57  ;;  %4952 = vadd.xlane.f32.xlu1 %v4951_v51  ;;  %v9508_v8 = vpop.eup %6337  ;;  %v4519_v35 = vadd.f32 %v4489_v19, %v4479_v45  ;;  %v6548_v19 = vmov 51  }
 0x92a   : > { %v4954_v60 = vsel %vm1446_vm0, %v9508_v8, 0.0  ;;  %v4469_v56 = vpop.permute.xlu0 %4468 }
 0x92b   : > { %v9510_v18 = vpop.eup %6339  ;;  %4955 = vadd.xlane.f32.xlu0 %v4954_v60  ;;  %5720 = vmatprep.mubr.msk.f32.mxu0 %vm1446_vm0, %v4519_v35  ;;  %v4484_v27 = vmul.f32 %v4469_v56, %v9446_v40  ;;  %v10272_v56 = vld [vmem:[#allocation71_spill] sm:$0xff] }
 0x92c   : > { %v4957_v48 = vsel %vm1446_vm0, %v9510_v18, 0.0  ;;  %5721 = vmatmul.mubr.msk.f32.vlgmr.msra.gmra.mrb[32].mxu0 %vm1446_vm0, %v4520_v52 }
 0x92d   : > { %4958 = vadd.xlane.f32.xlu1 %v4957_v48  ;;  %v4457_v30 = vpop.permute.xlu1 %4456  ;;  %v9518_v23 = vpop.eup %6341 }
 0x92e   : > { %v4960_v15 = vsel %vm1446_vm0, %v9518_v23, 0.0  ;;  %v4481_v1 = vmul.f32 %v4457_v30, %v4441_v0 }
 0x92f   : > { %4961 = vadd.xlane.f32.xlu0 %v4960_v15  ;;  %v4509_v42 = vpop.permute.xlu0 %4508 }
 0x930   : > { %v4524_v25 = vadd.f32 %v4509_v42, %v4484_v27 }
 0x931   : > { %v4461_v2 = vpop.permute.xlu1 %4460 }
 0x932   : > { %v4482_v24 = vmul.f32 %v4461_v2, %v4442_v32 }
 0x936   : > { %v4497_v13 = vpop.permute.xlu1 %4496 }
 0x937   : > { %v4521_v38 = vadd.f32 %v4497_v13, %v4481_v1  ;;  %v6414_v13 = vld [vmem:[%s9807_s2 + $0x20] sm:$0xff] }
 0x939   : > { %5723 = vmatprep.mubr.msk.f32.mxu0 %vm1446_vm0, %v4521_v38 }
 0x93a   : > { %v4501_v62 = vpop.permute.xlu1 %4500 }
 0x93b   : > { %v4522_v16 = vadd.f32 %v4501_v62, %v4482_v24  ;;  %v10267_v62 = vld [vmem:[#allocation56_spill] sm:$0xff] }
 0x93d   : > { %5724 = vmatmul.mubr.msk.f32.gmra.mrb[34].mxu0 %vm1446_vm0, %v4522_v16  ;;  %v10268_v16 = vld [vmem:[#allocation66_spill] sm:$0xff] }
 0x93f   : > { %v4465_v61 = vpop.permute.xlu1 %4464 }
 0x940   : > { %v4483_v58 = vmul.f32 %v4465_v61, %v9449_v33 }
 0x945   : > { %4512 = vperm.xlu0 %6169, %v9531_v34  }
 0x949   : > { %6172 = vset.pattern.permute.xlu0 %v6545_v59 }
 0x94a   : > { %4130 = vperm.xlu0 %6172, %v9537_v11  }
 0x94e   : > { %4142 = vperm.xlu0 %6172, %v9543_v14  }
 0x952   : > { %4150 = vperm.xlu0 %6172, %v9164_v3  }
 0x956   : > { %4158 = vperm.xlu0 %6172, %v9183_v55  }
 0x95a   : > { %6175 = vset.pattern.permute.xlu0 %v6546_v37 }
 0x95b   : > { %4174 = vperm.xlu0 %6175, %v9551_v63  }
 0x95f   : > { %4186 = vperm.xlu0 %6175, %v9144_v43  }
 0x963   : > { %4194 = vperm.xlu0 %6175, %v9531_v34  }
 0x967   : > { %6176 = vset.pattern.permute.xlu0 %v6547_v22 }
 0x968   : > { %4218 = vperm.xlu0 %6176, %v9537_v11  }
 0x96c   : > { %4230 = vperm.xlu0 %6176, %v9543_v14  }
 0x970   : > { %4238 = vperm.xlu0 %6176, %v9164_v3  }
 0x971   : > { %v4917_v9 = vpop.xlane.xlu1 %4916 }
 0x972   : > { %v4925_v39 = vsub.f32 %v9439_v29, %v4917_v9 }
 0x974   : > { %v4940_v28 = vmul.f32 1.442695, %v4925_v39  ;;  %4246 = vperm.xlu0 %6176, %v9183_v55   ;;  %v10273_v39 = vld [vmem:[#allocation61_spill] sm:$0xff] }
 0x975   : > { %v4505_v26 = vpop.permute.xlu1 %4504 }
 0x976   : > { %6343 = vpow2.f32 %v4940_v28  ;;  %v4523_v10 = vadd.f32 %v4505_v26, %v4483_v58  ;;  %v10274_v58 = vld [vmem:[#allocation60_spill] sm:$0xff]  ;;  %v10275_v28 = vld [vmem:[#allocation53_spill] sm:$0xff]  ;;  %v10276_v26 = vld [vmem:[#allocation39_spill] sm:$0xff] }
 0x977   : > { %v3150_v27 = vmul.f32 %v10275_v28, %v10274_v58 }
 0x978   : > { %5726 = vmatprep.mubr.msk.f32.mxu0 %vm1446_vm0, %v4523_v10  ;;  %6179 = vset.pattern.permute.xlu0 %v6548_v19  ;;  %v3236_v10 = vmul.f32 %v10276_v26, %v10267_v62 }
 0x979   : > { %v4473_v41 = vpop.permute.xlu1 %4472  ;;  %5727 = vmatmul.mubr.msk.f32.gmra.mrb[36].mxu0 %vm1446_vm0, %v4524_v25  ;;  %4262 = vperm.xlu0 %6179, %v9551_v63  }
 0x97a   : > { %v4485_v15 = vmul.f32 %v4473_v41, %v9452_v5  ;;  %v10277_v41 = vld [vmem:[#allocation62_spill] sm:$0xff] }
 0x97d   : > { %v4477_v29 = vpop.permute.xlu1 %4476  ;;  %4274 = vperm.xlu0 %6179, %v9144_v43  }
 0x97e   : > { %v9568_v33 = vmul.f32 %v4477_v29, %v9455_v46  ;;  %v6413_v46 = vld [vmem:[%s9807_s2 + $0x10] sm:$0xff] }
 0x980   : > { %v9571_v40 = vpop.eup %6343 }
 0x981   : > { %v4963_v20 = vsel %vm1446_vm0, %v9571_v40, 0.0  ;;  %4282 = vperm.xlu0 %6179, %v9531_v34  }
 0x982   : > { %4964 = vadd.xlane.f32.xlu1 %v4963_v20  ;;  %v10279_v20 = vld [vmem:[#allocation5_spill] sm:$0xff] }
 0x985   : > { %6180 = vset.pattern.permute.xlu0 %v10266_v12  ;;  %v10280_v12 = vld [vmem:[#allocation65_spill] sm:$0xff] }
 0x993   : > { %4516 = vperm.xlu1 %6171, %v9183_v55  }
 0x997   : > { %6173 = vset.pattern.permute.xlu1 %v6545_v59  ;;  %v6416_v59 = vld [vmem:[%s9807_s2 + $0x38] sm:$0xff] }
 0x998   : > { %4134 = vperm.xlu1 %6173, %v9551_v63  }
 0x99c   : > { %4138 = vperm.xlu1 %6173, %v6413_v46  }
 0x9a0   : > { %4146 = vperm.xlu1 %6173, %v9144_v43  }
 0x9a4   : > { %4154 = vperm.xlu1 %6173, %v9531_v34  }
 0x9a8   : > { %6174 = vset.pattern.permute.xlu1 %v6546_v37  ;;  %v10269_v37 = vld [vmem:[#allocation58_spill] sm:$0xff] }
 0x9a9   : > { %4170 = vperm.xlu1 %6174, %v9537_v11   ;;  %v3235_v42 = vmul.f32 %v10273_v39, %v10269_v37  ;;  %v10295_v39 = vld [vmem:[#allocation82_spill] sm:$0xff] }
 0x9ad   : > { %4178 = vperm.xlu1 %6174, %v6413_v46  }
 0x9b0   : > { %v4944_v7 = vpop.xlane.xlu0 %4943 }
 0x9b1   : > { %4182 = vperm.xlu1 %6174, %v9543_v14   ;;  %6345 = vrcp.f32 %v4944_v7 }
 0x9b2   : > { %v4947_v57 = vpop.xlane.xlu1 %4946 }
 0x9b3   : > { %6347 = vrcp.f32 %v4947_v57  ;;  %v10281_v57 = vld [vmem:[#allocation67_spill] sm:$0xff] }
 0x9b4   : > { %v4950_v6 = vpop.xlane.xlu0 %4949 }
 0x9b5   : > { %4190 = vperm.xlu1 %6174, %v9164_v3   ;;  %6349 = vrcp.f32 %v4950_v6  ;;  %v3190_v6 = vadd.f32 %v10281_v57, %v3150_v27  ;;  %v10296_v27 = vld [vmem:[#allocation63_spill] sm:$0xff] }
 0x9b6   : > { %v4953_v44 = vpop.xlane.xlu1 %4952 }
 0x9b7   : > { %6351 = vrcp.f32 %v4953_v44  ;;  %v10282_v44 = vld [vmem:[#allocation50_spill] sm:$0xff] }
 0x9b8   : > { %v4956_v45 = vpop.xlane.xlu0 %4955 }
 0x9b9   : > { %4198 = vperm.xlu1 %6174, %v9183_v55   ;;  %6353 = vrcp.f32 %v4956_v45  ;;  %v3238_v45 = vmul.f32 %v10282_v44, %v10274_v58 }
 0x9ba   : > { %v4959_v43 = vpop.xlane.xlu1 %4958 }
 0x9bb   : > { %6355 = vrcp.f32 %v4959_v43  ;;  %v6346_v17 = vpop.eup %6345  ;;  %v10283_v43 = vld [vmem:[#allocation84_spill] sm:$0xff] }
 0x9bc   : > { %v4962_v52 = vpop.xlane.xlu0 %4961  ;;  %v4974_v35 = vmul.f32 %v6346_v17, %v9488_v47  ;;  %v3276_v17 = vadd.f32 %v10283_v43, %v3236_v10 }
 0x9bd   : > { %v6348_v51 = vpop.eup %6347  ;;  %6177 = vset.pattern.permute.xlu1 %v6547_v22  ;;  %6357 = vrcp.f32 %v4962_v52  ;;  %v10271_v22 = vld [vmem:[#allocation57_spill] sm:$0xff] }
 0x9be   : > { %v4975_v60 = vmul.f32 %v6348_v51, %v9490_v21  ;;  %4222 = vperm.xlu1 %6177, %v9551_v63   ;;  %5740 = vmatprep.mubr.msk.f32.mxu1 %vm1446_vm0, %v4974_v35  ;;  %v10270_v63 = vld [vmem:[#allocation47_spill] sm:$0xff]  ;;  %v10284_v51 = vld [vmem:[#allocation70_spill] sm:$0xff] }
 0x9bf   : > { %v6350_v3 = vpop.eup %6349 }
 0x9c0   : > { %5741 = vmatmul.mubr.msk.f32.vlgmr.msra.gmra.mrb[32].mxu1 %vm1446_vm0, %v4975_v60  ;;  %v4976_v48 = vmul.f32 %v6350_v3, %v9498_v54  ;;  %v10285_v3 = vld [vmem:[#allocation90_spill] sm:$0xff] }
 0x9c1   : > { %v6352_v55 = vpop.eup %6351 }
 0x9c2   : > { %4226 = vperm.xlu1 %6177, %v6413_v46   ;;  %v4977_v30 = vmul.f32 %v6352_v55, %v9502_v31  ;;  %5743 = vmatprep.mubr.msk.f32.mxu1 %vm1446_vm0, %v4976_v48  ;;  %v3275_v55 = vadd.f32 %v10285_v3, %v3235_v42  ;;  %v10286_v48 = vld [vmem:[#allocation52_spill] sm:$0xff]  ;;  %v10303_v3 = vld [vmem:[#allocation83_spill] sm:$0xff] }
 0x9c3   : > { %v6354_v47 = vpop.eup %6353 }
 0x9c4   : > { %5744 = vmatmul.mubr.msk.f32.gmra.mrb[34].mxu1 %vm1446_vm0, %v4977_v30  ;;  %v4513_v2 = vpop.permute.xlu0 %4512  ;;  %v4978_v0 = vmul.f32 %v6354_v47, %v9508_v8  ;;  %v10287_v30 = vld [vmem:[#allocation51_spill] sm:$0xff] }
 0x9c5   : > { %v6356_v21 = vpop.eup %6355  ;;  %v4525_v1 = vadd.f32 %v4513_v2, %v4485_v15  ;;  %v3151_v47 = vmul.f32 %v10287_v30, %v10286_v48  ;;  %v10288_v15 = vld [vmem:[#allocation81_spill] sm:$0xff] }
 0x9c6   : > { %4234 = vperm.xlu1 %6177, %v6414_v13   ;;  %v4979_v54 = vmul.f32 %v6356_v21, %v9510_v18  ;;  %5746 = vmatprep.mubr.msk.f32.mxu1 %vm1446_vm0, %v4978_v0  ;;  %v10289_v13 = vld [vmem:[#allocation59_spill] sm:$0xff] }
 0x9c7   : > { %v6358_v31 = vpop.eup %6357  ;;  %5729 = vmatprep.mubr.msk.f32.mxu0 %vm1446_vm0, %v4525_v1 }
 0x9c8   : > { %5747 = vmatmul.mubr.msk.f32.gmra.mrb[36].mxu1 %vm1446_vm0, %v4979_v54  ;;  %v4980_v5 = vmul.f32 %v6358_v31, %v9518_v23  ;;  %v6415_v23 = vld [vmem:[%s9807_s2 + $0x28] sm:$0xff]  ;;  %v10290_v54 = vld [vmem:[#allocation55_spill] sm:$0xff] }
 0x9c9   : > { %v9608_v8 = vpop.permute.xlu0 %4130  ;;  %v3154_v31 = vmul.f32 %v10290_v54, %v10289_v13 }
 0x9ca   : > { %4242 = vperm.xlu1 %6177, %v9531_v34   ;;  %5749 = vmatprep.mubr.msk.f32.mxu1 %vm1446_vm0, %v4980_v5  ;;  %v3148_v34 = vmul.f32 %v10268_v16, %v10267_v62  ;;  %v10291_v5 = vld [vmem:[#allocation77_spill] sm:$0xff] }
 0x9cc   : > { %v3188_v61 = vadd.f32 %v10271_v22, %v3148_v34  ;;  %v10293_v22 = vld [vmem:[#allocation85_spill] sm:$0xff] }
 0x9cd   : > { %v9612_v32 = vpop.permute.xlu0 %4142 }
 0x9ce   : > { %6178 = vset.pattern.permute.xlu1 %v6548_v19  ;;  %v10278_v19 = vld [vmem:[#allocation49_spill] sm:$0xff]  ;;  %v3196_v7 = vmax.f32 %v3188_v61, 0.0 }
 0x9cf   : > { %4258 = vperm.xlu1 %6178, %v9537_v11   ;;  %v3149_v29 = vmul.f32 %v10278_v19, %v10277_v41 }
 0x9d0   : > { %v3643_v2 = vmul.f32 %v9260_v4, %v3196_v7  ;;  %v3278_v4 = vadd.f32 %v10293_v22, %v3238_v45  ;;  %v10300_v45 = vld [vmem:[#allocation48_spill] sm:$0xff] }
 0x9d1   : > { %v9615_v18 = vpop.permute.xlu0 %4150  ;;  %v3189_v52 = vadd.f32 %v10284_v51, %v3149_v29  ;;  %v3242_v43 = vmul.f32 %v10300_v45, %v10289_v13  ;;  %v10301_v51 = vld [vmem:[#allocation98_spill] sm:$0xff] }
 0x9d2   : > { %v6418_v45 = vld [vmem:[%s6938_s9 + $0x8] sm:$0xff] }
 0x9d3   : > { %4266 = vperm.xlu1 %6178, %v6413_v46   ;;  %v3152_v46 = vmul.f32 %v10280_v12, %v10279_v20  ;;  %v3197_v61 = vmax.f32 %v3189_v52, 0.0 }
 0x9d5   : > { %v9617_v38 = vpop.permute.xlu0 %4158  ;;  %v3192_v21 = vadd.f32 %v10288_v15, %v3152_v46  ;;  %v3644_v46 = vmul.f32 %v9268_v36, %v3197_v61  ;;  %v10304_v36 = vld [vmem:[#allocation26_spill] sm:$0xff] }
 0x9d7   : > { %4270 = vperm.xlu1 %6178, %v9543_v14   ;;  %v3147_v14 = vmul.f32 %v10270_v63, %v10269_v37  ;;  %v10292_v37 = vld [vmem:[#allocation6_spill] sm:$0xff]  ;;  %v3200_v29 = vmax.f32 %v3192_v21, 0.0 }
 0x9d8   : > { %v3240_v63 = vmul.f32 %v10292_v37, %v10279_v20  ;;  %v10298_v20 = vld [vmem:[#allocation80_spill] sm:$0xff] }
 0x9d9   : > { %v3187_v9 = vadd.f32 %v10272_v56, %v3147_v14  ;;  %v10294_v56 = vld [vmem:[#allocation64_spill] sm:$0xff]  ;;  %v3239_v12 = vmul.f32 %v10298_v20, %v10286_v48 }
 0x9da   : > { %v9623_v24 = vpop.permute.xlu0 %4174 }
 0x9db   : > { %4278 = vperm.xlu1 %6178, %v6415_v23   ;;  %v3195_v35 = vmax.f32 %v3187_v9, 0.0  ;;  %v3237_v23 = vmul.f32 %v10291_v5, %v10277_v41  ;;  %v3191_v9 = vadd.f32 %v10294_v56, %v3151_v47  ;;  %v3647_v47 = vmul.f32 %v10304_v36, %v3200_v29 }
 0x9dd   : > { %v3642_v62 = vmul.f32 %v9262_v49, %v3195_v35  ;;  %v3277_v42 = vadd.f32 %v10295_v39, %v3237_v23  ;;  %v10297_v49 = vld [vmem:[#allocation54_spill] sm:$0xff]  ;;  %v3199_v52 = vmax.f32 %v3191_v9, 0.0  ;;  %v10302_v35 = vld [vmem:[#allocation68_spill] sm:$0xff] }
 0x9de   : > { %v9630_v11 = vpop.permute.xlu0 %4186  ;;  %v3153_v26 = vmul.f32 %v10297_v49, %v10296_v27  ;;  %v10307_v23 = vld [vmem:[#allocation92_spill] sm:$0xff] }
 0x9df   : > { %4286 = vperm.xlu1 %6178, %v6416_v59   ;;  %v3198_v59 = vmax.f32 %v3190_v6, 0.0  ;;  %v10299_v6 = vld [vmem:[#allocation86_spill] sm:$0xff]  ;;  %v10309_v39 = vld [vmem:[#allocation32_spill] sm:$0xff] }
 0x9e0   : > { %v3194_v44 = vadd.f32 %v10299_v6, %v3154_v31 }
 0x9e1   : > { %v3645_v10 = vmul.f32 %v9266_v53, %v3198_v59  ;;  %v3280_v53 = vadd.f32 %v10301_v51, %v3240_v63  ;;  %v10308_v59 = vld [vmem:[#allocation91_spill] sm:$0xff] }
 0x9e2   : > { %v9642_v25 = vpop.permute.xlu0 %4194  ;;  %v3202_v31 = vmax.f32 %v3194_v44, 0.0 }
 0x9e4   : > { %v3649_v61 = vmul.f32 %v9278_v50, %v3202_v31 }
 0x9e5   : > { %v5702_v60 = vpop.f32.mrb[24].mxu1 }
 0x9e6   : > { %v4098_v0 = vmul.f32 %v5702_v60, %v3276_v17  ;;  %v4058_v1 = vpop.f32.mrb[25].mxu1  ;;  %v3193_v60 = vadd.f32 %v10302_v35, %v3153_v26 }
 0x9e7   : > { %v4097_v16 = vmul.f32 %v4058_v1, %v3275_v55  ;;  %v9663_v34 = vpop.permute.xlu0 %4218  ;;  %v3279_v55 = vadd.f32 %v10303_v3, %v3239_v12  ;;  %v10306_v1 = vld [vmem:[#allocation23_spill] sm:$0xff] }
 0x9e8   : > { %v4106_v14 = vadd.f32 %v4098_v0, %v3643_v2  ;;  %v10305_v2 = vld [vmem:[#allocation88_spill] sm:$0xff]  ;;  %v3646_v13 = vmul.f32 %v10306_v1, %v3199_v52 }
 0x9e9   : > { %v9670_v58 = vadd.f32 %v4097_v16, %v3642_v62  ;;  %v5705_v28 = vpop.f32.mrb[26].mxu1  ;;  %v3241_v0 = vmul.f32 %v10305_v2, %v10296_v27  ;;  %v3282_v62 = vadd.f32 %v10307_v23, %v3242_v43  ;;  %v3201_v16 = vmax.f32 %v3193_v60, 0.0 }
 0x9ea   : > { %v4100_v41 = vmul.f32 %v5705_v28, %v3278_v4  ;;  %v4068_v19 = vpop.f32.mrb[27].mxu1  ;;  %v4114_v43 = vadd.f32 %v6418_v45, %v4106_v14 }
 0x9eb   : > { %v4099_v7 = vmul.f32 %v4068_v19, %v3277_v42  ;;  %v9678_v57 = vpop.permute.xlu0 %4230  ;;  %v3281_v37 = vadd.f32 %v10308_v59, %v3241_v0  ;;  %v3648_v42 = vmul.f32 %v10309_v39, %v3201_v16  ;;  %v6421_v0 = vld [vmem:[%s6938_s9 + $0x10] sm:$0xff] }
 0x9ec   : > { %v9683_v17 = vadd.f32 %v4100_v41, %v3645_v10  ;;  %v6417_v10 = vld [vmem:[%s6938_s9 + $0x38] sm:$0xff] }
 0x9ed   : > { %v4107_v48 = vadd.f32 %v4099_v7, %v3644_v46  ;;  %v5708_v30 = vpop.f32.mrb[28].mxu1 }
 0x9ee   : > { %v4102_v15 = vmul.f32 %v5708_v30, %v3280_v53  ;;  %v4078_v21 = vpop.f32.mrb[29].mxu1  ;;  %v6419_v30 = vld [vmem:[%s6938_s9 + $0x30] sm:$0xff] }
 0x9ef   : > { %v4101_v54 = vmul.f32 %v4078_v21, %v3279_v55  ;;  %v9698_v22 = vpop.permute.xlu0 %4238  ;;  %v4115_v1 = vadd.f32 %v6421_v0, %v4107_v48 }
 0x9f0   : > { %v9692_v5 = vadd.f32 %v4102_v15, %v3647_v47  ;;  %v6420_v47 = vld [vmem:[%s6938_s9] sm:$0xff] }
 0x9f1   : > { %v9696_v63 = vadd.f32 %v4101_v54, %v3646_v13  ;;  %v5711_v4 = vpop.f32.mrb[30].mxu1  ;;  %v4113_v14 = vadd.f32 %v6420_v47, %v9670_v58  ;;  %v6422_v54 = vld [vmem:[%s6938_s9 + $0x18] sm:$0xff] }
 0x9f2   : > { %v4104_v56 = vmul.f32 %v5711_v4, %v3282_v62  ;;  %v4088_v9 = vpop.f32.mrb[31].mxu1  ;;  %v4116_v31 = vadd.f32 %v6422_v54, %v9683_v17 }
 0x9f3   : > { %v4103_v28 = vmul.f32 %v4088_v9, %v3281_v37  ;;  %v4247_v26 = vpop.permute.xlu0 %4246  ;;  %v4161_v2 = vmul.f32 %v9608_v8, %v4113_v14 }
 0x9f4   : > { %v4112_v27 = vadd.f32 %v4104_v56, %v3649_v61 }
 0x9f5   : > { %v4111_v49 = vadd.f32 %v4103_v28, %v3648_v42  ;;  %v6423_v28 = vld [vmem:[%s6938_s9 + $0x28] sm:$0xff] }
 0x9f6   : > { %v4120_v41 = vadd.f32 %v6417_v10, %v4112_v27  ;;  %v4118_v27 = vadd.f32 %v6423_v28, %v9692_v5 }
 0x9f7   : > { %v4119_v36 = vadd.f32 %v6419_v30, %v4111_v49 }
 0x9f8   : > { %v9703_v19 = vmul.f32 %v4247_v26, %v4120_v41  ;;  %v4168_v29 = vmul.f32 %v9617_v38, %v4120_v41  ;;  %v6424_v26 = vld [vmem:[%s6938_s9 + $0x20] sm:$0xff]  ;;  %s230_s9 = sand.u32 1, %s6479_s19  }
 0x9f9   : > { %v4117_v10 = vadd.f32 %v6424_v26, %v9696_v63  ;;  %s5227_s14 = sshll.u32 %s230_s9, 6  ;;  %s9764_s22 = scalar_lea.sflag [#allocation3], %s230_s9 }
 0x9fa   : > { %s9740_s15 = scalar_lea.vmem [#allocation2], %s5227_s14 }
 0x9fb   : > { %s5149_s17 = sshll.u32 %s9740_s15, 4  ;;  %s9758_s17 = int_to_ptr.vmem [resolvable:$true] %s5149_s17 }
 0x9fc   : > { %s6425_s7 = scalar_lea.vmem %s9758_s17, 1024  ;;  %p6432_p0 = scmp.lt.s32.totalorder %s9758_s17, %s6430_s30 }
 0x9fd   : > { %p6426_p11 = scmp.ne.s32.totalorder %s9758_s17, %s6425_s7  ;;  %p6433_p1 = scmp.lt.s32.totalorder %s6431_s6, %s6425_s7 }
 0x9ff   : > { %v5722_v20 = vpop.f32.mrb[32].mxu0  ;;  %p6427_p12 = pnand %p6426_p11, %p6620_p5  ;;  %p6434_p2 = por %p6433_p1, %p6432_p0 }
 0xa00   : > { %v4617_v12 = vpop.f32.mrb[33].mxu0 }
 0xa01   : > { %p6428_p13 = pneg %p6427_p12 }
 0xa03   : > { %p6435_p3 = pnand %p6434_p2, %p6428_p13 }
 0xa0f   : > { %v4965_v46 = vpop.xlane.xlu1 %4964 }
 0xa10   : > { %6359 = vrcp.f32 %v4965_v46  ;;  %v5725_v50 = vpop.f32.mrb[34].mxu0 }
 0xa11   : > { %v4627_v7 = vpop.f32.mrb[35].mxu0 }
 0xa13   : > { %v4517_v6 = vpop.permute.xlu1 %4516 }
 0xa14   : > { %v4526_v44 = vadd.f32 %v4517_v6, %v9568_v33 }
 0xa16   : > { %5730 = vmatmul.mubr.msk.f32.gmra.mrb[38].mxu0 %vm1446_vm0, %v4526_v44 }
 0xa17   : > { %v4135_v51 = vpop.permute.xlu1 %4134 }
 0xa18   : > { %v4162_v53 = vmul.f32 %v4135_v51, %v4114_v43 }
 0xa1a   : > { %v6360_v52 = vpop.eup %6359  ;;  %v4202_v38 = vadd.f32 %v9623_v24, %v4162_v53 }
 0xa1b   : > { %v4139_v35 = vpop.permute.xlu1 %4138  ;;  %v4981_v60 = vmul.f32 %v6360_v52, %v9571_v40 }
 0xa1c   : > { %v4210_v3 = vmax.f32 %v4202_v38, 0.0  ;;  %v4163_v23 = vmul.f32 %v4139_v35, %v4115_v1  ;;  %v4263_v38 = vpop.permute.xlu0 %4262 }
 0xa1d   : > { %5750 = vmatmul.mubr.msk.f32.gmra.mrb[38].mxu1 %vm1446_vm0, %v4981_v60 }
 0xa1e   : > { %v9712_v55 = vmul.f32 %v5722_v20, %v4210_v3 }
 0xa1f   : > { %v4147_v33 = vpop.permute.xlu1 %4146 }
 0xa20   : > { %v4165_v41 = vmul.f32 %v4147_v33, %v4117_v10  ;;  %v4252_v33 = vmul.f32 %v9678_v57, %v4116_v31  ;;  %v4275_v54 = vpop.permute.xlu0 %4274 }
 0xa22   : > { %v4205_v46 = vadd.f32 %v9630_v11, %v4165_v41 }
 0xa23   : > { %v4155_v15 = vpop.permute.xlu1 %4154 }
 0xa24   : > { %v4167_v21 = vmul.f32 %v4155_v15, %v4119_v36  ;;  %v4213_v44 = vmax.f32 %v4205_v46, 0.0  ;;  %v4283_v28 = vpop.permute.xlu0 %4282 }
 0xa26   : > { %v9718_v24 = vadd.f32 %v9642_v25, %v4167_v21  ;;  %v4164_v25 = vmul.f32 %v9612_v32, %v4116_v31  ;;  %v4166_v32 = vmul.f32 %v9615_v18, %v4118_v27  ;;  %v4249_v18 = vmul.f32 %v9663_v34, %v4113_v14 }
 0xa27   : > { %v4254_v14 = vmul.f32 %v9698_v22, %v4118_v27 }
 0xa28   : > { %v4171_v40 = vpop.permute.xlu1 %4170 }
 0xa29   : > { %v4201_v13 = vadd.f32 %v4171_v40, %v4161_v2 }
 0xa2b   : > { %v4209_v62 = vmax.f32 %v4201_v13, 0.0 }
 0xa2c   : > { %v4179_v16 = vpop.permute.xlu1 %4178 }
 0xa2d   : > { %v4656_v59 = vmul.f32 %v4617_v12, %v4209_v62  ;;  %v4203_v58 = vadd.f32 %v4179_v16, %v4163_v23 }
 0xa2f   : > { %v4211_v37 = vmax.f32 %v4203_v58, 0.0 }
 0xa30   : > { %v4183_v4 = vpop.permute.xlu1 %4182 }
 0xa31   : > { %v4658_v61 = vmul.f32 %v4627_v7, %v4211_v37  ;;  %v4204_v8 = vadd.f32 %v4183_v4, %v4164_v25 }
 0xa33   : > { %v4212_v56 = vmax.f32 %v4204_v8, 0.0 }
 0xa34   : > { %v4191_v9 = vpop.permute.xlu1 %4190 }
 0xa35   : > { %v4659_v48 = vmul.f32 %v5725_v50, %v4212_v56  ;;  %v4206_v12 = vadd.f32 %v4191_v9, %v4166_v32  ;;  %v4215_v9 = vmax.f32 %v9718_v24, 0.0 }
 0xa37   : > { %v4214_v7 = vmax.f32 %v4206_v12, 0.0 }
 0xa38   : > { %v4199_v39 = vpop.permute.xlu1 %4198 }
 0xa39   : > { %v9725_v42 = vadd.f32 %v4199_v39, %v4168_v29 }
 0xa3b   : > { %v4216_v8 = vmax.f32 %v9725_v42, 0.0 }
 0xa3d   : > { %v4223_v17 = vpop.permute.xlu1 %4222 }
 0xa3e   : > { %v4250_v63 = vmul.f32 %v4223_v17, %v4114_v43 }
 0xa40   : > { %v4290_v60 = vadd.f32 %v4263_v38, %v4250_v63 }
 0xa41   : > { %v4227_v49 = vpop.permute.xlu1 %4226 }
 0xa42   : > { %v4251_v47 = vmul.f32 %v4227_v49, %v4115_v1 }
 0xa45   : > { %v4235_v20 = vpop.permute.xlu1 %4234 }
 0xa46   : > { %v4253_v43 = vmul.f32 %v4235_v20, %v4117_v10 }
 0xa48   : > { %v4293_v62 = vadd.f32 %v4275_v54, %v4253_v43 }
 0xa49   : > { %v4243_v50 = vpop.permute.xlu1 %4242 }
 0xa4a   : > { %v4255_v29 = vmul.f32 %v4243_v50, %v4119_v36 }
 0xa4c   : > { %v5728_v6 = vpop.f32.mrb[36].mxu0  ;;  %v4295_v49 = vadd.f32 %v4283_v28, %v4255_v29 }
 0xa4d   : > { %v4661_v45 = vmul.f32 %v5728_v6, %v4214_v7  ;;  %v4637_v5 = vpop.f32.mrb[37].mxu0 }
 0xa4e   : > { %v4660_v51 = vmul.f32 %v4637_v5, %v4213_v44  ;;  %v4259_v53 = vpop.permute.xlu1 %4258 }
 0xa4f   : > { %v4289_v11 = vadd.f32 %v4259_v53, %v4249_v18 }
 0xa52   : > { %v4267_v52 = vpop.permute.xlu1 %4266 }
 0xa53   : > { %v4291_v40 = vadd.f32 %v4267_v52, %v4251_v47 }
 0xa56   : > { %v4271_v35 = vpop.permute.xlu1 %4270 }
 0xa57   : > { %v4292_v21 = vadd.f32 %v4271_v35, %v4252_v33 }
 0xa5a   : > { %v4279_v0 = vpop.permute.xlu1 %4278 }
 0xa5b   : > { %v4294_v31 = vadd.f32 %v4279_v0, %v4254_v14 }
 0xa5e   : > { %v4287_v17 = vpop.permute.xlu1 %4286 }
 0xa5f   : > { %v4296_v27 = vadd.f32 %v4287_v17, %v9703_v19 }
 0xa93   : > { %v5742_v3 = vpop.f32.mrb[32].mxu1 }
 0xa94   : > { %v5112_v30 = vmul.f32 %v5742_v3, %v4290_v60  ;;  %v5072_v36 = vpop.f32.mrb[33].mxu1 }
 0xa95   : > { %v5111_v15 = vmul.f32 %v5072_v36, %v4289_v11 }
 0xa96   : > { %v5120_v2 = vadd.f32 %v5112_v30, %v9712_v55 }
 0xa97   : > { %v5119_v13 = vadd.f32 %v5111_v15, %v4656_v59  ;;  %v5745_v34 = vpop.f32.mrb[34].mxu1 }
 0xa98   : > { %5128 = vst [vmem:[%s9740_s15 + $0x8] sm:$0xff] %v5120_v2  ;;  %v5114_v57 = vmul.f32 %v5745_v34, %v4292_v21  ;;  %v5082_v1 = vpop.f32.mrb[35].mxu1 }
 0xa99   : > { %5127 = vst [vmem:[%s9740_s15] sm:$0xff] %v5119_v13  ;;  %v5113_v55 = vmul.f32 %v5082_v1, %v4291_v40 }
 0xa9a   : > { %v5122_v23 = vadd.f32 %v5114_v57, %v4659_v48 }
 0xa9b   : > { %v5121_v16 = vadd.f32 %v5113_v55, %v4658_v61  ;;  %v5748_v59 = vpop.f32.mrb[36].mxu1 }
 0xa9c   : > { %5130 = vst [vmem:[%s9740_s15 + $0x18] sm:$0xff] %v5122_v23  ;;  %v5116_v22 = vmul.f32 %v5748_v59, %v4294_v31  ;;  %v5092_v58 = vpop.f32.mrb[37].mxu1 }
 0xa9d   : > { %5129 = vst [vmem:[%s9740_s15 + $0x10] sm:$0xff] %v5121_v16  ;;  %v5115_v37 = vmul.f32 %v5092_v58, %v4293_v62 }
 0xa9e   : > { %v5124_v25 = vadd.f32 %v5116_v22, %v4661_v45 }
 0xa9f   : > { %v5123_v4 = vadd.f32 %v5115_v37, %v4660_v51 }
 0xaa0   : > { %5132 = vst [vmem:[%s9740_s15 + $0x28] sm:$0xff] %v5124_v25 }
 0xaa1   : > { %5131 = vst [vmem:[%s9740_s15 + $0x20] sm:$0xff] %v5123_v4 }
 0xae9   : > { %v5731_v56 = vpop.f32.mrb[38].mxu0 }
 0xaea   : > { %v4663_v48 = vmul.f32 %v5731_v56, %v4216_v8  ;;  %v4647_v39 = vpop.f32.mrb[39].mxu0 }
 0xaeb   : > { %v4662_v61 = vmul.f32 %v4647_v39, %v4215_v9 }
 0xaf0   : > { %v5751_v26 = vpop.f32.mrb[38].mxu1 }
 0xaf1   : > { %v5118_v10 = vmul.f32 %v5751_v26, %v4296_v27  ;;  %v5102_v42 = vpop.f32.mrb[39].mxu1 }
 0xaf2   : > { %v5117_v41 = vmul.f32 %v5102_v42, %v4295_v49 }
 0xaf3   : > { %v5126_v32 = vadd.f32 %v5118_v10, %v4663_v48 }
 0xaf4   : > { %v5125_v19 = vadd.f32 %v5117_v41, %v4662_v61 }
 0xaf5   : > { %5134 = vst [vmem:[%s9740_s15 + $0x38] sm:$0xff] %v5126_v32 }
 0xaf6   : > { %5133 = vst [vmem:[%s9740_s15 + $0x30] sm:$0xff] %v5125_v19 }
 0xaf7   : > { %6438 = shalt.err (!%p6435_p3)
}
 0xaf8   : > { %s6439_s11 = scalar_lea.hbm %s9756_s26, 1024  ;;  %s6443_s13 = scalar_lea.hbm %s9810_s5, 2048 }
 0xaf9   : > { %p6440_p4 = scmp.ne.s32.totalorder %s9756_s26, %s6439_s11  ;;  %p6444_p9 = scmp.lt.u32.totalorder %s9756_s26, %s9810_s5 }
 0xafa   : > { %p6445_p10 = scmp.lt.u32.totalorder %s6443_s13, %s6439_s11  ;;  %p6447_p12 = scmp.lt.u32.totalorder %s6439_s11, %s9756_s26 }
 0xafb   : > { %p6441_p7 = pnand %p6440_p4, %p6620_p5 }
 0xafc   : > { %p6446_p11 = por %p6445_p10, %p6444_p9 }
 0xafd   : > { %p6442_p8 = pneg %p6441_p7 }
 0xafe   : > { %p6448_p13 = por %p6447_p12, %p6446_p11 }
 0xb00   : > { %p6449_p0 = pnand %p6448_p13, %p6442_p8 }
 0xb02   : > { %6452 = shalt.err (!%p6449_p0)
}
 0xb03   : > { %s6550_s15 = smov 128   ;;  %s6551_s16 = smov 8  }
 0xb04   : > { %5928 = dma.vmem_to_hbm [thread:$0]  (%p6620_p5), %s9758_s17, 1024, %s9756_s26, %s9764_s22, %s6550_s15, %s6550_s15, %s6551_s16  }
 0xb05 PF: > { %p5934_p1 = scmp.ge.s32.totalorder %s6487_s21, 2  ;;  %s5164_s23 = sand.u32 1, %s6475_s18  }
 0xb06   : > { %s5165_s25 = scalar_lea.sflag [#allocation3], %s5164_s23 }
 0xb07   : > { %p5931_p2 = pnand %p5934_p1, %p6624_p6 }
 0xb09   : > { %6470 = dma.done.wait (!%p5931_p2), %s5165_s25, 1024  }
 0xb0a   : > { %6472 = vsyncadd (!%p5931_p2), %s5165_s25, 4294966272  ;;  %p15_p3 = scmp.ge.s32.totalorder %s6607_s24, 4   ;;  %s10310_s18 = smov %s6479_s19 }
 0xb0b   : > { %s10311_s19 = smov %s6483_s20  ;;  %s10312_s20 = smov %s6618_s27 }
 0xb0c   : > { %s10313_s21 = smov %s6607_s24  ;;  %17 = sbr.rel (!%p15_p3) target bundleno = 3 (0x3), region = 78 }
 0xb13   :  { %5170 = vsyncpa [#allocation3], 1 }
 0xb14   :  { %5172 = vsyncpa [#allocation3 + $0x1], 1 }

</bundles_post_ra>
